<compile_context>
chip_gen: v7x
topology: tpu7x:2x2x1
jax: 0.10.0
libtpu: 0.0.40
codegen_flags: <defaults>
</compile_context>

<pallas_src>
import jax
import jax.numpy as jnp
from jax.experimental import pallas as pl
from jax.experimental.pallas import tpu as pltpu

PADDED_CLASSES = 128   # lane-dense fc output (10 real classes + zero padding)


# ------------------------------ Pallas kernel ------------------------------

def _fused_cnn_kernel(xr_ref, w1t_ref, w2t_ref, b2t_ref, wfc_ref, bfc_ref, o_ref):
    """Whole SimpleCNN forward for one batch block.

    xr_ref : (B, 32, 96) bf16  row records; row v = 16*py + 8*ry + u covers
             pooled row i = 2u (ry=0) / 2u-1 (ry=1) for pool-row-phase py, and
             lane 32*dy + xin holds padded-image pixel [row 2i+py+dy, col xin]
             (lane 31 is a constant 1 that injects the conv1 bias).  Invalid
             rows (ry=0,u=7 / ry=1,u=0) are all-zero.
    w1t_ref: (96, 2*LQ) bf16   conv1 Toeplitz weight, both pool-col phases px
             stacked along N; output lane = 32*x + c with x = pooled col + 1,
             so lanes x=0 and x=15 are conv2's zero padding.
    w2t_ref: (LQ, 6*LD) bf16   conv2 Toeplitz blocks, (dy, qx)-major; block
             column = 64*t + d (t = pooled2 col, padded to 8).
    b2t_ref: (1, LD)  f32      conv2 bias tiled over the t slots.
    wfc_ref: (7, LD, 128) bf16 fc weight per pooled2 row s, (t, d)-ordered rows
             (t=7 rows zero), classes padded to 128.
    bfc_ref: (1, 128) f32
    o_ref  : (B, 128) f32      padded logits (lane-dense store).
    """
    B = xr_ref.shape[0]
    rows = xr_ref.shape[1]              # 32
    k1 = xr_ref.shape[2]                # 96
    LQ = w1t_ref.shape[1] // 2          # 16 * C1
    LD = b2t_ref.shape[1]               # 8 * C2

    # ---- layer 1: conv3x3(1->C1) + bias + ReLU + maxpool2x2 : one MXU dot ----
    lhs1 = xr_ref[...].reshape(B * rows, k1)
    y1 = jnp.dot(lhs1, w1t_ref[...], preferred_element_type=jnp.float32)
    y1 = y1.reshape(B, rows, 2 * LQ)
    # 2x2 max pool == elementwise max over the 4 (py, px) phases.
    m = jnp.maximum(jnp.maximum(y1[:, 0:16, :LQ], y1[:, 0:16, LQ:]),
                    jnp.maximum(y1[:, 16:32, :LQ], y1[:, 16:32, LQ:]))
    g = jnp.maximum(m, 0.0)                      # bias already folded into w1t
    g_odd = g[:, 0:8, :]       # row u = h1pad[2u+1]   (h1pad = pool1 out, zero-padded 16x16)
    g_even = g[:, 8:16, :]     # row u = h1pad[2u]     (rows 0 / 15 are the zero padding)

    # Row-shifted copies (row u <- row u+1); the wrapped last row is never used.
    g_even_s = jnp.concatenate([g_even[:, 1:, :], g_even[:, :1, :]], axis=1)
    g_odd_s = jnp.concatenate([g_odd[:, 1:, :], g_odd[:, :1, :]], axis=1)
    slabs = (g_even, g_odd, g_even_s, g_odd_s)   # slab a: row s = h1pad[2s + a]

    # ---- layer 2: conv3x3(C1->C2) + bias + ReLU + maxpool2x2 : four MXU dots ----
    acc2 = [[None, None], [None, None]]          # [qy][qx] -> (B, 8, LD) f32
    for a in range(4):
        dy_lo, dy_hi = max(0, a - 1), min(2, a)
        lhs = slabs[a].reshape(B * 8, LQ).astype(jnp.bfloat16)
        w = w2t_ref[:, 2 * LD * dy_lo:2 * LD * (dy_hi + 1)]
        y = jnp.dot(lhs, w, preferred_element_type=jnp.float32)
        y = y.reshape(B, 8, 2 * LD * (dy_hi - dy_lo + 1))
        for k, dy in enumerate(range(dy_lo, dy_hi + 1)):
            qy = a - dy
            for qx in range(2):
                blk = y[:, :, (2 * k + qx) * LD:(2 * k + qx + 1) * LD]
                prev = acc2[qy][qx]
                acc2[qy][qx] = blk if prev is None else prev + blk

    h2 = jnp.maximum(jnp.maximum(acc2[0][0], acc2[0][1]),
                     jnp.maximum(acc2[1][0], acc2[1][1]))
    h2 = jnp.maximum(h2 + b2t_ref[...], 0.0)     # (B, 8, LD); row 7 / t=7 lanes are dead padding

    # ---- classifier: Linear(C2*7*7 -> 10); fc weight pre-permuted & padded ----
    logits = jnp.zeros((B, o_ref.shape[1]), jnp.float32)
    for s in range(7):
        logits = logits + jnp.dot(h2[:, s, :].astype(jnp.bfloat16), wfc_ref[s],
                                  preferred_element_type=jnp.float32)
    o_ref[...] = logits + bfc_ref[...]


# ------------------------ wrapper-side data / weight prep --------------------

def _build_records(x2):
    """(N, 28, 28) image -> (N, 32, 96) bf16 conv1 row records (see kernel doc)."""
    n = x2.shape[0]
    xpad = jnp.pad(x2, ((0, 0), (1, 1), (1, 3)))            # (N, 30, 32), zero border
    xpad = xpad.at[:, :, 31].set(1.0)                        # constant "bias" lane
    py = jnp.arange(2)[:, None, None, None]
    ry = jnp.arange(2)[None, :, None, None]
    u = jnp.arange(8)[None, None, :, None]
    dy = jnp.arange(3)[None, None, None, :]
    row = jnp.where(ry == 0, 4 * u + py + dy, 4 * u - 2 + py + dy)      # (2,2,8,3)
    valid = jnp.broadcast_to(jnp.where(ry == 0, u <= 6, u >= 1), row.shape)
    rec = xpad[:, jnp.clip(row, 0, 29), :]                   # (N,2,2,8,3,32)
    rec = rec * valid[None, ..., None].astype(rec.dtype)     # zero the invalid rows
    return rec.reshape(n, 32, 96).astype(jnp.bfloat16)


def _build_w1t(w1, b1):
    """Conv1 OIHW (C1,1,3,3) + bias -> Toeplitz weight (96, 2*16*C1) bf16."""
    c1 = w1.shape[0]
    w1h = jnp.transpose(w1[:, 0], (1, 2, 0))                 # (3,3,C1) [dy,dx,c]
    xin = jnp.arange(32)[:, None, None, None]
    px = jnp.arange(2)[None, :, None, None]
    xout = jnp.arange(16)[None, None, :, None]
    dx = jnp.arange(3)[None, None, None, :]
    sel = ((xin == 2 * (xout - 1) + px + dx) & (xout >= 1) & (xout <= 14))
    sel = sel.astype(jnp.float32)                            # (32,2,16,3)
    w = jnp.einsum('ipox,yxc->yipoc', sel, w1h)              # (3,32,2,16,C1)
    ov = ((jnp.arange(16) >= 1) & (jnp.arange(16) <= 14)).astype(jnp.float32)
    bias_blk = jnp.broadcast_to(ov[:, None] * b1[None, :], (2, 16, c1))
    w = w.at[0, 31].set(bias_blk)                            # the "ones" lane carries b1
    return w.reshape(96, 2 * 16 * c1).astype(jnp.bfloat16)


def _build_w2t(w2):
    """Conv2 OIHW (C2,C1,3,3) -> 6 Toeplitz blocks (16*C1, 6*8*C2) bf16, (dy,qx)-major."""
    c2, c1 = w2.shape[0], w2.shape[1]
    w2h = jnp.transpose(w2, (2, 3, 1, 0))                    # (3,3,C1,C2) [dy,dx,c,d]
    x = jnp.arange(16)[:, None, None, None]
    qx = jnp.arange(2)[None, :, None, None]
    t = jnp.arange(8)[None, None, :, None]
    dx = jnp.arange(3)[None, None, None, :]
    sel = ((x == 2 * t + qx + dx) & (t <= 6)).astype(jnp.float32)       # (16,2,8,3)
    blocks = []
    for dyv in range(3):
        for qxv in range(2):
            blk = jnp.einsum('xtz,zcd->xctd', sel[:, qxv], w2h[dyv])    # (16,C1,8,C2)
            blocks.append(blk.reshape(16 * c1, 8 * c2))
    return jnp.concatenate(blocks, axis=1).astype(jnp.bfloat16)


def _build_wfc(wfc, bfc, c2):
    """Linear (nc, C2*7*7) -> (7, 8*C2, 128) bf16 in the kernel's (s, t, d) order."""
    nc = wfc.shape[0]
    wr = jnp.transpose(wfc.reshape(nc, c2, 7, 7), (2, 3, 1, 0))         # (7,7,C2,nc)
    wr = jnp.pad(wr, ((0, 0), (0, 1), (0, 0), (0, PADDED_CLASSES - nc)))
    wfc3 = wr.reshape(7, 8 * c2, PADDED_CLASSES).astype(jnp.bfloat16)
    bfc_p = jnp.pad(bfc, (0, PADDED_CLASSES - nc)).reshape(1, PADDED_CLASSES)
    return wfc3, bfc_p.astype(jnp.float32)


# ------------------------------ JAX wrapper ---------------------------------

def simple_cnn_forward(x_nchw, params, *, block_batch=32):
    """SimpleCNN forward; `params` use the PyTorch module's native layouts."""
    n, cin, h, w = x_nchw.shape
    assert (cin, h, w) == (1, 28, 28), "SimpleCNN expects (N, 1, 28, 28) input"
    c1, c2 = params["w1"].shape[0], params["w2"].shape[0]
    num_classes = params["wfc"].shape[0]
    assert c1 % 8 == 0 and c2 % 16 == 0 and num_classes <= PADDED_CLASSES
    lq, ld = 16 * c1, 8 * c2

    # Batch block: multiple of 8, and capped so N >= 16 still yields >= 2 grid
    # blocks (v7x has two TensorCores sharded over the "parallel" grid axis).
    b = max(1, min(block_batch, n))
    if n >= 16:
        half = -(-n // 2)
        b = min(b, -(-half // 8) * 8)
    if b < n:
        b = -(-b // 8) * 8
    n_blocks = -(-n // b)
    n_pad = n_blocks * b

    xr = _build_records(x_nchw[:, 0])                        # (N, 32, 96) bf16
    if n_pad != n:
        xr = jnp.pad(xr, ((0, n_pad - n), (0, 0), (0, 0)))
    w1t = _build_w1t(params["w1"], params["b1"])             # (96, 2*lq)
    w2t = _build_w2t(params["w2"])                           # (lq, 6*ld)
    b2t = jnp.tile(params["b2"].astype(jnp.float32), 8).reshape(1, ld)
    wfc3, bfc_p = _build_wfc(params["wfc"], params["bfc"], c2)

    grid_spec = pltpu.PrefetchScalarGridSpec(
        num_scalar_prefetch=0,
        grid=(n_blocks,),
        in_specs=[
            pl.BlockSpec((b, 32, 96), lambda i: (i, 0, 0)),
            pl.BlockSpec((96, 2 * lq), lambda i: (0, 0)),
            pl.BlockSpec((lq, 6 * ld), lambda i: (0, 0)),
            pl.BlockSpec((1, ld), lambda i: (0, 0)),
            pl.BlockSpec((7, ld, PADDED_CLASSES), lambda i: (0, 0, 0)),
            pl.BlockSpec((1, PADDED_CLASSES), lambda i: (0, 0)),
        ],
        out_specs=pl.BlockSpec((b, PADDED_CLASSES), lambda i: (i, 0)),
    )
    out = pl.pallas_call(
        _fused_cnn_kernel,
        out_shape=jax.ShapeDtypeStruct((n_pad, PADDED_CLASSES), jnp.float32),
        grid_spec=grid_spec,
        compiler_params=pltpu.CompilerParams(
            dimension_semantics=("parallel",),
            vmem_limit_bytes=32 * 1024 * 1024,
        ),
    )(xr, w1t, w2t, b2t, wfc3, bfc_p)
    return out[:n, :num_classes]


def init_params(key, config=(32, 64), num_classes=10):
    """Random params in the PyTorch module's native layouts."""
    c1, c2 = config
    k1, k2, k3, k4, k5, k6 = jax.random.split(key, 6)
    return dict(
        w1=jax.random.normal(k1, (c1, 1, 3, 3), jnp.float32) * 0.10,   # Conv2d OIHW
        b1=jax.random.normal(k2, (c1,), jnp.float32) * 0.01,
        w2=jax.random.normal(k3, (c2, c1, 3, 3), jnp.float32) * 0.05,  # Conv2d OIHW
        b2=jax.random.normal(k4, (c2,), jnp.float32) * 0.01,
        wfc=jax.random.normal(k5, (num_classes, c2 * 7 * 7), jnp.float32) * 0.02,
        bfc=jax.random.normal(k6, (num_classes,), jnp.float32) * 0.01,
    )


def simple_cnn_reference(x, params):
    """Pure-JAX reference forward, layout-for-layout the PyTorch module."""
    hi = jax.lax.Precision.HIGHEST
    dn = ("NCHW", "OIHW", "NCHW")
    y = jax.lax.conv_general_dilated(x, params["w1"], (1, 1), ((1, 1), (1, 1)),
                                     dimension_numbers=dn, precision=hi)
    y = jnp.maximum(y + params["b1"][None, :, None, None], 0.0)
    y = jax.lax.reduce_window(y, -jnp.inf, jax.lax.max, (1, 1, 2, 2), (1, 1, 2, 2), "VALID")
    y = jax.lax.conv_general_dilated(y, params["w2"], (1, 1), ((1, 1), (1, 1)),
                                     dimension_numbers=dn, precision=hi)
    y = jnp.maximum(y + params["b2"][None, :, None, None], 0.0)
    y = jax.lax.reduce_window(y, -jnp.inf, jax.lax.max, (1, 1, 2, 2), (1, 1, 2, 2), "VALID")
    y = y.reshape(y.shape[0], -1)                            # NCHW flatten, like torch
    return jnp.dot(y, params["wfc"].T, precision=hi) + params["bfc"]


if __name__ == "__main__":
    key = jax.random.PRNGKey(0)
    kx, kp = jax.random.split(key)
    # classifier is Linear(64*7*7, 10) -> input must be (N, 1, 28, 28)
    x = jax.random.normal(kx, (2, 1, 28, 28), jnp.float32)   # NCHW, like PyTorch
    params = init_params(kp)

    out = jax.jit(simple_cnn_forward)(x, params)
    jax.block_until_ready(out)
    assert out.shape == (2, 10) and out.dtype == jnp.float32

    ref = simple_cnn_reference(x, params)
    err = float(jnp.max(jnp.abs(out - ref)))
    assert err < 8e-2, f"kernel vs reference mismatch: max|diff| = {err}"
    print("KERNEL_OK")
</pallas_src>

<mosaic_0001>
module attributes {stable_mosaic.version = 11 : i64} {
  func.func @_fused_cnn_kernel(%arg0: i32, %arg1: memref<2x32x96xbf16, #tpu.memory_space<vmem>>, %arg2: memref<96x1024xbf16, #tpu.memory_space<vmem>>, %arg3: memref<512x3072xbf16, #tpu.memory_space<vmem>>, %arg4: memref<1x512xf32, #tpu.memory_space<vmem>>, %arg5: memref<7x512x128xbf16, #tpu.memory_space<vmem>>, %arg6: memref<1x128xf32, #tpu.memory_space<vmem>>, %arg7: memref<2x128xf32, #tpu.memory_space<vmem>>) attributes {dimension_semantics = [#tpu.dimension_semantics<parallel>], iteration_bounds = array<i64: 1>, scalar_prefetch = 0 : i64, scratch_operands = 0 : i64, tpu.core_type = #tpu.core_type<tc>, window_params = [{transform_indices = @transform_0, window_bounds = array<i64: 2, 32, 96>}, {pipeline_mode = #tpu.pipeline_mode<synchronous>, transform_indices = @transform_1, window_bounds = array<i64: 96, 1024>}, {pipeline_mode = #tpu.pipeline_mode<synchronous>, transform_indices = @transform_2, window_bounds = array<i64: 512, 3072>}, {pipeline_mode = #tpu.pipeline_mode<synchronous>, transform_indices = @transform_3, window_bounds = array<i64: 1, 512>}, {pipeline_mode = #tpu.pipeline_mode<synchronous>, transform_indices = @transform_4, window_bounds = array<i64: 7, 512, 128>}, {pipeline_mode = #tpu.pipeline_mode<synchronous>, transform_indices = @transform_5, window_bounds = array<i64: 1, 128>}, {transform_indices = @transform_6, window_bounds = array<i64: 2, 128>}]} {
    %c0 = arith.constant 0 : index
    %c0_0 = arith.constant 0 : index
    %c0_1 = arith.constant 0 : index
    %0 = vector.load %arg1[%c0, %c0_0, %c0_1] : memref<2x32x96xbf16, #tpu.memory_space<vmem>>, vector<2x32x96xbf16>
    %1 = vector.shape_cast %0 : vector<2x32x96xbf16> to vector<64x96xbf16>
    %c0_2 = arith.constant 0 : index
    %c0_3 = arith.constant 0 : index
    %2 = vector.load %arg2[%c0_2, %c0_3] : memref<96x1024xbf16, #tpu.memory_space<vmem>>, vector<96x1024xbf16>
    %cst = arith.constant dense<0.000000e+00> : vector<64x1024xf32>
    %3 = tpu.matmul %1, %2, %cst {dimension_numbers = #tpu.dot_dimension_numbers<[1], [0], [0], [1], [0, 0, 1, 1], [], []>} : vector<64x96xbf16>, vector<96x1024xbf16>, vector<64x1024xf32> -> vector<64x1024xf32>
    %4 = vector.shape_cast %3 : vector<64x1024xf32> to vector<2x32x1024xf32>
    %5 = vector.extract_strided_slice %4 {offsets = [0, 0, 0], sizes = [2, 16, 512], strides = [1, 1, 1]} : vector<2x32x1024xf32> to vector<2x16x512xf32>
    %6 = vector.extract_strided_slice %4 {offsets = [0, 0, 512], sizes = [2, 16, 512], strides = [1, 1, 1]} : vector<2x32x1024xf32> to vector<2x16x512xf32>
    %7 = arith.maximumf %5, %6 : vector<2x16x512xf32>
    %8 = vector.extract_strided_slice %4 {offsets = [0, 16, 0], sizes = [2, 16, 512], strides = [1, 1, 1]} : vector<2x32x1024xf32> to vector<2x16x512xf32>
    %9 = vector.extract_strided_slice %4 {offsets = [0, 16, 512], sizes = [2, 16, 512], strides = [1, 1, 1]} : vector<2x32x1024xf32> to vector<2x16x512xf32>
    %10 = arith.maximumf %8, %9 : vector<2x16x512xf32>
    %11 = arith.maximumf %7, %10 : vector<2x16x512xf32>
    %cst_4 = arith.constant 0.000000e+00 : f32
    %12 = vector.broadcast %cst_4 : f32 to vector<2x16x512xf32>
    %13 = arith.maximumf %11, %12 : vector<2x16x512xf32>
    %14 = vector.extract_strided_slice %13 {offsets = [0, 0, 0], sizes = [2, 8, 512], strides = [1, 1, 1]} : vector<2x16x512xf32> to vector<2x8x512xf32>
    %15 = vector.extract_strided_slice %13 {offsets = [0, 8, 0], sizes = [2, 8, 512], strides = [1, 1, 1]} : vector<2x16x512xf32> to vector<2x8x512xf32>
    %16 = vector.extract_strided_slice %15 {offsets = [0, 1, 0], sizes = [2, 7, 512], strides = [1, 1, 1]} : vector<2x8x512xf32> to vector<2x7x512xf32>
    %17 = vector.extract_strided_slice %15 {offsets = [0, 0, 0], sizes = [2, 1, 512], strides = [1, 1, 1]} : vector<2x8x512xf32> to vector<2x1x512xf32>
    %18 = tpu.concatenate %16, %17 in 1 : vector<2x7x512xf32>, vector<2x1x512xf32> -> vector<2x8x512xf32>
    %19 = vector.extract_strided_slice %14 {offsets = [0, 1, 0], sizes = [2, 7, 512], strides = [1, 1, 1]} : vector<2x8x512xf32> to vector<2x7x512xf32>
    %20 = vector.extract_strided_slice %14 {offsets = [0, 0, 0], sizes = [2, 1, 512], strides = [1, 1, 1]} : vector<2x8x512xf32> to vector<2x1x512xf32>
    %21 = tpu.concatenate %19, %20 in 1 : vector<2x7x512xf32>, vector<2x1x512xf32> -> vector<2x8x512xf32>
    %22 = vector.shape_cast %15 : vector<2x8x512xf32> to vector<16x512xf32>
    %23 = arith.truncf %22 : vector<16x512xf32> to vector<16x512xbf16>
    %c0_5 = arith.constant 0 : index
    %c0_6 = arith.constant 0 : index
    %24 = vector.load %arg3[%c0_5, %c0_6] : memref<512x3072xbf16, #tpu.memory_space<vmem>>, vector<512x1024xbf16>
    %cst_7 = arith.constant dense<0.000000e+00> : vector<16x1024xf32>
    %25 = tpu.matmul %23, %24, %cst_7 {dimension_numbers = #tpu.dot_dimension_numbers<[1], [0], [0], [1], [0, 0, 1, 1], [], []>} : vector<16x512xbf16>, vector<512x1024xbf16>, vector<16x1024xf32> -> vector<16x1024xf32>
    %26 = vector.shape_cast %25 : vector<16x1024xf32> to vector<2x8x1024xf32>
    %27 = vector.extract_strided_slice %26 {offsets = [0, 0, 0], sizes = [2, 8, 512], strides = [1, 1, 1]} : vector<2x8x1024xf32> to vector<2x8x512xf32>
    %28 = vector.extract_strided_slice %26 {offsets = [0, 0, 512], sizes = [2, 8, 512], strides = [1, 1, 1]} : vector<2x8x1024xf32> to vector<2x8x512xf32>
    %29 = vector.shape_cast %14 : vector<2x8x512xf32> to vector<16x512xf32>
    %30 = arith.truncf %29 : vector<16x512xf32> to vector<16x512xbf16>
    %c0_8 = arith.constant 0 : index
    %c0_9 = arith.constant 0 : index
    %31 = vector.load %arg3[%c0_8, %c0_9] : memref<512x3072xbf16, #tpu.memory_space<vmem>>, vector<512x2048xbf16>
    %cst_10 = arith.constant dense<0.000000e+00> : vector<16x2048xf32>
    %32 = tpu.matmul %30, %31, %cst_10 {dimension_numbers = #tpu.dot_dimension_numbers<[1], [0], [0], [1], [0, 0, 1, 1], [], []>} : vector<16x512xbf16>, vector<512x2048xbf16>, vector<16x2048xf32> -> vector<16x2048xf32>
    %33 = vector.shape_cast %32 : vector<16x2048xf32> to vector<2x8x2048xf32>
    %34 = vector.extract_strided_slice %33 {offsets = [0, 0, 0], sizes = [2, 8, 512], strides = [1, 1, 1]} : vector<2x8x2048xf32> to vector<2x8x512xf32>
    %35 = vector.extract_strided_slice %33 {offsets = [0, 0, 512], sizes = [2, 8, 512], strides = [1, 1, 1]} : vector<2x8x2048xf32> to vector<2x8x512xf32>
    %36 = vector.extract_strided_slice %33 {offsets = [0, 0, 1024], sizes = [2, 8, 512], strides = [1, 1, 1]} : vector<2x8x2048xf32> to vector<2x8x512xf32>
    %37 = arith.addf %27, %36 : vector<2x8x512xf32>
    %38 = vector.extract_strided_slice %33 {offsets = [0, 0, 1536], sizes = [2, 8, 512], strides = [1, 1, 1]} : vector<2x8x2048xf32> to vector<2x8x512xf32>
    %39 = arith.addf %28, %38 : vector<2x8x512xf32>
    %40 = vector.shape_cast %18 : vector<2x8x512xf32> to vector<16x512xf32>
    %41 = arith.truncf %40 : vector<16x512xf32> to vector<16x512xbf16>
    %c0_11 = arith.constant 0 : index
    %c1024 = arith.constant 1024 : index
    %42 = vector.load %arg3[%c0_11, %c1024] : memref<512x3072xbf16, #tpu.memory_space<vmem>>, vector<512x2048xbf16>
    %cst_12 = arith.constant dense<0.000000e+00> : vector<16x2048xf32>
    %43 = tpu.matmul %41, %42, %cst_12 {dimension_numbers = #tpu.dot_dimension_numbers<[1], [0], [0], [1], [0, 0, 1, 1], [], []>} : vector<16x512xbf16>, vector<512x2048xbf16>, vector<16x2048xf32> -> vector<16x2048xf32>
    %44 = vector.shape_cast %43 : vector<16x2048xf32> to vector<2x8x2048xf32>
    %45 = vector.extract_strided_slice %44 {offsets = [0, 0, 0], sizes = [2, 8, 512], strides = [1, 1, 1]} : vector<2x8x2048xf32> to vector<2x8x512xf32>
    %46 = arith.addf %34, %45 : vector<2x8x512xf32>
    %47 = vector.extract_strided_slice %44 {offsets = [0, 0, 512], sizes = [2, 8, 512], strides = [1, 1, 1]} : vector<2x8x2048xf32> to vector<2x8x512xf32>
    %48 = arith.addf %35, %47 : vector<2x8x512xf32>
    %49 = vector.extract_strided_slice %44 {offsets = [0, 0, 1024], sizes = [2, 8, 512], strides = [1, 1, 1]} : vector<2x8x2048xf32> to vector<2x8x512xf32>
    %50 = arith.addf %37, %49 : vector<2x8x512xf32>
    %51 = vector.extract_strided_slice %44 {offsets = [0, 0, 1536], sizes = [2, 8, 512], strides = [1, 1, 1]} : vector<2x8x2048xf32> to vector<2x8x512xf32>
    %52 = arith.addf %39, %51 : vector<2x8x512xf32>
    %53 = vector.shape_cast %21 : vector<2x8x512xf32> to vector<16x512xf32>
    %54 = arith.truncf %53 : vector<16x512xf32> to vector<16x512xbf16>
    %c0_13 = arith.constant 0 : index
    %c2048 = arith.constant 2048 : index
    %55 = vector.load %arg3[%c0_13, %c2048] : memref<512x3072xbf16, #tpu.memory_space<vmem>>, vector<512x1024xbf16>
    %cst_14 = arith.constant dense<0.000000e+00> : vector<16x1024xf32>
    %56 = tpu.matmul %54, %55, %cst_14 {dimension_numbers = #tpu.dot_dimension_numbers<[1], [0], [0], [1], [0, 0, 1, 1], [], []>} : vector<16x512xbf16>, vector<512x1024xbf16>, vector<16x1024xf32> -> vector<16x1024xf32>
    %57 = vector.shape_cast %56 : vector<16x1024xf32> to vector<2x8x1024xf32>
    %58 = vector.extract_strided_slice %57 {offsets = [0, 0, 0], sizes = [2, 8, 512], strides = [1, 1, 1]} : vector<2x8x1024xf32> to vector<2x8x512xf32>
    %59 = arith.addf %46, %58 : vector<2x8x512xf32>
    %60 = vector.extract_strided_slice %57 {offsets = [0, 0, 512], sizes = [2, 8, 512], strides = [1, 1, 1]} : vector<2x8x1024xf32> to vector<2x8x512xf32>
    %61 = arith.addf %48, %60 : vector<2x8x512xf32>
    %62 = arith.maximumf %50, %52 : vector<2x8x512xf32>
    %63 = arith.maximumf %59, %61 : vector<2x8x512xf32>
    %64 = arith.maximumf %62, %63 : vector<2x8x512xf32>
    %c0_15 = arith.constant 0 : index
    %c0_16 = arith.constant 0 : index
    %65 = vector.load %arg4[%c0_15, %c0_16] : memref<1x512xf32, #tpu.memory_space<vmem>>, vector<1x512xf32>
    %66 = vector.shape_cast %65 : vector<1x512xf32> to vector<1x1x512xf32>
    %67 = vector.broadcast %66 : vector<1x1x512xf32> to vector<2x8x512xf32>
    %68 = arith.addf %64, %67 : vector<2x8x512xf32>
    %cst_17 = arith.constant 0.000000e+00 : f32
    %69 = vector.broadcast %cst_17 : f32 to vector<2x8x512xf32>
    %70 = arith.maximumf %68, %69 : vector<2x8x512xf32>
    %cst_18 = arith.constant 0.000000e+00 : f32
    %71 = vector.broadcast %cst_18 : f32 to vector<2x128xf32>
    %72 = vector.extract_strided_slice %70 {offsets = [0, 0, 0], sizes = [2, 1, 512], strides = [1, 1, 1]} : vector<2x8x512xf32> to vector<2x1x512xf32>
    %73 = vector.shape_cast %72 : vector<2x1x512xf32> to vector<2x512xf32>
    %74 = arith.truncf %73 : vector<2x512xf32> to vector<2x512xbf16>
    %c0_19 = arith.constant 0 : index
    %c0_20 = arith.constant 0 : index
    %c0_21 = arith.constant 0 : index
    %75 = vector.load %arg5[%c0_19, %c0_20, %c0_21] : memref<7x512x128xbf16, #tpu.memory_space<vmem>>, vector<1x512x128xbf16>
    %76 = vector.shape_cast %75 : vector<1x512x128xbf16> to vector<512x128xbf16>
    %cst_22 = arith.constant dense<0.000000e+00> : vector<2x128xf32>
    %77 = tpu.matmul %74, %76, %cst_22 {dimension_numbers = #tpu.dot_dimension_numbers<[1], [0], [0], [1], [0, 0, 1, 1], [], []>} : vector<2x512xbf16>, vector<512x128xbf16>, vector<2x128xf32> -> vector<2x128xf32>
    %78 = arith.addf %71, %77 : vector<2x128xf32>
    %79 = vector.extract_strided_slice %70 {offsets = [0, 1, 0], sizes = [2, 1, 512], strides = [1, 1, 1]} : vector<2x8x512xf32> to vector<2x1x512xf32>
    %80 = vector.shape_cast %79 : vector<2x1x512xf32> to vector<2x512xf32>
    %81 = arith.truncf %80 : vector<2x512xf32> to vector<2x512xbf16>
    %c1 = arith.constant 1 : index
    %c0_23 = arith.constant 0 : index
    %c0_24 = arith.constant 0 : index
    %82 = vector.load %arg5[%c1, %c0_23, %c0_24] : memref<7x512x128xbf16, #tpu.memory_space<vmem>>, vector<1x512x128xbf16>
    %83 = vector.shape_cast %82 : vector<1x512x128xbf16> to vector<512x128xbf16>
    %cst_25 = arith.constant dense<0.000000e+00> : vector<2x128xf32>
    %84 = tpu.matmul %81, %83, %cst_25 {dimension_numbers = #tpu.dot_dimension_numbers<[1], [0], [0], [1], [0, 0, 1, 1], [], []>} : vector<2x512xbf16>, vector<512x128xbf16>, vector<2x128xf32> -> vector<2x128xf32>
    %85 = arith.addf %78, %84 : vector<2x128xf32>
    %86 = vector.extract_strided_slice %70 {offsets = [0, 2, 0], sizes = [2, 1, 512], strides = [1, 1, 1]} : vector<2x8x512xf32> to vector<2x1x512xf32>
    %87 = vector.shape_cast %86 : vector<2x1x512xf32> to vector<2x512xf32>
    %88 = arith.truncf %87 : vector<2x512xf32> to vector<2x512xbf16>
    %c2 = arith.constant 2 : index
    %c0_26 = arith.constant 0 : index
    %c0_27 = arith.constant 0 : index
    %89 = vector.load %arg5[%c2, %c0_26, %c0_27] : memref<7x512x128xbf16, #tpu.memory_space<vmem>>, vector<1x512x128xbf16>
    %90 = vector.shape_cast %89 : vector<1x512x128xbf16> to vector<512x128xbf16>
    %cst_28 = arith.constant dense<0.000000e+00> : vector<2x128xf32>
    %91 = tpu.matmul %88, %90, %cst_28 {dimension_numbers = #tpu.dot_dimension_numbers<[1], [0], [0], [1], [0, 0, 1, 1], [], []>} : vector<2x512xbf16>, vector<512x128xbf16>, vector<2x128xf32> -> vector<2x128xf32>
    %92 = arith.addf %85, %91 : vector<2x128xf32>
    %93 = vector.extract_strided_slice %70 {offsets = [0, 3, 0], sizes = [2, 1, 512], strides = [1, 1, 1]} : vector<2x8x512xf32> to vector<2x1x512xf32>
    %94 = vector.shape_cast %93 : vector<2x1x512xf32> to vector<2x512xf32>
    %95 = arith.truncf %94 : vector<2x512xf32> to vector<2x512xbf16>
    %c3 = arith.constant 3 : index
    %c0_29 = arith.constant 0 : index
    %c0_30 = arith.constant 0 : index
    %96 = vector.load %arg5[%c3, %c0_29, %c0_30] : memref<7x512x128xbf16, #tpu.memory_space<vmem>>, vector<1x512x128xbf16>
    %97 = vector.shape_cast %96 : vector<1x512x128xbf16> to vector<512x128xbf16>
    %cst_31 = arith.constant dense<0.000000e+00> : vector<2x128xf32>
    %98 = tpu.matmul %95, %97, %cst_31 {dimension_numbers = #tpu.dot_dimension_numbers<[1], [0], [0], [1], [0, 0, 1, 1], [], []>} : vector<2x512xbf16>, vector<512x128xbf16>, vector<2x128xf32> -> vector<2x128xf32>
    %99 = arith.addf %92, %98 : vector<2x128xf32>
    %100 = vector.extract_strided_slice %70 {offsets = [0, 4, 0], sizes = [2, 1, 512], strides = [1, 1, 1]} : vector<2x8x512xf32> to vector<2x1x512xf32>
    %101 = vector.shape_cast %100 : vector<2x1x512xf32> to vector<2x512xf32>
    %102 = arith.truncf %101 : vector<2x512xf32> to vector<2x512xbf16>
    %c4 = arith.constant 4 : index
    %c0_32 = arith.constant 0 : index
    %c0_33 = arith.constant 0 : index
    %103 = vector.load %arg5[%c4, %c0_32, %c0_33] : memref<7x512x128xbf16, #tpu.memory_space<vmem>>, vector<1x512x128xbf16>
    %104 = vector.shape_cast %103 : vector<1x512x128xbf16> to vector<512x128xbf16>
    %cst_34 = arith.constant dense<0.000000e+00> : vector<2x128xf32>
    %105 = tpu.matmul %102, %104, %cst_34 {dimension_numbers = #tpu.dot_dimension_numbers<[1], [0], [0], [1], [0, 0, 1, 1], [], []>} : vector<2x512xbf16>, vector<512x128xbf16>, vector<2x128xf32> -> vector<2x128xf32>
    %106 = arith.addf %99, %105 : vector<2x128xf32>
    %107 = vector.extract_strided_slice %70 {offsets = [0, 5, 0], sizes = [2, 1, 512], strides = [1, 1, 1]} : vector<2x8x512xf32> to vector<2x1x512xf32>
    %108 = vector.shape_cast %107 : vector<2x1x512xf32> to vector<2x512xf32>
    %109 = arith.truncf %108 : vector<2x512xf32> to vector<2x512xbf16>
    %c5 = arith.constant 5 : index
    %c0_35 = arith.constant 0 : index
    %c0_36 = arith.constant 0 : index
    %110 = vector.load %arg5[%c5, %c0_35, %c0_36] : memref<7x512x128xbf16, #tpu.memory_space<vmem>>, vector<1x512x128xbf16>
    %111 = vector.shape_cast %110 : vector<1x512x128xbf16> to vector<512x128xbf16>
    %cst_37 = arith.constant dense<0.000000e+00> : vector<2x128xf32>
    %112 = tpu.matmul %109, %111, %cst_37 {dimension_numbers = #tpu.dot_dimension_numbers<[1], [0], [0], [1], [0, 0, 1, 1], [], []>} : vector<2x512xbf16>, vector<512x128xbf16>, vector<2x128xf32> -> vector<2x128xf32>
    %113 = arith.addf %106, %112 : vector<2x128xf32>
    %114 = vector.extract_strided_slice %70 {offsets = [0, 6, 0], sizes = [2, 1, 512], strides = [1, 1, 1]} : vector<2x8x512xf32> to vector<2x1x512xf32>
    %115 = vector.shape_cast %114 : vector<2x1x512xf32> to vector<2x512xf32>
    %116 = arith.truncf %115 : vector<2x512xf32> to vector<2x512xbf16>
    %c6 = arith.constant 6 : index
    %c0_38 = arith.constant 0 : index
    %c0_39 = arith.constant 0 : index
    %117 = vector.load %arg5[%c6, %c0_38, %c0_39] : memref<7x512x128xbf16, #tpu.memory_space<vmem>>, vector<1x512x128xbf16>
    %118 = vector.shape_cast %117 : vector<1x512x128xbf16> to vector<512x128xbf16>
    %cst_40 = arith.constant dense<0.000000e+00> : vector<2x128xf32>
    %119 = tpu.matmul %116, %118, %cst_40 {dimension_numbers = #tpu.dot_dimension_numbers<[1], [0], [0], [1], [0, 0, 1, 1], [], []>} : vector<2x512xbf16>, vector<512x128xbf16>, vector<2x128xf32> -> vector<2x128xf32>
    %120 = arith.addf %113, %119 : vector<2x128xf32>
    %c0_41 = arith.constant 0 : index
    %c0_42 = arith.constant 0 : index
    %121 = vector.load %arg6[%c0_41, %c0_42] : memref<1x128xf32, #tpu.memory_space<vmem>>, vector<1x128xf32>
    %122 = vector.broadcast %121 : vector<1x128xf32> to vector<2x128xf32>
    %123 = arith.addf %120, %122 : vector<2x128xf32>
    %c0_43 = arith.constant 0 : index
    %c0_44 = arith.constant 0 : index
    %124 = vector.load %arg7[%c0_43, %c0_44] : memref<2x128xf32, #tpu.memory_space<vmem>>, vector<2x128xf32>
    tpu.vector_store %arg7[%c0_43, %c0_44], %123 {strides = array<i32>} : memref<2x128xf32, #tpu.memory_space<vmem>>, vector<2x128xf32>,
    return
  }
  func.func @transform_0(%arg0: i32) -> (i32, i32, i32) {
    %c0_i32 = arith.constant 0 : i32
    %c0_i32_0 = arith.constant 0 : i32
    %c0_i32_1 = arith.constant 0 : i32
    return %arg0, %c0_i32, %c0_i32_0 : i32, i32, i32
  }
  func.func @transform_1(%arg0: i32) -> (i32, i32) {
    %c0_i32 = arith.constant 0 : i32
    %c0_i32_0 = arith.constant 0 : i32
    %c0_i32_1 = arith.constant 0 : i32
    return %c0_i32, %c0_i32_0 : i32, i32
  }
  func.func @transform_2(%arg0: i32) -> (i32, i32) {
    %c0_i32 = arith.constant 0 : i32
    %c0_i32_0 = arith.constant 0 : i32
    %c0_i32_1 = arith.constant 0 : i32
    return %c0_i32, %c0_i32_0 : i32, i32
  }
  func.func @transform_3(%arg0: i32) -> (i32, i32) {
    %c0_i32 = arith.constant 0 : i32
    %c0_i32_0 = arith.constant 0 : i32
    %c0_i32_1 = arith.constant 0 : i32
    return %c0_i32, %c0_i32_0 : i32, i32
  }
  func.func @transform_4(%arg0: i32) -> (i32, i32, i32) {
    %c0_i32 = arith.constant 0 : i32
    %c0_i32_0 = arith.constant 0 : i32
    %c0_i32_1 = arith.constant 0 : i32
    %c0_i32_2 = arith.constant 0 : i32
    return %c0_i32, %c0_i32_0, %c0_i32_1 : i32, i32, i32
  }
  func.func @transform_5(%arg0: i32) -> (i32, i32) {
    %c0_i32 = arith.constant 0 : i32
    %c0_i32_0 = arith.constant 0 : i32
    %c0_i32_1 = arith.constant 0 : i32
    return %c0_i32, %c0_i32_0 : i32, i32
  }
  func.func @transform_6(%arg0: i32) -> (i32, i32) {
    %c0_i32 = arith.constant 0 : i32
    %c0_i32_0 = arith.constant 0 : i32
    return %arg0, %c0_i32 : i32, i32
  }
}

</mosaic_0001>

<bundles_post_ra>
// kernel: tile.8
= control target key start
LH: loop header
LB: loop body
LE: loop exit
PB: predicated region body
PF: predicated region fallthrough
CT: control target
= control target key end

     0   :  { %s22_s0 = inlined_call_operand.vmem [shape: f32[64], index: 0, kind: input, shape index: {}]   ;;  %s23_s1 = inlined_call_operand.vmem [shape: f32[8,64], index: 1, kind: output, shape index: {}]  }
   0x1   :  { %v4_v0 = vld [vmem:[%s22_s0] ss:$0 sm:$0xff] }
   0x2   :  { %5 = vst [vmem:[%s23_s1] sm:$0xff] %v4_v0 }

// kernel: tile.9
= control target key start
LH: loop header
LB: loop body
LE: loop exit
PB: predicated region body
PF: predicated region fallthrough
CT: control target
= control target key end

     0   :  { %vm3_vm0 = vcmask 523264   ;;  %s41_s8 = smov 64   ;;  %vm9_vm1 = vcmask 1048064   ;;  %s70_s0 = inlined_call_operand.vmem [shape: f32[8,64], index: 0, kind: input, shape index: {}]   ;;  %s71_s1 = inlined_call_operand.vmem [shape: f32[1,512], index: 1, kind: output, shape index: {}]  }
   0x1   :  { %v36_v0 = vld [vmem:[%s70_s0 + $0x1] ss:$2 sm:$0xf]   ;;  %v2_v1 = vld [vmem:[%s70_s0] ss:$2 sm:$0xf]  }
   0x2   :  { %7 = vrot.lane.b32.xlu0 %v36_v0, %s41_s8  ;;  %4 = vst.msk [vmem:[#allocation0] ss:$8 sm:$0xf] %vm3_vm0, %v2_v1  }
  0x74   :  { %v8_v2 = vpop.permute.xlu0 %7  }
  0x75   :  { %10 = vst.msk [vmem:[#allocation0] ss:$8 sm:$0xf] %vm9_vm1, %v8_v2  }
  0x7c   :  { %v14_v3 = vld [vmem:[#allocation0] sm:$0x1]  ;;  %v18_v4 = vld [vmem:[#allocation0 + $0x8] sm:$0x1]  ;;  %v23_v5 = vld [vmem:[#allocation0 + $0x10] sm:$0x1] }
  0x7d   :  { %16 = vst [vmem:[%s71_s1] sm:$0x1] %v14_v3  ;;  %37 = vst [vmem:[%s71_s1 + $0x1] sm:$0x1] %v18_v4  ;;  %v29_v6 = vld [vmem:[#allocation0 + $0x18] sm:$0x1] }
  0x7e   :  { %38 = vst [vmem:[%s71_s1 + $0x2] sm:$0x1] %v23_v5  ;;  %39 = vst [vmem:[%s71_s1 + $0x3] sm:$0x1] %v29_v6 }

// kernel: simple_cnn_forward.1
= control target key start
LH: loop header
LB: loop body
LE: loop exit
PB: predicated region body
PF: predicated region fallthrough
CT: control target
= control target key end

     0   :  { %v15883_v8 = vmov 0   ;;  %vm341_vm0 = vcmask 785408   ;;  %s22231_s0 = inlined_call_operand.vmem [shape: bf16[2,32,96], index: 0, kind: input, shape index: {}]   ;;  %s22232_s1 = inlined_call_operand.vmem [shape: bf16[96,1024], index: 1, kind: input, shape index: {}]   ;;  %s22233_s2 = inlined_call_operand.vmem [shape: bf16[512,3072], index: 2, kind: input, shape index: {}]   ;;  %s22234_s3 = inlined_call_operand.vmem [shape: f32[1,512], index: 3, kind: input, shape index: {}]   ;;  %s22235_s4 = inlined_call_operand.vmem [shape: bf16[7,512,128], index: 4, kind: input, shape index: {}]   ;;  %s22236_s5 = inlined_call_operand.vmem [shape: f32[1,128], index: 5, kind: input, shape index: {}]   ;;  %s22237_s6 = inlined_call_operand.hbm [shape: f32[2,128], index: 6, kind: output, shape index: {}]  }
   0x1   :  { %v33_v0 = vld [vmem:[%s22232_s1] sm:$0xff]  ;;  %v34_v6 = vld [vmem:[%s22232_s1 + $0x8] sm:$0xff]  ;;  %386 = vmatprep.mubr.bf16.mxu0 %v15883_v8  ;;  %459 = vmatprep.mubr.bf16.mxu1 %v15883_v8  ;;  %v35_v46 = vld [vmem:[%s22232_s1 + $0x10] sm:$0xff] }
   0x2   :  { %v37_v1 = vld [vmem:[%s22232_s1 + $0x20] sm:$0xff]  ;;  %v38_v7 = vld [vmem:[%s22232_s1 + $0x28] sm:$0xff]  ;;  %v39_v47 = vld [vmem:[%s22232_s1 + $0x30] sm:$0xff] }
   0x3   :  { %v41_v2 = vld [vmem:[%s22232_s1 + $0x40] sm:$0xff]  ;;  %v13209_v3 = vcombine.high %v33_v0, %v37_v1  ;;  %v13208_v4 = vcombine.low %v33_v0, %v37_v1  ;;  %v13211_v10 = vcombine.high %v34_v6, %v38_v7  ;;  %v13210_v11 = vcombine.low %v34_v6, %v38_v7  ;;  %v42_v14 = vld [vmem:[%s22232_s1 + $0x48] sm:$0xff]  ;;  %v36_v49 = vld [vmem:[%s22232_s1 + $0x18] sm:$0xff] }
   0x4   :  { %v45_v5 = vld [vmem:[%s22232_s1 + $0x60] sm:$0xff]  ;;  %v46_v15 = vld [vmem:[%s22232_s1 + $0x68] sm:$0xff]  ;;  %v40_v50 = vld [vmem:[%s22232_s1 + $0x38] sm:$0xff]  ;;  %v13213_v55 = vcombine.high %v35_v46, %v39_v47  ;;  %v13212_v60 = vcombine.low %v35_v46, %v39_v47 }
   0x5   :  { %v13217_v9 = vcombine.high %v41_v2, %v45_v5  ;;  %v49_v12 = vld [vmem:[%s22232_s1 + $0x80] sm:$0xff]  ;;  %354 = vmatprep.subr.bf16.mxu0 %v13209_v3  ;;  %v13216_v16 = vcombine.low %v41_v2, %v45_v5  ;;  %427 = vmatprep.subr.bf16.mxu1 %v13211_v10  ;;  %v13219_v17 = vcombine.high %v42_v14, %v46_v15  ;;  %v50_v18 = vld [vmem:[%s22232_s1 + $0x88] sm:$0xff]  ;;  %v43_v52 = vld [vmem:[%s22232_s1 + $0x50] sm:$0xff] }
   0x6   :  { %v53_v13 = vld [vmem:[%s22232_s1 + $0xa0] sm:$0xff]  ;;  %355 = vmatpush1.bf16.msra.mxu0 %v13208_v4  ;;  %v54_v19 = vld [vmem:[%s22232_s1 + $0xa8] sm:$0xff]  ;;  %428 = vmatpush1.bf16.msra.mxu1 %v13210_v11  ;;  %v13218_v21 = vcombine.low %v42_v14, %v46_v15  ;;  %v47_v53 = vld [vmem:[%s22232_s1 + $0x70] sm:$0xff]  ;;  %v13215_v57 = vcombine.high %v36_v49, %v40_v50  ;;  %v13214_v0 = vcombine.low %v36_v49, %v40_v50 }
   0x7   :  { %356 = vmatprep.subr.bf16.mxu0 %v13217_v9  ;;  %v13225_v20 = vcombine.high %v49_v12, %v53_v13  ;;  %429 = vmatprep.subr.bf16.mxu1 %v13219_v17  ;;  %v57_v22 = vld [vmem:[%s22232_s1 + $0xc0] sm:$0xff]  ;;  %v13227_v24 = vcombine.high %v50_v18, %v54_v19  ;;  %v58_v25 = vld [vmem:[%s22232_s1 + $0xc8] sm:$0xff]  ;;  %v13224_v27 = vcombine.low %v49_v12, %v53_v13  ;;  %v44_v58 = vld [vmem:[%s22232_s1 + $0x58] sm:$0xff] }
   0x8   :  { %v61_v23 = vld [vmem:[%s22232_s1 + $0xe0] sm:$0xff]  ;;  %v62_v26 = vld [vmem:[%s22232_s1 + $0xe8] sm:$0xff]  ;;  %v13226_v29 = vcombine.low %v50_v18, %v54_v19  ;;  %v48_v59 = vld [vmem:[%s22232_s1 + $0x78] sm:$0xff]  ;;  %v13221_v63 = vcombine.high %v43_v52, %v47_v53  ;;  %v13220_v4 = vcombine.low %v43_v52, %v47_v53 }
   0x9   :  { %v13233_v28 = vcombine.high %v57_v22, %v61_v23  ;;  %v65_v30 = vld [vmem:[%s22232_s1 + $0x100] sm:$0xff]  ;;  %v13235_v32 = vcombine.high %v58_v25, %v62_v26  ;;  %v66_v33 = vld [vmem:[%s22232_s1 + $0x108] sm:$0xff]  ;;  %v13232_v35 = vcombine.low %v57_v22, %v61_v23  ;;  %v13234_v37 = vcombine.low %v58_v25, %v62_v26  ;;  %v51_v61 = vld [vmem:[%s22232_s1 + $0x90] sm:$0xff] }
   0xa   :  { %357 = vmatpush1.bf16.msra.mxu0 %v13216_v16  ;;  %430 = vmatpush1.bf16.msra.mxu1 %v13218_v21  ;;  %v69_v31 = vld [vmem:[%s22232_s1 + $0x120] sm:$0xff]  ;;  %v70_v34 = vld [vmem:[%s22232_s1 + $0x128] sm:$0xff]  ;;  %v55_v62 = vld [vmem:[%s22232_s1 + $0xb0] sm:$0xff]  ;;  %v13223_v3 = vcombine.high %v44_v58, %v48_v59  ;;  %v13222_v10 = vcombine.low %v44_v58, %v48_v59 }
   0xb   :  { %358 = vmatprep.subr.bf16.mxu0 %v13225_v20  ;;  %431 = vmatprep.subr.bf16.mxu1 %v13227_v24  ;;  %v13241_v36 = vcombine.high %v65_v30, %v69_v31  ;;  %v73_v38 = vld [vmem:[%s22232_s1 + $0x140] sm:$0xff]  ;;  %v13243_v40 = vcombine.high %v66_v33, %v70_v34  ;;  %v74_v41 = vld [vmem:[%s22232_s1 + $0x148] sm:$0xff]  ;;  %v13240_v43 = vcombine.low %v65_v30, %v69_v31  ;;  %v52_v1 = vld [vmem:[%s22232_s1 + $0x98] sm:$0xff] }
   0xc   :  { %v77_v39 = vld [vmem:[%s22232_s1 + $0x160] sm:$0xff]  ;;  %v78_v42 = vld [vmem:[%s22232_s1 + $0x168] sm:$0xff]  ;;  %v13242_v45 = vcombine.low %v66_v33, %v70_v34  ;;  %v56_v2 = vld [vmem:[%s22232_s1 + $0xb8] sm:$0xff]  ;;  %v13229_v9 = vcombine.high %v51_v61, %v55_v62  ;;  %v13228_v14 = vcombine.low %v51_v61, %v55_v62 }
   0xd   :  { %v13249_v44 = vcombine.high %v73_v38, %v77_v39  ;;  %v13251_v48 = vcombine.high %v74_v41, %v78_v42  ;;  %v13248_v51 = vcombine.low %v73_v38, %v77_v39  ;;  %v16015_v54 = vld [vmem:[%s22231_s0] sm:$0xff]   ;;  %v13250_v56 = vcombine.low %v74_v41, %v78_v42  ;;  %v59_v5 = vld [vmem:[%s22232_s1 + $0xd0] sm:$0xff]  ;;  %v16049_v7 = vld [vmem:[%s22231_s0 + $0x8] sm:$0xff]  }
   0xe   :  { %359 = vmatpush1.bf16.msra.mxu0 %v13224_v27  ;;  %432 = vmatpush1.bf16.msra.mxu1 %v13226_v29  ;;  %v63_v6 = vld [vmem:[%s22232_s1 + $0xf0] sm:$0xff]  ;;  %v60_v11 = vld [vmem:[%s22232_s1 + $0xd8] sm:$0xff]  ;;  %v13231_v13 = vcombine.high %v52_v1, %v56_v2  ;;  %v13230_v18 = vcombine.low %v52_v1, %v56_v2  ;;  %v779_v38 = vld [vmem:[%s22233_s2] sm:$0xff] }
   0xf   :  { %360 = vmatprep.subr.bf16.mxu0 %v13233_v28  ;;  %433 = vmatprep.subr.bf16.mxu1 %v13235_v32  ;;  %v64_v12 = vld [vmem:[%s22232_s1 + $0xf8] sm:$0xff]  ;;  %v67_v15 = vld [vmem:[%s22232_s1 + $0x110] sm:$0xff]  ;;  %v13237_v17 = vcombine.high %v59_v5, %v63_v6  ;;  %v13236_v22 = vcombine.low %v59_v5, %v63_v6  ;;  %v783_v39 = vld [vmem:[%s22233_s2 + $0x60] sm:$0xff] }
  0x10   :  { %v71_v16 = vld [vmem:[%s22232_s1 + $0x130] sm:$0xff]  ;;  %v68_v19 = vld [vmem:[%s22232_s1 + $0x118] sm:$0xff]  ;;  %v13239_v21 = vcombine.high %v60_v11, %v64_v12  ;;  %v13238_v27 = vcombine.low %v60_v11, %v64_v12  ;;  %v13273_v41 = vcombine.high %v779_v38, %v783_v39  ;;  %v13272_v42 = vcombine.low %v779_v38, %v783_v39  ;;  %v791_v46 = vld [vmem:[%s22233_s2 + $0x120] sm:$0xff] }
  0x11   :  { %v72_v20 = vld [vmem:[%s22232_s1 + $0x138] sm:$0xff]  ;;  %v15633_v23 = vld [vmem:[%s22231_s0 + $0x10] sm:$0xff]   ;;  %v13245_v24 = vcombine.high %v67_v15, %v71_v16  ;;  %v13244_v31 = vcombine.low %v67_v15, %v71_v16  ;;  %v788_v47 = vld [vmem:[%s22233_s2 + $0xc8] sm:$0xff] }
  0x12   :  { %361 = vmatpush1.bf16.msra.mxu0 %v13232_v35  ;;  %434 = vmatpush1.bf16.msra.mxu1 %v13234_v37  ;;  %v75_v25 = vld [vmem:[%s22232_s1 + $0x150] sm:$0xff]  ;;  %v76_v28 = vld [vmem:[%s22232_s1 + $0x158] sm:$0xff]  ;;  %v13247_v30 = vcombine.high %v68_v19, %v72_v20  ;;  %v13246_v33 = vcombine.low %v68_v19, %v72_v20  ;;  %v792_v49 = vld [vmem:[%s22233_s2 + $0x128] sm:$0xff] }
  0x13   :  { %362 = vmatprep.subr.bf16.mxu0 %v13241_v36  ;;  %435 = vmatprep.subr.bf16.mxu1 %v13243_v40  ;;  %v79_v26 = vld [vmem:[%s22232_s1 + $0x170] sm:$0xff]  ;;  %v80_v29 = vld [vmem:[%s22232_s1 + $0x178] sm:$0xff]  ;;  %v780_v40 = vld [vmem:[%s22233_s2 + $0x8] sm:$0xff]  ;;  %v13283_v52 = vcombine.high %v788_v47, %v792_v49 }
  0x14   :  { %v13253_v32 = vcombine.high %v75_v25, %v79_v26  ;;  %v13255_v34 = vcombine.high %v76_v28, %v80_v29  ;;  %v15634_v35 = vld [vmem:[%s22231_s0 + $0x18] sm:$0xff]   ;;  %v13252_v36 = vcombine.low %v75_v25, %v79_v26  ;;  %v13254_v37 = vcombine.low %v76_v28, %v80_v29  ;;  %v795_v53 = vld [vmem:[%s22233_s2 + $0x180] sm:$0xff]  ;;  %v808_v1 = vld [vmem:[%s22233_s2 + $0x2a8] sm:$0xff] }
  0x15   :  { %v803_v61 = vld [vmem:[%s22233_s2 + $0x240] sm:$0xff]  ;;  %v820_v16 = vld [vmem:[%s22233_s2 + $0x3c8] sm:$0xff] }
  0x16   :  { %363 = vmatpush1.bf16.msra.mxu0 %v13240_v43  ;;  %436 = vmatpush1.bf16.msra.mxu1 %v13242_v45  ;;  %v787_v45 = vld [vmem:[%s22233_s2 + $0xc0] sm:$0xff]  ;;  %v832_v26 = vld [vmem:[%s22233_s2 + $0x4e8] sm:$0xff] }
  0x17   :  { %364 = vmatprep.subr.bf16.mxu0 %v13249_v44  ;;  %437 = vmatprep.subr.bf16.mxu1 %v13251_v48  ;;  %v13281_v48 = vcombine.high %v787_v45, %v791_v46  ;;  %v13280_v50 = vcombine.low %v787_v45, %v791_v46  ;;  %v807_v62 = vld [vmem:[%s22233_s2 + $0x2a0] sm:$0xff] }
  0x18   :  { %v13296_v2 = vcombine.low %v803_v61, %v807_v62  ;;  %v811_v5 = vld [vmem:[%s22233_s2 + $0x300] sm:$0xff] }
  0x19   :  { %v815_v6 = vld [vmem:[%s22233_s2 + $0x360] sm:$0xff] }
  0x1a   :  { %365 = vmatpush1.bf16.msra.mxu0 %v13248_v51  ;;  %438 = vmatpush1.bf16.msra.mxu1 %v13250_v56  ;;  %v13282_v51 = vcombine.low %v788_v47, %v792_v49  ;;  %v13304_v11 = vcombine.low %v811_v5, %v815_v6  ;;  %v823_v15 = vld [vmem:[%s22233_s2 + $0x420] sm:$0xff]  ;;  %v852_v47 = vld [vmem:[%s22233_s2 + $0x6c8] sm:$0xff] }
  0x1b   :  { %500 = vmatprep.subr.bf16.mxu0 %v13213_v55  ;;  %573 = vmatprep.subr.bf16.mxu1 %v13215_v57  ;;  %v796_v55 = vld [vmem:[%s22233_s2 + $0x188] sm:$0xff]  ;;  %v843_v38 = vld [vmem:[%s22233_s2 + $0x600] sm:$0xff] }
  0x1c   :  { %v800_v57 = vld [vmem:[%s22233_s2 + $0x1e8] sm:$0xff]  ;;  %v847_v39 = vld [vmem:[%s22233_s2 + $0x660] sm:$0xff] }
  0x1d   :  { %13256 = vmatmul.mubr.msk.bf16.vlgmr.msra.gmra.mrb[0].mxu0 %vm341_vm0, %v16015_v54  ;;  %13260 = vmatmul.mubr.msk.bf16.vlgmr.msra.gmra.mrb[0].mxu1 %vm341_vm0, %v16015_v54  ;;  %v13290_v59 = vcombine.low %v796_v55, %v800_v57  ;;  %v851_v45 = vld [vmem:[%s22233_s2 + $0x6c0] sm:$0xff]  ;;  %v856_v49 = vld [vmem:[%s22233_s2 + $0x728] sm:$0xff] }
  0x1e   :  { %501 = vmatpush1.bf16.msra.mxu0 %v13212_v60  ;;  %396 = vmatprep.mubr.bf16.mxu0 %v15883_v8  ;;  %v13291_v60 = vcombine.high %v796_v55, %v800_v57  ;;  %v855_v46 = vld [vmem:[%s22233_s2 + $0x720] sm:$0xff]  ;;  %v860_v55 = vld [vmem:[%s22233_s2 + $0x788] sm:$0xff] }
  0x1f   :  { %502 = vmatprep.subr.bf16.mxu0 %v13221_v63  ;;  %469 = vmatprep.mubr.bf16.mxu1 %v15883_v8  ;;  %v804_v63 = vld [vmem:[%s22233_s2 + $0x248] sm:$0xff] }
  0x20   :  { %574 = vmatpush1.bf16.msra.mxu1 %v13214_v0  ;;  %v13297_v0 = vcombine.high %v803_v61, %v807_v62  ;;  %v864_v57 = vld [vmem:[%s22233_s2 + $0x7e8] sm:$0xff]  ;;  %v867_v61 = vld [vmem:[%s22233_s2 + $0x840] sm:$0xff] }
  0x21   :  { %575 = vmatprep.subr.bf16.mxu1 %v13223_v3  ;;  %v13298_v3 = vcombine.low %v804_v63, %v808_v1  ;;  %v871_v62 = vld [vmem:[%s22233_s2 + $0x8a0] sm:$0xff] }
  0x22   :  { %503 = vmatpush1.bf16.msra.mxu0 %v13220_v4  ;;  %v13299_v4 = vcombine.high %v804_v63, %v808_v1  ;;  %v868_v63 = vld [vmem:[%s22233_s2 + $0x848] sm:$0xff] }
  0x23   :  { %504 = vmatprep.subr.bf16.mxu0 %v13229_v9  ;;  %v13305_v9 = vcombine.high %v811_v5, %v815_v6  ;;  %v872_v1 = vld [vmem:[%s22233_s2 + $0x8a8] sm:$0xff]  ;;  %v875_v5 = vld [vmem:[%s22233_s2 + $0x900] sm:$0xff] }
  0x24   :  { %576 = vmatpush1.bf16.msra.mxu1 %v13222_v10  ;;  %v816_v10 = vld [vmem:[%s22233_s2 + $0x368] sm:$0xff]  ;;  %v879_v6 = vld [vmem:[%s22233_s2 + $0x960] sm:$0xff] }
  0x25   :  { %13257 = vmatmul.mubr.msk.bf16.gmra.mrb[4].mxu0 %vm341_vm0, %v16049_v7  ;;  %577 = vmatprep.subr.bf16.mxu1 %v13231_v13 }
  0x26   :  { %505 = vmatpush1.bf16.msra.mxu0 %v13228_v14  ;;  %13261 = vmatmul.mubr.msk.bf16.gmra.mrb[4].mxu1 %vm341_vm0, %v16049_v7  ;;  %v819_v14 = vld [vmem:[%s22233_s2 + $0x3c0] sm:$0xff] }
  0x27   :  { %406 = vmatprep.mubr.bf16.mxu0 %v15883_v8  ;;  %506 = vmatprep.subr.bf16.mxu0 %v13237_v17  ;;  %v13313_v17 = vcombine.high %v819_v14, %v823_v15  ;;  %v13312_v19 = vcombine.low %v819_v14, %v823_v15  ;;  %v883_v14 = vld [vmem:[%s22233_s2 + $0x9c0] sm:$0xff] }
  0x28   :  { %479 = vmatprep.mubr.bf16.mxu1 %v15883_v8  ;;  %578 = vmatpush1.bf16.msra.mxu1 %v13230_v18  ;;  %v824_v18 = vld [vmem:[%s22233_s2 + $0x428] sm:$0xff]  ;;  %v887_v15 = vld [vmem:[%s22233_s2 + $0xa20] sm:$0xff] }
  0x29   :  { %579 = vmatprep.subr.bf16.mxu1 %v13239_v21  ;;  %v13314_v20 = vcombine.low %v820_v16, %v824_v18  ;;  %v13315_v21 = vcombine.high %v820_v16, %v824_v18  ;;  %v884_v16 = vld [vmem:[%s22233_s2 + $0x9c8] sm:$0xff] }
  0x2a   :  { %507 = vmatpush1.bf16.msra.mxu0 %v13236_v22  ;;  %v827_v22 = vld [vmem:[%s22233_s2 + $0x480] sm:$0xff]  ;;  %v888_v18 = vld [vmem:[%s22233_s2 + $0xa28] sm:$0xff] }
  0x2b   :  { %508 = vmatprep.subr.bf16.mxu0 %v13245_v24  ;;  %v828_v24 = vld [vmem:[%s22233_s2 + $0x488] sm:$0xff] }
  0x2c   :  { %580 = vmatpush1.bf16.msra.mxu1 %v13238_v27  ;;  %v13322_v28 = vcombine.low %v828_v24, %v832_v26  ;;  %v13323_v29 = vcombine.high %v828_v24, %v832_v26  ;;  %v892_v24 = vld [vmem:[%s22233_s2 + $0xa88] sm:$0xff] }
  0x2d   :  { %13258 = vmatmul.mubr.msk.bf16.gmra.mrb[8].mxu0 %vm341_vm0, %v15633_v23  ;;  %581 = vmatprep.subr.bf16.mxu1 %v13247_v30  ;;  %v835_v30 = vld [vmem:[%s22233_s2 + $0x540] sm:$0xff]  ;;  %v896_v26 = vld [vmem:[%s22233_s2 + $0xae8] sm:$0xff] }
  0x2e   :  { %13262 = vmatmul.mubr.msk.bf16.gmra.mrb[8].mxu1 %vm341_vm0, %v15633_v23  ;;  %416 = vmatprep.mubr.bf16.mxu0 %v15883_v8 }
  0x2f   :  { %509 = vmatpush1.bf16.msra.mxu0 %v13244_v31  ;;  %489 = vmatprep.mubr.bf16.mxu1 %v15883_v8  ;;  %v839_v31 = vld [vmem:[%s22233_s2 + $0x5a0] sm:$0xff] }
  0x30   :  { %510 = vmatprep.subr.bf16.mxu0 %v13253_v32  ;;  %582 = vmatpush1.bf16.msra.mxu1 %v13246_v33  ;;  %v836_v32 = vld [vmem:[%s22233_s2 + $0x548] sm:$0xff]  ;;  %v13329_v33 = vcombine.high %v835_v30, %v839_v31 }
  0x31   :  { %583 = vmatprep.subr.bf16.mxu1 %v13255_v34  ;;  %v840_v34 = vld [vmem:[%s22233_s2 + $0x5a8] sm:$0xff] }
  0x33   :  { %511 = vmatpush1.bf16.msra.mxu0 %v13252_v36  ;;  %v13330_v36 = vcombine.low %v836_v32, %v840_v34 }
  0x34   :  { %584 = vmatpush1.bf16.msra.mxu1 %v13254_v37  ;;  %2315 = vmatprep.subr.bf16.mxu0 %v13273_v41  ;;  %v13331_v37 = vcombine.high %v836_v32, %v840_v34  ;;  %v13337_v41 = vcombine.high %v843_v38, %v847_v39  ;;  %v900_v32 = vld [vmem:[%s22233_s2 + $0xb48] sm:$0xff] }
  0x35   :  { %13259 = vmatmul.mubr.msk.bf16.gmra.mrb[12].mxu0 %vm341_vm0, %v15634_v35  ;;  %v904_v34 = vld [vmem:[%s22233_s2 + $0xba8] sm:$0xff] }
  0x36   :  { %13263 = vmatmul.mubr.msk.bf16.gmra.mrb[12].mxu1 %vm341_vm0, %v15634_v35  ;;  %532 = vmatprep.mubr.bf16.mxu0 %v15883_v8 }
  0x37   :  { %605 = vmatprep.mubr.bf16.mxu1 %v15883_v8 }
  0x3d   :  { %13264 = vmatmul.mubr.msk.bf16.vlgmr.msra.gmra.mrb[16].mxu0 %vm341_vm0, %v16015_v54 }
  0x3e   :  { %13268 = vmatmul.mubr.msk.bf16.vlgmr.msra.gmra.mrb[16].mxu1 %vm341_vm0, %v16015_v54  ;;  %542 = vmatprep.mubr.bf16.mxu0 %v15883_v8  ;;  %v799_v54 = vld [vmem:[%s22233_s2 + $0x1e0] sm:$0xff] }
  0x3f   :  { %615 = vmatprep.mubr.bf16.mxu1 %v15883_v8  ;;  %2316 = vmatpush1.bf16.msra.mxu0 %v13272_v42  ;;  %v13289_v56 = vcombine.high %v795_v53, %v799_v54  ;;  %v13288_v58 = vcombine.low %v795_v53, %v799_v54  ;;  %v13336_v42 = vcombine.low %v843_v38, %v847_v39  ;;  %v859_v53 = vld [vmem:[%s22233_s2 + $0x780] sm:$0xff] }
  0x40   :  { %2317 = vmatprep.subr.bf16.mxu0 %v13281_v48  ;;  %v13345_v48 = vcombine.high %v851_v45, %v855_v46  ;;  %v863_v54 = vld [vmem:[%s22233_s2 + $0x7e0] sm:$0xff] }
  0x41   :  { %v16315_v38 = vld [vmem:[%s22233_s2 + $0xc00] sm:$0xff] }
  0x42   :  { %v16320_v39 = vld [vmem:[%s22233_s2 + $0xc60] sm:$0xff] }
  0x43   :  { %2318 = vmatpush1.bf16.msra.mxu0 %v13280_v50  ;;  %v13344_v50 = vcombine.low %v851_v45, %v855_v46 }
  0x44   :  { %2319 = vmatprep.subr.bf16.mxu0 %v13289_v56  ;;  %v13353_v56 = vcombine.high %v859_v53, %v863_v54 }
  0x45   :  { %13265 = vmatmul.mubr.msk.bf16.gmra.mrb[20].mxu0 %vm341_vm0, %v16049_v7 }
  0x46   :  { %13269 = vmatmul.mubr.msk.bf16.gmra.mrb[20].mxu1 %vm341_vm0, %v16049_v7  ;;  %552 = vmatprep.mubr.bf16.mxu0 %v15883_v8  ;;  %v812_v7 = vld [vmem:[%s22233_s2 + $0x308] sm:$0xff] }
  0x47   :  { %625 = vmatprep.mubr.bf16.mxu1 %v15883_v8  ;;  %2320 = vmatpush1.bf16.msra.mxu0 %v13288_v58  ;;  %v13306_v12 = vcombine.low %v812_v7, %v816_v10  ;;  %v13307_v13 = vcombine.high %v812_v7, %v816_v10  ;;  %v13352_v58 = vcombine.low %v859_v53, %v863_v54  ;;  %v876_v7 = vld [vmem:[%s22233_s2 + $0x908] sm:$0xff] }
  0x48   :  { %2321 = vmatprep.subr.bf16.mxu0 %v13297_v0  ;;  %v13361_v0 = vcombine.high %v867_v61, %v871_v62  ;;  %v880_v10 = vld [vmem:[%s22233_s2 + $0x968] sm:$0xff] }
  0x4b   :  { %2322 = vmatpush1.bf16.msra.mxu0 %v13296_v2  ;;  %v13360_v2 = vcombine.low %v867_v61, %v871_v62 }
  0x4c   :  { %2323 = vmatprep.subr.bf16.mxu0 %v13305_v9  ;;  %v13369_v9 = vcombine.high %v875_v5, %v879_v6 }
  0x4d   :  { %13266 = vmatmul.mubr.msk.bf16.gmra.mrb[24].mxu0 %vm341_vm0, %v15633_v23 }
  0x4e   :  { %13270 = vmatmul.mubr.msk.bf16.gmra.mrb[24].mxu1 %vm341_vm0, %v15633_v23  ;;  %562 = vmatprep.mubr.bf16.mxu0 %v15883_v8  ;;  %v831_v23 = vld [vmem:[%s22233_s2 + $0x4e0] sm:$0xff] }
  0x4f   :  { %635 = vmatprep.mubr.bf16.mxu1 %v15883_v8  ;;  %v784_v8 = vld [vmem:[%s22233_s2 + $0x68] sm:$0xff]  ;;  %2324 = vmatpush1.bf16.msra.mxu0 %v13304_v11  ;;  %v13321_v25 = vcombine.high %v827_v22, %v831_v23  ;;  %v13320_v27 = vcombine.low %v827_v22, %v831_v23  ;;  %v13368_v11 = vcombine.low %v875_v5, %v879_v6  ;;  %v891_v22 = vld [vmem:[%s22233_s2 + $0xa80] sm:$0xff] }
  0x50   :  { %v13274_v43 = vcombine.low %v780_v40, %v784_v8  ;;  %v13275_v44 = vcombine.high %v780_v40, %v784_v8  ;;  %2325 = vmatprep.subr.bf16.mxu0 %v13313_v17  ;;  %v844_v40 = vld [vmem:[%s22233_s2 + $0x608] sm:$0xff]  ;;  %v13377_v17 = vcombine.high %v883_v14, %v887_v15  ;;  %v895_v23 = vld [vmem:[%s22233_s2 + $0xae0] sm:$0xff] }
  0x51   :  { %v848_v8 = vld [vmem:[%s22233_s2 + $0x668] sm:$0xff] }
  0x52   :  { %2401 = vmatprep.subr.bf16.mxu1 %v13275_v44  ;;  %v13339_v44 = vcombine.high %v844_v40, %v848_v8 }
  0x53   :  { %2402 = vmatpush1.bf16.msra.mxu1 %v13274_v43  ;;  %2326 = vmatpush1.bf16.msra.mxu0 %v13312_v19  ;;  %v13338_v43 = vcombine.low %v844_v40, %v848_v8  ;;  %v13376_v19 = vcombine.low %v883_v14, %v887_v15  ;;  %v16325_v40 = vld [vmem:[%s22233_s2 + $0xc08] sm:$0xff] }
  0x54   :  { %2403 = vmatprep.subr.bf16.mxu1 %v13283_v52  ;;  %2327 = vmatprep.subr.bf16.mxu0 %v13321_v25  ;;  %v13347_v52 = vcombine.high %v852_v47, %v856_v49  ;;  %v13385_v25 = vcombine.high %v891_v22, %v895_v23  ;;  %v16332_v8 = vld [vmem:[%s22233_s2 + $0xc68] sm:$0xff] }
  0x55   :  { %13267 = vmatmul.mubr.msk.bf16.gmra.mrb[28].mxu0 %vm341_vm0, %v15634_v35 }
  0x56   :  { %13271 = vmatmul.mubr.msk.bf16.gmra.mrb[28].mxu1 %vm341_vm0, %v15634_v35  ;;  %v13328_v35 = vcombine.low %v835_v30, %v839_v31  ;;  %v899_v30 = vld [vmem:[%s22233_s2 + $0xb40] sm:$0xff] }
  0x57   :  { %2404 = vmatpush1.bf16.msra.mxu1 %v13282_v51  ;;  %2328 = vmatpush1.bf16.msra.mxu0 %v13320_v27  ;;  %v13346_v51 = vcombine.low %v852_v47, %v856_v49  ;;  %v13384_v27 = vcombine.low %v891_v22, %v895_v23  ;;  %v903_v31 = vld [vmem:[%s22233_s2 + $0xba0] sm:$0xff] }
  0x58   :  { %2405 = vmatprep.subr.bf16.mxu1 %v13291_v60  ;;  %2329 = vmatprep.subr.bf16.mxu0 %v13329_v33  ;;  %v13355_v60 = vcombine.high %v860_v55, %v864_v57  ;;  %v13393_v33 = vcombine.high %v899_v30, %v903_v31 }
  0x5b   :  { %2406 = vmatpush1.bf16.msra.mxu1 %v13290_v59  ;;  %2330 = vmatpush1.bf16.msra.mxu0 %v13328_v35  ;;  %v13354_v59 = vcombine.low %v860_v55, %v864_v57  ;;  %v13392_v35 = vcombine.low %v899_v30, %v903_v31 }
  0x5c   :  { %2407 = vmatprep.subr.bf16.mxu1 %v13299_v4  ;;  %2331 = vmatprep.subr.bf16.mxu0 %v13337_v41  ;;  %v13363_v4 = vcombine.high %v868_v63, %v872_v1  ;;  %v13401_v41 = vcombine.high %v16315_v38, %v16320_v39 }
  0x5f   :  { %2408 = vmatpush1.bf16.msra.mxu1 %v13298_v3  ;;  %2332 = vmatpush1.bf16.msra.mxu0 %v13336_v42  ;;  %v13362_v3 = vcombine.low %v868_v63, %v872_v1  ;;  %v13400_v42 = vcombine.low %v16315_v38, %v16320_v39 }
  0x60   :  { %2409 = vmatprep.subr.bf16.mxu1 %v13307_v13  ;;  %2333 = vmatprep.subr.bf16.mxu0 %v13345_v48  ;;  %v13371_v13 = vcombine.high %v876_v7, %v880_v10 }
  0x63   :  { %2410 = vmatpush1.bf16.msra.mxu1 %v13306_v12  ;;  %2334 = vmatpush1.bf16.msra.mxu0 %v13344_v50  ;;  %v13370_v12 = vcombine.low %v876_v7, %v880_v10 }
  0x64   :  { %2411 = vmatprep.subr.bf16.mxu1 %v13315_v21  ;;  %2335 = vmatprep.subr.bf16.mxu0 %v13353_v56  ;;  %v13379_v21 = vcombine.high %v884_v16, %v888_v18 }
  0x67   :  { %2412 = vmatpush1.bf16.msra.mxu1 %v13314_v20  ;;  %2336 = vmatpush1.bf16.msra.mxu0 %v13352_v58  ;;  %v13378_v20 = vcombine.low %v884_v16, %v888_v18 }
  0x68   :  { %2413 = vmatprep.subr.bf16.mxu1 %v13323_v29  ;;  %2337 = vmatprep.subr.bf16.mxu0 %v13361_v0  ;;  %v13387_v29 = vcombine.high %v892_v24, %v896_v26 }
  0x6b   :  { %2414 = vmatpush1.bf16.msra.mxu1 %v13322_v28  ;;  %2338 = vmatpush1.bf16.msra.mxu0 %v13360_v2  ;;  %v13386_v28 = vcombine.low %v892_v24, %v896_v26 }
  0x6c   :  { %2415 = vmatprep.subr.bf16.mxu1 %v13331_v37  ;;  %2339 = vmatprep.subr.bf16.mxu0 %v13369_v9  ;;  %v13395_v37 = vcombine.high %v900_v32, %v904_v34 }
  0x6f   :  { %2416 = vmatpush1.bf16.msra.mxu1 %v13330_v36  ;;  %2340 = vmatpush1.bf16.msra.mxu0 %v13368_v11  ;;  %v13394_v36 = vcombine.low %v900_v32, %v904_v34 }
  0x70   :  { %2417 = vmatprep.subr.bf16.mxu1 %v13339_v44  ;;  %2341 = vmatprep.subr.bf16.mxu0 %v13377_v17  ;;  %v13403_v44 = vcombine.high %v16325_v40, %v16332_v8 }
  0x73   :  { %2418 = vmatpush1.bf16.msra.mxu1 %v13338_v43  ;;  %2342 = vmatpush1.bf16.msra.mxu0 %v13376_v19  ;;  %v13402_v43 = vcombine.low %v16325_v40, %v16332_v8 }
  0x74   :  { %2419 = vmatprep.subr.bf16.mxu1 %v13347_v52  ;;  %2343 = vmatprep.subr.bf16.mxu0 %v13385_v25 }
  0x77   :  { %2420 = vmatpush1.bf16.msra.mxu1 %v13346_v51  ;;  %2344 = vmatpush1.bf16.msra.mxu0 %v13384_v27 }
  0x78   :  { %2421 = vmatprep.subr.bf16.mxu1 %v13355_v60  ;;  %2345 = vmatprep.subr.bf16.mxu0 %v13393_v33 }
  0x7b   :  { %2422 = vmatpush1.bf16.msra.mxu1 %v13354_v59  ;;  %2346 = vmatpush1.bf16.msra.mxu0 %v13392_v35 }
  0x7c   :  { %2423 = vmatprep.subr.bf16.mxu1 %v13363_v4  ;;  %2358 = vmatprep.subr.bf16.mxu0 %v13401_v41 }
  0x7f   :  { %2424 = vmatpush1.bf16.msra.mxu1 %v13362_v3 }
  0x80   :  { %2425 = vmatprep.subr.bf16.mxu1 %v13371_v13 }
  0x83   :  { %2426 = vmatpush1.bf16.msra.mxu1 %v13370_v12 }
  0x84   :  { %2427 = vmatprep.subr.bf16.mxu1 %v13379_v21 }
  0x87   :  { %2428 = vmatpush1.bf16.msra.mxu1 %v13378_v20 }
  0x88   :  { %2429 = vmatprep.subr.bf16.mxu1 %v13387_v29 }
  0x8b   :  { %2430 = vmatpush1.bf16.msra.mxu1 %v13386_v28 }
  0x8c   :  { %2431 = vmatprep.subr.bf16.mxu1 %v13395_v37 }
  0x8f   :  { %2432 = vmatpush1.bf16.msra.mxu1 %v13394_v36 }
  0x90   :  { %2444 = vmatprep.subr.bf16.mxu1 %v13403_v44 }
  0x91   :  { %11 = vsyncpa [#allocation3], 0  ;;  %v931_v39 = vld [vmem:[%s22233_s2 + $0xe40] sm:$0xff]  ;;  %vm10815_vm1 = vcmask 1041409   ;;  %s15884_s19 = smov [#allocation2]  }
  0x92   :  { %s13196_s20 = sshll.u32 %s15884_s19, 4  ;;  %s13197_s20 = int_to_ptr.vmem [resolvable:$true] %s13196_s20 }
  0x93   :  { %s15859_s21 = scalar_lea.vmem %s13197_s20, 32  ;;  %p15864_p1 = scmp.lt.s32.totalorder %s13197_s20, %s13197_s20 }
  0x94   :  { %p15860_p0 = scmp.ne.s32.totalorder %s13197_s20, %s15859_s21  ;;  %p15865_p2 = scmp.lt.s32.totalorder %s15859_s21, %s15859_s21 }
  0x96   :  { %p15866_p3 = por %p15865_p2, %p15864_p1 }
  0x98   :  { %p15867_p4 = pnand %p15866_p3, %p15860_p0 }
  0xf0   :  { %v388_v45 = vpop.f32.mrb[0].mxu0  ;;  %v461_v47 = vpop.f32.mrb[0].mxu1 }
  0xf1   :  { %v390_v46 = vpop.f32.mrb[1].mxu0  ;;  %v16342_v49 = vpop.f32.mrb[1].mxu1 }
  0xf2   :  { %v16340_v48 = vpop.f32.mrb[2].mxu0  ;;  %v16346_v51 = vpop.f32.mrb[2].mxu1 }
  0xf3   :  { %v16344_v50 = vpop.f32.mrb[3].mxu0  ;;  %v16348_v52 = vpop.f32.mrb[3].mxu1 }
  0xf8   :  { %v398_v53 = vpop.f32.mrb[4].mxu0 }
  0xf9   :  { %v400_v54 = vpop.f32.mrb[5].mxu0  ;;  %v471_v55 = vpop.f32.mrb[4].mxu1 }
  0xfa   :  { %v402_v56 = vpop.f32.mrb[6].mxu0  ;;  %v473_v57 = vpop.f32.mrb[5].mxu1 }
  0xfb   :  { %v404_v58 = vpop.f32.mrb[7].mxu0  ;;  %v475_v59 = vpop.f32.mrb[6].mxu1 }
  0xfc   :  { %v477_v60 = vpop.f32.mrb[7].mxu1 }
 0x100   :  { %v16350_v61 = vpop.f32.mrb[8].mxu0 }
 0x101   :  { %v16352_v62 = vpop.f32.mrb[9].mxu0  ;;  %v16354_v63 = vpop.f32.mrb[8].mxu1 }
 0x102   :  { %v16356_v0 = vpop.f32.mrb[10].mxu0  ;;  %v16358_v1 = vpop.f32.mrb[9].mxu1 }
 0x103   :  { %v16360_v2 = vpop.f32.mrb[11].mxu0  ;;  %v16362_v3 = vpop.f32.mrb[10].mxu1 }
 0x104   :  { %v16364_v4 = vpop.f32.mrb[11].mxu1 }
 0x108   :  { %v16366_v5 = vpop.f32.mrb[12].mxu0 }
 0x109   :  { %v16368_v6 = vpop.f32.mrb[13].mxu0  ;;  %v16370_v7 = vpop.f32.mrb[12].mxu1 }
 0x10a   :  { %v16372_v9 = vpop.f32.mrb[14].mxu0  ;;  %v16374_v10 = vpop.f32.mrb[13].mxu1 }
 0x10b   :  { %v16376_v11 = vpop.f32.mrb[15].mxu0  ;;  %v16378_v12 = vpop.f32.mrb[14].mxu1 }
 0x10c   :  { %v16380_v13 = vpop.f32.mrb[15].mxu1 }
 0x110   :  { %v534_v14 = vpop.f32.mrb[16].mxu0 }
 0x111   :  { %v646_v15 = vmax.f32 %v388_v45, %v534_v14  ;;  %v536_v16 = vpop.f32.mrb[17].mxu0  ;;  %v607_v17 = vpop.f32.mrb[16].mxu1 }
 0x112   :  { %v647_v18 = vmax.f32 %v390_v46, %v536_v16  ;;  %v538_v19 = vpop.f32.mrb[18].mxu0  ;;  %v648_v20 = vmax.f32 %v461_v47, %v607_v17  ;;  %v609_v21 = vpop.f32.mrb[17].mxu1 }
 0x113   :  { %v650_v22 = vmax.f32 %v16340_v48, %v538_v19  ;;  %v540_v23 = vpop.f32.mrb[19].mxu0  ;;  %v649_v24 = vmax.f32 %v16342_v49, %v609_v21  ;;  %v611_v25 = vpop.f32.mrb[18].mxu1 }
 0x114   :  { %v651_v26 = vmax.f32 %v16344_v50, %v540_v23  ;;  %v652_v27 = vmax.f32 %v16346_v51, %v611_v25  ;;  %v613_v28 = vpop.f32.mrb[19].mxu1 }
 0x115   :  { %v653_v29 = vmax.f32 %v16348_v52, %v613_v28 }
 0x118   :  { %v544_v30 = vpop.f32.mrb[20].mxu0 }
 0x119   :  { %v662_v31 = vmax.f32 %v398_v53, %v544_v30  ;;  %v546_v32 = vpop.f32.mrb[21].mxu0  ;;  %v617_v33 = vpop.f32.mrb[20].mxu1 }
 0x11a   :  { %v663_v34 = vmax.f32 %v400_v54, %v546_v32  ;;  %v548_v35 = vpop.f32.mrb[22].mxu0  ;;  %v664_v36 = vmax.f32 %v471_v55, %v617_v33  ;;  %v619_v37 = vpop.f32.mrb[21].mxu1 }
 0x11b   :  { %v16387_v41 = vmax.f32 %v646_v15, %v662_v31  ;;  %v666_v44 = vmax.f32 %v402_v56, %v548_v35  ;;  %v550_v45 = vpop.f32.mrb[23].mxu0  ;;  %v665_v46 = vmax.f32 %v473_v57, %v619_v37  ;;  %v621_v47 = vpop.f32.mrb[22].mxu1 }
 0x11c   :  { %v16389_v48 = vmax.f32 %v647_v18, %v663_v34  ;;  %v667_v49 = vmax.f32 %v404_v58, %v550_v45  ;;  %v16391_v50 = vmax.f32 %v648_v20, %v664_v36  ;;  %v668_v51 = vmax.f32 %v475_v59, %v621_v47  ;;  %v623_v52 = vpop.f32.mrb[23].mxu1 }
 0x11d   :  { %v16393_v53 = vmax.f32 %v650_v22, %v666_v44  ;;  %v16395_v14 = vmax.f32 %v649_v24, %v665_v46  ;;  %v669_v54 = vmax.f32 %v477_v60, %v623_v52  ;;  %v694_v24 = vmax.f32 %v16387_v41, 0.0 }
 0x11e   :  { %v16397_v55 = vmax.f32 %v651_v26, %v667_v49  ;;  %v16399_v15 = vmax.f32 %v652_v27, %v668_v51  ;;  %v695_v25 = vmax.f32 %v16389_v48, 0.0 }
 0x11f   :  { %v16401_v56 = vmax.f32 %v653_v29, %v669_v54  ;;  %v16437_v29 = vld [vmem:[%s22233_s2 + $0xd28] sm:$0xff]  ;;  %v751_v32 = vrot.slane %v694_v24, 1 }
 0x120   :  { %v554_v57 = vpop.f32.mrb[24].mxu0  ;;  %v699_v30 = vmax.f32 %v16397_v55, 0.0  ;;  %v700_v31 = vmax.f32 %v16399_v15, 0.0  ;;  %v752_v33 = vrot.slane %v695_v25, 1 }
 0x121   :  { %v654_v16 = vmax.f32 %v16350_v61, %v554_v57  ;;  %v556_v17 = vpop.f32.mrb[25].mxu0  ;;  %v627_v58 = vpop.f32.mrb[24].mxu1 }
 0x122   :  { %v655_v18 = vmax.f32 %v16352_v62, %v556_v17  ;;  %v558_v59 = vpop.f32.mrb[26].mxu0  ;;  %v656_v19 = vmax.f32 %v16354_v63, %v627_v58  ;;  %v629_v20 = vpop.f32.mrb[25].mxu1  ;;  %v16417_v62 = vld [vmem:[%s22233_s2 + $0xcc0] sm:$0xff]  ;;  %v698_v63 = vmax.f32 %v16393_v53, 0.0  ;;  %v719_v48 = vrot.slane %v699_v30, 1 }
 0x123   :  { %v658_v21 = vmax.f32 %v16356_v0, %v558_v59  ;;  %v560_v60 = vpop.f32.mrb[27].mxu0  ;;  %v657_v22 = vmax.f32 %v16358_v1, %v629_v20  ;;  %v631_v23 = vpop.f32.mrb[26].mxu1  ;;  %v696_v0 = vmax.f32 %v16391_v50, 0.0  ;;  %v697_v1 = vmax.f32 %v16395_v14, 0.0 }
 0x124   :  { %v659_v61 = vmax.f32 %v16360_v2, %v560_v60  ;;  %v660_v26 = vmax.f32 %v16362_v3, %v631_v23  ;;  %v16412_v27 = vpop.f32.mrb[27].mxu1  ;;  %v16427_v2 = vld [vmem:[%s22233_s2 + $0xd20] sm:$0xff]  ;;  %v16432_v3 = vld [vmem:[%s22233_s2 + $0xcc8] sm:$0xff]  ;;  %v718_v37 = vrot.slane %v698_v63, 1  ;;  %v701_v50 = vmax.f32 %v16401_v56, 0.0 }
 0x125   :  { %v661_v28 = vmax.f32 %v16364_v4, %v16412_v27  ;;  %v13409_v35 = vcombine.high %v16417_v62, %v16427_v2  ;;  %v753_v41 = vrot.slane %v696_v0, 1  ;;  %v754_v44 = vrot.slane %v697_v1, 1  ;;  %v927_v4 = vld [vmem:[%s22233_s2 + $0xde0] sm:$0xff]  ;;  %v924_v27 = vld [vmem:[%s22233_s2 + $0xd88] sm:$0xff] }
 0x126   :  { %v720_v54 = vrot.slane %v700_v31, 1  ;;  %v721_v15 = vrot.slane %v701_v50, 1  ;;  %v22445_v38 = vcombine.high %v16432_v3, %v16437_v29 }
 0x128   :  { %v564_v34 = vpop.f32.mrb[28].mxu0 }
 0x129   :  { %v670_v45 = vmax.f32 %v16366_v5, %v564_v34  ;;  %v566_v46 = vpop.f32.mrb[29].mxu0  ;;  %v637_v47 = vpop.f32.mrb[28].mxu1 }
 0x12a   :  { %v671_v49 = vmax.f32 %v16368_v6, %v566_v46  ;;  %v568_v51 = vpop.f32.mrb[30].mxu0  ;;  %v672_v52 = vmax.f32 %v16370_v7, %v637_v47  ;;  %v639_v53 = vpop.f32.mrb[29].mxu1 }
 0x12b   :  { %v686_v14 = vmax.f32 %v654_v16, %v670_v45  ;;  %v674_v55 = vmax.f32 %v16372_v9, %v568_v51  ;;  %v570_v57 = vpop.f32.mrb[31].mxu0  ;;  %v673_v5 = vmax.f32 %v16374_v10, %v639_v53  ;;  %v641_v17 = vpop.f32.mrb[30].mxu1 }
 0x12c   :  { %v687_v58 = vmax.f32 %v655_v18, %v671_v49  ;;  %v675_v59 = vmax.f32 %v16376_v11, %v570_v57  ;;  %v688_v6 = vmax.f32 %v656_v19, %v672_v52  ;;  %v676_v20 = vmax.f32 %v16378_v12, %v641_v17  ;;  %v643_v60 = vpop.f32.mrb[31].mxu1  ;;  %v940_v17 = vld [vmem:[%s22233_s2 + $0xf08] sm:$0xff] }
 0x12d   :  { %v702_v23 = vmax.f32 %v686_v14, 0.0  ;;  %v690_v7 = vmax.f32 %v658_v21, %v674_v55  ;;  %v689_v34 = vmax.f32 %v657_v22, %v673_v5  ;;  %v677_v16 = vmax.f32 %v16380_v13, %v643_v60  ;;  %v943_v5 = vld [vmem:[%s22233_s2 + $0xf60] sm:$0xff] }
 0x12e   :  { %v703_v45 = vmax.f32 %v687_v58, 0.0  ;;  %v691_v46 = vmax.f32 %v659_v61, %v675_v59  ;;  %v704_v47 = vmax.f32 %v688_v6, 0.0  ;;  %v692_v9 = vmax.f32 %v660_v26, %v676_v20  ;;  %v944_v58 = vld [vmem:[%s22233_s2 + $0xf68] sm:$0xff] }
 0x12f   :  { %v755_v51 = vrot.slane %v702_v23, 1  ;;  %v16456_v36 = vpack.c.bf16 %v702_v23, %v694_v24  ;;  %v706_v10 = vmax.f32 %v690_v7, 0.0  ;;  %v705_v18 = vmax.f32 %v689_v34, 0.0  ;;  %v947_v23 = vld [vmem:[%s22233_s2 + $0xfc0] sm:$0xff]  ;;  %v948_v34 = vld [vmem:[%s22233_s2 + $0xfc8] sm:$0xff] }
 0x130   :  { %v756_v49 = vrot.slane %v703_v45, 1  ;;  %v16458_v11 = vpack.c.bf16 %v703_v45, %v695_v25  ;;  %v707_v19 = vmax.f32 %v691_v46, 0.0  ;;  %v757_v12 = vrot.slane %v704_v47, 1  ;;  %v951_v7 = vld [vmem:[%s22233_s2 + $0x1020] sm:$0xff] }
 0x131   :  { %v16460_v52 = vpack.c.bf16 %v755_v51, %v751_v32  ;;  %v722_v21 = vrot.slane %v706_v10, 1  ;;  %v16462_v22 = vpack.c.bf16 %v706_v10, %v698_v63  ;;  %v16464_v13 = vpack.c.bf16 %v704_v47, %v696_v0  ;;  %v923_v0 = vld [vmem:[%s22233_s2 + $0xd80] sm:$0xff] }
 0x132   :  { %v16466_v61 = vpack.c.bf16 %v756_v49, %v752_v33  ;;  %v723_v26 = vrot.slane %v707_v19, 1  ;;  %v16468_v53 = vpack.c.bf16 %v707_v19, %v699_v30  ;;  %v16470_v24 = vpack.c.bf16 %v757_v12, %v753_v41  ;;  %v955_v51 = vld [vmem:[%s22233_s2 + $0x1080] sm:$0xff]  ;;  %v960_v49 = vld [vmem:[%s22233_s2 + $0x10e8] sm:$0xff] }
 0x133   :  { %22442 = vst [vmem:[#allocation5_spill] sm:$0xff] %v16460_v52  ;;  %v16472_v14 = vpack.c.bf16 %v722_v21, %v718_v37  ;;  %v758_v25 = vrot.slane %v705_v18, 1  ;;  %v16474_v55 = vpack.c.bf16 %v705_v18, %v697_v1  ;;  %v708_v57 = vmax.f32 %v692_v9, 0.0  ;;  %v959_v10 = vld [vmem:[%s22233_s2 + $0x10e0] sm:$0xff]  ;;  %v956_v18 = vld [vmem:[%s22233_s2 + $0x1088] sm:$0xff] }
 0x134   :  { %22443 = vst [vmem:[#allocation6_spill] sm:$0xff] %v16470_v24  ;;  %v16476_v32 = vpack.c.bf16 %v723_v26, %v719_v48  ;;  %v693_v63 = vmax.f32 %v661_v28, %v677_v16  ;;  %2347 = vmatprep.mubr.bf16.mxu0 %v16468_v53  ;;  %2433 = vmatprep.mubr.bf16.mxu1 %v16468_v53  ;;  %v928_v28 = vld [vmem:[%s22233_s2 + $0xde8] sm:$0xff]  ;;  %v6655_v52 = vld [vmem:[%s22233_s2 + $0xa00] sm:$0xff] }
 0x135   :  { %v16486_v30 = vpack.c.bf16 %v758_v25, %v754_v44  ;;  %v724_v33 = vrot.slane %v708_v57, 1  ;;  %v16490_v1 = vpack.c.bf16 %v708_v57, %v700_v31  ;;  %2348 = vmatmul.mubr.bf16.vlgmr.msra.gmra.mrb[32].mxu0 %v16462_v22  ;;  %2434 = vmatmul.mubr.bf16.vlgmr.msra.gmra.mrb[32].mxu1 %v16462_v22  ;;  %v13408_v37 = vcombine.low %v16417_v62, %v16427_v2  ;;  %v935_v62 = vld [vmem:[%s22233_s2 + $0xea0] sm:$0xff]  ;;  %v932_v2 = vld [vmem:[%s22233_s2 + $0xe48] sm:$0xff] }
 0x136   :  { %v709_v31 = vmax.f32 %v693_v63, 0.0  ;;  %2359 = vmatpush1.bf16.msra.mxu0 %v13400_v42  ;;  %2445 = vmatpush1.bf16.msra.mxu1 %v13402_v43  ;;  %v13410_v41 = vcombine.low %v16432_v3, %v16437_v29  ;;  %v13417_v42 = vcombine.high %v923_v0, %v927_v4  ;;  %v13419_v43 = vcombine.high %v924_v27, %v928_v28  ;;  %v936_v3 = vld [vmem:[%s22233_s2 + $0xea8] sm:$0xff]  ;;  %v963_v25 = vld [vmem:[%s22233_s2 + $0x1140] sm:$0xff] }
 0x137   :  { %22444 = vst [vmem:[#allocation7_spill] sm:$0xff] %v16486_v30  ;;  %v16515_v44 = vpack.c.bf16 %v724_v33, %v720_v54  ;;  %2360 = vmatprep.subr.bf16.mxu0 %v13409_v35  ;;  %2446 = vmatprep.subr.bf16.mxu1 %v22445_v38  ;;  %v13416_v56 = vcombine.low %v923_v0, %v927_v4  ;;  %v939_v54 = vld [vmem:[%s22233_s2 + $0xf00] sm:$0xff]  ;;  %v952_v16 = vld [vmem:[%s22233_s2 + $0x1028] sm:$0xff] }
 0x138   :  { %v725_v40 = vrot.slane %v709_v31, 1  ;;  %v16528_v8 = vpack.c.bf16 %v709_v31, %v701_v50  ;;  %v13418_v35 = vcombine.low %v924_v27, %v928_v28  ;;  %v13425_v48 = vcombine.high %v931_v39, %v935_v62  ;;  %v967_v57 = vld [vmem:[%s22233_s2 + $0x11a0] sm:$0xff]  ;;  %v964_v63 = vld [vmem:[%s22233_s2 + $0x1148] sm:$0xff] }
 0x139   :  { %v13427_v50 = vcombine.high %v932_v2, %v936_v3  ;;  %v13424_v59 = vcombine.low %v931_v39, %v935_v62  ;;  %v13426_v6 = vcombine.low %v932_v2, %v936_v3  ;;  %v13433_v20 = vcombine.high %v939_v54, %v943_v5  ;;  %v968_v0 = vld [vmem:[%s22233_s2 + $0x11a8] sm:$0xff]  ;;  %v975_v31 = vld [vmem:[%s22233_s2 + $0x1260] sm:$0xff] }
 0x13a   :  { %v16539_v29 = vpack.c.bf16 %v725_v40, %v721_v15  ;;  %2361 = vmatpush1.bf16.msra.mxu0 %v13408_v37  ;;  %2447 = vmatpush1.bf16.msra.mxu1 %v13410_v41  ;;  %v13435_v60 = vcombine.high %v940_v17, %v944_v58  ;;  %v13432_v45 = vcombine.low %v939_v54, %v943_v5  ;;  %v971_v15 = vld [vmem:[%s22233_s2 + $0x1200] sm:$0xff]  ;;  %v972_v37 = vld [vmem:[%s22233_s2 + $0x1208] sm:$0xff] }
 0x13b   :  { %2390 = vmatprep.mubr.bf16.mxu0 %v16528_v8  ;;  %2476 = vmatprep.mubr.bf16.mxu1 %v16528_v8  ;;  %v13434_v46 = vcombine.low %v940_v17, %v944_v58  ;;  %v13441_v47 = vcombine.high %v947_v23, %v951_v7  ;;  %v13443_v9 = vcombine.high %v948_v34, %v952_v16  ;;  %v976_v41 = vld [vmem:[%s22233_s2 + $0x1268] sm:$0xff]  ;;  %v983_v62 = vld [vmem:[%s22233_s2 + $0x1320] sm:$0xff] }
 0x13c   :  { %2362 = vmatprep.subr.bf16.mxu0 %v13417_v42  ;;  %2448 = vmatprep.subr.bf16.mxu1 %v13419_v43  ;;  %v13440_v19 = vcombine.low %v947_v23, %v951_v7  ;;  %v13442_v12 = vcombine.low %v948_v34, %v952_v16  ;;  %v13449_v21 = vcombine.high %v955_v51, %v959_v10  ;;  %v979_v43 = vld [vmem:[%s22233_s2 + $0x12c0] sm:$0xff]  ;;  %v980_v2 = vld [vmem:[%s22233_s2 + $0x12c8] sm:$0xff] }
 0x13d   :  { %v13451_v26 = vcombine.high %v956_v18, %v960_v49  ;;  %v13448_v33 = vcombine.low %v955_v51, %v959_v10  ;;  %v13450_v4 = vcombine.low %v956_v18, %v960_v49  ;;  %v13457_v27 = vcombine.high %v963_v25, %v967_v57  ;;  %v984_v3 = vld [vmem:[%s22233_s2 + $0x1328] sm:$0xff]  ;;  %v987_v54 = vld [vmem:[%s22233_s2 + $0x1380] sm:$0xff] }
 0x13e   :  { %2363 = vmatpush1.bf16.msra.mxu0 %v13416_v56  ;;  %2449 = vmatpush1.bf16.msra.mxu1 %v13418_v35  ;;  %v13459_v28 = vcombine.high %v964_v63, %v968_v0  ;;  %v13456_v38 = vcombine.low %v963_v25, %v967_v57  ;;  %v13458_v39 = vcombine.low %v964_v63, %v968_v0  ;;  %v991_v5 = vld [vmem:[%s22233_s2 + $0x13e0] sm:$0xff]  ;;  %v988_v17 = vld [vmem:[%s22233_s2 + $0x1388] sm:$0xff] }
 0x13f   :  { %2364 = vmatprep.subr.bf16.mxu0 %v13425_v48  ;;  %2450 = vmatprep.subr.bf16.mxu1 %v13427_v50  ;;  %v13465_v40 = vcombine.high %v971_v15, %v975_v31  ;;  %v13467_v42 = vcombine.high %v972_v37, %v976_v41  ;;  %v13464_v56 = vcombine.low %v971_v15, %v975_v31  ;;  %v992_v58 = vld [vmem:[%s22233_s2 + $0x13e8] sm:$0xff]  ;;  %v995_v23 = vld [vmem:[%s22233_s2 + $0x1440] sm:$0xff] }
 0x140   :  { %v13466_v35 = vcombine.low %v972_v37, %v976_v41  ;;  %v13473_v48 = vcombine.high %v979_v43, %v983_v62  ;;  %v13475_v50 = vcombine.high %v980_v2, %v984_v3  ;;  %v999_v7 = vld [vmem:[%s22233_s2 + $0x14a0] sm:$0xff]  ;;  %v996_v34 = vld [vmem:[%s22233_s2 + $0x1448] sm:$0xff] }
 0x141   :  { %v1000_v16 = vld [vmem:[%s22233_s2 + $0x14a8] sm:$0xff]  ;;  %v1003_v51 = vld [vmem:[%s22233_s2 + $0x1500] sm:$0xff] }
 0x142   :  { %2365 = vmatpush1.bf16.msra.mxu0 %v13424_v59  ;;  %2451 = vmatpush1.bf16.msra.mxu1 %v13426_v6  ;;  %v13472_v59 = vcombine.low %v979_v43, %v983_v62  ;;  %v13474_v6 = vcombine.low %v980_v2, %v984_v3  ;;  %v1007_v10 = vld [vmem:[%s22233_s2 + $0x1560] sm:$0xff]  ;;  %v1004_v18 = vld [vmem:[%s22233_s2 + $0x1508] sm:$0xff] }
 0x143   :  { %2366 = vmatprep.subr.bf16.mxu0 %v13433_v20  ;;  %2452 = vmatprep.subr.bf16.mxu1 %v13435_v60  ;;  %v13481_v20 = vcombine.high %v987_v54, %v991_v5  ;;  %v13483_v60 = vcombine.high %v988_v17, %v992_v58  ;;  %v1008_v49 = vld [vmem:[%s22233_s2 + $0x1568] sm:$0xff]  ;;  %v1011_v25 = vld [vmem:[%s22233_s2 + $0x15c0] sm:$0xff] }
 0x144   :  { %v1015_v57 = vld [vmem:[%s22233_s2 + $0x1620] sm:$0xff]  ;;  %v1012_v63 = vld [vmem:[%s22233_s2 + $0x15c8] sm:$0xff] }
 0x145   :  { %v1016_v0 = vld [vmem:[%s22233_s2 + $0x1628] sm:$0xff]  ;;  %v1019_v15 = vld [vmem:[%s22233_s2 + $0x1680] sm:$0xff] }
 0x146   :  { %2367 = vmatpush1.bf16.msra.mxu0 %v13432_v45  ;;  %2453 = vmatpush1.bf16.msra.mxu1 %v13434_v46  ;;  %v13480_v45 = vcombine.low %v987_v54, %v991_v5  ;;  %v13482_v46 = vcombine.low %v988_v17, %v992_v58  ;;  %v1023_v31 = vld [vmem:[%s22233_s2 + $0x16e0] sm:$0xff]  ;;  %v1020_v37 = vld [vmem:[%s22233_s2 + $0x1688] sm:$0xff]  ;;  %v781_v54 = vld [vmem:[%s22233_s2 + $0x10] sm:$0xff] }
 0x147   :  { %2368 = vmatprep.subr.bf16.mxu0 %v13441_v47  ;;  %2454 = vmatprep.subr.bf16.mxu1 %v13443_v9  ;;  %v13489_v47 = vcombine.high %v995_v23, %v999_v7  ;;  %v13491_v9 = vcombine.high %v996_v34, %v1000_v16  ;;  %v1024_v41 = vld [vmem:[%s22233_s2 + $0x16e8] sm:$0xff]  ;;  %v1027_v43 = vld [vmem:[%s22233_s2 + $0x1740] sm:$0xff]  ;;  %v785_v5 = vld [vmem:[%s22233_s2 + $0x70] sm:$0xff] }
 0x148   :  { %v1031_v62 = vld [vmem:[%s22233_s2 + $0x17a0] sm:$0xff]  ;;  %v1028_v2 = vld [vmem:[%s22233_s2 + $0x1748] sm:$0xff]  ;;  %v782_v17 = vld [vmem:[%s22233_s2 + $0x18] sm:$0xff] }
 0x149   :  { %v1032_v3 = vld [vmem:[%s22233_s2 + $0x17a8] sm:$0xff]  ;;  %v786_v58 = vld [vmem:[%s22233_s2 + $0x78] sm:$0xff] }
 0x14a   :  { %2369 = vmatpush1.bf16.msra.mxu0 %v13440_v19  ;;  %2455 = vmatpush1.bf16.msra.mxu1 %v13442_v12  ;;  %v13488_v19 = vcombine.low %v995_v23, %v999_v7  ;;  %v13490_v12 = vcombine.low %v996_v34, %v1000_v16  ;;  %v789_v23 = vld [vmem:[%s22233_s2 + $0xd0] sm:$0xff]  ;;  %v790_v34 = vld [vmem:[%s22233_s2 + $0xd8] sm:$0xff] }
 0x14b   :  { %2370 = vmatprep.subr.bf16.mxu0 %v13449_v21  ;;  %2456 = vmatprep.subr.bf16.mxu1 %v13451_v26  ;;  %v13497_v21 = vcombine.high %v1003_v51, %v1007_v10  ;;  %v13499_v26 = vcombine.high %v1004_v18, %v1008_v49  ;;  %v793_v7 = vld [vmem:[%s22233_s2 + $0x130] sm:$0xff]  ;;  %v794_v16 = vld [vmem:[%s22233_s2 + $0x138] sm:$0xff] }
 0x14e   :  { %2371 = vmatpush1.bf16.msra.mxu0 %v13448_v33  ;;  %2457 = vmatpush1.bf16.msra.mxu1 %v13450_v4  ;;  %v13496_v33 = vcombine.low %v1003_v51, %v1007_v10  ;;  %v13498_v4 = vcombine.low %v1004_v18, %v1008_v49  ;;  %v797_v51 = vld [vmem:[%s22233_s2 + $0x190] sm:$0xff]  ;;  %v798_v18 = vld [vmem:[%s22233_s2 + $0x198] sm:$0xff] }
 0x14f   :  { %2372 = vmatprep.subr.bf16.mxu0 %v13457_v27  ;;  %2458 = vmatprep.subr.bf16.mxu1 %v13459_v28  ;;  %v13505_v27 = vcombine.high %v1011_v25, %v1015_v57  ;;  %v13507_v28 = vcombine.high %v1012_v63, %v1016_v0  ;;  %v801_v10 = vld [vmem:[%s22233_s2 + $0x1f0] sm:$0xff]  ;;  %v802_v49 = vld [vmem:[%s22233_s2 + $0x1f8] sm:$0xff] }
 0x152   :  { %2373 = vmatpush1.bf16.msra.mxu0 %v13456_v38  ;;  %2459 = vmatpush1.bf16.msra.mxu1 %v13458_v39  ;;  %v13504_v38 = vcombine.low %v1011_v25, %v1015_v57  ;;  %v13506_v39 = vcombine.low %v1012_v63, %v1016_v0  ;;  %v805_v25 = vld [vmem:[%s22233_s2 + $0x250] sm:$0xff]  ;;  %v806_v63 = vld [vmem:[%s22233_s2 + $0x258] sm:$0xff]  ;;  %v13292_v0 = vcombine.low %v797_v51, %v801_v10 }
 0x153   :  { %2374 = vmatprep.subr.bf16.mxu0 %v13465_v40  ;;  %2460 = vmatprep.subr.bf16.mxu1 %v13467_v42  ;;  %v13513_v40 = vcombine.high %v1019_v15, %v1023_v31  ;;  %v13515_v42 = vcombine.high %v1020_v37, %v1024_v41  ;;  %v809_v57 = vld [vmem:[%s22233_s2 + $0x2b0] sm:$0xff] }
 0x156   :  { %2375 = vmatpush1.bf16.msra.mxu0 %v13464_v56  ;;  %2461 = vmatpush1.bf16.msra.mxu1 %v13466_v35  ;;  %v13512_v56 = vcombine.low %v1019_v15, %v1023_v31  ;;  %v13514_v35 = vcombine.low %v1020_v37, %v1024_v41  ;;  %v817_v15 = vld [vmem:[%s22233_s2 + $0x370] sm:$0xff]  ;;  %v814_v31 = vld [vmem:[%s22233_s2 + $0x318] sm:$0xff]  ;;  %v13300_v41 = vcombine.low %v805_v25, %v809_v57 }
 0x157   :  { %2376 = vmatprep.subr.bf16.mxu0 %v13473_v48  ;;  %2462 = vmatprep.subr.bf16.mxu1 %v13475_v50  ;;  %v13521_v48 = vcombine.high %v1027_v43, %v1031_v62  ;;  %v13523_v50 = vcombine.high %v1028_v2, %v1032_v3  ;;  %v818_v37 = vld [vmem:[%s22233_s2 + $0x378] sm:$0xff] }
 0x15a   :  { %2377 = vmatpush1.bf16.msra.mxu0 %v13472_v59  ;;  %2463 = vmatpush1.bf16.msra.mxu1 %v13474_v6  ;;  %v13520_v59 = vcombine.low %v1027_v43, %v1031_v62  ;;  %v13522_v6 = vcombine.low %v1028_v2, %v1032_v3  ;;  %v825_v43 = vld [vmem:[%s22233_s2 + $0x430] sm:$0xff]  ;;  %v822_v62 = vld [vmem:[%s22233_s2 + $0x3d8] sm:$0xff] }
 0x15b   :  { %2378 = vmatprep.subr.bf16.mxu0 %v13481_v20  ;;  %2464 = vmatprep.subr.bf16.mxu1 %v13483_v60  ;;  %v13277_v20 = vcombine.high %v781_v54, %v785_v5  ;;  %v13279_v60 = vcombine.high %v782_v17, %v786_v58  ;;  %v826_v2 = vld [vmem:[%s22233_s2 + $0x438] sm:$0xff] }
 0x15e   :  { %2379 = vmatpush1.bf16.msra.mxu0 %v13480_v45  ;;  %2465 = vmatpush1.bf16.msra.mxu1 %v13482_v46  ;;  %v13276_v45 = vcombine.low %v781_v54, %v785_v5  ;;  %v13278_v46 = vcombine.low %v782_v17, %v786_v58  ;;  %v833_v54 = vld [vmem:[%s22233_s2 + $0x4f0] sm:$0xff]  ;;  %v830_v5 = vld [vmem:[%s22233_s2 + $0x498] sm:$0xff] }
 0x15f   :  { %2380 = vmatprep.subr.bf16.mxu0 %v13489_v47  ;;  %2466 = vmatprep.subr.bf16.mxu1 %v13491_v9  ;;  %v13285_v47 = vcombine.high %v789_v23, %v793_v7  ;;  %v13287_v9 = vcombine.high %v790_v34, %v794_v16  ;;  %v834_v17 = vld [vmem:[%s22233_s2 + $0x4f8] sm:$0xff] }
 0x162   :  { %2381 = vmatpush1.bf16.msra.mxu0 %v13488_v19  ;;  %2467 = vmatpush1.bf16.msra.mxu1 %v13490_v12  ;;  %v13284_v19 = vcombine.low %v789_v23, %v793_v7  ;;  %v13286_v12 = vcombine.low %v790_v34, %v794_v16  ;;  %v841_v23 = vld [vmem:[%s22233_s2 + $0x5b0] sm:$0xff]  ;;  %v838_v7 = vld [vmem:[%s22233_s2 + $0x558] sm:$0xff] }
 0x163   :  { %2382 = vmatprep.subr.bf16.mxu0 %v13497_v21  ;;  %2468 = vmatprep.subr.bf16.mxu1 %v13499_v26  ;;  %v13293_v21 = vcombine.high %v797_v51, %v801_v10  ;;  %v13295_v26 = vcombine.high %v798_v18, %v802_v49  ;;  %v842_v34 = vld [vmem:[%s22233_s2 + $0x5b8] sm:$0xff]  ;;  %v849_v51 = vld [vmem:[%s22233_s2 + $0x670] sm:$0xff] }
 0x164   :  { %v846_v10 = vld [vmem:[%s22233_s2 + $0x618] sm:$0xff] }
 0x166   :  { %2383 = vmatpush1.bf16.msra.mxu0 %v13496_v33  ;;  %2469 = vmatpush1.bf16.msra.mxu1 %v13498_v4  ;;  %v13294_v33 = vcombine.low %v798_v18, %v802_v49  ;;  %v13301_v4 = vcombine.high %v805_v25, %v809_v57  ;;  %v850_v18 = vld [vmem:[%s22233_s2 + $0x678] sm:$0xff]  ;;  %v857_v25 = vld [vmem:[%s22233_s2 + $0x730] sm:$0xff] }
 0x167   :  { %2384 = vmatprep.subr.bf16.mxu0 %v13505_v27  ;;  %2470 = vmatprep.subr.bf16.mxu1 %v13507_v28  ;;  %v813_v28 = vld [vmem:[%s22233_s2 + $0x310] sm:$0xff]  ;;  %v854_v57 = vld [vmem:[%s22233_s2 + $0x6d8] sm:$0xff] }
 0x168   :  { %v13308_v3 = vcombine.low %v813_v28, %v817_v15 }
 0x16a   :  { %2385 = vmatpush1.bf16.msra.mxu0 %v13504_v38  ;;  %2471 = vmatpush1.bf16.msra.mxu1 %v13506_v39  ;;  %v13309_v39 = vcombine.high %v813_v28, %v817_v15  ;;  %v865_v28 = vld [vmem:[%s22233_s2 + $0x7f0] sm:$0xff]  ;;  %v862_v15 = vld [vmem:[%s22233_s2 + $0x798] sm:$0xff] }
 0x16b   :  { %2386 = vmatprep.subr.bf16.mxu0 %v13513_v40  ;;  %2472 = vmatprep.subr.bf16.mxu1 %v13515_v42  ;;  %v13311_v40 = vcombine.high %v814_v31, %v818_v37  ;;  %v821_v42 = vld [vmem:[%s22233_s2 + $0x3d0] sm:$0xff] }
 0x16c   :  { %v13316_v58 = vcombine.low %v821_v42, %v825_v43 }
 0x16e   :  { %2387 = vmatpush1.bf16.msra.mxu0 %v13512_v56  ;;  %2473 = vmatpush1.bf16.msra.mxu1 %v13514_v35  ;;  %v13310_v56 = vcombine.low %v814_v31, %v818_v37  ;;  %v13317_v35 = vcombine.high %v821_v42, %v825_v43  ;;  %v866_v31 = vld [vmem:[%s22233_s2 + $0x7f8] sm:$0xff]  ;;  %v873_v42 = vld [vmem:[%s22233_s2 + $0x8b0] sm:$0xff] }
 0x16f   :  { %2388 = vmatprep.subr.bf16.mxu0 %v13521_v48  ;;  %2474 = vmatprep.subr.bf16.mxu1 %v13523_v50  ;;  %v13319_v48 = vcombine.high %v822_v62, %v826_v2  ;;  %v829_v50 = vld [vmem:[%s22233_s2 + $0x490] sm:$0xff]  ;;  %v870_v43 = vld [vmem:[%s22233_s2 + $0x858] sm:$0xff] }
 0x170   :  { %v13324_v16 = vcombine.low %v829_v50, %v833_v54 }
 0x172   :  { %2389 = vmatpush1.bf16.msra.mxu0 %v13520_v59  ;;  %2475 = vmatpush1.bf16.msra.mxu1 %v13522_v6  ;;  %v13318_v59 = vcombine.low %v822_v62, %v826_v2  ;;  %v13325_v6 = vcombine.high %v829_v50, %v833_v54  ;;  %v874_v62 = vld [vmem:[%s22233_s2 + $0x8b8] sm:$0xff]  ;;  %v881_v50 = vld [vmem:[%s22233_s2 + $0x970] sm:$0xff] }
 0x173   :  { %2487 = vmatprep.subr.bf16.mxu0 %v13277_v20  ;;  %2573 = vmatprep.subr.bf16.mxu1 %v13279_v60  ;;  %v13327_v20 = vcombine.high %v830_v5, %v834_v17  ;;  %v837_v60 = vld [vmem:[%s22233_s2 + $0x550] sm:$0xff]  ;;  %v878_v54 = vld [vmem:[%s22233_s2 + $0x918] sm:$0xff] }
 0x174   :  { %v13332_v49 = vcombine.low %v837_v60, %v841_v23 }
 0x175   :  { %2391 = vmatmul.mubr.bf16.vlgmr.msra.gmra.mrb[32].mxu0 %v16490_v1  ;;  %2477 = vmatmul.mubr.bf16.vlgmr.msra.gmra.mrb[32].mxu1 %v16490_v1 }
 0x176   :  { %2488 = vmatpush1.bf16.msra.mxu0 %v13276_v45  ;;  %2519 = vmatprep.mubr.bf16.mxu0 %v16468_v53  ;;  %v13326_v45 = vcombine.low %v830_v5, %v834_v17  ;;  %v882_v5 = vld [vmem:[%s22233_s2 + $0x978] sm:$0xff] }
 0x177   :  { %2574 = vmatpush1.bf16.msra.mxu1 %v13278_v46  ;;  %2605 = vmatprep.mubr.bf16.mxu1 %v16468_v53  ;;  %v810_v53 = vld [vmem:[%s22233_s2 + $0x2b8] sm:$0xff]  ;;  %v13333_v46 = vcombine.high %v837_v60, %v841_v23  ;;  %v889_v60 = vld [vmem:[%s22233_s2 + $0xa30] sm:$0xff] }
 0x178   :  { %2489 = vmatprep.subr.bf16.mxu0 %v13285_v47  ;;  %2575 = vmatprep.subr.bf16.mxu1 %v13287_v9  ;;  %v13303_v27 = vcombine.high %v806_v63, %v810_v53  ;;  %v13302_v38 = vcombine.low %v806_v63, %v810_v53  ;;  %v13335_v47 = vcombine.high %v838_v7, %v842_v34  ;;  %v845_v9 = vld [vmem:[%s22233_s2 + $0x610] sm:$0xff]  ;;  %v858_v63 = vld [vmem:[%s22233_s2 + $0x738] sm:$0xff] }
 0x179   :  { %v13340_v53 = vcombine.low %v845_v9, %v849_v51  ;;  %v886_v23 = vld [vmem:[%s22233_s2 + $0x9d8] sm:$0xff] }
 0x17a   :  { %2490 = vmatpush1.bf16.msra.mxu0 %v13284_v19  ;;  %v13334_v19 = vcombine.low %v838_v7, %v842_v34  ;;  %v890_v7 = vld [vmem:[%s22233_s2 + $0xa38] sm:$0xff] }
 0x17b   :  { %2576 = vmatpush1.bf16.msra.mxu1 %v13286_v12  ;;  %2491 = vmatprep.subr.bf16.mxu0 %v13293_v21  ;;  %v13341_v12 = vcombine.high %v845_v9, %v849_v51  ;;  %v13343_v21 = vcombine.high %v846_v10, %v850_v18  ;;  %v897_v9 = vld [vmem:[%s22233_s2 + $0xaf0] sm:$0xff]  ;;  %v894_v51 = vld [vmem:[%s22233_s2 + $0xa98] sm:$0xff] }
 0x17c   :  { %2577 = vmatprep.subr.bf16.mxu1 %v13295_v26  ;;  %v853_v26 = vld [vmem:[%s22233_s2 + $0x6d0] sm:$0xff] }
 0x17d   :  { %v13348_v37 = vcombine.low %v853_v26, %v857_v25 }
 0x17e   :  { %2492 = vmatpush1.bf16.msra.mxu0 %v13292_v0  ;;  %v13342_v0 = vcombine.low %v846_v10, %v850_v18  ;;  %v898_v10 = vld [vmem:[%s22233_s2 + $0xaf8] sm:$0xff] }
 0x17f   :  { %2578 = vmatpush1.bf16.msra.mxu1 %v13294_v33  ;;  %2493 = vmatprep.subr.bf16.mxu0 %v13301_v4  ;;  %v13349_v33 = vcombine.high %v853_v26, %v857_v25  ;;  %v13351_v4 = vcombine.high %v854_v57, %v858_v63  ;;  %v905_v26 = vld [vmem:[%s22233_s2 + $0xbb0] sm:$0xff]  ;;  %v902_v25 = vld [vmem:[%s22233_s2 + $0xb58] sm:$0xff] }
 0x180   :  { %2579 = vmatprep.subr.bf16.mxu1 %v13303_v27  ;;  %v861_v27 = vld [vmem:[%s22233_s2 + $0x790] sm:$0xff] }
 0x181   :  { %v13356_v2 = vcombine.low %v861_v27, %v865_v28 }
 0x182   :  { %2494 = vmatpush1.bf16.msra.mxu0 %v13300_v41  ;;  %v13350_v41 = vcombine.low %v854_v57, %v858_v63  ;;  %v906_v57 = vld [vmem:[%s22233_s2 + $0xbb8] sm:$0xff] }
 0x183   :  { %2580 = vmatpush1.bf16.msra.mxu1 %v13302_v38  ;;  %2495 = vmatprep.subr.bf16.mxu0 %v13309_v39  ;;  %v13357_v38 = vcombine.high %v861_v27, %v865_v28  ;;  %v13359_v39 = vcombine.high %v862_v15, %v866_v31  ;;  %v913_v27 = vld [vmem:[%s22233_s2 + $0xc70] sm:$0xff]  ;;  %v910_v28 = vld [vmem:[%s22233_s2 + $0xc18] sm:$0xff] }
 0x184   :  { %2581 = vmatprep.subr.bf16.mxu1 %v13311_v40  ;;  %v869_v40 = vld [vmem:[%s22233_s2 + $0x850] sm:$0xff] }
 0x185   :  { %v13364_v17 = vcombine.low %v869_v40, %v873_v42 }
 0x186   :  { %2496 = vmatpush1.bf16.msra.mxu0 %v13308_v3  ;;  %v13358_v3 = vcombine.low %v862_v15, %v866_v31  ;;  %v914_v15 = vld [vmem:[%s22233_s2 + $0xc78] sm:$0xff] }
 0x187   :  { %2582 = vmatpush1.bf16.msra.mxu1 %v13310_v56  ;;  %2497 = vmatprep.subr.bf16.mxu0 %v13317_v35  ;;  %v13365_v56 = vcombine.high %v869_v40, %v873_v42  ;;  %v13367_v35 = vcombine.high %v870_v43, %v874_v62  ;;  %v921_v40 = vld [vmem:[%s22233_s2 + $0xd30] sm:$0xff] }
 0x188   :  { %2583 = vmatprep.subr.bf16.mxu1 %v13319_v48  ;;  %v877_v48 = vld [vmem:[%s22233_s2 + $0x910] sm:$0xff] }
 0x189   :  { %v13372_v34 = vcombine.low %v877_v48, %v881_v50 }
 0x18a   :  { %2498 = vmatpush1.bf16.msra.mxu0 %v13316_v58  ;;  %v13366_v58 = vcombine.low %v870_v43, %v874_v62  ;;  %v918_v43 = vld [vmem:[%s22233_s2 + $0xcd8] sm:$0xff] }
 0x18b   :  { %2584 = vmatpush1.bf16.msra.mxu1 %v13318_v59  ;;  %2499 = vmatprep.subr.bf16.mxu0 %v13325_v6  ;;  %v13373_v59 = vcombine.high %v877_v48, %v881_v50  ;;  %v13375_v6 = vcombine.high %v878_v54, %v882_v5  ;;  %v922_v62 = vld [vmem:[%s22233_s2 + $0xd38] sm:$0xff] }
 0x18c   :  { %2585 = vmatprep.subr.bf16.mxu1 %v13327_v20  ;;  %v885_v20 = vld [vmem:[%s22233_s2 + $0x9d0] sm:$0xff]  ;;  %v13415_v48 = vcombine.high %v918_v43, %v922_v62  ;;  %v926_v50 = vld [vmem:[%s22233_s2 + $0xd98] sm:$0xff] }
 0x18d   :  { %v13380_v18 = vcombine.low %v885_v20, %v889_v60 }
 0x18e   :  { %2500 = vmatpush1.bf16.msra.mxu0 %v13324_v16  ;;  %v13374_v16 = vcombine.low %v878_v54, %v882_v5  ;;  %v930_v54 = vld [vmem:[%s22233_s2 + $0xdf8] sm:$0xff] }
 0x18f   :  { %2586 = vmatpush1.bf16.msra.mxu1 %v13326_v45  ;;  %2501 = vmatprep.subr.bf16.mxu0 %v13333_v46  ;;  %v13381_v45 = vcombine.high %v885_v20, %v889_v60  ;;  %v13383_v46 = vcombine.high %v886_v23, %v890_v7  ;;  %v937_v20 = vld [vmem:[%s22233_s2 + $0xeb0] sm:$0xff]  ;;  %v938_v60 = vld [vmem:[%s22233_s2 + $0xeb8] sm:$0xff] }
 0x190   :  { %2587 = vmatprep.subr.bf16.mxu1 %v13335_v47  ;;  %v893_v47 = vld [vmem:[%s22233_s2 + $0xa90] sm:$0xff] }
 0x191   :  { %v13388_v63 = vcombine.low %v893_v47, %v897_v9 }
 0x192   :  { %2502 = vmatpush1.bf16.msra.mxu0 %v13332_v49  ;;  %v13382_v49 = vcombine.low %v886_v23, %v890_v7  ;;  %v13422_v23 = vcombine.low %v926_v50, %v930_v54 }
 0x193   :  { %2588 = vmatpush1.bf16.msra.mxu1 %v13334_v19  ;;  %2503 = vmatprep.subr.bf16.mxu0 %v13341_v12  ;;  %v13389_v19 = vcombine.high %v893_v47, %v897_v9  ;;  %v13391_v12 = vcombine.high %v894_v51, %v898_v10  ;;  %v946_v47 = vld [vmem:[%s22233_s2 + $0xf78] sm:$0xff] }
 0x194   :  { %2589 = vmatprep.subr.bf16.mxu1 %v13343_v21  ;;  %v901_v21 = vld [vmem:[%s22233_s2 + $0xb50] sm:$0xff] }
 0x195   :  { %v13396_v31 = vcombine.low %v901_v21, %v905_v26 }
 0x196   :  { %2504 = vmatpush1.bf16.msra.mxu0 %v13340_v53  ;;  %v13390_v53 = vcombine.low %v894_v51, %v898_v10 }
 0x197   :  { %2590 = vmatpush1.bf16.msra.mxu1 %v13342_v0  ;;  %2505 = vmatprep.subr.bf16.mxu0 %v13349_v33  ;;  %v13397_v0 = vcombine.high %v901_v21, %v905_v26  ;;  %v13399_v33 = vcombine.high %v902_v25, %v906_v57  ;;  %v954_v21 = vld [vmem:[%s22233_s2 + $0x1038] sm:$0xff] }
 0x198   :  { %2591 = vmatprep.subr.bf16.mxu1 %v13351_v4  ;;  %v909_v4 = vld [vmem:[%s22233_s2 + $0xc10] sm:$0xff] }
 0x199   :  { %v13404_v42 = vcombine.low %v909_v4, %v913_v27 }
 0x19a   :  { %2506 = vmatpush1.bf16.msra.mxu0 %v13348_v37  ;;  %v13398_v37 = vcombine.low %v902_v25, %v906_v57 }
 0x19b   :  { %2592 = vmatpush1.bf16.msra.mxu1 %v13350_v41  ;;  %2507 = vmatprep.subr.bf16.mxu0 %v13357_v38  ;;  %v13405_v41 = vcombine.high %v909_v4, %v913_v27  ;;  %v13407_v38 = vcombine.high %v910_v28, %v914_v15  ;;  %v962_v4 = vld [vmem:[%s22233_s2 + $0x10f8] sm:$0xff] }
 0x19c   :  { %2593 = vmatprep.subr.bf16.mxu1 %v13359_v39  ;;  %v917_v39 = vld [vmem:[%s22233_s2 + $0xcd0] sm:$0xff] }
 0x19d   :  { %v13412_v5 = vcombine.low %v917_v39, %v921_v40 }
 0x19e   :  { %2508 = vmatpush1.bf16.msra.mxu0 %v13356_v2  ;;  %v13406_v2 = vcombine.low %v910_v28, %v914_v15 }
 0x19f   :  { %2594 = vmatpush1.bf16.msra.mxu1 %v13358_v3  ;;  %2509 = vmatprep.subr.bf16.mxu0 %v13365_v56  ;;  %v13413_v3 = vcombine.high %v917_v39, %v921_v40  ;;  %v925_v56 = vld [vmem:[%s22233_s2 + $0xd90] sm:$0xff]  ;;  %v970_v39 = vld [vmem:[%s22233_s2 + $0x11b8] sm:$0xff] }
 0x1a0   :  { %2595 = vmatprep.subr.bf16.mxu1 %v13367_v35  ;;  %v929_v35 = vld [vmem:[%s22233_s2 + $0xdf0] sm:$0xff] }
 0x1a2   :  { %2510 = vmatpush1.bf16.msra.mxu0 %v13364_v17  ;;  %v13414_v17 = vcombine.low %v918_v43, %v922_v62 }
 0x1a3   :  { %2596 = vmatpush1.bf16.msra.mxu1 %v13366_v58  ;;  %2511 = vmatprep.subr.bf16.mxu0 %v13373_v59  ;;  %v13421_v58 = vcombine.high %v925_v56, %v929_v35  ;;  %v13423_v59 = vcombine.high %v926_v50, %v930_v54 }
 0x1a4   :  { %2597 = vmatprep.subr.bf16.mxu1 %v13375_v6  ;;  %v933_v6 = vld [vmem:[%s22233_s2 + $0xe50] sm:$0xff] }
 0x1a5   :  { %v13429_v7 = vcombine.high %v933_v6, %v937_v20  ;;  %v13428_v9 = vcombine.low %v933_v6, %v937_v20  ;;  %v986_v6 = vld [vmem:[%s22233_s2 + $0x1338] sm:$0xff] }
 0x1a6   :  { %2512 = vmatpush1.bf16.msra.mxu0 %v13372_v34 }
 0x1a7   :  { %2598 = vmatpush1.bf16.msra.mxu1 %v13374_v16  ;;  %2513 = vmatprep.subr.bf16.mxu0 %v13381_v45  ;;  %v941_v16 = vld [vmem:[%s22233_s2 + $0xf10] sm:$0xff] }
 0x1a8   :  { %2599 = vmatprep.subr.bf16.mxu1 %v13383_v46  ;;  %v945_v45 = vld [vmem:[%s22233_s2 + $0xf70] sm:$0xff]  ;;  %v942_v46 = vld [vmem:[%s22233_s2 + $0xf18] sm:$0xff] }
 0x1a9   :  { %v13437_v10 = vcombine.high %v941_v16, %v945_v45  ;;  %v13436_v26 = vcombine.low %v941_v16, %v945_v45  ;;  %v13438_v25 = vcombine.low %v942_v46, %v946_v47  ;;  %v994_v16 = vld [vmem:[%s22233_s2 + $0x13f8] sm:$0xff] }
 0x1aa   :  { %2514 = vmatpush1.bf16.msra.mxu0 %v13380_v18  ;;  %v13439_v18 = vcombine.high %v942_v46, %v946_v47 }
 0x1ab   :  { %2600 = vmatpush1.bf16.msra.mxu1 %v13382_v49  ;;  %2515 = vmatprep.subr.bf16.mxu0 %v13389_v19  ;;  %v949_v49 = vld [vmem:[%s22233_s2 + $0xfd0] sm:$0xff] }
 0x1ac   :  { %2601 = vmatprep.subr.bf16.mxu1 %v13391_v12  ;;  %v953_v19 = vld [vmem:[%s22233_s2 + $0x1030] sm:$0xff]  ;;  %v950_v12 = vld [vmem:[%s22233_s2 + $0xfd8] sm:$0xff] }
 0x1ad   :  { %v13445_v57 = vcombine.high %v949_v49, %v953_v19  ;;  %v13444_v27 = vcombine.low %v949_v49, %v953_v19  ;;  %v13446_v28 = vcombine.low %v950_v12, %v954_v21  ;;  %v1002_v49 = vld [vmem:[%s22233_s2 + $0x14b8] sm:$0xff] }
 0x1ae   :  { %2516 = vmatpush1.bf16.msra.mxu0 %v13388_v63  ;;  %v13447_v63 = vcombine.high %v950_v12, %v954_v21 }
 0x1af   :  { %2602 = vmatpush1.bf16.msra.mxu1 %v13390_v53  ;;  %2517 = vmatprep.subr.bf16.mxu0 %v13397_v0  ;;  %v957_v53 = vld [vmem:[%s22233_s2 + $0x1090] sm:$0xff] }
 0x1b0   :  { %2603 = vmatprep.subr.bf16.mxu1 %v13399_v33  ;;  %v961_v0 = vld [vmem:[%s22233_s2 + $0x10f0] sm:$0xff]  ;;  %v958_v33 = vld [vmem:[%s22233_s2 + $0x1098] sm:$0xff] }
 0x1b1   :  { %v13453_v15 = vcombine.high %v957_v53, %v961_v0  ;;  %v13452_v40 = vcombine.low %v957_v53, %v961_v0  ;;  %v1010_v53 = vld [vmem:[%s22233_s2 + $0x1578] sm:$0xff] }
 0x1b2   :  { %2518 = vmatpush1.bf16.msra.mxu0 %v13396_v31  ;;  %v13455_v31 = vcombine.high %v958_v33, %v962_v4 }
 0x1b3   :  { %2604 = vmatpush1.bf16.msra.mxu1 %v13398_v37  ;;  %2530 = vmatprep.subr.bf16.mxu0 %v13405_v41  ;;  %v965_v37 = vld [vmem:[%s22233_s2 + $0x1150] sm:$0xff] }
 0x1b4   :  { %2616 = vmatprep.subr.bf16.mxu1 %v13407_v38  ;;  %v969_v41 = vld [vmem:[%s22233_s2 + $0x11b0] sm:$0xff]  ;;  %v966_v38 = vld [vmem:[%s22233_s2 + $0x1158] sm:$0xff] }
 0x1b5   :  { %2520 = vmatmul.mubr.bf16.vlgmr.msra.gmra.mrb[36].mxu0 %v16462_v22  ;;  %v13461_v43 = vcombine.high %v965_v37, %v969_v41  ;;  %v13463_v62 = vcombine.high %v966_v38, %v970_v39  ;;  %v13462_v50 = vcombine.low %v966_v38, %v970_v39 }
 0x1b6   :  { %2606 = vmatmul.mubr.bf16.vlgmr.msra.gmra.mrb[36].mxu1 %v16462_v22  ;;  %2531 = vmatpush1.bf16.msra.mxu0 %v13404_v42  ;;  %v934_v22 = vld [vmem:[%s22233_s2 + $0xe58] sm:$0xff]  ;;  %v13454_v42 = vcombine.low %v958_v33, %v962_v4 }
 0x1b7   :  { %2562 = vmatprep.mubr.bf16.mxu0 %v16528_v8  ;;  %2617 = vmatpush1.bf16.msra.mxu1 %v13406_v2  ;;  %v13431_v34 = vcombine.high %v934_v22, %v938_v60  ;;  %v13430_v51 = vcombine.low %v934_v22, %v938_v60  ;;  %v973_v2 = vld [vmem:[%s22233_s2 + $0x1210] sm:$0xff] }
 0x1b8   :  { %2648 = vmatprep.mubr.bf16.mxu1 %v16528_v8  ;;  %2532 = vmatprep.subr.bf16.mxu0 %v13413_v3  ;;  %v13420_v8 = vcombine.low %v925_v56, %v929_v35  ;;  %v977_v3 = vld [vmem:[%s22233_s2 + $0x1270] sm:$0xff]  ;;  %v974_v56 = vld [vmem:[%s22233_s2 + $0x1218] sm:$0xff] }
 0x1b9   :  { %2618 = vmatprep.subr.bf16.mxu1 %v13415_v48  ;;  %v978_v35 = vld [vmem:[%s22233_s2 + $0x1278] sm:$0xff]  ;;  %v13460_v48 = vcombine.low %v965_v37, %v969_v41  ;;  %v13469_v54 = vcombine.high %v973_v2, %v977_v3  ;;  %v13468_v20 = vcombine.low %v973_v2, %v977_v3 }
 0x1ba   :  { %2533 = vmatpush1.bf16.msra.mxu0 %v13412_v5  ;;  %v13471_v5 = vcombine.high %v974_v56, %v978_v35  ;;  %v13470_v22 = vcombine.low %v974_v56, %v978_v35  ;;  %v1018_v37 = vld [vmem:[%s22233_s2 + $0x1638] sm:$0xff] }
 0x1bb   :  { %2619 = vmatpush1.bf16.msra.mxu1 %v13414_v17  ;;  %2534 = vmatprep.subr.bf16.mxu0 %v13421_v58  ;;  %v981_v17 = vld [vmem:[%s22233_s2 + $0x12d0] sm:$0xff]  ;;  %v1026_v2 = vld [vmem:[%s22233_s2 + $0x16f8] sm:$0xff] }
 0x1bc   :  { %2620 = vmatprep.subr.bf16.mxu1 %v13423_v59  ;;  %v985_v58 = vld [vmem:[%s22233_s2 + $0x1330] sm:$0xff]  ;;  %v982_v59 = vld [vmem:[%s22233_s2 + $0x12d8] sm:$0xff] }
 0x1bd   :  { %v13477_v60 = vcombine.high %v981_v17, %v985_v58  ;;  %v13476_v45 = vcombine.low %v981_v17, %v985_v58  ;;  %v13478_v46 = vcombine.low %v982_v59, %v986_v6  ;;  %v1034_v17 = vld [vmem:[%s22233_s2 + $0x17b8] sm:$0xff] }
 0x1be   :  { %2535 = vmatpush1.bf16.msra.mxu0 %v13420_v8  ;;  %v13479_v8 = vcombine.high %v982_v59, %v986_v6 }
 0x1bf   :  { %2621 = vmatpush1.bf16.msra.mxu1 %v13422_v23  ;;  %2536 = vmatprep.subr.bf16.mxu0 %v13429_v7  ;;  %v989_v23 = vld [vmem:[%s22233_s2 + $0x1390] sm:$0xff] }
 0x1c0   :  { %2622 = vmatprep.subr.bf16.mxu1 %v13431_v34  ;;  %v993_v7 = vld [vmem:[%s22233_s2 + $0x13f0] sm:$0xff]  ;;  %v990_v34 = vld [vmem:[%s22233_s2 + $0x1398] sm:$0xff] }
 0x1c1   :  { %v13485_v47 = vcombine.high %v989_v23, %v993_v7  ;;  %v13484_v19 = vcombine.low %v989_v23, %v993_v7  ;;  %v13486_v12 = vcombine.low %v990_v34, %v994_v16  ;;  %v2672_v23 = vld [vmem:[%s22233_s2 + $0x68] sm:$0xff] }
 0x1c2   :  { %2537 = vmatpush1.bf16.msra.mxu0 %v13428_v9  ;;  %v13487_v9 = vcombine.high %v990_v34, %v994_v16 }
 0x1c3   :  { %2623 = vmatpush1.bf16.msra.mxu1 %v13430_v51  ;;  %2538 = vmatprep.subr.bf16.mxu0 %v13437_v10  ;;  %v997_v51 = vld [vmem:[%s22233_s2 + $0x1450] sm:$0xff] }
 0x1c4   :  { %2624 = vmatprep.subr.bf16.mxu1 %v13439_v18  ;;  %v1001_v10 = vld [vmem:[%s22233_s2 + $0x14b0] sm:$0xff]  ;;  %v998_v18 = vld [vmem:[%s22233_s2 + $0x1458] sm:$0xff] }
 0x1c5   :  { %v13493_v21 = vcombine.high %v997_v51, %v1001_v10  ;;  %v13492_v0 = vcombine.low %v997_v51, %v1001_v10  ;;  %v13494_v33 = vcombine.low %v998_v18, %v1002_v49  ;;  %v2680_v51 = vld [vmem:[%s22233_s2 + $0xc8] sm:$0xff] }
 0x1c6   :  { %2539 = vmatpush1.bf16.msra.mxu0 %v13436_v26  ;;  %v13495_v26 = vcombine.high %v998_v18, %v1002_v49  ;;  %v2688_v10 = vld [vmem:[%s22233_s2 + $0x128] sm:$0xff] }
 0x1c7   :  { %2625 = vmatpush1.bf16.msra.mxu1 %v13438_v25  ;;  %2540 = vmatprep.subr.bf16.mxu0 %v13445_v57  ;;  %v1005_v25 = vld [vmem:[%s22233_s2 + $0x1510] sm:$0xff] }
 0x1c8   :  { %2626 = vmatprep.subr.bf16.mxu1 %v13447_v63  ;;  %v1009_v57 = vld [vmem:[%s22233_s2 + $0x1570] sm:$0xff]  ;;  %v1006_v63 = vld [vmem:[%s22233_s2 + $0x1518] sm:$0xff] }
 0x1c9   :  { %v13501_v4 = vcombine.high %v1005_v25, %v1009_v57  ;;  %v13500_v41 = vcombine.low %v1005_v25, %v1009_v57  ;;  %v13502_v38 = vcombine.low %v1006_v63, %v1010_v53  ;;  %v2704_v25 = vld [vmem:[%s22233_s2 + $0x1e8] sm:$0xff] }
 0x1ca   :  { %2541 = vmatpush1.bf16.msra.mxu0 %v13444_v27  ;;  %v13503_v27 = vcombine.high %v1006_v63, %v1010_v53  ;;  %v13546_v63 = vcombine.low %v2680_v51, %v2688_v10 }
 0x1cb   :  { %2627 = vmatpush1.bf16.msra.mxu1 %v13446_v28  ;;  %2542 = vmatprep.subr.bf16.mxu0 %v13453_v15  ;;  %v1013_v28 = vld [vmem:[%s22233_s2 + $0x15d0] sm:$0xff] }
 0x1cc   :  { %2628 = vmatprep.subr.bf16.mxu1 %v13455_v31  ;;  %v1017_v15 = vld [vmem:[%s22233_s2 + $0x1630] sm:$0xff]  ;;  %v1014_v31 = vld [vmem:[%s22233_s2 + $0x15d8] sm:$0xff] }
 0x1cd   :  { %v13509_v39 = vcombine.high %v1013_v28, %v1017_v15  ;;  %v13508_v3 = vcombine.low %v1013_v28, %v1017_v15  ;;  %v13510_v56 = vcombine.low %v1014_v31, %v1018_v37 }
 0x1ce   :  { %2543 = vmatpush1.bf16.msra.mxu0 %v13452_v40  ;;  %v13511_v40 = vcombine.high %v1014_v31, %v1018_v37 }
 0x1cf   :  { %2629 = vmatpush1.bf16.msra.mxu1 %v13454_v42  ;;  %2544 = vmatprep.subr.bf16.mxu0 %v13461_v43  ;;  %v1021_v42 = vld [vmem:[%s22233_s2 + $0x1690] sm:$0xff] }
 0x1d0   :  { %2630 = vmatprep.subr.bf16.mxu1 %v13463_v62  ;;  %v1025_v43 = vld [vmem:[%s22233_s2 + $0x16f0] sm:$0xff]  ;;  %v1022_v62 = vld [vmem:[%s22233_s2 + $0x1698] sm:$0xff] }
 0x1d1   :  { %v13517_v35 = vcombine.high %v1021_v42, %v1025_v43  ;;  %v13516_v58 = vcombine.low %v1021_v42, %v1025_v43  ;;  %v13518_v59 = vcombine.low %v1022_v62, %v1026_v2 }
 0x1d2   :  { %2545 = vmatpush1.bf16.msra.mxu0 %v13460_v48  ;;  %v13519_v48 = vcombine.high %v1022_v62, %v1026_v2 }
 0x1d3   :  { %2631 = vmatpush1.bf16.msra.mxu1 %v13462_v50  ;;  %2546 = vmatprep.subr.bf16.mxu0 %v13469_v54  ;;  %v1029_v50 = vld [vmem:[%s22233_s2 + $0x1750] sm:$0xff] }
 0x1d4   :  { %2632 = vmatprep.subr.bf16.mxu1 %v13471_v5  ;;  %v1033_v54 = vld [vmem:[%s22233_s2 + $0x17b0] sm:$0xff]  ;;  %v1030_v5 = vld [vmem:[%s22233_s2 + $0x1758] sm:$0xff] }
 0x1d5   :  { %v13525_v6 = vcombine.high %v1029_v50, %v1033_v54  ;;  %v13524_v7 = vcombine.low %v1029_v50, %v1033_v54  ;;  %v13526_v34 = vcombine.low %v1030_v5, %v1034_v17 }
 0x1d6   :  { %2547 = vmatpush1.bf16.msra.mxu0 %v13468_v20  ;;  %v13527_v20 = vcombine.high %v1030_v5, %v1034_v17 }
 0x1d7   :  { %2633 = vmatpush1.bf16.msra.mxu1 %v13470_v22  ;;  %2548 = vmatprep.subr.bf16.mxu0 %v13477_v60  ;;  %v2663_v22 = vld [vmem:[%s22233_s2] sm:$0xff] }
 0x1d8   :  { %2634 = vmatprep.subr.bf16.mxu1 %v13479_v8  ;;  %v2671_v60 = vld [vmem:[%s22233_s2 + $0x60] sm:$0xff]  ;;  %v2664_v8 = vld [vmem:[%s22233_s2 + $0x8] sm:$0xff] }
 0x1d9   :  { %v13529_v16 = vcombine.high %v2663_v22, %v2671_v60  ;;  %v13530_v18 = vcombine.low %v2664_v8, %v2672_v23 }
 0x1da   :  { %2549 = vmatpush1.bf16.msra.mxu0 %v13476_v45  ;;  %v13531_v45 = vcombine.high %v2664_v8, %v2672_v23 }
 0x1db   :  { %2635 = vmatpush1.bf16.msra.mxu1 %v13478_v46  ;;  %2550 = vmatprep.subr.bf16.mxu0 %v13485_v47  ;;  %v2679_v46 = vld [vmem:[%s22233_s2 + $0xc0] sm:$0xff] }
 0x1dc   :  { %2636 = vmatprep.subr.bf16.mxu1 %v13487_v9  ;;  %v2687_v47 = vld [vmem:[%s22233_s2 + $0x120] sm:$0xff]  ;;  %v13528_v9 = vcombine.low %v2663_v22, %v2671_v60 }
 0x1dd   :  { %v13545_v49 = vcombine.high %v2679_v46, %v2687_v47  ;;  %v13544_v57 = vcombine.low %v2679_v46, %v2687_v47 }
 0x1de   :  { %2551 = vmatpush1.bf16.msra.mxu0 %v13484_v19  ;;  %v2695_v19 = vld [vmem:[%s22233_s2 + $0x180] sm:$0xff] }
 0x1df   :  { %2637 = vmatpush1.bf16.msra.mxu1 %v13486_v12  ;;  %2552 = vmatprep.subr.bf16.mxu0 %v13493_v21  ;;  %v2703_v12 = vld [vmem:[%s22233_s2 + $0x1e0] sm:$0xff]  ;;  %v13547_v21 = vcombine.high %v2680_v51, %v2688_v10 }
 0x1e0   :  { %2638 = vmatprep.subr.bf16.mxu1 %v13495_v26  ;;  %v2696_v26 = vld [vmem:[%s22233_s2 + $0x188] sm:$0xff]  ;;  %v13561_v53 = vcombine.high %v2695_v19, %v2703_v12  ;;  %v13560_v28 = vcombine.low %v2695_v19, %v2703_v12  ;;  %v2791_v10 = vld [vmem:[%s22233_s2 + $0x600] sm:$0xff] }
 0x1e1   :  { %v13562_v15 = vcombine.low %v2696_v26, %v2704_v25  ;;  %v2800_v19 = vld [vmem:[%s22233_s2 + $0x668] sm:$0xff] }
 0x1e2   :  { %2553 = vmatpush1.bf16.msra.mxu0 %v13492_v0  ;;  %v13563_v0 = vcombine.high %v2696_v26, %v2704_v25 }
 0x1e3   :  { %2639 = vmatpush1.bf16.msra.mxu1 %v13494_v33  ;;  %2554 = vmatprep.subr.bf16.mxu0 %v13501_v4  ;;  %v2711_v33 = vld [vmem:[%s22233_s2 + $0x240] sm:$0xff] }
 0x1e4   :  { %2640 = vmatprep.subr.bf16.mxu1 %v13503_v27  ;;  %v2719_v4 = vld [vmem:[%s22233_s2 + $0x2a0] sm:$0xff]  ;;  %v2720_v27 = vld [vmem:[%s22233_s2 + $0x2a8] sm:$0xff] }
 0x1e5   :  { %v13577_v31 = vcombine.high %v2711_v33, %v2719_v4  ;;  %v13576_v42 = vcombine.low %v2711_v33, %v2719_v4 }
 0x1e6   :  { %2555 = vmatpush1.bf16.msra.mxu0 %v13500_v41  ;;  %v2727_v41 = vld [vmem:[%s22233_s2 + $0x300] sm:$0xff] }
 0x1e7   :  { %2641 = vmatpush1.bf16.msra.mxu1 %v13502_v38  ;;  %2556 = vmatprep.subr.bf16.mxu0 %v13509_v39  ;;  %v2735_v38 = vld [vmem:[%s22233_s2 + $0x360] sm:$0xff]  ;;  %v2728_v39 = vld [vmem:[%s22233_s2 + $0x308] sm:$0xff] }
 0x1e8   :  { %2642 = vmatprep.subr.bf16.mxu1 %v13511_v40  ;;  %v2736_v40 = vld [vmem:[%s22233_s2 + $0x368] sm:$0xff]  ;;  %v13593_v62 = vcombine.high %v2727_v41, %v2735_v38  ;;  %v13592_v50 = vcombine.low %v2727_v41, %v2735_v38 }
 0x1e9   :  { %v13595_v2 = vcombine.high %v2728_v39, %v2736_v40  ;;  %v13594_v54 = vcombine.low %v2728_v39, %v2736_v40 }
 0x1ea   :  { %2557 = vmatpush1.bf16.msra.mxu0 %v13508_v3  ;;  %v2743_v3 = vld [vmem:[%s22233_s2 + $0x3c0] sm:$0xff] }
 0x1eb   :  { %2643 = vmatpush1.bf16.msra.mxu1 %v13510_v56  ;;  %2558 = vmatprep.subr.bf16.mxu0 %v13517_v35  ;;  %v2751_v56 = vld [vmem:[%s22233_s2 + $0x420] sm:$0xff]  ;;  %v2744_v35 = vld [vmem:[%s22233_s2 + $0x3c8] sm:$0xff] }
 0x1ec   :  { %2644 = vmatprep.subr.bf16.mxu1 %v13519_v48  ;;  %v2752_v48 = vld [vmem:[%s22233_s2 + $0x428] sm:$0xff]  ;;  %v13609_v5 = vcombine.high %v2743_v3, %v2751_v56  ;;  %v13608_v22 = vcombine.low %v2743_v3, %v2751_v56 }
 0x1ed   :  { %v13611_v17 = vcombine.high %v2744_v35, %v2752_v48  ;;  %v13610_v60 = vcombine.low %v2744_v35, %v2752_v48 }
 0x1ee   :  { %2559 = vmatpush1.bf16.msra.mxu0 %v13516_v58  ;;  %v2759_v58 = vld [vmem:[%s22233_s2 + $0x480] sm:$0xff] }
 0x1ef   :  { %2645 = vmatpush1.bf16.msra.mxu1 %v13518_v59  ;;  %2560 = vmatprep.subr.bf16.mxu0 %v13525_v6  ;;  %v2767_v59 = vld [vmem:[%s22233_s2 + $0x4e0] sm:$0xff]  ;;  %v2760_v6 = vld [vmem:[%s22233_s2 + $0x488] sm:$0xff] }
 0x1f0   :  { %2646 = vmatprep.subr.bf16.mxu1 %v13527_v20  ;;  %v2768_v20 = vld [vmem:[%s22233_s2 + $0x4e8] sm:$0xff]  ;;  %v13625_v8 = vcombine.high %v2759_v58, %v2767_v59  ;;  %v13624_v46 = vcombine.low %v2759_v58, %v2767_v59 }
 0x1f1   :  { %v13627_v23 = vcombine.high %v2760_v6, %v2768_v20  ;;  %v13626_v47 = vcombine.low %v2760_v6, %v2768_v20 }
 0x1f2   :  { %2561 = vmatpush1.bf16.msra.mxu0 %v13524_v7  ;;  %v2775_v7 = vld [vmem:[%s22233_s2 + $0x540] sm:$0xff] }
 0x1f3   :  { %2647 = vmatpush1.bf16.msra.mxu1 %v13526_v34  ;;  %5735 = vmatprep.subr.bf16.mxu0 %v13529_v16  ;;  %v2783_v34 = vld [vmem:[%s22233_s2 + $0x5a0] sm:$0xff]  ;;  %v2776_v16 = vld [vmem:[%s22233_s2 + $0x548] sm:$0xff] }
 0x1f4   :  { %5821 = vmatprep.subr.bf16.mxu1 %v13531_v45  ;;  %v2784_v45 = vld [vmem:[%s22233_s2 + $0x5a8] sm:$0xff]  ;;  %v13640_v12 = vcombine.low %v2775_v7, %v2783_v34 }
 0x1f5   :  { %2563 = vmatmul.mubr.bf16.vlgmr.msra.gmra.mrb[36].mxu0 %v16490_v1  ;;  %v13643_v51 = vcombine.high %v2776_v16, %v2784_v45 }
 0x1f6   :  { %2649 = vmatmul.mubr.bf16.vlgmr.msra.gmra.mrb[36].mxu1 %v16490_v1  ;;  %5736 = vmatpush1.bf16.msra.mxu0 %v13528_v9  ;;  %v2712_v1 = vld [vmem:[%s22233_s2 + $0x248] sm:$0xff]  ;;  %v13641_v9 = vcombine.high %v2775_v7, %v2783_v34 }
 0x1f7   :  { %5767 = vmatprep.mubr.bf16.mxu0 %v16458_v11  ;;  %5822 = vmatpush1.bf16.msra.mxu1 %v13530_v18  ;;  %v13579_v37 = vcombine.high %v2712_v1, %v2720_v27  ;;  %v13578_v43 = vcombine.low %v2712_v1, %v2720_v27  ;;  %v2799_v18 = vld [vmem:[%s22233_s2 + $0x660] sm:$0xff] }
 0x1f8   :  { %5853 = vmatprep.mubr.bf16.mxu1 %v16458_v11  ;;  %5737 = vmatprep.subr.bf16.mxu0 %v13545_v49  ;;  %v2792_v49 = vld [vmem:[%s22233_s2 + $0x608] sm:$0xff]  ;;  %v13657_v26 = vcombine.high %v2791_v10, %v2799_v18  ;;  %v13656_v33 = vcombine.low %v2791_v10, %v2799_v18 }
 0x1f9   :  { %5823 = vmatprep.subr.bf16.mxu1 %v13547_v21  ;;  %v13642_v21 = vcombine.low %v2776_v16, %v2784_v45  ;;  %v13659_v25 = vcombine.high %v2792_v49, %v2800_v19  ;;  %v13658_v4 = vcombine.low %v2792_v49, %v2800_v19 }
 0x1fa   :  { %5738 = vmatpush1.bf16.msra.mxu0 %v13544_v57  ;;  %v2807_v57 = vld [vmem:[%s22233_s2 + $0x6c0] sm:$0xff] }
 0x1fb   :  { %5824 = vmatpush1.bf16.msra.mxu1 %v13546_v63  ;;  %5739 = vmatprep.subr.bf16.mxu0 %v13561_v53  ;;  %v2815_v63 = vld [vmem:[%s22233_s2 + $0x720] sm:$0xff]  ;;  %v2808_v53 = vld [vmem:[%s22233_s2 + $0x6c8] sm:$0xff] }
 0x1fc   :  { %5825 = vmatprep.subr.bf16.mxu1 %v13563_v0  ;;  %v2816_v0 = vld [vmem:[%s22233_s2 + $0x728] sm:$0xff]  ;;  %v13673_v1 = vcombine.high %v2807_v57, %v2815_v63  ;;  %v13672_v41 = vcombine.low %v2807_v57, %v2815_v63 }
 0x1fd   :  { %v13675_v27 = vcombine.high %v2808_v53, %v2816_v0  ;;  %v13674_v38 = vcombine.low %v2808_v53, %v2816_v0 }
 0x1fe   :  { %5740 = vmatpush1.bf16.msra.mxu0 %v13560_v28  ;;  %v2823_v28 = vld [vmem:[%s22233_s2 + $0x780] sm:$0xff] }
 0x1ff   :  { %5826 = vmatpush1.bf16.msra.mxu1 %v13562_v15  ;;  %5741 = vmatprep.subr.bf16.mxu0 %v13577_v31  ;;  %v2831_v15 = vld [vmem:[%s22233_s2 + $0x7e0] sm:$0xff]  ;;  %v2824_v31 = vld [vmem:[%s22233_s2 + $0x788] sm:$0xff] }
 0x200   :  { %5827 = vmatprep.subr.bf16.mxu1 %v13579_v37  ;;  %v2832_v37 = vld [vmem:[%s22233_s2 + $0x7e8] sm:$0xff]  ;;  %v13689_v39 = vcombine.high %v2823_v28, %v2831_v15  ;;  %v13688_v3 = vcombine.low %v2823_v28, %v2831_v15 }
 0x201   :  { %v13691_v40 = vcombine.high %v2824_v31, %v2832_v37  ;;  %v13690_v56 = vcombine.low %v2824_v31, %v2832_v37 }
 0x202   :  { %5742 = vmatpush1.bf16.msra.mxu0 %v13576_v42  ;;  %v2839_v42 = vld [vmem:[%s22233_s2 + $0x840] sm:$0xff] }
 0x203   :  { %5828 = vmatpush1.bf16.msra.mxu1 %v13578_v43  ;;  %5743 = vmatprep.subr.bf16.mxu0 %v13593_v62  ;;  %v2847_v43 = vld [vmem:[%s22233_s2 + $0x8a0] sm:$0xff]  ;;  %v2840_v62 = vld [vmem:[%s22233_s2 + $0x848] sm:$0xff] }
 0x204   :  { %5829 = vmatprep.subr.bf16.mxu1 %v13595_v2  ;;  %v2848_v2 = vld [vmem:[%s22233_s2 + $0x8a8] sm:$0xff]  ;;  %v13705_v35 = vcombine.high %v2839_v42, %v2847_v43  ;;  %v13704_v58 = vcombine.low %v2839_v42, %v2847_v43 }
 0x205   :  { %v13707_v48 = vcombine.high %v2840_v62, %v2848_v2  ;;  %v13706_v59 = vcombine.low %v2840_v62, %v2848_v2  ;;  %v2944_v42 = vld [vmem:[%s22233_s2 + $0xd28] sm:$0xff]  ;;  %v2951_v2 = vld [vmem:[%s22233_s2 + $0xd80] sm:$0xff] }
 0x206   :  { %5744 = vmatpush1.bf16.msra.mxu0 %v13592_v50  ;;  %v2855_v50 = vld [vmem:[%s22233_s2 + $0x900] sm:$0xff] }
 0x207   :  { %5830 = vmatpush1.bf16.msra.mxu1 %v13594_v54  ;;  %5745 = vmatprep.subr.bf16.mxu0 %v13609_v5  ;;  %v2863_v54 = vld [vmem:[%s22233_s2 + $0x960] sm:$0xff]  ;;  %v2856_v5 = vld [vmem:[%s22233_s2 + $0x908] sm:$0xff] }
 0x208   :  { %5831 = vmatprep.subr.bf16.mxu1 %v13611_v17  ;;  %v2864_v17 = vld [vmem:[%s22233_s2 + $0x968] sm:$0xff]  ;;  %v13721_v6 = vcombine.high %v2855_v50, %v2863_v54  ;;  %v13720_v7 = vcombine.low %v2855_v50, %v2863_v54 }
 0x209   :  { %v13723_v20 = vcombine.high %v2856_v5, %v2864_v17  ;;  %v13722_v34 = vcombine.low %v2856_v5, %v2864_v17 }
 0x20a   :  { %5746 = vmatpush1.bf16.msra.mxu0 %v13608_v22  ;;  %v2871_v22 = vld [vmem:[%s22233_s2 + $0x9c0] sm:$0xff] }
 0x20b   :  { %5832 = vmatpush1.bf16.msra.mxu1 %v13610_v60  ;;  %5747 = vmatprep.subr.bf16.mxu0 %v13625_v8  ;;  %v2879_v60 = vld [vmem:[%s22233_s2 + $0xa20] sm:$0xff]  ;;  %v2872_v8 = vld [vmem:[%s22233_s2 + $0x9c8] sm:$0xff] }
 0x20c   :  { %5833 = vmatprep.subr.bf16.mxu1 %v13627_v23  ;;  %v2880_v23 = vld [vmem:[%s22233_s2 + $0xa28] sm:$0xff]  ;;  %v13737_v16 = vcombine.high %v2871_v22, %v2879_v60  ;;  %v13736_v10 = vcombine.low %v2871_v22, %v2879_v60 }
 0x20d   :  { %v13739_v45 = vcombine.high %v2872_v8, %v2880_v23  ;;  %v13738_v18 = vcombine.low %v2872_v8, %v2880_v23 }
 0x20e   :  { %5748 = vmatpush1.bf16.msra.mxu0 %v13624_v46  ;;  %v2887_v46 = vld [vmem:[%s22233_s2 + $0xa80] sm:$0xff] }
 0x20f   :  { %5834 = vmatpush1.bf16.msra.mxu1 %v13626_v47  ;;  %5749 = vmatprep.subr.bf16.mxu0 %v13641_v9  ;;  %v2895_v47 = vld [vmem:[%s22233_s2 + $0xae0] sm:$0xff]  ;;  %v2888_v9 = vld [vmem:[%s22233_s2 + $0xa88] sm:$0xff] }
 0x210   :  { %5835 = vmatprep.subr.bf16.mxu1 %v13643_v51  ;;  %v2896_v51 = vld [vmem:[%s22233_s2 + $0xae8] sm:$0xff]  ;;  %v13753_v49 = vcombine.high %v2887_v46, %v2895_v47  ;;  %v13752_v57 = vcombine.low %v2887_v46, %v2895_v47 }
 0x211   :  { %v13755_v19 = vcombine.high %v2888_v9, %v2896_v51  ;;  %v13754_v63 = vcombine.low %v2888_v9, %v2896_v51 }
 0x212   :  { %5750 = vmatpush1.bf16.msra.mxu0 %v13640_v12  ;;  %v2903_v12 = vld [vmem:[%s22233_s2 + $0xb40] sm:$0xff] }
 0x213   :  { %5836 = vmatpush1.bf16.msra.mxu1 %v13642_v21  ;;  %5751 = vmatprep.subr.bf16.mxu0 %v13657_v26  ;;  %v2911_v21 = vld [vmem:[%s22233_s2 + $0xba0] sm:$0xff]  ;;  %v2904_v26 = vld [vmem:[%s22233_s2 + $0xb48] sm:$0xff] }
 0x214   :  { %5837 = vmatprep.subr.bf16.mxu1 %v13659_v25  ;;  %v2912_v25 = vld [vmem:[%s22233_s2 + $0xba8] sm:$0xff]  ;;  %v13769_v53 = vcombine.high %v2903_v12, %v2911_v21  ;;  %v13768_v28 = vcombine.low %v2903_v12, %v2911_v21 }
 0x215   :  { %v13771_v0 = vcombine.high %v2904_v26, %v2912_v25  ;;  %v13770_v15 = vcombine.low %v2904_v26, %v2912_v25 }
 0x216   :  { %5752 = vmatpush1.bf16.msra.mxu0 %v13656_v33  ;;  %v2919_v33 = vld [vmem:[%s22233_s2 + $0xc00] sm:$0xff] }
 0x217   :  { %5838 = vmatpush1.bf16.msra.mxu1 %v13658_v4  ;;  %5753 = vmatprep.subr.bf16.mxu0 %v13673_v1  ;;  %v2927_v4 = vld [vmem:[%s22233_s2 + $0xc60] sm:$0xff]  ;;  %v2920_v1 = vld [vmem:[%s22233_s2 + $0xc08] sm:$0xff] }
 0x218   :  { %5839 = vmatprep.subr.bf16.mxu1 %v13675_v27  ;;  %v2928_v27 = vld [vmem:[%s22233_s2 + $0xc68] sm:$0xff]  ;;  %v13785_v31 = vcombine.high %v2919_v33, %v2927_v4 }
 0x219   :  { %v13787_v37 = vcombine.high %v2920_v1, %v2928_v27  ;;  %v13786_v43 = vcombine.low %v2920_v1, %v2928_v27 }
 0x21a   :  { %5754 = vmatpush1.bf16.msra.mxu0 %v13672_v41  ;;  %v2935_v41 = vld [vmem:[%s22233_s2 + $0xcc0] sm:$0xff] }
 0x21b   :  { %5840 = vmatpush1.bf16.msra.mxu1 %v13674_v38  ;;  %5755 = vmatprep.subr.bf16.mxu0 %v13689_v39  ;;  %v2943_v38 = vld [vmem:[%s22233_s2 + $0xd20] sm:$0xff]  ;;  %v13784_v39 = vcombine.low %v2919_v33, %v2927_v4 }
 0x21c   :  { %5841 = vmatprep.subr.bf16.mxu1 %v13691_v40  ;;  %v2936_v40 = vld [vmem:[%s22233_s2 + $0xcc8] sm:$0xff]  ;;  %v13801_v62 = vcombine.high %v2935_v41, %v2943_v38  ;;  %v13800_v50 = vcombine.low %v2935_v41, %v2943_v38 }
 0x21d   :  { %v13802_v54 = vcombine.low %v2936_v40, %v2944_v42 }
 0x21e   :  { %5756 = vmatpush1.bf16.msra.mxu0 %v13688_v3  ;;  %v2959_v3 = vld [vmem:[%s22233_s2 + $0xde0] sm:$0xff] }
 0x21f   :  { %5842 = vmatpush1.bf16.msra.mxu1 %v13690_v56  ;;  %5757 = vmatprep.subr.bf16.mxu0 %v13705_v35  ;;  %v13803_v56 = vcombine.high %v2936_v40, %v2944_v42  ;;  %v2952_v35 = vld [vmem:[%s22233_s2 + $0xd88] sm:$0xff]  ;;  %v13817_v5 = vcombine.high %v2951_v2, %v2959_v3  ;;  %v13816_v22 = vcombine.low %v2951_v2, %v2959_v3  ;;  %v3047_v42 = vld [vmem:[%s22233_s2 + $0x1200] sm:$0xff] }
 0x220   :  { %5843 = vmatprep.subr.bf16.mxu1 %v13707_v48  ;;  %v2960_v48 = vld [vmem:[%s22233_s2 + $0xde8] sm:$0xff] }
 0x221   :  { %v13819_v17 = vcombine.high %v2952_v35, %v2960_v48  ;;  %v13818_v60 = vcombine.low %v2952_v35, %v2960_v48  ;;  %v3056_v2 = vld [vmem:[%s22233_s2 + $0x1268] sm:$0xff] }
 0x222   :  { %5758 = vmatpush1.bf16.msra.mxu0 %v13704_v58  ;;  %v2967_v58 = vld [vmem:[%s22233_s2 + $0xe40] sm:$0xff] }
 0x223   :  { %5844 = vmatpush1.bf16.msra.mxu1 %v13706_v59  ;;  %5759 = vmatprep.subr.bf16.mxu0 %v13721_v6  ;;  %v2975_v59 = vld [vmem:[%s22233_s2 + $0xea0] sm:$0xff]  ;;  %v2968_v6 = vld [vmem:[%s22233_s2 + $0xe48] sm:$0xff] }
 0x224   :  { %5845 = vmatprep.subr.bf16.mxu1 %v13723_v20  ;;  %v2976_v20 = vld [vmem:[%s22233_s2 + $0xea8] sm:$0xff]  ;;  %v13833_v8 = vcombine.high %v2967_v58, %v2975_v59  ;;  %v13832_v46 = vcombine.low %v2967_v58, %v2975_v59 }
 0x225   :  { %v13835_v23 = vcombine.high %v2968_v6, %v2976_v20  ;;  %v13834_v47 = vcombine.low %v2968_v6, %v2976_v20 }
 0x226   :  { %5760 = vmatpush1.bf16.msra.mxu0 %v13720_v7  ;;  %v2983_v7 = vld [vmem:[%s22233_s2 + $0xf00] sm:$0xff] }
 0x227   :  { %5846 = vmatpush1.bf16.msra.mxu1 %v13722_v34  ;;  %5761 = vmatprep.subr.bf16.mxu0 %v13737_v16  ;;  %v2991_v34 = vld [vmem:[%s22233_s2 + $0xf60] sm:$0xff]  ;;  %v2984_v16 = vld [vmem:[%s22233_s2 + $0xf08] sm:$0xff] }
 0x228   :  { %5847 = vmatprep.subr.bf16.mxu1 %v13739_v45  ;;  %v2992_v45 = vld [vmem:[%s22233_s2 + $0xf68] sm:$0xff]  ;;  %v13849_v9 = vcombine.high %v2983_v7, %v2991_v34  ;;  %v13848_v12 = vcombine.low %v2983_v7, %v2991_v34 }
 0x229   :  { %v13851_v51 = vcombine.high %v2984_v16, %v2992_v45  ;;  %v13850_v21 = vcombine.low %v2984_v16, %v2992_v45 }
 0x22a   :  { %5762 = vmatpush1.bf16.msra.mxu0 %v13736_v10  ;;  %v2999_v10 = vld [vmem:[%s22233_s2 + $0xfc0] sm:$0xff] }
 0x22b   :  { %5848 = vmatpush1.bf16.msra.mxu1 %v13738_v18  ;;  %5763 = vmatprep.subr.bf16.mxu0 %v13753_v49  ;;  %v3007_v18 = vld [vmem:[%s22233_s2 + $0x1020] sm:$0xff]  ;;  %v3000_v49 = vld [vmem:[%s22233_s2 + $0xfc8] sm:$0xff] }
 0x22c   :  { %5849 = vmatprep.subr.bf16.mxu1 %v13755_v19  ;;  %v3008_v19 = vld [vmem:[%s22233_s2 + $0x1028] sm:$0xff]  ;;  %v13865_v26 = vcombine.high %v2999_v10, %v3007_v18  ;;  %v13864_v33 = vcombine.low %v2999_v10, %v3007_v18 }
 0x22d   :  { %v13867_v25 = vcombine.high %v3000_v49, %v3008_v19  ;;  %v13866_v4 = vcombine.low %v3000_v49, %v3008_v19 }
 0x22e   :  { %5764 = vmatpush1.bf16.msra.mxu0 %v13752_v57  ;;  %v3015_v57 = vld [vmem:[%s22233_s2 + $0x1080] sm:$0xff] }
 0x22f   :  { %5850 = vmatpush1.bf16.msra.mxu1 %v13754_v63  ;;  %5765 = vmatprep.subr.bf16.mxu0 %v13769_v53  ;;  %v3023_v63 = vld [vmem:[%s22233_s2 + $0x10e0] sm:$0xff]  ;;  %v3016_v53 = vld [vmem:[%s22233_s2 + $0x1088] sm:$0xff] }
 0x230   :  { %5851 = vmatprep.subr.bf16.mxu1 %v13771_v0  ;;  %v3024_v0 = vld [vmem:[%s22233_s2 + $0x10e8] sm:$0xff]  ;;  %v13881_v1 = vcombine.high %v3015_v57, %v3023_v63  ;;  %v13880_v41 = vcombine.low %v3015_v57, %v3023_v63 }
 0x231   :  { %v13883_v27 = vcombine.high %v3016_v53, %v3024_v0  ;;  %v13882_v38 = vcombine.low %v3016_v53, %v3024_v0 }
 0x232   :  { %5766 = vmatpush1.bf16.msra.mxu0 %v13768_v28  ;;  %v3031_v28 = vld [vmem:[%s22233_s2 + $0x1140] sm:$0xff] }
 0x233   :  { %5852 = vmatpush1.bf16.msra.mxu1 %v13770_v15  ;;  %5778 = vmatprep.subr.bf16.mxu0 %v13785_v31  ;;  %v3039_v15 = vld [vmem:[%s22233_s2 + $0x11a0] sm:$0xff]  ;;  %v3032_v31 = vld [vmem:[%s22233_s2 + $0x1148] sm:$0xff] }
 0x234   :  { %5864 = vmatprep.subr.bf16.mxu1 %v13787_v37  ;;  %v3040_v37 = vld [vmem:[%s22233_s2 + $0x11a8] sm:$0xff]  ;;  %v13896_v3 = vcombine.low %v3031_v28, %v3039_v15 }
 0x235   :  { %5768 = vmatmul.mubr.bf16.vlgmr.msra.gmra.mrb[40].mxu0 %v16456_v36  ;;  %v13899_v40 = vcombine.high %v3032_v31, %v3040_v37 }
 0x236   :  { %5854 = vmatmul.mubr.bf16.vlgmr.msra.gmra.mrb[40].mxu1 %v16456_v36  ;;  %5779 = vmatpush1.bf16.msra.mxu0 %v13784_v39  ;;  %v13897_v39 = vcombine.high %v3031_v28, %v3039_v15 }
 0x237   :  { %5810 = vmatprep.mubr.bf16.mxu0 %v16474_v55  ;;  %5865 = vmatpush1.bf16.msra.mxu1 %v13786_v43  ;;  %v3055_v43 = vld [vmem:[%s22233_s2 + $0x1260] sm:$0xff] }
 0x238   :  { %5896 = vmatprep.mubr.bf16.mxu1 %v16474_v55  ;;  %5780 = vmatprep.subr.bf16.mxu0 %v13801_v62  ;;  %v3048_v62 = vld [vmem:[%s22233_s2 + $0x1208] sm:$0xff]  ;;  %v13913_v35 = vcombine.high %v3047_v42, %v3055_v43  ;;  %v13912_v58 = vcombine.low %v3047_v42, %v3055_v43 }
 0x239   :  { %5866 = vmatprep.subr.bf16.mxu1 %v13803_v56  ;;  %v13898_v56 = vcombine.low %v3032_v31, %v3040_v37  ;;  %v13915_v48 = vcombine.high %v3048_v62, %v3056_v2  ;;  %v13914_v59 = vcombine.low %v3048_v62, %v3056_v2 }
 0x23a   :  { %5781 = vmatpush1.bf16.msra.mxu0 %v13800_v50  ;;  %v3063_v50 = vld [vmem:[%s22233_s2 + $0x12c0] sm:$0xff] }
 0x23b   :  { %5867 = vmatpush1.bf16.msra.mxu1 %v13802_v54  ;;  %5782 = vmatprep.subr.bf16.mxu0 %v13817_v5  ;;  %v3071_v54 = vld [vmem:[%s22233_s2 + $0x1320] sm:$0xff]  ;;  %v3064_v5 = vld [vmem:[%s22233_s2 + $0x12c8] sm:$0xff] }
 0x23c   :  { %5868 = vmatprep.subr.bf16.mxu1 %v13819_v17  ;;  %v3072_v17 = vld [vmem:[%s22233_s2 + $0x1328] sm:$0xff]  ;;  %v13929_v6 = vcombine.high %v3063_v50, %v3071_v54  ;;  %v13928_v7 = vcombine.low %v3063_v50, %v3071_v54 }
 0x23d   :  { %v13931_v20 = vcombine.high %v3064_v5, %v3072_v17  ;;  %v13930_v34 = vcombine.low %v3064_v5, %v3072_v17 }
 0x23e   :  { %5783 = vmatpush1.bf16.msra.mxu0 %v13816_v22  ;;  %v3079_v22 = vld [vmem:[%s22233_s2 + $0x1380] sm:$0xff] }
 0x23f   :  { %5869 = vmatpush1.bf16.msra.mxu1 %v13818_v60  ;;  %5784 = vmatprep.subr.bf16.mxu0 %v13833_v8  ;;  %v3087_v60 = vld [vmem:[%s22233_s2 + $0x13e0] sm:$0xff]  ;;  %v3080_v8 = vld [vmem:[%s22233_s2 + $0x1388] sm:$0xff] }
 0x240   :  { %5870 = vmatprep.subr.bf16.mxu1 %v13835_v23  ;;  %v3088_v23 = vld [vmem:[%s22233_s2 + $0x13e8] sm:$0xff]  ;;  %v13945_v16 = vcombine.high %v3079_v22, %v3087_v60  ;;  %v13944_v10 = vcombine.low %v3079_v22, %v3087_v60 }
 0x241   :  { %v13947_v45 = vcombine.high %v3080_v8, %v3088_v23  ;;  %v13946_v18 = vcombine.low %v3080_v8, %v3088_v23 }
 0x242   :  { %5785 = vmatpush1.bf16.msra.mxu0 %v13832_v46  ;;  %v3095_v46 = vld [vmem:[%s22233_s2 + $0x1440] sm:$0xff] }
 0x243   :  { %5871 = vmatpush1.bf16.msra.mxu1 %v13834_v47  ;;  %5786 = vmatprep.subr.bf16.mxu0 %v13849_v9  ;;  %v3103_v47 = vld [vmem:[%s22233_s2 + $0x14a0] sm:$0xff]  ;;  %v3096_v9 = vld [vmem:[%s22233_s2 + $0x1448] sm:$0xff] }
 0x244   :  { %5872 = vmatprep.subr.bf16.mxu1 %v13851_v51  ;;  %v3104_v51 = vld [vmem:[%s22233_s2 + $0x14a8] sm:$0xff]  ;;  %v13961_v49 = vcombine.high %v3095_v46, %v3103_v47  ;;  %v13960_v57 = vcombine.low %v3095_v46, %v3103_v47  ;;  %v2690_v46 = vld [vmem:[%s22233_s2 + $0x138] sm:$0xff] }
 0x245   :  { %v13963_v19 = vcombine.high %v3096_v9, %v3104_v51  ;;  %v13962_v63 = vcombine.low %v3096_v9, %v3104_v51  ;;  %v2697_v51 = vld [vmem:[%s22233_s2 + $0x190] sm:$0xff] }
 0x246   :  { %5787 = vmatpush1.bf16.msra.mxu0 %v13848_v12  ;;  %v3111_v12 = vld [vmem:[%s22233_s2 + $0x1500] sm:$0xff] }
 0x247   :  { %5873 = vmatpush1.bf16.msra.mxu1 %v13850_v21  ;;  %5788 = vmatprep.subr.bf16.mxu0 %v13865_v26  ;;  %v3119_v21 = vld [vmem:[%s22233_s2 + $0x1560] sm:$0xff]  ;;  %v3112_v26 = vld [vmem:[%s22233_s2 + $0x1508] sm:$0xff] }
 0x248   :  { %5874 = vmatprep.subr.bf16.mxu1 %v13867_v25  ;;  %v3120_v25 = vld [vmem:[%s22233_s2 + $0x1568] sm:$0xff]  ;;  %v13977_v53 = vcombine.high %v3111_v12, %v3119_v21  ;;  %v13976_v28 = vcombine.low %v3111_v12, %v3119_v21 }
 0x249   :  { %v13979_v0 = vcombine.high %v3112_v26, %v3120_v25  ;;  %v13978_v15 = vcombine.low %v3112_v26, %v3120_v25 }
 0x24a   :  { %5789 = vmatpush1.bf16.msra.mxu0 %v13864_v33  ;;  %v3127_v33 = vld [vmem:[%s22233_s2 + $0x15c0] sm:$0xff] }
 0x24b   :  { %5875 = vmatpush1.bf16.msra.mxu1 %v13866_v4  ;;  %5790 = vmatprep.subr.bf16.mxu0 %v13881_v1  ;;  %v3135_v4 = vld [vmem:[%s22233_s2 + $0x1620] sm:$0xff]  ;;  %v3128_v1 = vld [vmem:[%s22233_s2 + $0x15c8] sm:$0xff] }
 0x24c   :  { %5876 = vmatprep.subr.bf16.mxu1 %v13883_v27  ;;  %v3136_v27 = vld [vmem:[%s22233_s2 + $0x1628] sm:$0xff]  ;;  %v13993_v31 = vcombine.high %v3127_v33, %v3135_v4  ;;  %v13992_v42 = vcombine.low %v3127_v33, %v3135_v4 }
 0x24d   :  { %v13995_v37 = vcombine.high %v3128_v1, %v3136_v27  ;;  %v13994_v43 = vcombine.low %v3128_v1, %v3136_v27 }
 0x24e   :  { %5791 = vmatpush1.bf16.msra.mxu0 %v13880_v41  ;;  %v3143_v41 = vld [vmem:[%s22233_s2 + $0x1680] sm:$0xff] }
 0x24f   :  { %5877 = vmatpush1.bf16.msra.mxu1 %v13882_v38  ;;  %5792 = vmatprep.subr.bf16.mxu0 %v13897_v39  ;;  %v3151_v38 = vld [vmem:[%s22233_s2 + $0x16e0] sm:$0xff]  ;;  %v3144_v39 = vld [vmem:[%s22233_s2 + $0x1688] sm:$0xff] }
 0x250   :  { %5878 = vmatprep.subr.bf16.mxu1 %v13899_v40  ;;  %v3152_v40 = vld [vmem:[%s22233_s2 + $0x16e8] sm:$0xff]  ;;  %v14009_v62 = vcombine.high %v3143_v41, %v3151_v38  ;;  %v14008_v50 = vcombine.low %v3143_v41, %v3151_v38 }
 0x251   :  { %v14011_v2 = vcombine.high %v3144_v39, %v3152_v40  ;;  %v14010_v54 = vcombine.low %v3144_v39, %v3152_v40 }
 0x252   :  { %5793 = vmatpush1.bf16.msra.mxu0 %v13896_v3  ;;  %v3159_v3 = vld [vmem:[%s22233_s2 + $0x1740] sm:$0xff] }
 0x253   :  { %5879 = vmatpush1.bf16.msra.mxu1 %v13898_v56  ;;  %5794 = vmatprep.subr.bf16.mxu0 %v13913_v35  ;;  %v3167_v56 = vld [vmem:[%s22233_s2 + $0x17a0] sm:$0xff]  ;;  %v3160_v35 = vld [vmem:[%s22233_s2 + $0x1748] sm:$0xff] }
 0x254   :  { %5880 = vmatprep.subr.bf16.mxu1 %v13915_v48  ;;  %v3168_v48 = vld [vmem:[%s22233_s2 + $0x17a8] sm:$0xff]  ;;  %v14025_v5 = vcombine.high %v3159_v3, %v3167_v56  ;;  %v14024_v22 = vcombine.low %v3159_v3, %v3167_v56 }
 0x255   :  { %v14027_v17 = vcombine.high %v3160_v35, %v3168_v48  ;;  %v14026_v60 = vcombine.low %v3160_v35, %v3168_v48 }
 0x256   :  { %5795 = vmatpush1.bf16.msra.mxu0 %v13912_v58  ;;  %v2665_v58 = vld [vmem:[%s22233_s2 + $0x10] sm:$0xff] }
 0x257   :  { %5881 = vmatpush1.bf16.msra.mxu1 %v13914_v59  ;;  %5796 = vmatprep.subr.bf16.mxu0 %v13929_v6  ;;  %v2673_v59 = vld [vmem:[%s22233_s2 + $0x70] sm:$0xff]  ;;  %v2666_v6 = vld [vmem:[%s22233_s2 + $0x18] sm:$0xff] }
 0x258   :  { %5882 = vmatprep.subr.bf16.mxu1 %v13931_v20  ;;  %v2674_v20 = vld [vmem:[%s22233_s2 + $0x78] sm:$0xff]  ;;  %v13533_v8 = vcombine.high %v2665_v58, %v2673_v59 }
 0x259   :  { %v13535_v23 = vcombine.high %v2666_v6, %v2674_v20  ;;  %v13534_v47 = vcombine.low %v2666_v6, %v2674_v20 }
 0x25a   :  { %5797 = vmatpush1.bf16.msra.mxu0 %v13928_v7  ;;  %v2681_v7 = vld [vmem:[%s22233_s2 + $0xd0] sm:$0xff] }
 0x25b   :  { %5883 = vmatpush1.bf16.msra.mxu1 %v13930_v34  ;;  %5798 = vmatprep.subr.bf16.mxu0 %v13945_v16  ;;  %v2689_v34 = vld [vmem:[%s22233_s2 + $0x130] sm:$0xff]  ;;  %v13532_v16 = vcombine.low %v2665_v58, %v2673_v59 }
 0x25c   :  { %5884 = vmatprep.subr.bf16.mxu1 %v13947_v45  ;;  %v2682_v45 = vld [vmem:[%s22233_s2 + $0xd8] sm:$0xff]  ;;  %v13549_v9 = vcombine.high %v2681_v7, %v2689_v34  ;;  %v13548_v12 = vcombine.low %v2681_v7, %v2689_v34 }
 0x25d   :  { %v13550_v21 = vcombine.low %v2682_v45, %v2690_v46 }
 0x25e   :  { %5799 = vmatpush1.bf16.msra.mxu0 %v13944_v10  ;;  %v2705_v10 = vld [vmem:[%s22233_s2 + $0x1f0] sm:$0xff] }
 0x25f   :  { %5885 = vmatpush1.bf16.msra.mxu1 %v13946_v18  ;;  %5800 = vmatprep.subr.bf16.mxu0 %v13961_v49  ;;  %v13551_v18 = vcombine.high %v2682_v45, %v2690_v46  ;;  %v2698_v49 = vld [vmem:[%s22233_s2 + $0x198] sm:$0xff]  ;;  %v13565_v26 = vcombine.high %v2697_v51, %v2705_v10  ;;  %v13564_v33 = vcombine.low %v2697_v51, %v2705_v10  ;;  %v2793_v46 = vld [vmem:[%s22233_s2 + $0x610] sm:$0xff] }
 0x260   :  { %5886 = vmatprep.subr.bf16.mxu1 %v13963_v19  ;;  %v2706_v19 = vld [vmem:[%s22233_s2 + $0x1f8] sm:$0xff] }
 0x261   :  { %v13567_v25 = vcombine.high %v2698_v49, %v2706_v19  ;;  %v13566_v4 = vcombine.low %v2698_v49, %v2706_v19  ;;  %v2802_v51 = vld [vmem:[%s22233_s2 + $0x678] sm:$0xff] }
 0x262   :  { %5801 = vmatpush1.bf16.msra.mxu0 %v13960_v57  ;;  %v2713_v57 = vld [vmem:[%s22233_s2 + $0x250] sm:$0xff] }
 0x263   :  { %5887 = vmatpush1.bf16.msra.mxu1 %v13962_v63  ;;  %5802 = vmatprep.subr.bf16.mxu0 %v13977_v53  ;;  %v2721_v63 = vld [vmem:[%s22233_s2 + $0x2b0] sm:$0xff]  ;;  %v2714_v53 = vld [vmem:[%s22233_s2 + $0x258] sm:$0xff] }
 0x264   :  { %5888 = vmatprep.subr.bf16.mxu1 %v13979_v0  ;;  %v2722_v0 = vld [vmem:[%s22233_s2 + $0x2b8] sm:$0xff]  ;;  %v13581_v1 = vcombine.high %v2713_v57, %v2721_v63  ;;  %v13580_v41 = vcombine.low %v2713_v57, %v2721_v63 }
 0x265   :  { %v13583_v27 = vcombine.high %v2714_v53, %v2722_v0  ;;  %v13582_v38 = vcombine.low %v2714_v53, %v2722_v0 }
 0x266   :  { %5803 = vmatpush1.bf16.msra.mxu0 %v13976_v28  ;;  %v2729_v28 = vld [vmem:[%s22233_s2 + $0x310] sm:$0xff] }
 0x267   :  { %5889 = vmatpush1.bf16.msra.mxu1 %v13978_v15  ;;  %5804 = vmatprep.subr.bf16.mxu0 %v13993_v31  ;;  %v2737_v15 = vld [vmem:[%s22233_s2 + $0x370] sm:$0xff]  ;;  %v2730_v31 = vld [vmem:[%s22233_s2 + $0x318] sm:$0xff] }
 0x268   :  { %5890 = vmatprep.subr.bf16.mxu1 %v13995_v37  ;;  %v2738_v37 = vld [vmem:[%s22233_s2 + $0x378] sm:$0xff]  ;;  %v13597_v39 = vcombine.high %v2729_v28, %v2737_v15  ;;  %v13596_v3 = vcombine.low %v2729_v28, %v2737_v15 }
 0x269   :  { %v13599_v40 = vcombine.high %v2730_v31, %v2738_v37  ;;  %v13598_v56 = vcombine.low %v2730_v31, %v2738_v37 }
 0x26a   :  { %5805 = vmatpush1.bf16.msra.mxu0 %v13992_v42  ;;  %v2745_v42 = vld [vmem:[%s22233_s2 + $0x3d0] sm:$0xff] }
 0x26b   :  { %5891 = vmatpush1.bf16.msra.mxu1 %v13994_v43  ;;  %5806 = vmatprep.subr.bf16.mxu0 %v14009_v62  ;;  %v2753_v43 = vld [vmem:[%s22233_s2 + $0x430] sm:$0xff]  ;;  %v2746_v62 = vld [vmem:[%s22233_s2 + $0x3d8] sm:$0xff] }
 0x26c   :  { %5892 = vmatprep.subr.bf16.mxu1 %v14011_v2  ;;  %v2754_v2 = vld [vmem:[%s22233_s2 + $0x438] sm:$0xff]  ;;  %v13613_v35 = vcombine.high %v2745_v42, %v2753_v43  ;;  %v13612_v58 = vcombine.low %v2745_v42, %v2753_v43 }
 0x26d   :  { %v13615_v48 = vcombine.high %v2746_v62, %v2754_v2  ;;  %v13614_v59 = vcombine.low %v2746_v62, %v2754_v2 }
 0x26e   :  { %5807 = vmatpush1.bf16.msra.mxu0 %v14008_v50  ;;  %v2761_v50 = vld [vmem:[%s22233_s2 + $0x490] sm:$0xff] }
 0x26f   :  { %5893 = vmatpush1.bf16.msra.mxu1 %v14010_v54  ;;  %5808 = vmatprep.subr.bf16.mxu0 %v14025_v5  ;;  %v2769_v54 = vld [vmem:[%s22233_s2 + $0x4f0] sm:$0xff]  ;;  %v2762_v5 = vld [vmem:[%s22233_s2 + $0x498] sm:$0xff] }
 0x270   :  { %5894 = vmatprep.subr.bf16.mxu1 %v14027_v17  ;;  %v2770_v17 = vld [vmem:[%s22233_s2 + $0x4f8] sm:$0xff]  ;;  %v13629_v6 = vcombine.high %v2761_v50, %v2769_v54  ;;  %v13628_v7 = vcombine.low %v2761_v50, %v2769_v54 }
 0x271   :  { %v13631_v20 = vcombine.high %v2762_v5, %v2770_v17  ;;  %v13630_v34 = vcombine.low %v2762_v5, %v2770_v17 }
 0x272   :  { %5809 = vmatpush1.bf16.msra.mxu0 %v14024_v22  ;;  %v2777_v22 = vld [vmem:[%s22233_s2 + $0x550] sm:$0xff] }
 0x273   :  { %5895 = vmatpush1.bf16.msra.mxu1 %v14026_v60  ;;  %5907 = vmatprep.subr.bf16.mxu0 %v13533_v8  ;;  %v2785_v60 = vld [vmem:[%s22233_s2 + $0x5b0] sm:$0xff]  ;;  %v2778_v8 = vld [vmem:[%s22233_s2 + $0x558] sm:$0xff] }
 0x274   :  { %5993 = vmatprep.subr.bf16.mxu1 %v13535_v23  ;;  %v2786_v23 = vld [vmem:[%s22233_s2 + $0x5b8] sm:$0xff]  ;;  %v13644_v10 = vcombine.low %v2777_v22, %v2785_v60 }
 0x275   :  { %5811 = vmatmul.mubr.bf16.vlgmr.msra.gmra.mrb[40].mxu0 %v16464_v13  ;;  %v13647_v45 = vcombine.high %v2778_v8, %v2786_v23 }
 0x276   :  { %5897 = vmatmul.mubr.bf16.vlgmr.msra.gmra.mrb[40].mxu1 %v16464_v13  ;;  %5908 = vmatpush1.bf16.msra.mxu0 %v13532_v16  ;;  %v13645_v16 = vcombine.high %v2777_v22, %v2785_v60 }
 0x277   :  { %5939 = vmatprep.mubr.bf16.mxu0 %v16458_v11  ;;  %5994 = vmatpush1.bf16.msra.mxu1 %v13534_v47  ;;  %v2801_v47 = vld [vmem:[%s22233_s2 + $0x670] sm:$0xff] }
 0x278   :  { %6025 = vmatprep.mubr.bf16.mxu1 %v16458_v11  ;;  %5909 = vmatprep.subr.bf16.mxu0 %v13549_v9  ;;  %v2794_v9 = vld [vmem:[%s22233_s2 + $0x618] sm:$0xff]  ;;  %v13661_v49 = vcombine.high %v2793_v46, %v2801_v47  ;;  %v13660_v57 = vcombine.low %v2793_v46, %v2801_v47 }
 0x279   :  { %5995 = vmatprep.subr.bf16.mxu1 %v13551_v18  ;;  %v13646_v18 = vcombine.low %v2778_v8, %v2786_v23  ;;  %v13663_v19 = vcombine.high %v2794_v9, %v2802_v51  ;;  %v13662_v63 = vcombine.low %v2794_v9, %v2802_v51 }
 0x27a   :  { %5910 = vmatpush1.bf16.msra.mxu0 %v13548_v12  ;;  %v2809_v12 = vld [vmem:[%s22233_s2 + $0x6d0] sm:$0xff] }
 0x27b   :  { %5996 = vmatpush1.bf16.msra.mxu1 %v13550_v21  ;;  %5911 = vmatprep.subr.bf16.mxu0 %v13565_v26  ;;  %v2817_v21 = vld [vmem:[%s22233_s2 + $0x730] sm:$0xff]  ;;  %v2810_v26 = vld [vmem:[%s22233_s2 + $0x6d8] sm:$0xff] }
 0x27c   :  { %5997 = vmatprep.subr.bf16.mxu1 %v13567_v25  ;;  %v2818_v25 = vld [vmem:[%s22233_s2 + $0x738] sm:$0xff]  ;;  %v13677_v53 = vcombine.high %v2809_v12, %v2817_v21  ;;  %v13676_v28 = vcombine.low %v2809_v12, %v2817_v21 }
 0x27d   :  { %v13679_v0 = vcombine.high %v2810_v26, %v2818_v25  ;;  %v13678_v15 = vcombine.low %v2810_v26, %v2818_v25 }
 0x27e   :  { %5912 = vmatpush1.bf16.msra.mxu0 %v13564_v33  ;;  %v2825_v33 = vld [vmem:[%s22233_s2 + $0x790] sm:$0xff] }
 0x27f   :  { %5998 = vmatpush1.bf16.msra.mxu1 %v13566_v4  ;;  %5913 = vmatprep.subr.bf16.mxu0 %v13581_v1  ;;  %v2833_v4 = vld [vmem:[%s22233_s2 + $0x7f0] sm:$0xff]  ;;  %v2826_v1 = vld [vmem:[%s22233_s2 + $0x798] sm:$0xff] }
 0x280   :  { %5999 = vmatprep.subr.bf16.mxu1 %v13583_v27  ;;  %v2834_v27 = vld [vmem:[%s22233_s2 + $0x7f8] sm:$0xff]  ;;  %v13693_v31 = vcombine.high %v2825_v33, %v2833_v4  ;;  %v13692_v42 = vcombine.low %v2825_v33, %v2833_v4 }
 0x281   :  { %v13695_v37 = vcombine.high %v2826_v1, %v2834_v27  ;;  %v13694_v43 = vcombine.low %v2826_v1, %v2834_v27 }
 0x282   :  { %5914 = vmatpush1.bf16.msra.mxu0 %v13580_v41  ;;  %v2841_v41 = vld [vmem:[%s22233_s2 + $0x850] sm:$0xff] }
 0x283   :  { %6000 = vmatpush1.bf16.msra.mxu1 %v13582_v38  ;;  %5915 = vmatprep.subr.bf16.mxu0 %v13597_v39  ;;  %v2849_v38 = vld [vmem:[%s22233_s2 + $0x8b0] sm:$0xff]  ;;  %v2842_v39 = vld [vmem:[%s22233_s2 + $0x858] sm:$0xff] }
 0x284   :  { %6001 = vmatprep.subr.bf16.mxu1 %v13599_v40  ;;  %v2850_v40 = vld [vmem:[%s22233_s2 + $0x8b8] sm:$0xff]  ;;  %v13709_v62 = vcombine.high %v2841_v41, %v2849_v38  ;;  %v13708_v50 = vcombine.low %v2841_v41, %v2849_v38 }
 0x285   :  { %v13711_v2 = vcombine.high %v2842_v39, %v2850_v40  ;;  %v13710_v54 = vcombine.low %v2842_v39, %v2850_v40  ;;  %v2946_v41 = vld [vmem:[%s22233_s2 + $0xd38] sm:$0xff]  ;;  %v2953_v40 = vld [vmem:[%s22233_s2 + $0xd90] sm:$0xff] }
 0x286   :  { %5916 = vmatpush1.bf16.msra.mxu0 %v13596_v3  ;;  %v2857_v3 = vld [vmem:[%s22233_s2 + $0x910] sm:$0xff] }
 0x287   :  { %6002 = vmatpush1.bf16.msra.mxu1 %v13598_v56  ;;  %5917 = vmatprep.subr.bf16.mxu0 %v13613_v35  ;;  %v2865_v56 = vld [vmem:[%s22233_s2 + $0x970] sm:$0xff]  ;;  %v2858_v35 = vld [vmem:[%s22233_s2 + $0x918] sm:$0xff] }
 0x288   :  { %6003 = vmatprep.subr.bf16.mxu1 %v13615_v48  ;;  %v2866_v48 = vld [vmem:[%s22233_s2 + $0x978] sm:$0xff]  ;;  %v13725_v5 = vcombine.high %v2857_v3, %v2865_v56  ;;  %v13724_v22 = vcombine.low %v2857_v3, %v2865_v56 }
 0x289   :  { %v13727_v17 = vcombine.high %v2858_v35, %v2866_v48  ;;  %v13726_v60 = vcombine.low %v2858_v35, %v2866_v48 }
 0x28a   :  { %5918 = vmatpush1.bf16.msra.mxu0 %v13612_v58  ;;  %v2873_v58 = vld [vmem:[%s22233_s2 + $0x9d0] sm:$0xff] }
 0x28b   :  { %6004 = vmatpush1.bf16.msra.mxu1 %v13614_v59  ;;  %5919 = vmatprep.subr.bf16.mxu0 %v13629_v6  ;;  %v2881_v59 = vld [vmem:[%s22233_s2 + $0xa30] sm:$0xff]  ;;  %v2874_v6 = vld [vmem:[%s22233_s2 + $0x9d8] sm:$0xff] }
 0x28c   :  { %6005 = vmatprep.subr.bf16.mxu1 %v13631_v20  ;;  %v2882_v20 = vld [vmem:[%s22233_s2 + $0xa38] sm:$0xff]  ;;  %v13741_v8 = vcombine.high %v2873_v58, %v2881_v59  ;;  %v13740_v46 = vcombine.low %v2873_v58, %v2881_v59 }
 0x28d   :  { %v13743_v23 = vcombine.high %v2874_v6, %v2882_v20  ;;  %v13742_v47 = vcombine.low %v2874_v6, %v2882_v20 }
 0x28e   :  { %5920 = vmatpush1.bf16.msra.mxu0 %v13628_v7  ;;  %v2889_v7 = vld [vmem:[%s22233_s2 + $0xa90] sm:$0xff] }
 0x28f   :  { %6006 = vmatpush1.bf16.msra.mxu1 %v13630_v34  ;;  %5921 = vmatprep.subr.bf16.mxu0 %v13645_v16  ;;  %v2897_v34 = vld [vmem:[%s22233_s2 + $0xaf0] sm:$0xff]  ;;  %v2890_v16 = vld [vmem:[%s22233_s2 + $0xa98] sm:$0xff] }
 0x290   :  { %6007 = vmatprep.subr.bf16.mxu1 %v13647_v45  ;;  %v2898_v45 = vld [vmem:[%s22233_s2 + $0xaf8] sm:$0xff]  ;;  %v13757_v9 = vcombine.high %v2889_v7, %v2897_v34  ;;  %v13756_v12 = vcombine.low %v2889_v7, %v2897_v34 }
 0x291   :  { %v13759_v51 = vcombine.high %v2890_v16, %v2898_v45  ;;  %v13758_v21 = vcombine.low %v2890_v16, %v2898_v45 }
 0x292   :  { %5922 = vmatpush1.bf16.msra.mxu0 %v13644_v10  ;;  %v2905_v10 = vld [vmem:[%s22233_s2 + $0xb50] sm:$0xff] }
 0x293   :  { %6008 = vmatpush1.bf16.msra.mxu1 %v13646_v18  ;;  %5923 = vmatprep.subr.bf16.mxu0 %v13661_v49  ;;  %v2913_v18 = vld [vmem:[%s22233_s2 + $0xbb0] sm:$0xff]  ;;  %v2906_v49 = vld [vmem:[%s22233_s2 + $0xb58] sm:$0xff] }
 0x294   :  { %6009 = vmatprep.subr.bf16.mxu1 %v13663_v19  ;;  %v2914_v19 = vld [vmem:[%s22233_s2 + $0xbb8] sm:$0xff]  ;;  %v13773_v26 = vcombine.high %v2905_v10, %v2913_v18  ;;  %v13772_v33 = vcombine.low %v2905_v10, %v2913_v18 }
 0x295   :  { %v13775_v25 = vcombine.high %v2906_v49, %v2914_v19  ;;  %v13774_v4 = vcombine.low %v2906_v49, %v2914_v19 }
 0x296   :  { %5924 = vmatpush1.bf16.msra.mxu0 %v13660_v57  ;;  %v2921_v57 = vld [vmem:[%s22233_s2 + $0xc10] sm:$0xff] }
 0x297   :  { %6010 = vmatpush1.bf16.msra.mxu1 %v13662_v63  ;;  %5925 = vmatprep.subr.bf16.mxu0 %v13677_v53  ;;  %v2929_v63 = vld [vmem:[%s22233_s2 + $0xc70] sm:$0xff]  ;;  %v2922_v53 = vld [vmem:[%s22233_s2 + $0xc18] sm:$0xff] }
 0x298   :  { %6011 = vmatprep.subr.bf16.mxu1 %v13679_v0  ;;  %v2930_v0 = vld [vmem:[%s22233_s2 + $0xc78] sm:$0xff]  ;;  %v13789_v1 = vcombine.high %v2921_v57, %v2929_v63 }
 0x299   :  { %v13791_v27 = vcombine.high %v2922_v53, %v2930_v0  ;;  %v13790_v38 = vcombine.low %v2922_v53, %v2930_v0 }
 0x29a   :  { %5926 = vmatpush1.bf16.msra.mxu0 %v13676_v28  ;;  %v2937_v28 = vld [vmem:[%s22233_s2 + $0xcd0] sm:$0xff] }
 0x29b   :  { %6012 = vmatpush1.bf16.msra.mxu1 %v13678_v15  ;;  %5927 = vmatprep.subr.bf16.mxu0 %v13693_v31  ;;  %v2945_v15 = vld [vmem:[%s22233_s2 + $0xd30] sm:$0xff]  ;;  %v13788_v31 = vcombine.low %v2921_v57, %v2929_v63 }
 0x29c   :  { %6013 = vmatprep.subr.bf16.mxu1 %v13695_v37  ;;  %v2938_v37 = vld [vmem:[%s22233_s2 + $0xcd8] sm:$0xff]  ;;  %v13805_v39 = vcombine.high %v2937_v28, %v2945_v15  ;;  %v13804_v3 = vcombine.low %v2937_v28, %v2945_v15 }
 0x29d   :  { %v13806_v56 = vcombine.low %v2938_v37, %v2946_v41 }
 0x29e   :  { %5928 = vmatpush1.bf16.msra.mxu0 %v13692_v42  ;;  %v2961_v42 = vld [vmem:[%s22233_s2 + $0xdf0] sm:$0xff] }
 0x29f   :  { %6014 = vmatpush1.bf16.msra.mxu1 %v13694_v43  ;;  %5929 = vmatprep.subr.bf16.mxu0 %v13709_v62  ;;  %v13807_v43 = vcombine.high %v2938_v37, %v2946_v41  ;;  %v2954_v62 = vld [vmem:[%s22233_s2 + $0xd98] sm:$0xff]  ;;  %v13821_v35 = vcombine.high %v2953_v40, %v2961_v42  ;;  %v13820_v58 = vcombine.low %v2953_v40, %v2961_v42  ;;  %v3049_v41 = vld [vmem:[%s22233_s2 + $0x1210] sm:$0xff] }
 0x2a0   :  { %6015 = vmatprep.subr.bf16.mxu1 %v13711_v2  ;;  %v2962_v2 = vld [vmem:[%s22233_s2 + $0xdf8] sm:$0xff] }
 0x2a1   :  { %v13823_v48 = vcombine.high %v2954_v62, %v2962_v2  ;;  %v13822_v59 = vcombine.low %v2954_v62, %v2962_v2  ;;  %v3058_v40 = vld [vmem:[%s22233_s2 + $0x1278] sm:$0xff] }
 0x2a2   :  { %5930 = vmatpush1.bf16.msra.mxu0 %v13708_v50  ;;  %v2969_v50 = vld [vmem:[%s22233_s2 + $0xe50] sm:$0xff] }
 0x2a3   :  { %6016 = vmatpush1.bf16.msra.mxu1 %v13710_v54  ;;  %5931 = vmatprep.subr.bf16.mxu0 %v13725_v5  ;;  %v2977_v54 = vld [vmem:[%s22233_s2 + $0xeb0] sm:$0xff]  ;;  %v2970_v5 = vld [vmem:[%s22233_s2 + $0xe58] sm:$0xff] }
 0x2a4   :  { %6017 = vmatprep.subr.bf16.mxu1 %v13727_v17  ;;  %v2978_v17 = vld [vmem:[%s22233_s2 + $0xeb8] sm:$0xff]  ;;  %v13837_v6 = vcombine.high %v2969_v50, %v2977_v54  ;;  %v13836_v7 = vcombine.low %v2969_v50, %v2977_v54 }
 0x2a5   :  { %v13839_v20 = vcombine.high %v2970_v5, %v2978_v17  ;;  %v13838_v34 = vcombine.low %v2970_v5, %v2978_v17 }
 0x2a6   :  { %5932 = vmatpush1.bf16.msra.mxu0 %v13724_v22  ;;  %v2985_v22 = vld [vmem:[%s22233_s2 + $0xf10] sm:$0xff] }
 0x2a7   :  { %6018 = vmatpush1.bf16.msra.mxu1 %v13726_v60  ;;  %5933 = vmatprep.subr.bf16.mxu0 %v13741_v8  ;;  %v2993_v60 = vld [vmem:[%s22233_s2 + $0xf70] sm:$0xff]  ;;  %v2986_v8 = vld [vmem:[%s22233_s2 + $0xf18] sm:$0xff] }
 0x2a8   :  { %6019 = vmatprep.subr.bf16.mxu1 %v13743_v23  ;;  %v2994_v23 = vld [vmem:[%s22233_s2 + $0xf78] sm:$0xff]  ;;  %v13853_v16 = vcombine.high %v2985_v22, %v2993_v60  ;;  %v13852_v10 = vcombine.low %v2985_v22, %v2993_v60 }
 0x2a9   :  { %v13855_v45 = vcombine.high %v2986_v8, %v2994_v23  ;;  %v13854_v18 = vcombine.low %v2986_v8, %v2994_v23 }
 0x2aa   :  { %5934 = vmatpush1.bf16.msra.mxu0 %v13740_v46  ;;  %v3001_v46 = vld [vmem:[%s22233_s2 + $0xfd0] sm:$0xff] }
 0x2ab   :  { %6020 = vmatpush1.bf16.msra.mxu1 %v13742_v47  ;;  %5935 = vmatprep.subr.bf16.mxu0 %v13757_v9  ;;  %v3009_v47 = vld [vmem:[%s22233_s2 + $0x1030] sm:$0xff]  ;;  %v3002_v9 = vld [vmem:[%s22233_s2 + $0xfd8] sm:$0xff] }
 0x2ac   :  { %6021 = vmatprep.subr.bf16.mxu1 %v13759_v51  ;;  %v3010_v51 = vld [vmem:[%s22233_s2 + $0x1038] sm:$0xff]  ;;  %v13869_v49 = vcombine.high %v3001_v46, %v3009_v47  ;;  %v13868_v57 = vcombine.low %v3001_v46, %v3009_v47 }
 0x2ad   :  { %v13871_v19 = vcombine.high %v3002_v9, %v3010_v51  ;;  %v13870_v63 = vcombine.low %v3002_v9, %v3010_v51 }
 0x2ae   :  { %5936 = vmatpush1.bf16.msra.mxu0 %v13756_v12  ;;  %v3017_v12 = vld [vmem:[%s22233_s2 + $0x1090] sm:$0xff] }
 0x2af   :  { %6022 = vmatpush1.bf16.msra.mxu1 %v13758_v21  ;;  %5937 = vmatprep.subr.bf16.mxu0 %v13773_v26  ;;  %v3025_v21 = vld [vmem:[%s22233_s2 + $0x10f0] sm:$0xff]  ;;  %v3018_v26 = vld [vmem:[%s22233_s2 + $0x1098] sm:$0xff] }
 0x2b0   :  { %6023 = vmatprep.subr.bf16.mxu1 %v13775_v25  ;;  %v3026_v25 = vld [vmem:[%s22233_s2 + $0x10f8] sm:$0xff]  ;;  %v13885_v53 = vcombine.high %v3017_v12, %v3025_v21  ;;  %v13884_v28 = vcombine.low %v3017_v12, %v3025_v21 }
 0x2b1   :  { %v13887_v0 = vcombine.high %v3018_v26, %v3026_v25  ;;  %v13886_v15 = vcombine.low %v3018_v26, %v3026_v25 }
 0x2b2   :  { %5938 = vmatpush1.bf16.msra.mxu0 %v13772_v33  ;;  %v3033_v33 = vld [vmem:[%s22233_s2 + $0x1150] sm:$0xff] }
 0x2b3   :  { %6024 = vmatpush1.bf16.msra.mxu1 %v13774_v4  ;;  %5950 = vmatprep.subr.bf16.mxu0 %v13789_v1  ;;  %v3041_v4 = vld [vmem:[%s22233_s2 + $0x11b0] sm:$0xff]  ;;  %v3034_v1 = vld [vmem:[%s22233_s2 + $0x1158] sm:$0xff] }
 0x2b4   :  { %6036 = vmatprep.subr.bf16.mxu1 %v13791_v27  ;;  %v3042_v27 = vld [vmem:[%s22233_s2 + $0x11b8] sm:$0xff]  ;;  %v13900_v42 = vcombine.low %v3033_v33, %v3041_v4 }
 0x2b5   :  { %5940 = vmatmul.mubr.bf16.vlgmr.msra.gmra.mrb[44].mxu0 %v16456_v36  ;;  %v13903_v37 = vcombine.high %v3034_v1, %v3042_v27 }
 0x2b6   :  { %6026 = vmatmul.mubr.bf16.vlgmr.msra.gmra.mrb[44].mxu1 %v16456_v36  ;;  %5951 = vmatpush1.bf16.msra.mxu0 %v13788_v31  ;;  %v13901_v31 = vcombine.high %v3033_v33, %v3041_v4 }
 0x2b7   :  { %5982 = vmatprep.mubr.bf16.mxu0 %v16474_v55  ;;  %6037 = vmatpush1.bf16.msra.mxu1 %v13790_v38  ;;  %v3057_v38 = vld [vmem:[%s22233_s2 + $0x1270] sm:$0xff] }
 0x2b8   :  { %6068 = vmatprep.mubr.bf16.mxu1 %v16474_v55  ;;  %5952 = vmatprep.subr.bf16.mxu0 %v13805_v39  ;;  %v3050_v39 = vld [vmem:[%s22233_s2 + $0x1218] sm:$0xff]  ;;  %v13917_v62 = vcombine.high %v3049_v41, %v3057_v38  ;;  %v13916_v50 = vcombine.low %v3049_v41, %v3057_v38 }
 0x2b9   :  { %6038 = vmatprep.subr.bf16.mxu1 %v13807_v43  ;;  %v13902_v43 = vcombine.low %v3034_v1, %v3042_v27  ;;  %v13919_v2 = vcombine.high %v3050_v39, %v3058_v40  ;;  %v13918_v54 = vcombine.low %v3050_v39, %v3058_v40 }
 0x2ba   :  { %5953 = vmatpush1.bf16.msra.mxu0 %v13804_v3  ;;  %v3065_v3 = vld [vmem:[%s22233_s2 + $0x12d0] sm:$0xff] }
 0x2bb   :  { %6039 = vmatpush1.bf16.msra.mxu1 %v13806_v56  ;;  %5954 = vmatprep.subr.bf16.mxu0 %v13821_v35  ;;  %v3073_v56 = vld [vmem:[%s22233_s2 + $0x1330] sm:$0xff]  ;;  %v3066_v35 = vld [vmem:[%s22233_s2 + $0x12d8] sm:$0xff] }
 0x2bc   :  { %6040 = vmatprep.subr.bf16.mxu1 %v13823_v48  ;;  %v3074_v48 = vld [vmem:[%s22233_s2 + $0x1338] sm:$0xff]  ;;  %v13933_v5 = vcombine.high %v3065_v3, %v3073_v56  ;;  %v13932_v22 = vcombine.low %v3065_v3, %v3073_v56 }
 0x2bd   :  { %v13935_v17 = vcombine.high %v3066_v35, %v3074_v48  ;;  %v13934_v60 = vcombine.low %v3066_v35, %v3074_v48 }
 0x2be   :  { %5955 = vmatpush1.bf16.msra.mxu0 %v13820_v58  ;;  %v3081_v58 = vld [vmem:[%s22233_s2 + $0x1390] sm:$0xff] }
 0x2bf   :  { %6041 = vmatpush1.bf16.msra.mxu1 %v13822_v59  ;;  %5956 = vmatprep.subr.bf16.mxu0 %v13837_v6  ;;  %v3089_v59 = vld [vmem:[%s22233_s2 + $0x13f0] sm:$0xff]  ;;  %v3082_v6 = vld [vmem:[%s22233_s2 + $0x1398] sm:$0xff] }
 0x2c0   :  { %6042 = vmatprep.subr.bf16.mxu1 %v13839_v20  ;;  %v3090_v20 = vld [vmem:[%s22233_s2 + $0x13f8] sm:$0xff]  ;;  %v13949_v8 = vcombine.high %v3081_v58, %v3089_v59  ;;  %v13948_v46 = vcombine.low %v3081_v58, %v3089_v59 }
 0x2c1   :  { %v13951_v23 = vcombine.high %v3082_v6, %v3090_v20  ;;  %v13950_v47 = vcombine.low %v3082_v6, %v3090_v20 }
 0x2c2   :  { %5957 = vmatpush1.bf16.msra.mxu0 %v13836_v7  ;;  %v3097_v7 = vld [vmem:[%s22233_s2 + $0x1450] sm:$0xff] }
 0x2c3   :  { %6043 = vmatpush1.bf16.msra.mxu1 %v13838_v34  ;;  %5958 = vmatprep.subr.bf16.mxu0 %v13853_v16  ;;  %v3105_v34 = vld [vmem:[%s22233_s2 + $0x14b0] sm:$0xff]  ;;  %v3098_v16 = vld [vmem:[%s22233_s2 + $0x1458] sm:$0xff] }
 0x2c4   :  { %6044 = vmatprep.subr.bf16.mxu1 %v13855_v45  ;;  %v3106_v45 = vld [vmem:[%s22233_s2 + $0x14b8] sm:$0xff]  ;;  %v13965_v9 = vcombine.high %v3097_v7, %v3105_v34  ;;  %v13964_v12 = vcombine.low %v3097_v7, %v3105_v34  ;;  %v2692_v7 = vld [vmem:[%s22233_s2 + $0x148] sm:$0xff] }
 0x2c5   :  { %v13967_v51 = vcombine.high %v3098_v16, %v3106_v45  ;;  %v13966_v21 = vcombine.low %v3098_v16, %v3106_v45  ;;  %v2699_v45 = vld [vmem:[%s22233_s2 + $0x1a0] sm:$0xff] }
 0x2c6   :  { %5959 = vmatpush1.bf16.msra.mxu0 %v13852_v10  ;;  %v3113_v10 = vld [vmem:[%s22233_s2 + $0x1510] sm:$0xff] }
 0x2c7   :  { %6045 = vmatpush1.bf16.msra.mxu1 %v13854_v18  ;;  %5960 = vmatprep.subr.bf16.mxu0 %v13869_v49  ;;  %v3121_v18 = vld [vmem:[%s22233_s2 + $0x1570] sm:$0xff]  ;;  %v3114_v49 = vld [vmem:[%s22233_s2 + $0x1518] sm:$0xff] }
 0x2c8   :  { %6046 = vmatprep.subr.bf16.mxu1 %v13871_v19  ;;  %v3122_v19 = vld [vmem:[%s22233_s2 + $0x1578] sm:$0xff]  ;;  %v13981_v26 = vcombine.high %v3113_v10, %v3121_v18  ;;  %v13980_v33 = vcombine.low %v3113_v10, %v3121_v18 }
 0x2c9   :  { %v13983_v25 = vcombine.high %v3114_v49, %v3122_v19  ;;  %v13982_v4 = vcombine.low %v3114_v49, %v3122_v19 }
 0x2ca   :  { %5961 = vmatpush1.bf16.msra.mxu0 %v13868_v57  ;;  %v3129_v57 = vld [vmem:[%s22233_s2 + $0x15d0] sm:$0xff] }
 0x2cb   :  { %6047 = vmatpush1.bf16.msra.mxu1 %v13870_v63  ;;  %5962 = vmatprep.subr.bf16.mxu0 %v13885_v53  ;;  %v3137_v63 = vld [vmem:[%s22233_s2 + $0x1630] sm:$0xff]  ;;  %v3130_v53 = vld [vmem:[%s22233_s2 + $0x15d8] sm:$0xff] }
 0x2cc   :  { %6048 = vmatprep.subr.bf16.mxu1 %v13887_v0  ;;  %v3138_v0 = vld [vmem:[%s22233_s2 + $0x1638] sm:$0xff]  ;;  %v13997_v1 = vcombine.high %v3129_v57, %v3137_v63  ;;  %v13996_v41 = vcombine.low %v3129_v57, %v3137_v63 }
 0x2cd   :  { %v13999_v27 = vcombine.high %v3130_v53, %v3138_v0  ;;  %v13998_v38 = vcombine.low %v3130_v53, %v3138_v0 }
 0x2ce   :  { %5963 = vmatpush1.bf16.msra.mxu0 %v13884_v28  ;;  %v3145_v28 = vld [vmem:[%s22233_s2 + $0x1690] sm:$0xff] }
 0x2cf   :  { %6049 = vmatpush1.bf16.msra.mxu1 %v13886_v15  ;;  %5964 = vmatprep.subr.bf16.mxu0 %v13901_v31  ;;  %v3153_v15 = vld [vmem:[%s22233_s2 + $0x16f0] sm:$0xff]  ;;  %v3146_v31 = vld [vmem:[%s22233_s2 + $0x1698] sm:$0xff] }
 0x2d0   :  { %6050 = vmatprep.subr.bf16.mxu1 %v13903_v37  ;;  %v3154_v37 = vld [vmem:[%s22233_s2 + $0x16f8] sm:$0xff]  ;;  %v14013_v39 = vcombine.high %v3145_v28, %v3153_v15  ;;  %v14012_v3 = vcombine.low %v3145_v28, %v3153_v15 }
 0x2d1   :  { %v14015_v40 = vcombine.high %v3146_v31, %v3154_v37  ;;  %v14014_v56 = vcombine.low %v3146_v31, %v3154_v37 }
 0x2d2   :  { %5965 = vmatpush1.bf16.msra.mxu0 %v13900_v42  ;;  %v3161_v42 = vld [vmem:[%s22233_s2 + $0x1750] sm:$0xff] }
 0x2d3   :  { %6051 = vmatpush1.bf16.msra.mxu1 %v13902_v43  ;;  %5966 = vmatprep.subr.bf16.mxu0 %v13917_v62  ;;  %v3169_v43 = vld [vmem:[%s22233_s2 + $0x17b0] sm:$0xff]  ;;  %v3162_v62 = vld [vmem:[%s22233_s2 + $0x1758] sm:$0xff] }
 0x2d4   :  { %6052 = vmatprep.subr.bf16.mxu1 %v13919_v2  ;;  %v3170_v2 = vld [vmem:[%s22233_s2 + $0x17b8] sm:$0xff]  ;;  %v14029_v35 = vcombine.high %v3161_v42, %v3169_v43  ;;  %v14028_v58 = vcombine.low %v3161_v42, %v3169_v43 }
 0x2d5   :  { %v14031_v48 = vcombine.high %v3162_v62, %v3170_v2  ;;  %v14030_v59 = vcombine.low %v3162_v62, %v3170_v2 }
 0x2d6   :  { %5967 = vmatpush1.bf16.msra.mxu0 %v13916_v50  ;;  %v2667_v50 = vld [vmem:[%s22233_s2 + $0x20] sm:$0xff] }
 0x2d7   :  { %6053 = vmatpush1.bf16.msra.mxu1 %v13918_v54  ;;  %5968 = vmatprep.subr.bf16.mxu0 %v13933_v5  ;;  %v2675_v54 = vld [vmem:[%s22233_s2 + $0x80] sm:$0xff]  ;;  %v2668_v5 = vld [vmem:[%s22233_s2 + $0x28] sm:$0xff] }
 0x2d8   :  { %6054 = vmatprep.subr.bf16.mxu1 %v13935_v17  ;;  %v2676_v17 = vld [vmem:[%s22233_s2 + $0x88] sm:$0xff]  ;;  %v13537_v6 = vcombine.high %v2667_v50, %v2675_v54 }
 0x2d9   :  { %v13539_v20 = vcombine.high %v2668_v5, %v2676_v17  ;;  %v13538_v34 = vcombine.low %v2668_v5, %v2676_v17 }
 0x2da   :  { %5969 = vmatpush1.bf16.msra.mxu0 %v13932_v22  ;;  %v2683_v22 = vld [vmem:[%s22233_s2 + $0xe0] sm:$0xff] }
 0x2db   :  { %6055 = vmatpush1.bf16.msra.mxu1 %v13934_v60  ;;  %5970 = vmatprep.subr.bf16.mxu0 %v13949_v8  ;;  %v2691_v60 = vld [vmem:[%s22233_s2 + $0x140] sm:$0xff]  ;;  %v13536_v8 = vcombine.low %v2667_v50, %v2675_v54 }
 0x2dc   :  { %6056 = vmatprep.subr.bf16.mxu1 %v13951_v23  ;;  %v2684_v23 = vld [vmem:[%s22233_s2 + $0xe8] sm:$0xff]  ;;  %v13553_v16 = vcombine.high %v2683_v22, %v2691_v60  ;;  %v13552_v10 = vcombine.low %v2683_v22, %v2691_v60 }
 0x2dd   :  { %v13554_v18 = vcombine.low %v2684_v23, %v2692_v7 }
 0x2de   :  { %5971 = vmatpush1.bf16.msra.mxu0 %v13948_v46  ;;  %v2707_v46 = vld [vmem:[%s22233_s2 + $0x200] sm:$0xff] }
 0x2df   :  { %6057 = vmatpush1.bf16.msra.mxu1 %v13950_v47  ;;  %5972 = vmatprep.subr.bf16.mxu0 %v13965_v9  ;;  %v13555_v47 = vcombine.high %v2684_v23, %v2692_v7  ;;  %v2700_v9 = vld [vmem:[%s22233_s2 + $0x1a8] sm:$0xff]  ;;  %v13569_v49 = vcombine.high %v2699_v45, %v2707_v46  ;;  %v13568_v57 = vcombine.low %v2699_v45, %v2707_v46  ;;  %v2795_v7 = vld [vmem:[%s22233_s2 + $0x620] sm:$0xff] }
 0x2e0   :  { %6058 = vmatprep.subr.bf16.mxu1 %v13967_v51  ;;  %v2708_v51 = vld [vmem:[%s22233_s2 + $0x208] sm:$0xff] }
 0x2e1   :  { %v13571_v19 = vcombine.high %v2700_v9, %v2708_v51  ;;  %v13570_v63 = vcombine.low %v2700_v9, %v2708_v51  ;;  %v2804_v45 = vld [vmem:[%s22233_s2 + $0x688] sm:$0xff] }
 0x2e2   :  { %5973 = vmatpush1.bf16.msra.mxu0 %v13964_v12  ;;  %v2715_v12 = vld [vmem:[%s22233_s2 + $0x260] sm:$0xff] }
 0x2e3   :  { %6059 = vmatpush1.bf16.msra.mxu1 %v13966_v21  ;;  %5974 = vmatprep.subr.bf16.mxu0 %v13981_v26  ;;  %v2723_v21 = vld [vmem:[%s22233_s2 + $0x2c0] sm:$0xff]  ;;  %v2716_v26 = vld [vmem:[%s22233_s2 + $0x268] sm:$0xff] }
 0x2e4   :  { %6060 = vmatprep.subr.bf16.mxu1 %v13983_v25  ;;  %v2724_v25 = vld [vmem:[%s22233_s2 + $0x2c8] sm:$0xff]  ;;  %v13585_v53 = vcombine.high %v2715_v12, %v2723_v21  ;;  %v13584_v28 = vcombine.low %v2715_v12, %v2723_v21 }
 0x2e5   :  { %v13587_v0 = vcombine.high %v2716_v26, %v2724_v25  ;;  %v13586_v15 = vcombine.low %v2716_v26, %v2724_v25 }
 0x2e6   :  { %5975 = vmatpush1.bf16.msra.mxu0 %v13980_v33  ;;  %v2731_v33 = vld [vmem:[%s22233_s2 + $0x320] sm:$0xff] }
 0x2e7   :  { %6061 = vmatpush1.bf16.msra.mxu1 %v13982_v4  ;;  %5976 = vmatprep.subr.bf16.mxu0 %v13997_v1  ;;  %v2739_v4 = vld [vmem:[%s22233_s2 + $0x380] sm:$0xff]  ;;  %v2732_v1 = vld [vmem:[%s22233_s2 + $0x328] sm:$0xff] }
 0x2e8   :  { %6062 = vmatprep.subr.bf16.mxu1 %v13999_v27  ;;  %v2740_v27 = vld [vmem:[%s22233_s2 + $0x388] sm:$0xff]  ;;  %v13601_v31 = vcombine.high %v2731_v33, %v2739_v4  ;;  %v13600_v42 = vcombine.low %v2731_v33, %v2739_v4 }
 0x2e9   :  { %v13603_v37 = vcombine.high %v2732_v1, %v2740_v27  ;;  %v13602_v43 = vcombine.low %v2732_v1, %v2740_v27 }
 0x2ea   :  { %5977 = vmatpush1.bf16.msra.mxu0 %v13996_v41  ;;  %v2747_v41 = vld [vmem:[%s22233_s2 + $0x3e0] sm:$0xff] }
 0x2eb   :  { %6063 = vmatpush1.bf16.msra.mxu1 %v13998_v38  ;;  %5978 = vmatprep.subr.bf16.mxu0 %v14013_v39  ;;  %v2755_v38 = vld [vmem:[%s22233_s2 + $0x440] sm:$0xff]  ;;  %v2748_v39 = vld [vmem:[%s22233_s2 + $0x3e8] sm:$0xff] }
 0x2ec   :  { %6064 = vmatprep.subr.bf16.mxu1 %v14015_v40  ;;  %v2756_v40 = vld [vmem:[%s22233_s2 + $0x448] sm:$0xff]  ;;  %v13617_v62 = vcombine.high %v2747_v41, %v2755_v38  ;;  %v13616_v50 = vcombine.low %v2747_v41, %v2755_v38 }
 0x2ed   :  { %v13619_v2 = vcombine.high %v2748_v39, %v2756_v40  ;;  %v13618_v54 = vcombine.low %v2748_v39, %v2756_v40 }
 0x2ee   :  { %5979 = vmatpush1.bf16.msra.mxu0 %v14012_v3  ;;  %v2763_v3 = vld [vmem:[%s22233_s2 + $0x4a0] sm:$0xff] }
 0x2ef   :  { %6065 = vmatpush1.bf16.msra.mxu1 %v14014_v56  ;;  %5980 = vmatprep.subr.bf16.mxu0 %v14029_v35  ;;  %v2771_v56 = vld [vmem:[%s22233_s2 + $0x500] sm:$0xff]  ;;  %v2764_v35 = vld [vmem:[%s22233_s2 + $0x4a8] sm:$0xff] }
 0x2f0   :  { %6066 = vmatprep.subr.bf16.mxu1 %v14031_v48  ;;  %v2772_v48 = vld [vmem:[%s22233_s2 + $0x508] sm:$0xff]  ;;  %v13633_v5 = vcombine.high %v2763_v3, %v2771_v56  ;;  %v13632_v22 = vcombine.low %v2763_v3, %v2771_v56 }
 0x2f1   :  { %v13635_v17 = vcombine.high %v2764_v35, %v2772_v48  ;;  %v13634_v60 = vcombine.low %v2764_v35, %v2772_v48 }
 0x2f2   :  { %5981 = vmatpush1.bf16.msra.mxu0 %v14028_v58  ;;  %v2779_v58 = vld [vmem:[%s22233_s2 + $0x560] sm:$0xff] }
 0x2f3   :  { %6067 = vmatpush1.bf16.msra.mxu1 %v14030_v59  ;;  %6079 = vmatprep.subr.bf16.mxu0 %v13537_v6  ;;  %v2787_v59 = vld [vmem:[%s22233_s2 + $0x5c0] sm:$0xff]  ;;  %v2780_v6 = vld [vmem:[%s22233_s2 + $0x568] sm:$0xff] }
 0x2f4   :  { %6165 = vmatprep.subr.bf16.mxu1 %v13539_v20  ;;  %v2788_v20 = vld [vmem:[%s22233_s2 + $0x5c8] sm:$0xff]  ;;  %v13648_v46 = vcombine.low %v2779_v58, %v2787_v59 }
 0x2f5   :  { %5983 = vmatmul.mubr.bf16.vlgmr.msra.gmra.mrb[44].mxu0 %v16464_v13  ;;  %v13651_v23 = vcombine.high %v2780_v6, %v2788_v20 }
 0x2f6   :  { %6069 = vmatmul.mubr.bf16.vlgmr.msra.gmra.mrb[44].mxu1 %v16464_v13  ;;  %6080 = vmatpush1.bf16.msra.mxu0 %v13536_v8  ;;  %v13649_v8 = vcombine.high %v2779_v58, %v2787_v59 }
 0x2f7   :  { %6111 = vmatprep.mubr.bf16.mxu0 %v16458_v11  ;;  %6166 = vmatpush1.bf16.msra.mxu1 %v13538_v34  ;;  %v2803_v34 = vld [vmem:[%s22233_s2 + $0x680] sm:$0xff] }
 0x2f8   :  { %6197 = vmatprep.mubr.bf16.mxu1 %v16458_v11  ;;  %6081 = vmatprep.subr.bf16.mxu0 %v13553_v16  ;;  %v2796_v16 = vld [vmem:[%s22233_s2 + $0x628] sm:$0xff]  ;;  %v13665_v9 = vcombine.high %v2795_v7, %v2803_v34  ;;  %v13664_v12 = vcombine.low %v2795_v7, %v2803_v34 }
 0x2f9   :  { %6167 = vmatprep.subr.bf16.mxu1 %v13555_v47  ;;  %v13650_v47 = vcombine.low %v2780_v6, %v2788_v20  ;;  %v13667_v51 = vcombine.high %v2796_v16, %v2804_v45  ;;  %v13666_v21 = vcombine.low %v2796_v16, %v2804_v45 }
 0x2fa   :  { %6082 = vmatpush1.bf16.msra.mxu0 %v13552_v10  ;;  %v2811_v10 = vld [vmem:[%s22233_s2 + $0x6e0] sm:$0xff] }
 0x2fb   :  { %6168 = vmatpush1.bf16.msra.mxu1 %v13554_v18  ;;  %6083 = vmatprep.subr.bf16.mxu0 %v13569_v49  ;;  %v2819_v18 = vld [vmem:[%s22233_s2 + $0x740] sm:$0xff]  ;;  %v2812_v49 = vld [vmem:[%s22233_s2 + $0x6e8] sm:$0xff] }
 0x2fc   :  { %6169 = vmatprep.subr.bf16.mxu1 %v13571_v19  ;;  %v2820_v19 = vld [vmem:[%s22233_s2 + $0x748] sm:$0xff]  ;;  %v13681_v26 = vcombine.high %v2811_v10, %v2819_v18  ;;  %v13680_v33 = vcombine.low %v2811_v10, %v2819_v18 }
 0x2fd   :  { %v13683_v25 = vcombine.high %v2812_v49, %v2820_v19  ;;  %v13682_v4 = vcombine.low %v2812_v49, %v2820_v19 }
 0x2fe   :  { %6084 = vmatpush1.bf16.msra.mxu0 %v13568_v57  ;;  %v2827_v57 = vld [vmem:[%s22233_s2 + $0x7a0] sm:$0xff] }
 0x2ff   :  { %6170 = vmatpush1.bf16.msra.mxu1 %v13570_v63  ;;  %6085 = vmatprep.subr.bf16.mxu0 %v13585_v53  ;;  %v2835_v63 = vld [vmem:[%s22233_s2 + $0x800] sm:$0xff]  ;;  %v2828_v53 = vld [vmem:[%s22233_s2 + $0x7a8] sm:$0xff] }
 0x300   :  { %6171 = vmatprep.subr.bf16.mxu1 %v13587_v0  ;;  %v2836_v0 = vld [vmem:[%s22233_s2 + $0x808] sm:$0xff]  ;;  %v13697_v1 = vcombine.high %v2827_v57, %v2835_v63  ;;  %v13696_v41 = vcombine.low %v2827_v57, %v2835_v63 }
 0x301   :  { %v13699_v27 = vcombine.high %v2828_v53, %v2836_v0  ;;  %v13698_v38 = vcombine.low %v2828_v53, %v2836_v0 }
 0x302   :  { %6086 = vmatpush1.bf16.msra.mxu0 %v13584_v28  ;;  %v2843_v28 = vld [vmem:[%s22233_s2 + $0x860] sm:$0xff] }
 0x303   :  { %6172 = vmatpush1.bf16.msra.mxu1 %v13586_v15  ;;  %6087 = vmatprep.subr.bf16.mxu0 %v13601_v31  ;;  %v2851_v15 = vld [vmem:[%s22233_s2 + $0x8c0] sm:$0xff]  ;;  %v2844_v31 = vld [vmem:[%s22233_s2 + $0x868] sm:$0xff] }
 0x304   :  { %6173 = vmatprep.subr.bf16.mxu1 %v13603_v37  ;;  %v2852_v37 = vld [vmem:[%s22233_s2 + $0x8c8] sm:$0xff]  ;;  %v13713_v39 = vcombine.high %v2843_v28, %v2851_v15  ;;  %v13712_v3 = vcombine.low %v2843_v28, %v2851_v15 }
 0x305   :  { %v13715_v40 = vcombine.high %v2844_v31, %v2852_v37  ;;  %v13714_v56 = vcombine.low %v2844_v31, %v2852_v37  ;;  %v2948_v28 = vld [vmem:[%s22233_s2 + $0xd48] sm:$0xff]  ;;  %v2955_v37 = vld [vmem:[%s22233_s2 + $0xda0] sm:$0xff] }
 0x306   :  { %6088 = vmatpush1.bf16.msra.mxu0 %v13600_v42  ;;  %v2859_v42 = vld [vmem:[%s22233_s2 + $0x920] sm:$0xff] }
 0x307   :  { %6174 = vmatpush1.bf16.msra.mxu1 %v13602_v43  ;;  %6089 = vmatprep.subr.bf16.mxu0 %v13617_v62  ;;  %v2867_v43 = vld [vmem:[%s22233_s2 + $0x980] sm:$0xff]  ;;  %v2860_v62 = vld [vmem:[%s22233_s2 + $0x928] sm:$0xff] }
 0x308   :  { %6175 = vmatprep.subr.bf16.mxu1 %v13619_v2  ;;  %v2868_v2 = vld [vmem:[%s22233_s2 + $0x988] sm:$0xff]  ;;  %v13729_v35 = vcombine.high %v2859_v42, %v2867_v43  ;;  %v13728_v58 = vcombine.low %v2859_v42, %v2867_v43 }
 0x309   :  { %v13731_v48 = vcombine.high %v2860_v62, %v2868_v2  ;;  %v13730_v59 = vcombine.low %v2860_v62, %v2868_v2 }
 0x30a   :  { %6090 = vmatpush1.bf16.msra.mxu0 %v13616_v50  ;;  %v2875_v50 = vld [vmem:[%s22233_s2 + $0x9e0] sm:$0xff] }
 0x30b   :  { %6176 = vmatpush1.bf16.msra.mxu1 %v13618_v54  ;;  %6091 = vmatprep.subr.bf16.mxu0 %v13633_v5  ;;  %v2883_v54 = vld [vmem:[%s22233_s2 + $0xa40] sm:$0xff]  ;;  %v2876_v5 = vld [vmem:[%s22233_s2 + $0x9e8] sm:$0xff] }
 0x30c   :  { %6177 = vmatprep.subr.bf16.mxu1 %v13635_v17  ;;  %v2884_v17 = vld [vmem:[%s22233_s2 + $0xa48] sm:$0xff]  ;;  %v13745_v6 = vcombine.high %v2875_v50, %v2883_v54  ;;  %v13744_v7 = vcombine.low %v2875_v50, %v2883_v54 }
 0x30d   :  { %v13747_v20 = vcombine.high %v2876_v5, %v2884_v17  ;;  %v13746_v34 = vcombine.low %v2876_v5, %v2884_v17 }
 0x30e   :  { %6092 = vmatpush1.bf16.msra.mxu0 %v13632_v22  ;;  %v2891_v22 = vld [vmem:[%s22233_s2 + $0xaa0] sm:$0xff] }
 0x30f   :  { %6178 = vmatpush1.bf16.msra.mxu1 %v13634_v60  ;;  %6093 = vmatprep.subr.bf16.mxu0 %v13649_v8  ;;  %v2899_v60 = vld [vmem:[%s22233_s2 + $0xb00] sm:$0xff]  ;;  %v2892_v8 = vld [vmem:[%s22233_s2 + $0xaa8] sm:$0xff] }
 0x310   :  { %6179 = vmatprep.subr.bf16.mxu1 %v13651_v23  ;;  %v2900_v23 = vld [vmem:[%s22233_s2 + $0xb08] sm:$0xff]  ;;  %v13761_v16 = vcombine.high %v2891_v22, %v2899_v60  ;;  %v13760_v10 = vcombine.low %v2891_v22, %v2899_v60 }
 0x311   :  { %v13763_v45 = vcombine.high %v2892_v8, %v2900_v23  ;;  %v13762_v18 = vcombine.low %v2892_v8, %v2900_v23 }
 0x312   :  { %6094 = vmatpush1.bf16.msra.mxu0 %v13648_v46  ;;  %v2907_v46 = vld [vmem:[%s22233_s2 + $0xb60] sm:$0xff] }
 0x313   :  { %6180 = vmatpush1.bf16.msra.mxu1 %v13650_v47  ;;  %6095 = vmatprep.subr.bf16.mxu0 %v13665_v9  ;;  %v2915_v47 = vld [vmem:[%s22233_s2 + $0xbc0] sm:$0xff]  ;;  %v2908_v9 = vld [vmem:[%s22233_s2 + $0xb68] sm:$0xff] }
 0x314   :  { %6181 = vmatprep.subr.bf16.mxu1 %v13667_v51  ;;  %v2916_v51 = vld [vmem:[%s22233_s2 + $0xbc8] sm:$0xff]  ;;  %v13777_v49 = vcombine.high %v2907_v46, %v2915_v47  ;;  %v13776_v57 = vcombine.low %v2907_v46, %v2915_v47 }
 0x315   :  { %v13779_v19 = vcombine.high %v2908_v9, %v2916_v51  ;;  %v13778_v63 = vcombine.low %v2908_v9, %v2916_v51 }
 0x316   :  { %6096 = vmatpush1.bf16.msra.mxu0 %v13664_v12  ;;  %v2923_v12 = vld [vmem:[%s22233_s2 + $0xc20] sm:$0xff] }
 0x317   :  { %6182 = vmatpush1.bf16.msra.mxu1 %v13666_v21  ;;  %6097 = vmatprep.subr.bf16.mxu0 %v13681_v26  ;;  %v2931_v21 = vld [vmem:[%s22233_s2 + $0xc80] sm:$0xff]  ;;  %v2924_v26 = vld [vmem:[%s22233_s2 + $0xc28] sm:$0xff] }
 0x318   :  { %6183 = vmatprep.subr.bf16.mxu1 %v13683_v25  ;;  %v2932_v25 = vld [vmem:[%s22233_s2 + $0xc88] sm:$0xff]  ;;  %v13793_v53 = vcombine.high %v2923_v12, %v2931_v21 }
 0x319   :  { %v13795_v0 = vcombine.high %v2924_v26, %v2932_v25  ;;  %v13794_v15 = vcombine.low %v2924_v26, %v2932_v25 }
 0x31a   :  { %6098 = vmatpush1.bf16.msra.mxu0 %v13680_v33  ;;  %v2939_v33 = vld [vmem:[%s22233_s2 + $0xce0] sm:$0xff] }
 0x31b   :  { %6184 = vmatpush1.bf16.msra.mxu1 %v13682_v4  ;;  %6099 = vmatprep.subr.bf16.mxu0 %v13697_v1  ;;  %v2947_v4 = vld [vmem:[%s22233_s2 + $0xd40] sm:$0xff]  ;;  %v13792_v1 = vcombine.low %v2923_v12, %v2931_v21 }
 0x31c   :  { %6185 = vmatprep.subr.bf16.mxu1 %v13699_v27  ;;  %v2940_v27 = vld [vmem:[%s22233_s2 + $0xce8] sm:$0xff]  ;;  %v13809_v31 = vcombine.high %v2939_v33, %v2947_v4  ;;  %v13808_v42 = vcombine.low %v2939_v33, %v2947_v4 }
 0x31d   :  { %v13810_v43 = vcombine.low %v2940_v27, %v2948_v28 }
 0x31e   :  { %6100 = vmatpush1.bf16.msra.mxu0 %v13696_v41  ;;  %v2963_v41 = vld [vmem:[%s22233_s2 + $0xe00] sm:$0xff] }
 0x31f   :  { %6186 = vmatpush1.bf16.msra.mxu1 %v13698_v38  ;;  %6101 = vmatprep.subr.bf16.mxu0 %v13713_v39  ;;  %v13811_v38 = vcombine.high %v2940_v27, %v2948_v28  ;;  %v2956_v39 = vld [vmem:[%s22233_s2 + $0xda8] sm:$0xff]  ;;  %v13825_v62 = vcombine.high %v2955_v37, %v2963_v41  ;;  %v13824_v50 = vcombine.low %v2955_v37, %v2963_v41  ;;  %v3051_v28 = vld [vmem:[%s22233_s2 + $0x1220] sm:$0xff] }
 0x320   :  { %6187 = vmatprep.subr.bf16.mxu1 %v13715_v40  ;;  %v2964_v40 = vld [vmem:[%s22233_s2 + $0xe08] sm:$0xff] }
 0x321   :  { %v13827_v2 = vcombine.high %v2956_v39, %v2964_v40  ;;  %v13826_v54 = vcombine.low %v2956_v39, %v2964_v40  ;;  %v3060_v37 = vld [vmem:[%s22233_s2 + $0x1288] sm:$0xff] }
 0x322   :  { %6102 = vmatpush1.bf16.msra.mxu0 %v13712_v3  ;;  %v2971_v3 = vld [vmem:[%s22233_s2 + $0xe60] sm:$0xff] }
 0x323   :  { %6188 = vmatpush1.bf16.msra.mxu1 %v13714_v56  ;;  %6103 = vmatprep.subr.bf16.mxu0 %v13729_v35  ;;  %v2979_v56 = vld [vmem:[%s22233_s2 + $0xec0] sm:$0xff]  ;;  %v2972_v35 = vld [vmem:[%s22233_s2 + $0xe68] sm:$0xff] }
 0x324   :  { %6189 = vmatprep.subr.bf16.mxu1 %v13731_v48  ;;  %v2980_v48 = vld [vmem:[%s22233_s2 + $0xec8] sm:$0xff]  ;;  %v13841_v5 = vcombine.high %v2971_v3, %v2979_v56  ;;  %v13840_v22 = vcombine.low %v2971_v3, %v2979_v56 }
 0x325   :  { %v13843_v17 = vcombine.high %v2972_v35, %v2980_v48  ;;  %v13842_v60 = vcombine.low %v2972_v35, %v2980_v48 }
 0x326   :  { %6104 = vmatpush1.bf16.msra.mxu0 %v13728_v58  ;;  %v2987_v58 = vld [vmem:[%s22233_s2 + $0xf20] sm:$0xff] }
 0x327   :  { %6190 = vmatpush1.bf16.msra.mxu1 %v13730_v59  ;;  %6105 = vmatprep.subr.bf16.mxu0 %v13745_v6  ;;  %v2995_v59 = vld [vmem:[%s22233_s2 + $0xf80] sm:$0xff]  ;;  %v2988_v6 = vld [vmem:[%s22233_s2 + $0xf28] sm:$0xff] }
 0x328   :  { %6191 = vmatprep.subr.bf16.mxu1 %v13747_v20  ;;  %v2996_v20 = vld [vmem:[%s22233_s2 + $0xf88] sm:$0xff]  ;;  %v13857_v8 = vcombine.high %v2987_v58, %v2995_v59  ;;  %v13856_v46 = vcombine.low %v2987_v58, %v2995_v59 }
 0x329   :  { %v13859_v23 = vcombine.high %v2988_v6, %v2996_v20  ;;  %v13858_v47 = vcombine.low %v2988_v6, %v2996_v20 }
 0x32a   :  { %6106 = vmatpush1.bf16.msra.mxu0 %v13744_v7  ;;  %v3003_v7 = vld [vmem:[%s22233_s2 + $0xfe0] sm:$0xff] }
 0x32b   :  { %6192 = vmatpush1.bf16.msra.mxu1 %v13746_v34  ;;  %6107 = vmatprep.subr.bf16.mxu0 %v13761_v16  ;;  %v3011_v34 = vld [vmem:[%s22233_s2 + $0x1040] sm:$0xff]  ;;  %v3004_v16 = vld [vmem:[%s22233_s2 + $0xfe8] sm:$0xff] }
 0x32c   :  { %6193 = vmatprep.subr.bf16.mxu1 %v13763_v45  ;;  %v3012_v45 = vld [vmem:[%s22233_s2 + $0x1048] sm:$0xff]  ;;  %v13873_v9 = vcombine.high %v3003_v7, %v3011_v34  ;;  %v13872_v12 = vcombine.low %v3003_v7, %v3011_v34 }
 0x32d   :  { %v13875_v51 = vcombine.high %v3004_v16, %v3012_v45  ;;  %v13874_v21 = vcombine.low %v3004_v16, %v3012_v45 }
 0x32e   :  { %6108 = vmatpush1.bf16.msra.mxu0 %v13760_v10  ;;  %v3019_v10 = vld [vmem:[%s22233_s2 + $0x10a0] sm:$0xff] }
 0x32f   :  { %6194 = vmatpush1.bf16.msra.mxu1 %v13762_v18  ;;  %6109 = vmatprep.subr.bf16.mxu0 %v13777_v49  ;;  %v3027_v18 = vld [vmem:[%s22233_s2 + $0x1100] sm:$0xff]  ;;  %v3020_v49 = vld [vmem:[%s22233_s2 + $0x10a8] sm:$0xff] }
 0x330   :  { %6195 = vmatprep.subr.bf16.mxu1 %v13779_v19  ;;  %v3028_v19 = vld [vmem:[%s22233_s2 + $0x1108] sm:$0xff]  ;;  %v13889_v26 = vcombine.high %v3019_v10, %v3027_v18  ;;  %v13888_v33 = vcombine.low %v3019_v10, %v3027_v18 }
 0x331   :  { %v13891_v25 = vcombine.high %v3020_v49, %v3028_v19  ;;  %v13890_v4 = vcombine.low %v3020_v49, %v3028_v19 }
 0x332   :  { %6110 = vmatpush1.bf16.msra.mxu0 %v13776_v57  ;;  %v3035_v57 = vld [vmem:[%s22233_s2 + $0x1160] sm:$0xff] }
 0x333   :  { %6196 = vmatpush1.bf16.msra.mxu1 %v13778_v63  ;;  %6122 = vmatprep.subr.bf16.mxu0 %v13793_v53  ;;  %v3043_v63 = vld [vmem:[%s22233_s2 + $0x11c0] sm:$0xff]  ;;  %v3036_v53 = vld [vmem:[%s22233_s2 + $0x1168] sm:$0xff] }
 0x334   :  { %6208 = vmatprep.subr.bf16.mxu1 %v13795_v0  ;;  %v3044_v0 = vld [vmem:[%s22233_s2 + $0x11c8] sm:$0xff]  ;;  %v13904_v41 = vcombine.low %v3035_v57, %v3043_v63 }
 0x335   :  { %6112 = vmatmul.mubr.bf16.vlgmr.msra.gmra.mrb[32].mxu0 %v16456_v36  ;;  %v13907_v27 = vcombine.high %v3036_v53, %v3044_v0 }
 0x336   :  { %6198 = vmatmul.mubr.bf16.vlgmr.msra.gmra.mrb[32].mxu1 %v16456_v36  ;;  %6123 = vmatpush1.bf16.msra.mxu0 %v13792_v1  ;;  %v13905_v1 = vcombine.high %v3035_v57, %v3043_v63 }
 0x337   :  { %6154 = vmatprep.mubr.bf16.mxu0 %v16474_v55  ;;  %6209 = vmatpush1.bf16.msra.mxu1 %v13794_v15  ;;  %v3059_v15 = vld [vmem:[%s22233_s2 + $0x1280] sm:$0xff] }
 0x338   :  { %6240 = vmatprep.mubr.bf16.mxu1 %v16474_v55  ;;  %6124 = vmatprep.subr.bf16.mxu0 %v13809_v31  ;;  %v3052_v31 = vld [vmem:[%s22233_s2 + $0x1228] sm:$0xff]  ;;  %v13921_v39 = vcombine.high %v3051_v28, %v3059_v15  ;;  %v13920_v3 = vcombine.low %v3051_v28, %v3059_v15 }
 0x339   :  { %6210 = vmatprep.subr.bf16.mxu1 %v13811_v38  ;;  %v13906_v38 = vcombine.low %v3036_v53, %v3044_v0  ;;  %v13923_v40 = vcombine.high %v3052_v31, %v3060_v37  ;;  %v13922_v56 = vcombine.low %v3052_v31, %v3060_v37 }
 0x33a   :  { %6125 = vmatpush1.bf16.msra.mxu0 %v13808_v42  ;;  %v3067_v42 = vld [vmem:[%s22233_s2 + $0x12e0] sm:$0xff] }
 0x33b   :  { %6211 = vmatpush1.bf16.msra.mxu1 %v13810_v43  ;;  %6126 = vmatprep.subr.bf16.mxu0 %v13825_v62  ;;  %v3075_v43 = vld [vmem:[%s22233_s2 + $0x1340] sm:$0xff]  ;;  %v3068_v62 = vld [vmem:[%s22233_s2 + $0x12e8] sm:$0xff] }
 0x33c   :  { %6212 = vmatprep.subr.bf16.mxu1 %v13827_v2  ;;  %v3076_v2 = vld [vmem:[%s22233_s2 + $0x1348] sm:$0xff]  ;;  %v13937_v35 = vcombine.high %v3067_v42, %v3075_v43  ;;  %v13936_v58 = vcombine.low %v3067_v42, %v3075_v43 }
 0x33d   :  { %v13939_v48 = vcombine.high %v3068_v62, %v3076_v2  ;;  %v13938_v59 = vcombine.low %v3068_v62, %v3076_v2 }
 0x33e   :  { %6127 = vmatpush1.bf16.msra.mxu0 %v13824_v50  ;;  %v3083_v50 = vld [vmem:[%s22233_s2 + $0x13a0] sm:$0xff] }
 0x33f   :  { %6213 = vmatpush1.bf16.msra.mxu1 %v13826_v54  ;;  %6128 = vmatprep.subr.bf16.mxu0 %v13841_v5  ;;  %v3091_v54 = vld [vmem:[%s22233_s2 + $0x1400] sm:$0xff]  ;;  %v3084_v5 = vld [vmem:[%s22233_s2 + $0x13a8] sm:$0xff] }
 0x340   :  { %6214 = vmatprep.subr.bf16.mxu1 %v13843_v17  ;;  %v3092_v17 = vld [vmem:[%s22233_s2 + $0x1408] sm:$0xff]  ;;  %v13953_v6 = vcombine.high %v3083_v50, %v3091_v54  ;;  %v13952_v7 = vcombine.low %v3083_v50, %v3091_v54 }
 0x341   :  { %v13955_v20 = vcombine.high %v3084_v5, %v3092_v17  ;;  %v13954_v34 = vcombine.low %v3084_v5, %v3092_v17 }
 0x342   :  { %6129 = vmatpush1.bf16.msra.mxu0 %v13840_v22  ;;  %v3099_v22 = vld [vmem:[%s22233_s2 + $0x1460] sm:$0xff] }
 0x343   :  { %6215 = vmatpush1.bf16.msra.mxu1 %v13842_v60  ;;  %6130 = vmatprep.subr.bf16.mxu0 %v13857_v8  ;;  %v3107_v60 = vld [vmem:[%s22233_s2 + $0x14c0] sm:$0xff]  ;;  %v3100_v8 = vld [vmem:[%s22233_s2 + $0x1468] sm:$0xff] }
 0x344   :  { %6216 = vmatprep.subr.bf16.mxu1 %v13859_v23  ;;  %v3108_v23 = vld [vmem:[%s22233_s2 + $0x14c8] sm:$0xff]  ;;  %v13969_v16 = vcombine.high %v3099_v22, %v3107_v60  ;;  %v13968_v10 = vcombine.low %v3099_v22, %v3107_v60  ;;  %v2694_v22 = vld [vmem:[%s22233_s2 + $0x158] sm:$0xff] }
 0x345   :  { %v13971_v45 = vcombine.high %v3100_v8, %v3108_v23  ;;  %v13970_v18 = vcombine.low %v3100_v8, %v3108_v23  ;;  %v2701_v23 = vld [vmem:[%s22233_s2 + $0x1b0] sm:$0xff] }
 0x346   :  { %6131 = vmatpush1.bf16.msra.mxu0 %v13856_v46  ;;  %v3115_v46 = vld [vmem:[%s22233_s2 + $0x1520] sm:$0xff] }
 0x347   :  { %6217 = vmatpush1.bf16.msra.mxu1 %v13858_v47  ;;  %6132 = vmatprep.subr.bf16.mxu0 %v13873_v9  ;;  %v3123_v47 = vld [vmem:[%s22233_s2 + $0x1580] sm:$0xff]  ;;  %v3116_v9 = vld [vmem:[%s22233_s2 + $0x1528] sm:$0xff] }
 0x348   :  { %6218 = vmatprep.subr.bf16.mxu1 %v13875_v51  ;;  %v3124_v51 = vld [vmem:[%s22233_s2 + $0x1588] sm:$0xff]  ;;  %v13985_v49 = vcombine.high %v3115_v46, %v3123_v47  ;;  %v13984_v57 = vcombine.low %v3115_v46, %v3123_v47 }
 0x349   :  { %v13987_v19 = vcombine.high %v3116_v9, %v3124_v51  ;;  %v13986_v63 = vcombine.low %v3116_v9, %v3124_v51 }
 0x34a   :  { %6133 = vmatpush1.bf16.msra.mxu0 %v13872_v12  ;;  %v3131_v12 = vld [vmem:[%s22233_s2 + $0x15e0] sm:$0xff] }
 0x34b   :  { %6219 = vmatpush1.bf16.msra.mxu1 %v13874_v21  ;;  %6134 = vmatprep.subr.bf16.mxu0 %v13889_v26  ;;  %v3139_v21 = vld [vmem:[%s22233_s2 + $0x1640] sm:$0xff]  ;;  %v3132_v26 = vld [vmem:[%s22233_s2 + $0x15e8] sm:$0xff] }
 0x34c   :  { %6220 = vmatprep.subr.bf16.mxu1 %v13891_v25  ;;  %v3140_v25 = vld [vmem:[%s22233_s2 + $0x1648] sm:$0xff]  ;;  %v14001_v53 = vcombine.high %v3131_v12, %v3139_v21  ;;  %v14000_v28 = vcombine.low %v3131_v12, %v3139_v21 }
 0x34d   :  { %v14003_v0 = vcombine.high %v3132_v26, %v3140_v25  ;;  %v14002_v15 = vcombine.low %v3132_v26, %v3140_v25  ;;  %v2733_v25 = vld [vmem:[%s22233_s2 + $0x330] sm:$0xff] }
 0x34e   :  { %6135 = vmatpush1.bf16.msra.mxu0 %v13888_v33  ;;  %v3147_v33 = vld [vmem:[%s22233_s2 + $0x16a0] sm:$0xff] }
 0x34f   :  { %6221 = vmatpush1.bf16.msra.mxu1 %v13890_v4  ;;  %6136 = vmatprep.subr.bf16.mxu0 %v13905_v1  ;;  %v3155_v4 = vld [vmem:[%s22233_s2 + $0x1700] sm:$0xff]  ;;  %v3148_v1 = vld [vmem:[%s22233_s2 + $0x16a8] sm:$0xff] }
 0x350   :  { %6222 = vmatprep.subr.bf16.mxu1 %v13907_v27  ;;  %v3156_v27 = vld [vmem:[%s22233_s2 + $0x1708] sm:$0xff]  ;;  %v14017_v31 = vcombine.high %v3147_v33, %v3155_v4  ;;  %v14016_v42 = vcombine.low %v3147_v33, %v3155_v4 }
 0x351   :  { %v14019_v37 = vcombine.high %v3148_v1, %v3156_v27  ;;  %v14018_v43 = vcombine.low %v3148_v1, %v3156_v27  ;;  %v2749_v27 = vld [vmem:[%s22233_s2 + $0x3f0] sm:$0xff] }
 0x352   :  { %6137 = vmatpush1.bf16.msra.mxu0 %v13904_v41  ;;  %v3163_v41 = vld [vmem:[%s22233_s2 + $0x1760] sm:$0xff] }
 0x353   :  { %6223 = vmatpush1.bf16.msra.mxu1 %v13906_v38  ;;  %6138 = vmatprep.subr.bf16.mxu0 %v13921_v39  ;;  %v3171_v38 = vld [vmem:[%s22233_s2 + $0x17c0] sm:$0xff]  ;;  %v3164_v39 = vld [vmem:[%s22233_s2 + $0x1768] sm:$0xff] }
 0x354   :  { %6224 = vmatprep.subr.bf16.mxu1 %v13923_v40  ;;  %v3172_v40 = vld [vmem:[%s22233_s2 + $0x17c8] sm:$0xff]  ;;  %v14033_v62 = vcombine.high %v3163_v41, %v3171_v38  ;;  %v14032_v50 = vcombine.low %v3163_v41, %v3171_v38 }
 0x355   :  { %v14035_v2 = vcombine.high %v3164_v39, %v3172_v40  ;;  %v14034_v54 = vcombine.low %v3164_v39, %v3172_v40  ;;  %v2765_v40 = vld [vmem:[%s22233_s2 + $0x4b0] sm:$0xff] }
 0x356   :  { %6139 = vmatpush1.bf16.msra.mxu0 %v13920_v3  ;;  %v2669_v3 = vld [vmem:[%s22233_s2 + $0x30] sm:$0xff] }
 0x357   :  { %6225 = vmatpush1.bf16.msra.mxu1 %v13922_v56  ;;  %6140 = vmatprep.subr.bf16.mxu0 %v13937_v35  ;;  %v2677_v56 = vld [vmem:[%s22233_s2 + $0x90] sm:$0xff]  ;;  %v2670_v35 = vld [vmem:[%s22233_s2 + $0x38] sm:$0xff] }
 0x358   :  { %6226 = vmatprep.subr.bf16.mxu1 %v13939_v48  ;;  %v2678_v48 = vld [vmem:[%s22233_s2 + $0x98] sm:$0xff]  ;;  %v13541_v5 = vcombine.high %v2669_v3, %v2677_v56 }
 0x359   :  { %v13543_v17 = vcombine.high %v2670_v35, %v2678_v48  ;;  %v13542_v60 = vcombine.low %v2670_v35, %v2678_v48  ;;  %v2781_v48 = vld [vmem:[%s22233_s2 + $0x570] sm:$0xff] }
 0x35a   :  { %6141 = vmatpush1.bf16.msra.mxu0 %v13936_v58  ;;  %v2685_v58 = vld [vmem:[%s22233_s2 + $0xf0] sm:$0xff] }
 0x35b   :  { %6227 = vmatpush1.bf16.msra.mxu1 %v13938_v59  ;;  %6142 = vmatprep.subr.bf16.mxu0 %v13953_v6  ;;  %v2693_v59 = vld [vmem:[%s22233_s2 + $0x150] sm:$0xff]  ;;  %v13540_v6 = vcombine.low %v2669_v3, %v2677_v56 }
 0x35c   :  { %6228 = vmatprep.subr.bf16.mxu1 %v13955_v20  ;;  %v2686_v20 = vld [vmem:[%s22233_s2 + $0xf8] sm:$0xff]  ;;  %v13557_v8 = vcombine.high %v2685_v58, %v2693_v59  ;;  %v13556_v46 = vcombine.low %v2685_v58, %v2693_v59 }
 0x35d   :  { %v13558_v47 = vcombine.low %v2686_v20, %v2694_v22 }
 0x35e   :  { %6143 = vmatpush1.bf16.msra.mxu0 %v13952_v7  ;;  %v2709_v7 = vld [vmem:[%s22233_s2 + $0x210] sm:$0xff] }
 0x35f   :  { %6229 = vmatpush1.bf16.msra.mxu1 %v13954_v34  ;;  %6144 = vmatprep.subr.bf16.mxu0 %v13969_v16  ;;  %v13559_v34 = vcombine.high %v2686_v20, %v2694_v22  ;;  %v2702_v16 = vld [vmem:[%s22233_s2 + $0x1b8] sm:$0xff]  ;;  %v13573_v9 = vcombine.high %v2701_v23, %v2709_v7  ;;  %v2797_v20 = vld [vmem:[%s22233_s2 + $0x630] sm:$0xff] }
 0x360   :  { %6230 = vmatprep.subr.bf16.mxu1 %v13971_v45  ;;  %v2710_v45 = vld [vmem:[%s22233_s2 + $0x218] sm:$0xff]  ;;  %v2805_v22 = vld [vmem:[%s22233_s2 + $0x690] sm:$0xff] }
 0x361   :  { %v13575_v51 = vcombine.high %v2702_v16, %v2710_v45  ;;  %v13574_v12 = vcombine.low %v2702_v16, %v2710_v45  ;;  %v2813_v45 = vld [vmem:[%s22233_s2 + $0x6f0] sm:$0xff] }
 0x362   :  { %6145 = vmatpush1.bf16.msra.mxu0 %v13968_v10  ;;  %v2717_v10 = vld [vmem:[%s22233_s2 + $0x270] sm:$0xff] }
 0x363   :  { %6231 = vmatpush1.bf16.msra.mxu1 %v13970_v18  ;;  %6146 = vmatprep.subr.bf16.mxu0 %v13985_v49  ;;  %v2725_v18 = vld [vmem:[%s22233_s2 + $0x2d0] sm:$0xff]  ;;  %v2718_v49 = vld [vmem:[%s22233_s2 + $0x278] sm:$0xff] }
 0x364   :  { %6232 = vmatprep.subr.bf16.mxu1 %v13987_v19  ;;  %v2726_v19 = vld [vmem:[%s22233_s2 + $0x2d8] sm:$0xff]  ;;  %v13589_v21 = vcombine.high %v2717_v10, %v2725_v18 }
 0x365   :  { %v13591_v26 = vcombine.high %v2718_v49, %v2726_v19  ;;  %v13590_v33 = vcombine.low %v2718_v49, %v2726_v19  ;;  %v2829_v19 = vld [vmem:[%s22233_s2 + $0x7b0] sm:$0xff] }
 0x366   :  { %6147 = vmatpush1.bf16.msra.mxu0 %v13984_v57  ;;  %v2741_v57 = vld [vmem:[%s22233_s2 + $0x390] sm:$0xff] }
 0x367   :  { %6233 = vmatpush1.bf16.msra.mxu1 %v13986_v63  ;;  %6148 = vmatprep.subr.bf16.mxu0 %v14001_v53  ;;  %v2734_v63 = vld [vmem:[%s22233_s2 + $0x338] sm:$0xff]  ;;  %v13605_v4 = vcombine.high %v2733_v25, %v2741_v57 }
 0x368   :  { %6234 = vmatprep.subr.bf16.mxu1 %v14003_v0  ;;  %v2742_v53 = vld [vmem:[%s22233_s2 + $0x398] sm:$0xff]  ;;  %v13588_v0 = vcombine.low %v2717_v10, %v2725_v18 }
 0x369   :  { %v13607_v1 = vcombine.high %v2734_v63, %v2742_v53  ;;  %v13606_v41 = vcombine.low %v2734_v63, %v2742_v53  ;;  %v2845_v53 = vld [vmem:[%s22233_s2 + $0x870] sm:$0xff] }
 0x36a   :  { %6149 = vmatpush1.bf16.msra.mxu0 %v14000_v28  ;;  %v2757_v28 = vld [vmem:[%s22233_s2 + $0x450] sm:$0xff] }
 0x36b   :  { %6235 = vmatpush1.bf16.msra.mxu1 %v14002_v15  ;;  %6150 = vmatprep.subr.bf16.mxu0 %v14017_v31  ;;  %v2750_v15 = vld [vmem:[%s22233_s2 + $0x3f8] sm:$0xff]  ;;  %v13621_v38 = vcombine.high %v2749_v27, %v2757_v28 }
 0x36c   :  { %6236 = vmatprep.subr.bf16.mxu1 %v14019_v37  ;;  %v2758_v31 = vld [vmem:[%s22233_s2 + $0x458] sm:$0xff]  ;;  %v13604_v37 = vcombine.low %v2733_v25, %v2741_v57 }
 0x36d   :  { %v13623_v39 = vcombine.high %v2750_v15, %v2758_v31  ;;  %v13622_v3 = vcombine.low %v2750_v15, %v2758_v31  ;;  %v2861_v31 = vld [vmem:[%s22233_s2 + $0x930] sm:$0xff] }
 0x36e   :  { %6151 = vmatpush1.bf16.msra.mxu0 %v14016_v42  ;;  %v2773_v42 = vld [vmem:[%s22233_s2 + $0x510] sm:$0xff] }
 0x36f   :  { %6237 = vmatpush1.bf16.msra.mxu1 %v14018_v43  ;;  %6152 = vmatprep.subr.bf16.mxu0 %v14033_v62  ;;  %v2766_v43 = vld [vmem:[%s22233_s2 + $0x4b8] sm:$0xff]  ;;  %v13637_v56 = vcombine.high %v2765_v40, %v2773_v42 }
 0x370   :  { %6238 = vmatprep.subr.bf16.mxu1 %v14035_v2  ;;  %v2774_v62 = vld [vmem:[%s22233_s2 + $0x518] sm:$0xff]  ;;  %v13620_v2 = vcombine.low %v2749_v27, %v2757_v28 }
 0x371   :  { %v13639_v35 = vcombine.high %v2766_v43, %v2774_v62  ;;  %v13638_v58 = vcombine.low %v2766_v43, %v2774_v62  ;;  %v2877_v62 = vld [vmem:[%s22233_s2 + $0x9f0] sm:$0xff] }
 0x372   :  { %6153 = vmatpush1.bf16.msra.mxu0 %v14032_v50  ;;  %v2789_v50 = vld [vmem:[%s22233_s2 + $0x5d0] sm:$0xff] }
 0x373   :  { %6239 = vmatpush1.bf16.msra.mxu1 %v14034_v54  ;;  %6251 = vmatprep.subr.bf16.mxu0 %v13541_v5  ;;  %v2782_v54 = vld [vmem:[%s22233_s2 + $0x578] sm:$0xff]  ;;  %v13653_v59 = vcombine.high %v2781_v48, %v2789_v50 }
 0x374   :  { %6337 = vmatprep.subr.bf16.mxu1 %v13543_v17  ;;  %v2790_v5 = vld [vmem:[%s22233_s2 + $0x5d8] sm:$0xff]  ;;  %v13636_v17 = vcombine.low %v2765_v40, %v2773_v42 }
 0x375   :  { %6155 = vmatmul.mubr.bf16.vlgmr.msra.gmra.mrb[32].mxu0 %v16464_v13 }
 0x376   :  { %6241 = vmatmul.mubr.bf16.vlgmr.msra.gmra.mrb[32].mxu1 %v16464_v13  ;;  %6252 = vmatpush1.bf16.msra.mxu0 %v13540_v6  ;;  %v13655_v6 = vcombine.high %v2782_v54, %v2790_v5 }
 0x377   :  { %6283 = vmatprep.mubr.bf16.mxu0 %v16458_v11  ;;  %6338 = vmatpush1.bf16.msra.mxu1 %v13542_v60  ;;  %v2798_v60 = vld [vmem:[%s22233_s2 + $0x638] sm:$0xff] }
 0x378   :  { %6369 = vmatprep.mubr.bf16.mxu1 %v16458_v11  ;;  %6253 = vmatprep.subr.bf16.mxu0 %v13557_v8  ;;  %v13572_v11 = vcombine.low %v2701_v23, %v2709_v7  ;;  %v2806_v8 = vld [vmem:[%s22233_s2 + $0x698] sm:$0xff]  ;;  %v13652_v23 = vcombine.low %v2781_v48, %v2789_v50  ;;  %v13654_v7 = vcombine.low %v2782_v54, %v2790_v5  ;;  %v2893_v5 = vld [vmem:[%s22233_s2 + $0xab0] sm:$0xff] }
 0x379   :  { %6339 = vmatprep.subr.bf16.mxu1 %v13559_v34  ;;  %v13669_v34 = vcombine.high %v2797_v20, %v2805_v22  ;;  %v13671_v16 = vcombine.high %v2798_v60, %v2806_v8  ;;  %v13670_v10 = vcombine.low %v2798_v60, %v2806_v8  ;;  %v2909_v8 = vld [vmem:[%s22233_s2 + $0xb70] sm:$0xff] }
 0x37a   :  { %6254 = vmatpush1.bf16.msra.mxu0 %v13556_v46  ;;  %v2821_v46 = vld [vmem:[%s22233_s2 + $0x750] sm:$0xff] }
 0x37b   :  { %6340 = vmatpush1.bf16.msra.mxu1 %v13558_v47  ;;  %6255 = vmatprep.subr.bf16.mxu0 %v13573_v9  ;;  %v2814_v47 = vld [vmem:[%s22233_s2 + $0x6f8] sm:$0xff]  ;;  %v13685_v18 = vcombine.high %v2813_v45, %v2821_v46 }
 0x37c   :  { %6341 = vmatprep.subr.bf16.mxu1 %v13575_v51  ;;  %v2822_v9 = vld [vmem:[%s22233_s2 + $0x758] sm:$0xff]  ;;  %v13668_v51 = vcombine.low %v2797_v20, %v2805_v22 }
 0x37d   :  { %v13687_v49 = vcombine.high %v2814_v47, %v2822_v9  ;;  %v13686_v25 = vcombine.low %v2814_v47, %v2822_v9  ;;  %v2925_v9 = vld [vmem:[%s22233_s2 + $0xc30] sm:$0xff] }
 0x37e   :  { %6256 = vmatpush1.bf16.msra.mxu0 %v13572_v11  ;;  %v2837_v11 = vld [vmem:[%s22233_s2 + $0x810] sm:$0xff] }
 0x37f   :  { %6342 = vmatpush1.bf16.msra.mxu1 %v13574_v12  ;;  %6257 = vmatprep.subr.bf16.mxu0 %v13589_v21  ;;  %v2830_v12 = vld [vmem:[%s22233_s2 + $0x7b8] sm:$0xff]  ;;  %v13701_v57 = vcombine.high %v2829_v19, %v2837_v11 }
 0x380   :  { %6343 = vmatprep.subr.bf16.mxu1 %v13591_v26  ;;  %v2838_v21 = vld [vmem:[%s22233_s2 + $0x818] sm:$0xff]  ;;  %v13684_v26 = vcombine.low %v2813_v45, %v2821_v46 }
 0x381   :  { %v13703_v63 = vcombine.high %v2830_v12, %v2838_v21  ;;  %v13702_v27 = vcombine.low %v2830_v12, %v2838_v21  ;;  %v2941_v21 = vld [vmem:[%s22233_s2 + $0xcf0] sm:$0xff] }
 0x382   :  { %6258 = vmatpush1.bf16.msra.mxu0 %v13588_v0  ;;  %v2853_v0 = vld [vmem:[%s22233_s2 + $0x8d0] sm:$0xff] }
 0x383   :  { %6344 = vmatpush1.bf16.msra.mxu1 %v13590_v33  ;;  %6259 = vmatprep.subr.bf16.mxu0 %v13605_v4  ;;  %v2846_v33 = vld [vmem:[%s22233_s2 + $0x878] sm:$0xff]  ;;  %v13717_v28 = vcombine.high %v2845_v53, %v2853_v0 }
 0x384   :  { %6345 = vmatprep.subr.bf16.mxu1 %v13607_v1  ;;  %v2854_v4 = vld [vmem:[%s22233_s2 + $0x8d8] sm:$0xff]  ;;  %v13700_v1 = vcombine.low %v2829_v19, %v2837_v11 }
 0x385   :  { %v13719_v15 = vcombine.high %v2846_v33, %v2854_v4  ;;  %v13718_v40 = vcombine.low %v2846_v33, %v2854_v4  ;;  %v2957_v33 = vld [vmem:[%s22233_s2 + $0xdb0] sm:$0xff] }
 0x386   :  { %6260 = vmatpush1.bf16.msra.mxu0 %v13604_v37  ;;  %v2869_v37 = vld [vmem:[%s22233_s2 + $0x990] sm:$0xff] }
 0x387   :  { %6346 = vmatpush1.bf16.msra.mxu1 %v13606_v41  ;;  %6261 = vmatprep.subr.bf16.mxu0 %v13621_v38  ;;  %v2862_v41 = vld [vmem:[%s22233_s2 + $0x938] sm:$0xff]  ;;  %v13733_v42 = vcombine.high %v2861_v31, %v2869_v37  ;;  %v2965_v4 = vld [vmem:[%s22233_s2 + $0xe10] sm:$0xff] }
 0x388   :  { %6347 = vmatprep.subr.bf16.mxu1 %v13623_v39  ;;  %v2870_v38 = vld [vmem:[%s22233_s2 + $0x998] sm:$0xff]  ;;  %v13716_v39 = vcombine.low %v2845_v53, %v2853_v0 }
 0x389   :  { %v13735_v43 = vcombine.high %v2862_v41, %v2870_v38  ;;  %v13734_v48 = vcombine.low %v2862_v41, %v2870_v38  ;;  %v2973_v38 = vld [vmem:[%s22233_s2 + $0xe70] sm:$0xff] }
 0x38a   :  { %6262 = vmatpush1.bf16.msra.mxu0 %v13620_v2  ;;  %v2885_v2 = vld [vmem:[%s22233_s2 + $0xa50] sm:$0xff] }
 0x38b   :  { %6348 = vmatpush1.bf16.msra.mxu1 %v13622_v3  ;;  %6263 = vmatprep.subr.bf16.mxu0 %v13637_v56  ;;  %v2878_v3 = vld [vmem:[%s22233_s2 + $0x9f8] sm:$0xff]  ;;  %v13749_v50 = vcombine.high %v2877_v62, %v2885_v2 }
 0x38c   :  { %6349 = vmatprep.subr.bf16.mxu1 %v13639_v35  ;;  %v2886_v56 = vld [vmem:[%s22233_s2 + $0xa58] sm:$0xff]  ;;  %v13732_v35 = vcombine.low %v2861_v31, %v2869_v37  ;;  %v13829_v37 = vcombine.high %v2957_v33, %v2965_v4 }
 0x38d   :  { %v13751_v54 = vcombine.high %v2878_v3, %v2886_v56  ;;  %v13750_v20 = vcombine.low %v2878_v3, %v2886_v56  ;;  %v2997_v3 = vld [vmem:[%s22233_s2 + $0xf90] sm:$0xff]  ;;  %v2990_v56 = vld [vmem:[%s22233_s2 + $0xf38] sm:$0xff] }
 0x38e   :  { %6264 = vmatpush1.bf16.msra.mxu0 %v13636_v17  ;;  %v2901_v17 = vld [vmem:[%s22233_s2 + $0xb10] sm:$0xff] }
 0x38f   :  { %6350 = vmatpush1.bf16.msra.mxu1 %v13638_v58  ;;  %6265 = vmatprep.subr.bf16.mxu0 %v13653_v59  ;;  %v2894_v58 = vld [vmem:[%s22233_s2 + $0xab8] sm:$0xff]  ;;  %v13765_v22 = vcombine.high %v2893_v5, %v2901_v17 }
 0x390   :  { %6351 = vmatprep.subr.bf16.mxu1 %v13655_v6  ;;  %v2902_v59 = vld [vmem:[%s22233_s2 + $0xb18] sm:$0xff]  ;;  %v13748_v6 = vcombine.low %v2877_v62, %v2885_v2  ;;  %v2989_v2 = vld [vmem:[%s22233_s2 + $0xf30] sm:$0xff] }
 0x391   :  { %v13767_v60 = vcombine.high %v2894_v58, %v2902_v59  ;;  %v13766_v45 = vcombine.low %v2894_v58, %v2902_v59  ;;  %v3013_v58 = vld [vmem:[%s22233_s2 + $0x1050] sm:$0xff]  ;;  %v3006_v59 = vld [vmem:[%s22233_s2 + $0xff8] sm:$0xff] }
 0x392   :  { %6266 = vmatpush1.bf16.msra.mxu0 %v13652_v23  ;;  %v2917_v23 = vld [vmem:[%s22233_s2 + $0xbd0] sm:$0xff] }
 0x393   :  { %6352 = vmatpush1.bf16.msra.mxu1 %v13654_v7  ;;  %6267 = vmatprep.subr.bf16.mxu0 %v13669_v34  ;;  %v2910_v7 = vld [vmem:[%s22233_s2 + $0xb78] sm:$0xff]  ;;  %v13781_v46 = vcombine.high %v2909_v8, %v2917_v23 }
 0x394   :  { %6353 = vmatprep.subr.bf16.mxu1 %v13671_v16  ;;  %v2918_v34 = vld [vmem:[%s22233_s2 + $0xbd8] sm:$0xff]  ;;  %v13764_v16 = vcombine.low %v2893_v5, %v2901_v17  ;;  %v3005_v17 = vld [vmem:[%s22233_s2 + $0xff0] sm:$0xff] }
 0x395   :  { %v13783_v47 = vcombine.high %v2910_v7, %v2918_v34  ;;  %v13782_v19 = vcombine.low %v2910_v7, %v2918_v34  ;;  %v3029_v7 = vld [vmem:[%s22233_s2 + $0x1110] sm:$0xff]  ;;  %v3022_v34 = vld [vmem:[%s22233_s2 + $0x10b8] sm:$0xff] }
 0x396   :  { %6268 = vmatpush1.bf16.msra.mxu0 %v13668_v51  ;;  %v2933_v51 = vld [vmem:[%s22233_s2 + $0xc90] sm:$0xff] }
 0x397   :  { %6354 = vmatpush1.bf16.msra.mxu1 %v13670_v10  ;;  %6269 = vmatprep.subr.bf16.mxu0 %v13685_v18  ;;  %v2926_v10 = vld [vmem:[%s22233_s2 + $0xc38] sm:$0xff]  ;;  %v13797_v11 = vcombine.high %v2925_v9, %v2933_v51 }
 0x398   :  { %6355 = vmatprep.subr.bf16.mxu1 %v13687_v49  ;;  %v2934_v18 = vld [vmem:[%s22233_s2 + $0xc98] sm:$0xff]  ;;  %v13780_v49 = vcombine.low %v2909_v8, %v2917_v23  ;;  %v3021_v23 = vld [vmem:[%s22233_s2 + $0x10b0] sm:$0xff] }
 0x399   :  { %v13799_v12 = vcombine.high %v2926_v10, %v2934_v18  ;;  %v13798_v53 = vcombine.low %v2926_v10, %v2934_v18  ;;  %v3045_v10 = vld [vmem:[%s22233_s2 + $0x11d0] sm:$0xff]  ;;  %v3038_v18 = vld [vmem:[%s22233_s2 + $0x1178] sm:$0xff] }
 0x39a   :  { %6270 = vmatpush1.bf16.msra.mxu0 %v13684_v26  ;;  %v2949_v26 = vld [vmem:[%s22233_s2 + $0xd50] sm:$0xff] }
 0x39b   :  { %6356 = vmatpush1.bf16.msra.mxu1 %v13686_v25  ;;  %6271 = vmatprep.subr.bf16.mxu0 %v13701_v57  ;;  %v13796_v25 = vcombine.low %v2925_v9, %v2933_v51  ;;  %v2942_v57 = vld [vmem:[%s22233_s2 + $0xcf8] sm:$0xff]  ;;  %v13813_v0 = vcombine.high %v2941_v21, %v2949_v26  ;;  %v3037_v51 = vld [vmem:[%s22233_s2 + $0x1170] sm:$0xff] }
 0x39c   :  { %6357 = vmatprep.subr.bf16.mxu1 %v13703_v63  ;;  %v2950_v63 = vld [vmem:[%s22233_s2 + $0xd58] sm:$0xff] }
 0x39d   :  { %v13814_v31 = vcombine.low %v2942_v57, %v2950_v63 }
 0x39e   :  { %6272 = vmatpush1.bf16.msra.mxu0 %v13700_v1  ;;  %v13815_v1 = vcombine.high %v2942_v57, %v2950_v63  ;;  %v3054_v57 = vld [vmem:[%s22233_s2 + $0x1238] sm:$0xff] }
 0x39f   :  { %6358 = vmatpush1.bf16.msra.mxu1 %v13702_v27  ;;  %6273 = vmatprep.subr.bf16.mxu0 %v13717_v28  ;;  %v2958_v27 = vld [vmem:[%s22233_s2 + $0xdb8] sm:$0xff] }
 0x3a0   :  { %6359 = vmatprep.subr.bf16.mxu1 %v13719_v15  ;;  %v2966_v28 = vld [vmem:[%s22233_s2 + $0xe18] sm:$0xff]  ;;  %v13812_v15 = vcombine.low %v2941_v21, %v2949_v26  ;;  %v3053_v26 = vld [vmem:[%s22233_s2 + $0x1230] sm:$0xff] }
 0x3a1   :  { %v13831_v41 = vcombine.high %v2958_v27, %v2966_v28  ;;  %v3062_v63 = vld [vmem:[%s22233_s2 + $0x1298] sm:$0xff] }
 0x3a2   :  { %6274 = vmatpush1.bf16.msra.mxu0 %v13716_v39  ;;  %v2981_v39 = vld [vmem:[%s22233_s2 + $0xed0] sm:$0xff] }
 0x3a3   :  { %6360 = vmatpush1.bf16.msra.mxu1 %v13718_v40  ;;  %6275 = vmatprep.subr.bf16.mxu0 %v13733_v42  ;;  %v2982_v40 = vld [vmem:[%s22233_s2 + $0xed8] sm:$0xff]  ;;  %v13830_v42 = vcombine.low %v2958_v27, %v2966_v28  ;;  %v3077_v27 = vld [vmem:[%s22233_s2 + $0x1350] sm:$0xff] }
 0x3a4   :  { %6361 = vmatprep.subr.bf16.mxu1 %v13735_v43  ;;  %v13845_v43 = vcombine.high %v2973_v38, %v2981_v39  ;;  %v3070_v28 = vld [vmem:[%s22233_s2 + $0x12f8] sm:$0xff] }
 0x3a6   :  { %6276 = vmatpush1.bf16.msra.mxu0 %v13732_v35  ;;  %v2998_v35 = vld [vmem:[%s22233_s2 + $0xf98] sm:$0xff] }
 0x3a7   :  { %6362 = vmatpush1.bf16.msra.mxu1 %v13734_v48  ;;  %6277 = vmatprep.subr.bf16.mxu0 %v13749_v50  ;;  %v13844_v48 = vcombine.low %v2973_v38, %v2981_v39  ;;  %v13863_v5 = vcombine.high %v2990_v56, %v2998_v35  ;;  %v3085_v39 = vld [vmem:[%s22233_s2 + $0x13b0] sm:$0xff] }
 0x3a8   :  { %6363 = vmatprep.subr.bf16.mxu1 %v13751_v54  ;;  %v13861_v54 = vcombine.high %v2989_v2, %v2997_v3 }
 0x3aa   :  { %6278 = vmatpush1.bf16.msra.mxu0 %v13748_v6  ;;  %v3014_v6 = vld [vmem:[%s22233_s2 + $0x1058] sm:$0xff] }
 0x3ab   :  { %6364 = vmatpush1.bf16.msra.mxu1 %v13750_v20  ;;  %6279 = vmatprep.subr.bf16.mxu0 %v13765_v22  ;;  %v13860_v20 = vcombine.low %v2989_v2, %v2997_v3  ;;  %v13862_v22 = vcombine.low %v2990_v56, %v2998_v35  ;;  %v13879_v8 = vcombine.high %v3006_v59, %v3014_v6  ;;  %v3101_v3 = vld [vmem:[%s22233_s2 + $0x1470] sm:$0xff]  ;;  %v3102_v35 = vld [vmem:[%s22233_s2 + $0x1478] sm:$0xff] }
 0x3ac   :  { %6365 = vmatprep.subr.bf16.mxu1 %v13767_v60  ;;  %v13877_v60 = vcombine.high %v3005_v17, %v3013_v58  ;;  %v3109_v56 = vld [vmem:[%s22233_s2 + $0x14d0] sm:$0xff] }
 0x3ae   :  { %6280 = vmatpush1.bf16.msra.mxu0 %v13764_v16  ;;  %v3030_v16 = vld [vmem:[%s22233_s2 + $0x1118] sm:$0xff] }
 0x3af   :  { %6366 = vmatpush1.bf16.msra.mxu1 %v13766_v45  ;;  %6281 = vmatprep.subr.bf16.mxu0 %v13781_v46  ;;  %v13876_v45 = vcombine.low %v3005_v17, %v3013_v58  ;;  %v13878_v46 = vcombine.low %v3006_v59, %v3014_v6  ;;  %v13895_v9 = vcombine.high %v3022_v34, %v3030_v16  ;;  %v3117_v58 = vld [vmem:[%s22233_s2 + $0x1530] sm:$0xff]  ;;  %v3118_v6 = vld [vmem:[%s22233_s2 + $0x1538] sm:$0xff] }
 0x3b0   :  { %6367 = vmatprep.subr.bf16.mxu1 %v13783_v47  ;;  %v13893_v47 = vcombine.high %v3021_v23, %v3029_v7  ;;  %v3125_v59 = vld [vmem:[%s22233_s2 + $0x1590] sm:$0xff] }
 0x3b2   :  { %6282 = vmatpush1.bf16.msra.mxu0 %v13780_v49  ;;  %v3046_v49 = vld [vmem:[%s22233_s2 + $0x11d8] sm:$0xff] }
 0x3b3   :  { %6368 = vmatpush1.bf16.msra.mxu1 %v13782_v19  ;;  %6294 = vmatprep.subr.bf16.mxu0 %v13797_v11  ;;  %v13892_v19 = vcombine.low %v3021_v23, %v3029_v7  ;;  %v13894_v11 = vcombine.low %v3022_v34, %v3030_v16  ;;  %v13911_v21 = vcombine.high %v3038_v18, %v3046_v49  ;;  %v3133_v7 = vld [vmem:[%s22233_s2 + $0x15f0] sm:$0xff]  ;;  %v3134_v16 = vld [vmem:[%s22233_s2 + $0x15f8] sm:$0xff] }
 0x3b4   :  { %6380 = vmatprep.subr.bf16.mxu1 %v13799_v12  ;;  %v13909_v12 = vcombine.high %v3037_v51, %v3045_v10  ;;  %v3141_v34 = vld [vmem:[%s22233_s2 + $0x1650] sm:$0xff] }
 0x3b5   :  { %6284 = vmatmul.mubr.bf16.vlgmr.msra.gmra.mrb[36].mxu0 %v16456_v36 }
 0x3b6   :  { %6370 = vmatmul.mubr.bf16.vlgmr.msra.gmra.mrb[36].mxu1 %v16456_v36  ;;  %6295 = vmatpush1.bf16.msra.mxu0 %v13796_v25  ;;  %v2974_v36 = vld [vmem:[%s22233_s2 + $0xe78] sm:$0xff]  ;;  %v3061_v25 = vld [vmem:[%s22233_s2 + $0x1290] sm:$0xff] }
 0x3b7   :  { %6326 = vmatprep.mubr.bf16.mxu0 %v16474_v55  ;;  %6381 = vmatpush1.bf16.msra.mxu1 %v13798_v53  ;;  %v13847_v62 = vcombine.high %v2974_v36, %v2982_v40  ;;  %v13846_v50 = vcombine.low %v2974_v36, %v2982_v40  ;;  %v13908_v53 = vcombine.low %v3037_v51, %v3045_v10  ;;  %v3093_v36 = vld [vmem:[%s22233_s2 + $0x1410] sm:$0xff]  ;;  %v3086_v40 = vld [vmem:[%s22233_s2 + $0x13b8] sm:$0xff] }
 0x3b8   :  { %6412 = vmatprep.mubr.bf16.mxu1 %v16474_v55  ;;  %6296 = vmatprep.subr.bf16.mxu0 %v13813_v0  ;;  %v13828_v55 = vcombine.low %v2957_v33, %v2965_v4  ;;  %v13910_v0 = vcombine.low %v3038_v18, %v3046_v49  ;;  %v13925_v33 = vcombine.high %v3053_v26, %v3061_v25  ;;  %v3149_v10 = vld [vmem:[%s22233_s2 + $0x16b0] sm:$0xff]  ;;  %v3150_v49 = vld [vmem:[%s22233_s2 + $0x16b8] sm:$0xff] }
 0x3b9   :  { %6382 = vmatprep.subr.bf16.mxu1 %v13815_v1  ;;  %v13927_v4 = vcombine.high %v3054_v57, %v3062_v63  ;;  %v3069_v1 = vld [vmem:[%s22233_s2 + $0x12f0] sm:$0xff] }
 0x3ba   :  { %6297 = vmatpush1.bf16.msra.mxu0 %v13812_v15  ;;  %v3078_v15 = vld [vmem:[%s22233_s2 + $0x1358] sm:$0xff]  ;;  %v3157_v18 = vld [vmem:[%s22233_s2 + $0x1710] sm:$0xff] }
 0x3bb   :  { %6383 = vmatpush1.bf16.msra.mxu1 %v13814_v31  ;;  %6298 = vmatprep.subr.bf16.mxu0 %v13829_v37  ;;  %v13924_v31 = vcombine.low %v3053_v26, %v3061_v25  ;;  %v13926_v37 = vcombine.low %v3054_v57, %v3062_v63  ;;  %v13943_v38 = vcombine.high %v3070_v28, %v3078_v15  ;;  %v3165_v25 = vld [vmem:[%s22233_s2 + $0x1770] sm:$0xff]  ;;  %v3166_v63 = vld [vmem:[%s22233_s2 + $0x1778] sm:$0xff] }
 0x3bc   :  { %6384 = vmatprep.subr.bf16.mxu1 %v13831_v41  ;;  %v13941_v41 = vcombine.high %v3069_v1, %v3077_v27  ;;  %v3173_v57 = vld [vmem:[%s22233_s2 + $0x17d0] sm:$0xff] }
 0x3be   :  { %6299 = vmatpush1.bf16.msra.mxu0 %v13828_v55  ;;  %v3094_v55 = vld [vmem:[%s22233_s2 + $0x1418] sm:$0xff] }
 0x3bf   :  { %6385 = vmatpush1.bf16.msra.mxu1 %v13830_v42  ;;  %6300 = vmatprep.subr.bf16.mxu0 %v13845_v43  ;;  %v13940_v42 = vcombine.low %v3069_v1, %v3077_v27  ;;  %v13942_v43 = vcombine.low %v3070_v28, %v3078_v15  ;;  %v13959_v2 = vcombine.high %v3086_v40, %v3094_v55  ;;  %v6443_v27 = vld [vmem:[%s22233_s2 + $0x20] sm:$0xff]  ;;  %v6444_v15 = vld [vmem:[%s22233_s2 + $0x28] sm:$0xff] }
 0x3c0   :  { %6386 = vmatprep.subr.bf16.mxu1 %v13847_v62  ;;  %v13957_v62 = vcombine.high %v3085_v39, %v3093_v36  ;;  %v6451_v28 = vld [vmem:[%s22233_s2 + $0x80] sm:$0xff] }
 0x3c2   :  { %6301 = vmatpush1.bf16.msra.mxu0 %v13844_v48  ;;  %v3110_v48 = vld [vmem:[%s22233_s2 + $0x14d8] sm:$0xff] }
 0x3c3   :  { %6387 = vmatpush1.bf16.msra.mxu1 %v13846_v50  ;;  %6302 = vmatprep.subr.bf16.mxu0 %v13861_v54  ;;  %v13956_v50 = vcombine.low %v3085_v39, %v3093_v36  ;;  %v13958_v54 = vcombine.low %v3086_v40, %v3094_v55  ;;  %v13975_v17 = vcombine.high %v3102_v35, %v3110_v48  ;;  %v6459_v36 = vld [vmem:[%s22233_s2 + $0xe0] sm:$0xff] }
 0x3c4   :  { %6388 = vmatprep.subr.bf16.mxu1 %v13863_v5  ;;  %v13973_v5 = vcombine.high %v3101_v3, %v3109_v56  ;;  %v6467_v40 = vld [vmem:[%s22233_s2 + $0x140] sm:$0xff]  ;;  %v14040_v55 = vcombine.low %v6443_v27, %v6451_v28 }
 0x3c6   :  { %6303 = vmatpush1.bf16.msra.mxu0 %v13860_v20  ;;  %v3126_v20 = vld [vmem:[%s22233_s2 + $0x1598] sm:$0xff] }
 0x3c7   :  { %6389 = vmatpush1.bf16.msra.mxu1 %v13862_v22  ;;  %6304 = vmatprep.subr.bf16.mxu0 %v13877_v60  ;;  %v13972_v22 = vcombine.low %v3101_v3, %v3109_v56  ;;  %v13974_v60 = vcombine.low %v3102_v35, %v3110_v48  ;;  %v13991_v23 = vcombine.high %v3118_v6, %v3126_v20  ;;  %v6475_v3 = vld [vmem:[%s22233_s2 + $0x1a0] sm:$0xff]  ;;  %v6476_v48 = vld [vmem:[%s22233_s2 + $0x1a8] sm:$0xff] }
 0x3c8   :  { %6390 = vmatprep.subr.bf16.mxu1 %v13879_v8  ;;  %v13989_v8 = vcombine.high %v3117_v58, %v3125_v59  ;;  %v6483_v56 = vld [vmem:[%s22233_s2 + $0x200] sm:$0xff] }
 0x3ca   :  { %6305 = vmatpush1.bf16.msra.mxu0 %v13876_v45  ;;  %v3142_v45 = vld [vmem:[%s22233_s2 + $0x1658] sm:$0xff] }
 0x3cb   :  { %6391 = vmatpush1.bf16.msra.mxu1 %v13878_v46  ;;  %6306 = vmatprep.subr.bf16.mxu0 %v13893_v47  ;;  %v13988_v46 = vcombine.low %v3117_v58, %v3125_v59  ;;  %v13990_v47 = vcombine.low %v3118_v6, %v3126_v20  ;;  %v14007_v51 = vcombine.high %v3134_v16, %v3142_v45  ;;  %v6491_v59 = vld [vmem:[%s22233_s2 + $0x260] sm:$0xff]  ;;  %v6500_v20 = vld [vmem:[%s22233_s2 + $0x2c8] sm:$0xff] }
 0x3cc   :  { %6392 = vmatprep.subr.bf16.mxu1 %v13895_v9  ;;  %v14005_v9 = vcombine.high %v3133_v7, %v3141_v34  ;;  %v6499_v6 = vld [vmem:[%s22233_s2 + $0x2c0] sm:$0xff] }
 0x3ce   :  { %6307 = vmatpush1.bf16.msra.mxu0 %v13892_v19  ;;  %v3158_v19 = vld [vmem:[%s22233_s2 + $0x1718] sm:$0xff] }
 0x3cf   :  { %6393 = vmatpush1.bf16.msra.mxu1 %v13894_v11  ;;  %6308 = vmatprep.subr.bf16.mxu0 %v13909_v12  ;;  %v14004_v11 = vcombine.low %v3133_v7, %v3141_v34  ;;  %v14006_v12 = vcombine.low %v3134_v16, %v3142_v45  ;;  %v14023_v26 = vcombine.high %v3150_v49, %v3158_v19  ;;  %v6507_v7 = vld [vmem:[%s22233_s2 + $0x320] sm:$0xff]  ;;  %v6508_v16 = vld [vmem:[%s22233_s2 + $0x328] sm:$0xff] }
 0x3d0   :  { %6394 = vmatprep.subr.bf16.mxu1 %v13911_v21  ;;  %v14021_v21 = vcombine.high %v3149_v10, %v3157_v18  ;;  %v6515_v34 = vld [vmem:[%s22233_s2 + $0x380] sm:$0xff]  ;;  %v6516_v45 = vld [vmem:[%s22233_s2 + $0x388] sm:$0xff] }
 0x3d2   :  { %6309 = vmatpush1.bf16.msra.mxu0 %v13908_v53  ;;  %v3174_v53 = vld [vmem:[%s22233_s2 + $0x17d8] sm:$0xff] }
 0x3d3   :  { %6395 = vmatpush1.bf16.msra.mxu1 %v13910_v0  ;;  %6310 = vmatprep.subr.bf16.mxu0 %v13925_v33  ;;  %v14020_v0 = vcombine.low %v3149_v10, %v3157_v18  ;;  %v14022_v33 = vcombine.low %v3150_v49, %v3158_v19  ;;  %v14039_v1 = vcombine.high %v3166_v63, %v3174_v53  ;;  %v6523_v10 = vld [vmem:[%s22233_s2 + $0x3e0] sm:$0xff]  ;;  %v6524_v49 = vld [vmem:[%s22233_s2 + $0x3e8] sm:$0xff] }
 0x3d4   :  { %6396 = vmatprep.subr.bf16.mxu1 %v13927_v4  ;;  %v14037_v4 = vcombine.high %v3165_v25, %v3173_v57  ;;  %v6531_v18 = vld [vmem:[%s22233_s2 + $0x440] sm:$0xff]  ;;  %v6532_v19 = vld [vmem:[%s22233_s2 + $0x448] sm:$0xff] }
 0x3d6   :  { %6311 = vmatpush1.bf16.msra.mxu0 %v13924_v31  ;;  %v6452_v31 = vld [vmem:[%s22233_s2 + $0x88] sm:$0xff] }
 0x3d7   :  { %6397 = vmatpush1.bf16.msra.mxu1 %v13926_v37  ;;  %6312 = vmatprep.subr.bf16.mxu0 %v13941_v41  ;;  %v14036_v37 = vcombine.low %v3165_v25, %v3173_v57  ;;  %v14038_v41 = vcombine.low %v3166_v63, %v3174_v53  ;;  %v14043_v39 = vcombine.high %v6444_v15, %v6452_v31  ;;  %v6539_v25 = vld [vmem:[%s22233_s2 + $0x4a0] sm:$0xff]  ;;  %v6540_v63 = vld [vmem:[%s22233_s2 + $0x4a8] sm:$0xff] }
 0x3d8   :  { %6398 = vmatprep.subr.bf16.mxu1 %v13943_v38  ;;  %v14041_v38 = vcombine.high %v6443_v27, %v6451_v28  ;;  %v6547_v57 = vld [vmem:[%s22233_s2 + $0x500] sm:$0xff]  ;;  %v6548_v53 = vld [vmem:[%s22233_s2 + $0x508] sm:$0xff] }
 0x3d9   :  { %v6555_v27 = vld [vmem:[%s22233_s2 + $0x560] sm:$0xff] }
 0x3da   :  { %6313 = vmatpush1.bf16.msra.mxu0 %v13940_v42  ;;  %v6460_v42 = vld [vmem:[%s22233_s2 + $0xe8] sm:$0xff]  ;;  %v6563_v28 = vld [vmem:[%s22233_s2 + $0x5c0] sm:$0xff] }
 0x3db   :  { %6399 = vmatpush1.bf16.msra.mxu1 %v13942_v43  ;;  %6314 = vmatprep.subr.bf16.mxu0 %v13957_v62  ;;  %v6468_v43 = vld [vmem:[%s22233_s2 + $0x148] sm:$0xff]  ;;  %v14042_v62 = vcombine.low %v6444_v15, %v6452_v31 }
 0x3dc   :  { %6400 = vmatprep.subr.bf16.mxu1 %v13959_v2  ;;  %v14057_v2 = vcombine.high %v6459_v36, %v6467_v40  ;;  %v14059_v35 = vcombine.high %v6460_v42, %v6468_v43  ;;  %v6556_v15 = vld [vmem:[%s22233_s2 + $0x568] sm:$0xff] }
 0x3dd   :  { %v6564_v31 = vld [vmem:[%s22233_s2 + $0x5c8] sm:$0xff] }
 0x3de   :  { %6315 = vmatpush1.bf16.msra.mxu0 %v13956_v50  ;;  %v6484_v50 = vld [vmem:[%s22233_s2 + $0x208] sm:$0xff] }
 0x3df   :  { %6401 = vmatpush1.bf16.msra.mxu1 %v13958_v54  ;;  %6316 = vmatprep.subr.bf16.mxu0 %v13973_v5  ;;  %v14056_v54 = vcombine.low %v6459_v36, %v6467_v40  ;;  %v14058_v5 = vcombine.low %v6460_v42, %v6468_v43  ;;  %v14075_v58 = vcombine.high %v6476_v48, %v6484_v50  ;;  %v6571_v36 = vld [vmem:[%s22233_s2 + $0x620] sm:$0xff]  ;;  %v6580_v42 = vld [vmem:[%s22233_s2 + $0x688] sm:$0xff] }
 0x3e0   :  { %6402 = vmatprep.subr.bf16.mxu1 %v13975_v17  ;;  %v14073_v17 = vcombine.high %v6475_v3, %v6483_v56  ;;  %v6579_v40 = vld [vmem:[%s22233_s2 + $0x680] sm:$0xff]  ;;  %v14152_v43 = vcombine.low %v6555_v27, %v6563_v28 }
 0x3e2   :  { %6317 = vmatpush1.bf16.msra.mxu0 %v13972_v22  ;;  %v14072_v22 = vcombine.low %v6475_v3, %v6483_v56  ;;  %v6587_v56 = vld [vmem:[%s22233_s2 + $0x6e0] sm:$0xff] }
 0x3e3   :  { %6403 = vmatpush1.bf16.msra.mxu1 %v13974_v60  ;;  %6318 = vmatprep.subr.bf16.mxu0 %v13989_v8  ;;  %v14074_v60 = vcombine.low %v6476_v48, %v6484_v50  ;;  %v14089_v8 = vcombine.high %v6491_v59, %v6499_v6  ;;  %v6588_v48 = vld [vmem:[%s22233_s2 + $0x6e8] sm:$0xff] }
 0x3e4   :  { %6404 = vmatprep.subr.bf16.mxu1 %v13991_v23  ;;  %v6596_v50 = vld [vmem:[%s22233_s2 + $0x748] sm:$0xff] }
 0x3e6   :  { %6319 = vmatpush1.bf16.msra.mxu0 %v13988_v46  ;;  %v14088_v46 = vcombine.low %v6491_v59, %v6499_v6  ;;  %v6603_v59 = vld [vmem:[%s22233_s2 + $0x7a0] sm:$0xff] }
 0x3e7   :  { %6405 = vmatpush1.bf16.msra.mxu1 %v13990_v47  ;;  %6320 = vmatprep.subr.bf16.mxu0 %v14005_v9  ;;  %v14105_v9 = vcombine.high %v6507_v7, %v6515_v34  ;;  %v6611_v6 = vld [vmem:[%s22233_s2 + $0x800] sm:$0xff] }
 0x3e8   :  { %6406 = vmatprep.subr.bf16.mxu1 %v14007_v51  ;;  %v14107_v51 = vcombine.high %v6508_v16, %v6516_v45 }
 0x3ea   :  { %6321 = vmatpush1.bf16.msra.mxu0 %v14004_v11  ;;  %v14104_v11 = vcombine.low %v6507_v7, %v6515_v34  ;;  %v6619_v7 = vld [vmem:[%s22233_s2 + $0x860] sm:$0xff] }
 0x3eb   :  { %6407 = vmatpush1.bf16.msra.mxu1 %v14006_v12  ;;  %6322 = vmatprep.subr.bf16.mxu0 %v14021_v21  ;;  %v14106_v12 = vcombine.low %v6508_v16, %v6516_v45  ;;  %v14121_v21 = vcombine.high %v6523_v10, %v6531_v18  ;;  %v6627_v34 = vld [vmem:[%s22233_s2 + $0x8c0] sm:$0xff]  ;;  %v6620_v16 = vld [vmem:[%s22233_s2 + $0x868] sm:$0xff] }
 0x3ec   :  { %6408 = vmatprep.subr.bf16.mxu1 %v14023_v26  ;;  %v14123_v26 = vcombine.high %v6524_v49, %v6532_v19  ;;  %v6628_v45 = vld [vmem:[%s22233_s2 + $0x8c8] sm:$0xff] }
 0x3ee   :  { %6323 = vmatpush1.bf16.msra.mxu0 %v14020_v0  ;;  %v14120_v0 = vcombine.low %v6523_v10, %v6531_v18  ;;  %v6635_v10 = vld [vmem:[%s22233_s2 + $0x920] sm:$0xff] }
 0x3ef   :  { %6409 = vmatpush1.bf16.msra.mxu1 %v14022_v33  ;;  %6324 = vmatprep.subr.bf16.mxu0 %v14037_v4  ;;  %v14122_v33 = vcombine.low %v6524_v49, %v6532_v19  ;;  %v14137_v4 = vcombine.high %v6539_v25, %v6547_v57  ;;  %v6643_v18 = vld [vmem:[%s22233_s2 + $0x980] sm:$0xff]  ;;  %v6636_v49 = vld [vmem:[%s22233_s2 + $0x928] sm:$0xff] }
 0x3f0   :  { %6410 = vmatprep.subr.bf16.mxu1 %v14039_v1  ;;  %v14139_v1 = vcombine.high %v6540_v63, %v6548_v53  ;;  %v6644_v19 = vld [vmem:[%s22233_s2 + $0x988] sm:$0xff] }
 0x3f2   :  { %6325 = vmatpush1.bf16.msra.mxu0 %v14036_v37  ;;  %v14136_v37 = vcombine.low %v6539_v25, %v6547_v57  ;;  %v6651_v25 = vld [vmem:[%s22233_s2 + $0x9e0] sm:$0xff] }
 0x3f3   :  { %6411 = vmatpush1.bf16.msra.mxu1 %v14038_v41  ;;  %9515 = vmatprep.subr.bf16.mxu0 %v14041_v38  ;;  %v14138_v41 = vcombine.low %v6540_v63, %v6548_v53  ;;  %v14153_v38 = vcombine.high %v6555_v27, %v6563_v28  ;;  %v6659_v57 = vld [vmem:[%s22233_s2 + $0xa40] sm:$0xff]  ;;  %v6652_v63 = vld [vmem:[%s22233_s2 + $0x9e8] sm:$0xff] }
 0x3f4   :  { %9601 = vmatprep.subr.bf16.mxu1 %v14043_v39  ;;  %v14155_v39 = vcombine.high %v6556_v15, %v6564_v31  ;;  %v6660_v53 = vld [vmem:[%s22233_s2 + $0xa48] sm:$0xff]  ;;  %v6667_v27 = vld [vmem:[%s22233_s2 + $0xaa0] sm:$0xff] }
 0x3f5   :  { %6327 = vmatmul.mubr.bf16.vlgmr.msra.gmra.mrb[36].mxu0 %v16464_v13  ;;  %v6675_v28 = vld [vmem:[%s22233_s2 + $0xb00] sm:$0xff] }
 0x3f6   :  { %6413 = vmatmul.mubr.bf16.vlgmr.msra.gmra.mrb[36].mxu1 %v16464_v13  ;;  %9516 = vmatpush1.bf16.msra.mxu0 %v14040_v55  ;;  %v6492_v13 = vld [vmem:[%s22233_s2 + $0x268] sm:$0xff] }
 0x3f7   :  { %9547 = vmatprep.mubr.bf16.mxu0 %v16476_v32  ;;  %9602 = vmatpush1.bf16.msra.mxu1 %v14042_v62  ;;  %v14091_v23 = vcombine.high %v6492_v13, %v6500_v20  ;;  %v14090_v47 = vcombine.low %v6492_v13, %v6500_v20  ;;  %v6572_v55 = vld [vmem:[%s22233_s2 + $0x628] sm:$0xff]  ;;  %v14154_v62 = vcombine.low %v6556_v15, %v6564_v31 }
 0x3f8   :  { %9633 = vmatprep.mubr.bf16.mxu1 %v16476_v32  ;;  %9517 = vmatprep.subr.bf16.mxu0 %v14057_v2  ;;  %v14169_v2 = vcombine.high %v6571_v36, %v6579_v40  ;;  %v14171_v3 = vcombine.high %v6572_v55, %v6580_v42  ;;  %v6604_v13 = vld [vmem:[%s22233_s2 + $0x7a8] sm:$0xff] }
 0x3f9   :  { %9603 = vmatprep.subr.bf16.mxu1 %v14059_v35  ;;  %v6595_v35 = vld [vmem:[%s22233_s2 + $0x740] sm:$0xff]  ;;  %v6612_v20 = vld [vmem:[%s22233_s2 + $0x808] sm:$0xff] }
 0x3fa   :  { %9518 = vmatpush1.bf16.msra.mxu0 %v14056_v54  ;;  %v14168_v54 = vcombine.low %v6571_v36, %v6579_v40  ;;  %v6668_v15 = vld [vmem:[%s22233_s2 + $0xaa8] sm:$0xff]  ;;  %v6683_v36 = vld [vmem:[%s22233_s2 + $0xb60] sm:$0xff] }
 0x3fb   :  { %9604 = vmatpush1.bf16.msra.mxu1 %v14058_v5  ;;  %9519 = vmatprep.subr.bf16.mxu0 %v14073_v17  ;;  %v14170_v5 = vcombine.low %v6572_v55, %v6580_v42  ;;  %v14185_v17 = vcombine.high %v6587_v56, %v6595_v35  ;;  %v6676_v31 = vld [vmem:[%s22233_s2 + $0xb08] sm:$0xff]  ;;  %v6691_v40 = vld [vmem:[%s22233_s2 + $0xbc0] sm:$0xff] }
 0x3fc   :  { %9605 = vmatprep.subr.bf16.mxu1 %v14075_v58  ;;  %v14187_v58 = vcombine.high %v6588_v48, %v6596_v50  ;;  %v6684_v55 = vld [vmem:[%s22233_s2 + $0xb68] sm:$0xff] }
 0x3fd   :  { %v6692_v42 = vld [vmem:[%s22233_s2 + $0xbc8] sm:$0xff] }
 0x3fe   :  { %9520 = vmatpush1.bf16.msra.mxu0 %v14072_v22  ;;  %v14184_v22 = vcombine.low %v6587_v56, %v6595_v35  ;;  %v6699_v56 = vld [vmem:[%s22233_s2 + $0xc20] sm:$0xff] }
 0x3ff   :  { %9606 = vmatpush1.bf16.msra.mxu1 %v14074_v60  ;;  %9521 = vmatprep.subr.bf16.mxu0 %v14089_v8  ;;  %v14186_v60 = vcombine.low %v6588_v48, %v6596_v50  ;;  %v14201_v8 = vcombine.high %v6603_v59, %v6611_v6  ;;  %v6707_v35 = vld [vmem:[%s22233_s2 + $0xc80] sm:$0xff]  ;;  %v6700_v48 = vld [vmem:[%s22233_s2 + $0xc28] sm:$0xff] }
 0x400   :  { %9607 = vmatprep.subr.bf16.mxu1 %v14091_v23  ;;  %v14203_v23 = vcombine.high %v6604_v13, %v6612_v20  ;;  %v6708_v50 = vld [vmem:[%s22233_s2 + $0xc88] sm:$0xff] }
 0x402   :  { %9522 = vmatpush1.bf16.msra.mxu0 %v14088_v46  ;;  %v14200_v46 = vcombine.low %v6603_v59, %v6611_v6  ;;  %v6715_v59 = vld [vmem:[%s22233_s2 + $0xce0] sm:$0xff] }
 0x403   :  { %9608 = vmatpush1.bf16.msra.mxu1 %v14090_v47  ;;  %9523 = vmatprep.subr.bf16.mxu0 %v14105_v9  ;;  %v14202_v47 = vcombine.low %v6604_v13, %v6612_v20  ;;  %v14217_v9 = vcombine.high %v6619_v7, %v6627_v34  ;;  %v6723_v6 = vld [vmem:[%s22233_s2 + $0xd40] sm:$0xff]  ;;  %v14296_v13 = vcombine.low %v6699_v56, %v6707_v35  ;;  %v6716_v20 = vld [vmem:[%s22233_s2 + $0xce8] sm:$0xff] }
 0x404   :  { %9609 = vmatprep.subr.bf16.mxu1 %v14107_v51  ;;  %v14219_v51 = vcombine.high %v6620_v16, %v6628_v45 }
 0x406   :  { %9524 = vmatpush1.bf16.msra.mxu0 %v14104_v11  ;;  %v14216_v11 = vcombine.low %v6619_v7, %v6627_v34  ;;  %v6739_v7 = vld [vmem:[%s22233_s2 + $0xe00] sm:$0xff] }
 0x407   :  { %9610 = vmatpush1.bf16.msra.mxu1 %v14106_v12  ;;  %9525 = vmatprep.subr.bf16.mxu0 %v14121_v21  ;;  %v14218_v12 = vcombine.low %v6620_v16, %v6628_v45  ;;  %v14233_v21 = vcombine.high %v6635_v10, %v6643_v18  ;;  %v6732_v16 = vld [vmem:[%s22233_s2 + $0xda8] sm:$0xff] }
 0x408   :  { %9611 = vmatprep.subr.bf16.mxu1 %v14123_v26  ;;  %v14235_v26 = vcombine.high %v6636_v49, %v6644_v19  ;;  %v6740_v45 = vld [vmem:[%s22233_s2 + $0xe08] sm:$0xff] }
 0x40a   :  { %9526 = vmatpush1.bf16.msra.mxu0 %v14120_v0  ;;  %v14232_v0 = vcombine.low %v6635_v10, %v6643_v18  ;;  %v6747_v10 = vld [vmem:[%s22233_s2 + $0xe60] sm:$0xff] }
 0x40b   :  { %9612 = vmatpush1.bf16.msra.mxu1 %v14122_v33  ;;  %9527 = vmatprep.subr.bf16.mxu0 %v14137_v4  ;;  %v14234_v33 = vcombine.low %v6636_v49, %v6644_v19  ;;  %v14249_v4 = vcombine.high %v6651_v25, %v6659_v57  ;;  %v6755_v18 = vld [vmem:[%s22233_s2 + $0xec0] sm:$0xff]  ;;  %v6748_v49 = vld [vmem:[%s22233_s2 + $0xe68] sm:$0xff] }
 0x40c   :  { %9613 = vmatprep.subr.bf16.mxu1 %v14139_v1  ;;  %v14251_v1 = vcombine.high %v6652_v63, %v6660_v53  ;;  %v6756_v19 = vld [vmem:[%s22233_s2 + $0xec8] sm:$0xff] }
 0x40e   :  { %9528 = vmatpush1.bf16.msra.mxu0 %v14136_v37  ;;  %v14248_v37 = vcombine.low %v6651_v25, %v6659_v57  ;;  %v6763_v25 = vld [vmem:[%s22233_s2 + $0xf20] sm:$0xff] }
 0x40f   :  { %9614 = vmatpush1.bf16.msra.mxu1 %v14138_v41  ;;  %9529 = vmatprep.subr.bf16.mxu0 %v14153_v38  ;;  %v14250_v41 = vcombine.low %v6652_v63, %v6660_v53  ;;  %v14265_v38 = vcombine.high %v6667_v27, %v6675_v28  ;;  %v6771_v57 = vld [vmem:[%s22233_s2 + $0xf80] sm:$0xff]  ;;  %v6764_v63 = vld [vmem:[%s22233_s2 + $0xf28] sm:$0xff] }
 0x410   :  { %9615 = vmatprep.subr.bf16.mxu1 %v14155_v39  ;;  %v14267_v39 = vcombine.high %v6668_v15, %v6676_v31  ;;  %v6772_v53 = vld [vmem:[%s22233_s2 + $0xf88] sm:$0xff] }
 0x412   :  { %9530 = vmatpush1.bf16.msra.mxu0 %v14152_v43  ;;  %v14264_v43 = vcombine.low %v6667_v27, %v6675_v28  ;;  %v6779_v27 = vld [vmem:[%s22233_s2 + $0xfe0] sm:$0xff] }
 0x413   :  { %9616 = vmatpush1.bf16.msra.mxu1 %v14154_v62  ;;  %9531 = vmatprep.subr.bf16.mxu0 %v14169_v2  ;;  %v14266_v62 = vcombine.low %v6668_v15, %v6676_v31  ;;  %v14281_v2 = vcombine.high %v6683_v36, %v6691_v40  ;;  %v6787_v28 = vld [vmem:[%s22233_s2 + $0x1040] sm:$0xff]  ;;  %v6780_v15 = vld [vmem:[%s22233_s2 + $0xfe8] sm:$0xff] }
 0x414   :  { %9617 = vmatprep.subr.bf16.mxu1 %v14171_v3  ;;  %v14283_v3 = vcombine.high %v6684_v55, %v6692_v42  ;;  %v6788_v31 = vld [vmem:[%s22233_s2 + $0x1048] sm:$0xff] }
 0x416   :  { %9532 = vmatpush1.bf16.msra.mxu0 %v14168_v54  ;;  %v14280_v54 = vcombine.low %v6683_v36, %v6691_v40  ;;  %v6795_v36 = vld [vmem:[%s22233_s2 + $0x10a0] sm:$0xff] }
 0x417   :  { %9618 = vmatpush1.bf16.msra.mxu1 %v14170_v5  ;;  %9533 = vmatprep.subr.bf16.mxu0 %v14185_v17  ;;  %v14282_v5 = vcombine.low %v6684_v55, %v6692_v42  ;;  %v14297_v17 = vcombine.high %v6699_v56, %v6707_v35  ;;  %v6803_v40 = vld [vmem:[%s22233_s2 + $0x1100] sm:$0xff]  ;;  %v6796_v55 = vld [vmem:[%s22233_s2 + $0x10a8] sm:$0xff] }
 0x418   :  { %9619 = vmatprep.subr.bf16.mxu1 %v14187_v58  ;;  %v14299_v58 = vcombine.high %v6700_v48, %v6708_v50  ;;  %v6804_v42 = vld [vmem:[%s22233_s2 + $0x1108] sm:$0xff]  ;;  %v6811_v56 = vld [vmem:[%s22233_s2 + $0x1160] sm:$0xff] }
 0x419   :  { %v6819_v35 = vld [vmem:[%s22233_s2 + $0x11c0] sm:$0xff] }
 0x41a   :  { %9534 = vmatpush1.bf16.msra.mxu0 %v14184_v22  ;;  %v6724_v22 = vld [vmem:[%s22233_s2 + $0xd48] sm:$0xff] }
 0x41b   :  { %9620 = vmatpush1.bf16.msra.mxu1 %v14186_v60  ;;  %9535 = vmatprep.subr.bf16.mxu0 %v14201_v8  ;;  %v14298_v60 = vcombine.low %v6700_v48, %v6708_v50  ;;  %v14313_v8 = vcombine.high %v6715_v59, %v6723_v6  ;;  %v14315_v34 = vcombine.high %v6716_v20, %v6724_v22  ;;  %v6812_v48 = vld [vmem:[%s22233_s2 + $0x1168] sm:$0xff] }
 0x41c   :  { %9621 = vmatprep.subr.bf16.mxu1 %v14203_v23  ;;  %v6731_v23 = vld [vmem:[%s22233_s2 + $0xda0] sm:$0xff]  ;;  %v6820_v50 = vld [vmem:[%s22233_s2 + $0x11c8] sm:$0xff] }
 0x41e   :  { %9536 = vmatpush1.bf16.msra.mxu0 %v14200_v46  ;;  %v14312_v46 = vcombine.low %v6715_v59, %v6723_v6  ;;  %v6827_v59 = vld [vmem:[%s22233_s2 + $0x1220] sm:$0xff] }
 0x41f   :  { %9622 = vmatpush1.bf16.msra.mxu1 %v14202_v47  ;;  %9537 = vmatprep.subr.bf16.mxu0 %v14217_v9  ;;  %v14314_v47 = vcombine.low %v6716_v20, %v6724_v22  ;;  %v14329_v9 = vcombine.high %v6731_v23, %v6739_v7  ;;  %v6835_v6 = vld [vmem:[%s22233_s2 + $0x1280] sm:$0xff]  ;;  %v6836_v20 = vld [vmem:[%s22233_s2 + $0x1288] sm:$0xff]  ;;  %v14408_v22 = vcombine.low %v6811_v56, %v6819_v35 }
 0x420   :  { %9623 = vmatprep.subr.bf16.mxu1 %v14219_v51  ;;  %v14331_v51 = vcombine.high %v6732_v16, %v6740_v45 }
 0x422   :  { %9538 = vmatpush1.bf16.msra.mxu0 %v14216_v11  ;;  %v14328_v11 = vcombine.low %v6731_v23, %v6739_v7  ;;  %v6843_v7 = vld [vmem:[%s22233_s2 + $0x12e0] sm:$0xff] }
 0x423   :  { %9624 = vmatpush1.bf16.msra.mxu1 %v14218_v12  ;;  %9539 = vmatprep.subr.bf16.mxu0 %v14233_v21  ;;  %v14330_v12 = vcombine.low %v6732_v16, %v6740_v45  ;;  %v14345_v21 = vcombine.high %v6747_v10, %v6755_v18  ;;  %v6844_v16 = vld [vmem:[%s22233_s2 + $0x12e8] sm:$0xff] }
 0x424   :  { %9625 = vmatprep.subr.bf16.mxu1 %v14235_v26  ;;  %v14347_v26 = vcombine.high %v6748_v49, %v6756_v19  ;;  %v6852_v45 = vld [vmem:[%s22233_s2 + $0x1348] sm:$0xff] }
 0x426   :  { %9540 = vmatpush1.bf16.msra.mxu0 %v14232_v0  ;;  %v14344_v0 = vcombine.low %v6747_v10, %v6755_v18  ;;  %v6859_v10 = vld [vmem:[%s22233_s2 + $0x13a0] sm:$0xff] }
 0x427   :  { %9626 = vmatpush1.bf16.msra.mxu1 %v14234_v33  ;;  %9541 = vmatprep.subr.bf16.mxu0 %v14249_v4  ;;  %v14346_v33 = vcombine.low %v6748_v49, %v6756_v19  ;;  %v14361_v4 = vcombine.high %v6763_v25, %v6771_v57  ;;  %v6867_v18 = vld [vmem:[%s22233_s2 + $0x1400] sm:$0xff]  ;;  %v6860_v49 = vld [vmem:[%s22233_s2 + $0x13a8] sm:$0xff] }
 0x428   :  { %9627 = vmatprep.subr.bf16.mxu1 %v14251_v1  ;;  %v14363_v1 = vcombine.high %v6764_v63, %v6772_v53  ;;  %v6868_v19 = vld [vmem:[%s22233_s2 + $0x1408] sm:$0xff] }
 0x42a   :  { %9542 = vmatpush1.bf16.msra.mxu0 %v14248_v37  ;;  %v14360_v37 = vcombine.low %v6763_v25, %v6771_v57  ;;  %v6875_v25 = vld [vmem:[%s22233_s2 + $0x1460] sm:$0xff] }
 0x42b   :  { %9628 = vmatpush1.bf16.msra.mxu1 %v14250_v41  ;;  %9543 = vmatprep.subr.bf16.mxu0 %v14265_v38  ;;  %v14362_v41 = vcombine.low %v6764_v63, %v6772_v53  ;;  %v14377_v38 = vcombine.high %v6779_v27, %v6787_v28  ;;  %v6883_v57 = vld [vmem:[%s22233_s2 + $0x14c0] sm:$0xff]  ;;  %v6876_v63 = vld [vmem:[%s22233_s2 + $0x1468] sm:$0xff] }
 0x42c   :  { %9629 = vmatprep.subr.bf16.mxu1 %v14267_v39  ;;  %v14379_v39 = vcombine.high %v6780_v15, %v6788_v31  ;;  %v6884_v53 = vld [vmem:[%s22233_s2 + $0x14c8] sm:$0xff] }
 0x42e   :  { %9544 = vmatpush1.bf16.msra.mxu0 %v14264_v43  ;;  %v14376_v43 = vcombine.low %v6779_v27, %v6787_v28  ;;  %v6891_v27 = vld [vmem:[%s22233_s2 + $0x1520] sm:$0xff] }
 0x42f   :  { %9630 = vmatpush1.bf16.msra.mxu1 %v14266_v62  ;;  %9545 = vmatprep.subr.bf16.mxu0 %v14281_v2  ;;  %v14378_v62 = vcombine.low %v6780_v15, %v6788_v31  ;;  %v14393_v2 = vcombine.high %v6795_v36, %v6803_v40  ;;  %v6899_v28 = vld [vmem:[%s22233_s2 + $0x1580] sm:$0xff]  ;;  %v6892_v15 = vld [vmem:[%s22233_s2 + $0x1528] sm:$0xff] }
 0x430   :  { %9631 = vmatprep.subr.bf16.mxu1 %v14283_v3  ;;  %v14395_v3 = vcombine.high %v6796_v55, %v6804_v42  ;;  %v6900_v31 = vld [vmem:[%s22233_s2 + $0x1588] sm:$0xff] }
 0x432   :  { %9546 = vmatpush1.bf16.msra.mxu0 %v14280_v54  ;;  %v14392_v54 = vcombine.low %v6795_v36, %v6803_v40  ;;  %v6907_v36 = vld [vmem:[%s22233_s2 + $0x15e0] sm:$0xff] }
 0x433   :  { %9632 = vmatpush1.bf16.msra.mxu1 %v14282_v5  ;;  %9558 = vmatprep.subr.bf16.mxu0 %v14297_v17  ;;  %v14394_v5 = vcombine.low %v6796_v55, %v6804_v42  ;;  %v14409_v17 = vcombine.high %v6811_v56, %v6819_v35  ;;  %v6915_v40 = vld [vmem:[%s22233_s2 + $0x1640] sm:$0xff]  ;;  %v6908_v55 = vld [vmem:[%s22233_s2 + $0x15e8] sm:$0xff] }
 0x434   :  { %9644 = vmatprep.subr.bf16.mxu1 %v14299_v58  ;;  %v14411_v58 = vcombine.high %v6812_v48, %v6820_v50  ;;  %v6916_v42 = vld [vmem:[%s22233_s2 + $0x1648] sm:$0xff]  ;;  %v6923_v56 = vld [vmem:[%s22233_s2 + $0x16a0] sm:$0xff] }
 0x435   :  { %9548 = vmatmul.mubr.bf16.vlgmr.msra.gmra.mrb[40].mxu0 %v16472_v14  ;;  %v6931_v35 = vld [vmem:[%s22233_s2 + $0x1700] sm:$0xff] }
 0x436   :  { %9634 = vmatmul.mubr.bf16.vlgmr.msra.gmra.mrb[40].mxu1 %v16472_v14  ;;  %9559 = vmatpush1.bf16.msra.mxu0 %v14296_v13  ;;  %v6828_v13 = vld [vmem:[%s22233_s2 + $0x1228] sm:$0xff] }
 0x437   :  { %9590 = vmatprep.mubr.bf16.mxu0 %v16539_v29  ;;  %9645 = vmatpush1.bf16.msra.mxu1 %v14298_v60  ;;  %v14410_v60 = vcombine.low %v6812_v48, %v6820_v50  ;;  %v14427_v23 = vcombine.high %v6828_v13, %v6836_v20  ;;  %v6924_v48 = vld [vmem:[%s22233_s2 + $0x16a8] sm:$0xff] }
 0x438   :  { %9676 = vmatprep.mubr.bf16.mxu1 %v16539_v29  ;;  %9560 = vmatprep.subr.bf16.mxu0 %v14313_v8  ;;  %v14425_v8 = vcombine.high %v6827_v59, %v6835_v6  ;;  %v6932_v50 = vld [vmem:[%s22233_s2 + $0x1708] sm:$0xff] }
 0x439   :  { %9646 = vmatprep.subr.bf16.mxu1 %v14315_v34  ;;  %v6851_v34 = vld [vmem:[%s22233_s2 + $0x1340] sm:$0xff] }
 0x43a   :  { %9561 = vmatpush1.bf16.msra.mxu0 %v14312_v46  ;;  %v14424_v46 = vcombine.low %v6827_v59, %v6835_v6  ;;  %v6939_v59 = vld [vmem:[%s22233_s2 + $0x1760] sm:$0xff] }
 0x43b   :  { %9647 = vmatpush1.bf16.msra.mxu1 %v14314_v47  ;;  %9562 = vmatprep.subr.bf16.mxu0 %v14329_v9  ;;  %v14426_v47 = vcombine.low %v6828_v13, %v6836_v20  ;;  %v14441_v9 = vcombine.high %v6843_v7, %v6851_v34  ;;  %v6947_v6 = vld [vmem:[%s22233_s2 + $0x17c0] sm:$0xff]  ;;  %v6940_v13 = vld [vmem:[%s22233_s2 + $0x1768] sm:$0xff] }
 0x43c   :  { %9648 = vmatprep.subr.bf16.mxu1 %v14331_v51  ;;  %v14443_v51 = vcombine.high %v6844_v16, %v6852_v45  ;;  %v6948_v20 = vld [vmem:[%s22233_s2 + $0x17c8] sm:$0xff] }
 0x43e   :  { %9563 = vmatpush1.bf16.msra.mxu0 %v14328_v11  ;;  %v14440_v11 = vcombine.low %v6843_v7, %v6851_v34  ;;  %v6445_v7 = vld [vmem:[%s22233_s2 + $0x30] sm:$0xff] }
 0x43f   :  { %9649 = vmatpush1.bf16.msra.mxu1 %v14330_v12  ;;  %9564 = vmatprep.subr.bf16.mxu0 %v14345_v21  ;;  %v14442_v12 = vcombine.low %v6844_v16, %v6852_v45  ;;  %v14457_v21 = vcombine.high %v6859_v10, %v6867_v18  ;;  %v6453_v34 = vld [vmem:[%s22233_s2 + $0x90] sm:$0xff]  ;;  %v6446_v16 = vld [vmem:[%s22233_s2 + $0x38] sm:$0xff] }
 0x440   :  { %9650 = vmatprep.subr.bf16.mxu1 %v14347_v26  ;;  %v14459_v26 = vcombine.high %v6860_v49, %v6868_v19  ;;  %v6454_v45 = vld [vmem:[%s22233_s2 + $0x98] sm:$0xff] }
 0x442   :  { %9565 = vmatpush1.bf16.msra.mxu0 %v14344_v0  ;;  %v14456_v0 = vcombine.low %v6859_v10, %v6867_v18  ;;  %v6461_v10 = vld [vmem:[%s22233_s2 + $0xf0] sm:$0xff] }
 0x443   :  { %9651 = vmatpush1.bf16.msra.mxu1 %v14346_v33  ;;  %9566 = vmatprep.subr.bf16.mxu0 %v14361_v4  ;;  %v14458_v33 = vcombine.low %v6860_v49, %v6868_v19  ;;  %v14473_v4 = vcombine.high %v6875_v25, %v6883_v57  ;;  %v6469_v18 = vld [vmem:[%s22233_s2 + $0x150] sm:$0xff]  ;;  %v14044_v49 = vcombine.low %v6445_v7, %v6453_v34  ;;  %v6462_v19 = vld [vmem:[%s22233_s2 + $0xf8] sm:$0xff] }
 0x444   :  { %9652 = vmatprep.subr.bf16.mxu1 %v14363_v1  ;;  %v14475_v1 = vcombine.high %v6876_v63, %v6884_v53 }
 0x446   :  { %9567 = vmatpush1.bf16.msra.mxu0 %v14360_v37  ;;  %v14472_v37 = vcombine.low %v6875_v25, %v6883_v57  ;;  %v6485_v25 = vld [vmem:[%s22233_s2 + $0x210] sm:$0xff] }
 0x447   :  { %9653 = vmatpush1.bf16.msra.mxu1 %v14362_v41  ;;  %9568 = vmatprep.subr.bf16.mxu0 %v14377_v38  ;;  %v14474_v41 = vcombine.low %v6876_v63, %v6884_v53  ;;  %v14489_v38 = vcombine.high %v6891_v27, %v6899_v28  ;;  %v6478_v63 = vld [vmem:[%s22233_s2 + $0x1b8] sm:$0xff] }
 0x448   :  { %9654 = vmatprep.subr.bf16.mxu1 %v14379_v39  ;;  %v14491_v39 = vcombine.high %v6892_v15, %v6900_v31  ;;  %v6486_v53 = vld [vmem:[%s22233_s2 + $0x218] sm:$0xff] }
 0x44a   :  { %9569 = vmatpush1.bf16.msra.mxu0 %v14376_v43  ;;  %v14488_v43 = vcombine.low %v6891_v27, %v6899_v28  ;;  %v6493_v27 = vld [vmem:[%s22233_s2 + $0x270] sm:$0xff] }
 0x44b   :  { %9655 = vmatpush1.bf16.msra.mxu1 %v14378_v62  ;;  %9570 = vmatprep.subr.bf16.mxu0 %v14393_v2  ;;  %v14490_v62 = vcombine.low %v6892_v15, %v6900_v31  ;;  %v14505_v2 = vcombine.high %v6907_v36, %v6915_v40  ;;  %v6501_v28 = vld [vmem:[%s22233_s2 + $0x2d0] sm:$0xff]  ;;  %v6494_v15 = vld [vmem:[%s22233_s2 + $0x278] sm:$0xff] }
 0x44c   :  { %9656 = vmatprep.subr.bf16.mxu1 %v14395_v3  ;;  %v14507_v3 = vcombine.high %v6908_v55, %v6916_v42  ;;  %v6502_v31 = vld [vmem:[%s22233_s2 + $0x2d8] sm:$0xff] }
 0x44e   :  { %9571 = vmatpush1.bf16.msra.mxu0 %v14392_v54  ;;  %v14504_v54 = vcombine.low %v6907_v36, %v6915_v40  ;;  %v6509_v36 = vld [vmem:[%s22233_s2 + $0x330] sm:$0xff] }
 0x44f   :  { %9657 = vmatpush1.bf16.msra.mxu1 %v14394_v5  ;;  %9572 = vmatprep.subr.bf16.mxu0 %v14409_v17  ;;  %v14506_v5 = vcombine.low %v6908_v55, %v6916_v42  ;;  %v14521_v17 = vcombine.high %v6923_v56, %v6931_v35  ;;  %v6517_v40 = vld [vmem:[%s22233_s2 + $0x390] sm:$0xff]  ;;  %v6510_v55 = vld [vmem:[%s22233_s2 + $0x338] sm:$0xff] }
 0x450   :  { %9658 = vmatprep.subr.bf16.mxu1 %v14411_v58  ;;  %v14523_v58 = vcombine.high %v6924_v48, %v6932_v50  ;;  %v6518_v42 = vld [vmem:[%s22233_s2 + $0x398] sm:$0xff] }
 0x452   :  { %9573 = vmatpush1.bf16.msra.mxu0 %v14408_v22  ;;  %v14520_v22 = vcombine.low %v6923_v56, %v6931_v35  ;;  %v6525_v56 = vld [vmem:[%s22233_s2 + $0x3f0] sm:$0xff] }
 0x453   :  { %9659 = vmatpush1.bf16.msra.mxu1 %v14410_v60  ;;  %9574 = vmatprep.subr.bf16.mxu0 %v14425_v8  ;;  %v14522_v60 = vcombine.low %v6924_v48, %v6932_v50  ;;  %v14537_v8 = vcombine.high %v6939_v59, %v6947_v6  ;;  %v6533_v35 = vld [vmem:[%s22233_s2 + $0x450] sm:$0xff]  ;;  %v6526_v48 = vld [vmem:[%s22233_s2 + $0x3f8] sm:$0xff] }
 0x454   :  { %9660 = vmatprep.subr.bf16.mxu1 %v14427_v23  ;;  %v14539_v23 = vcombine.high %v6940_v13, %v6948_v20  ;;  %v6534_v50 = vld [vmem:[%s22233_s2 + $0x458] sm:$0xff] }
 0x456   :  { %9575 = vmatpush1.bf16.msra.mxu0 %v14424_v46  ;;  %v14536_v46 = vcombine.low %v6939_v59, %v6947_v6  ;;  %v6541_v59 = vld [vmem:[%s22233_s2 + $0x4b0] sm:$0xff] }
 0x457   :  { %9661 = vmatpush1.bf16.msra.mxu1 %v14426_v47  ;;  %9576 = vmatprep.subr.bf16.mxu0 %v14441_v9  ;;  %v14538_v47 = vcombine.low %v6940_v13, %v6948_v20  ;;  %v14045_v9 = vcombine.high %v6445_v7, %v6453_v34  ;;  %v6549_v6 = vld [vmem:[%s22233_s2 + $0x510] sm:$0xff]  ;;  %v6542_v13 = vld [vmem:[%s22233_s2 + $0x4b8] sm:$0xff] }
 0x458   :  { %9662 = vmatprep.subr.bf16.mxu1 %v14443_v51  ;;  %v14047_v51 = vcombine.high %v6446_v16, %v6454_v45  ;;  %v6550_v20 = vld [vmem:[%s22233_s2 + $0x518] sm:$0xff]  ;;  %v6557_v7 = vld [vmem:[%s22233_s2 + $0x570] sm:$0xff] }
 0x459   :  { %v6565_v34 = vld [vmem:[%s22233_s2 + $0x5d0] sm:$0xff] }
 0x45a   :  { %9577 = vmatpush1.bf16.msra.mxu0 %v14440_v11  ;;  %v6470_v11 = vld [vmem:[%s22233_s2 + $0x158] sm:$0xff] }
 0x45b   :  { %9663 = vmatpush1.bf16.msra.mxu1 %v14442_v12  ;;  %9578 = vmatprep.subr.bf16.mxu0 %v14457_v21  ;;  %v14046_v12 = vcombine.low %v6446_v16, %v6454_v45  ;;  %v14061_v21 = vcombine.high %v6461_v10, %v6469_v18  ;;  %v14063_v57 = vcombine.high %v6462_v19, %v6470_v11  ;;  %v6558_v16 = vld [vmem:[%s22233_s2 + $0x578] sm:$0xff] }
 0x45c   :  { %9664 = vmatprep.subr.bf16.mxu1 %v14459_v26  ;;  %v6477_v26 = vld [vmem:[%s22233_s2 + $0x1b0] sm:$0xff]  ;;  %v6566_v45 = vld [vmem:[%s22233_s2 + $0x5d8] sm:$0xff] }
 0x45e   :  { %9579 = vmatpush1.bf16.msra.mxu0 %v14456_v0  ;;  %v14060_v0 = vcombine.low %v6461_v10, %v6469_v18  ;;  %v6573_v10 = vld [vmem:[%s22233_s2 + $0x630] sm:$0xff] }
 0x45f   :  { %9665 = vmatpush1.bf16.msra.mxu1 %v14458_v33  ;;  %9580 = vmatprep.subr.bf16.mxu0 %v14473_v4  ;;  %v14062_v33 = vcombine.low %v6462_v19, %v6470_v11  ;;  %v14077_v4 = vcombine.high %v6477_v26, %v6485_v25  ;;  %v6581_v18 = vld [vmem:[%s22233_s2 + $0x690] sm:$0xff]  ;;  %v6582_v19 = vld [vmem:[%s22233_s2 + $0x698] sm:$0xff]  ;;  %v14156_v11 = vcombine.low %v6557_v7, %v6565_v34 }
 0x460   :  { %9666 = vmatprep.subr.bf16.mxu1 %v14475_v1  ;;  %v14079_v1 = vcombine.high %v6478_v63, %v6486_v53 }
 0x462   :  { %9581 = vmatpush1.bf16.msra.mxu0 %v14472_v37  ;;  %v14076_v37 = vcombine.low %v6477_v26, %v6485_v25  ;;  %v6589_v25 = vld [vmem:[%s22233_s2 + $0x6f0] sm:$0xff] }
 0x463   :  { %9667 = vmatpush1.bf16.msra.mxu1 %v14474_v41  ;;  %9582 = vmatprep.subr.bf16.mxu0 %v14489_v38  ;;  %v14078_v41 = vcombine.low %v6478_v63, %v6486_v53  ;;  %v14093_v38 = vcombine.high %v6493_v27, %v6501_v28  ;;  %v6590_v63 = vld [vmem:[%s22233_s2 + $0x6f8] sm:$0xff] }
 0x464   :  { %9668 = vmatprep.subr.bf16.mxu1 %v14491_v39  ;;  %v14095_v39 = vcombine.high %v6494_v15, %v6502_v31  ;;  %v6598_v53 = vld [vmem:[%s22233_s2 + $0x758] sm:$0xff] }
 0x466   :  { %9583 = vmatpush1.bf16.msra.mxu0 %v14488_v43  ;;  %v14092_v43 = vcombine.low %v6493_v27, %v6501_v28  ;;  %v6605_v27 = vld [vmem:[%s22233_s2 + $0x7b0] sm:$0xff] }
 0x467   :  { %9669 = vmatpush1.bf16.msra.mxu1 %v14490_v62  ;;  %9584 = vmatprep.subr.bf16.mxu0 %v14505_v2  ;;  %v14094_v62 = vcombine.low %v6494_v15, %v6502_v31  ;;  %v14109_v2 = vcombine.high %v6509_v36, %v6517_v40  ;;  %v6613_v28 = vld [vmem:[%s22233_s2 + $0x810] sm:$0xff]  ;;  %v6606_v15 = vld [vmem:[%s22233_s2 + $0x7b8] sm:$0xff] }
 0x468   :  { %9670 = vmatprep.subr.bf16.mxu1 %v14507_v3  ;;  %v14111_v3 = vcombine.high %v6510_v55, %v6518_v42  ;;  %v6614_v31 = vld [vmem:[%s22233_s2 + $0x818] sm:$0xff] }
 0x46a   :  { %9585 = vmatpush1.bf16.msra.mxu0 %v14504_v54  ;;  %v14108_v54 = vcombine.low %v6509_v36, %v6517_v40  ;;  %v6621_v36 = vld [vmem:[%s22233_s2 + $0x870] sm:$0xff] }
 0x46b   :  { %9671 = vmatpush1.bf16.msra.mxu1 %v14506_v5  ;;  %9586 = vmatprep.subr.bf16.mxu0 %v14521_v17  ;;  %v14110_v5 = vcombine.low %v6510_v55, %v6518_v42  ;;  %v14125_v17 = vcombine.high %v6525_v56, %v6533_v35  ;;  %v6629_v40 = vld [vmem:[%s22233_s2 + $0x8d0] sm:$0xff]  ;;  %v6622_v55 = vld [vmem:[%s22233_s2 + $0x878] sm:$0xff] }
 0x46c   :  { %9672 = vmatprep.subr.bf16.mxu1 %v14523_v58  ;;  %v14127_v58 = vcombine.high %v6526_v48, %v6534_v50  ;;  %v6630_v42 = vld [vmem:[%s22233_s2 + $0x8d8] sm:$0xff] }
 0x46e   :  { %9587 = vmatpush1.bf16.msra.mxu0 %v14520_v22  ;;  %v14124_v22 = vcombine.low %v6525_v56, %v6533_v35  ;;  %v6637_v56 = vld [vmem:[%s22233_s2 + $0x930] sm:$0xff] }
 0x46f   :  { %9673 = vmatpush1.bf16.msra.mxu1 %v14522_v60  ;;  %9588 = vmatprep.subr.bf16.mxu0 %v14537_v8  ;;  %v14126_v60 = vcombine.low %v6526_v48, %v6534_v50  ;;  %v14141_v8 = vcombine.high %v6541_v59, %v6549_v6  ;;  %v6645_v35 = vld [vmem:[%s22233_s2 + $0x990] sm:$0xff]  ;;  %v6638_v48 = vld [vmem:[%s22233_s2 + $0x938] sm:$0xff] }
 0x470   :  { %9674 = vmatprep.subr.bf16.mxu1 %v14539_v23  ;;  %v14143_v23 = vcombine.high %v6542_v13, %v6550_v20  ;;  %v6646_v50 = vld [vmem:[%s22233_s2 + $0x998] sm:$0xff] }
 0x472   :  { %9589 = vmatpush1.bf16.msra.mxu0 %v14536_v46  ;;  %v14140_v46 = vcombine.low %v6541_v59, %v6549_v6  ;;  %v6653_v59 = vld [vmem:[%s22233_s2 + $0x9f0] sm:$0xff] }
 0x473   :  { %9675 = vmatpush1.bf16.msra.mxu1 %v14538_v47  ;;  %9687 = vmatprep.subr.bf16.mxu0 %v14045_v9  ;;  %v14142_v47 = vcombine.low %v6542_v13, %v6550_v20  ;;  %v14157_v9 = vcombine.high %v6557_v7, %v6565_v34  ;;  %v6661_v6 = vld [vmem:[%s22233_s2 + $0xa50] sm:$0xff]  ;;  %v6654_v13 = vld [vmem:[%s22233_s2 + $0x9f8] sm:$0xff] }
 0x474   :  { %9773 = vmatprep.subr.bf16.mxu1 %v14047_v51  ;;  %v14159_v51 = vcombine.high %v6558_v16, %v6566_v45  ;;  %v6662_v20 = vld [vmem:[%s22233_s2 + $0xa58] sm:$0xff]  ;;  %v6669_v7 = vld [vmem:[%s22233_s2 + $0xab0] sm:$0xff] }
 0x475   :  { %9591 = vmatmul.mubr.bf16.vlgmr.msra.gmra.mrb[40].mxu0 %v16515_v44  ;;  %v6677_v34 = vld [vmem:[%s22233_s2 + $0xb10] sm:$0xff] }
 0x476   :  { %9677 = vmatmul.mubr.bf16.vlgmr.msra.gmra.mrb[40].mxu1 %v16515_v44  ;;  %9688 = vmatpush1.bf16.msra.mxu0 %v14044_v49  ;;  %v6574_v49 = vld [vmem:[%s22233_s2 + $0x638] sm:$0xff] }
 0x477   :  { %9719 = vmatprep.mubr.bf16.mxu0 %v16476_v32  ;;  %9774 = vmatpush1.bf16.msra.mxu1 %v14046_v12  ;;  %v14158_v12 = vcombine.low %v6558_v16, %v6566_v45  ;;  %v14175_v26 = vcombine.high %v6574_v49, %v6582_v19  ;;  %v6670_v16 = vld [vmem:[%s22233_s2 + $0xab8] sm:$0xff] }
 0x478   :  { %9805 = vmatprep.mubr.bf16.mxu1 %v16476_v32  ;;  %9689 = vmatprep.subr.bf16.mxu0 %v14061_v21  ;;  %v14173_v21 = vcombine.high %v6573_v10, %v6581_v18  ;;  %v6678_v45 = vld [vmem:[%s22233_s2 + $0xb18] sm:$0xff] }
 0x479   :  { %9775 = vmatprep.subr.bf16.mxu1 %v14063_v57  ;;  %v6597_v57 = vld [vmem:[%s22233_s2 + $0x750] sm:$0xff] }
 0x47a   :  { %9690 = vmatpush1.bf16.msra.mxu0 %v14060_v0  ;;  %v14172_v0 = vcombine.low %v6573_v10, %v6581_v18  ;;  %v6685_v10 = vld [vmem:[%s22233_s2 + $0xb70] sm:$0xff] }
 0x47b   :  { %9776 = vmatpush1.bf16.msra.mxu1 %v14062_v33  ;;  %9691 = vmatprep.subr.bf16.mxu0 %v14077_v4  ;;  %v14174_v33 = vcombine.low %v6574_v49, %v6582_v19  ;;  %v14189_v4 = vcombine.high %v6589_v25, %v6597_v57  ;;  %v6693_v18 = vld [vmem:[%s22233_s2 + $0xbd0] sm:$0xff]  ;;  %v6686_v49 = vld [vmem:[%s22233_s2 + $0xb78] sm:$0xff] }
 0x47c   :  { %9777 = vmatprep.subr.bf16.mxu1 %v14079_v1  ;;  %v14191_v1 = vcombine.high %v6590_v63, %v6598_v53  ;;  %v6694_v19 = vld [vmem:[%s22233_s2 + $0xbd8] sm:$0xff] }
 0x47e   :  { %9692 = vmatpush1.bf16.msra.mxu0 %v14076_v37  ;;  %v14188_v37 = vcombine.low %v6589_v25, %v6597_v57  ;;  %v6701_v25 = vld [vmem:[%s22233_s2 + $0xc30] sm:$0xff] }
 0x47f   :  { %9778 = vmatpush1.bf16.msra.mxu1 %v14078_v41  ;;  %9693 = vmatprep.subr.bf16.mxu0 %v14093_v38  ;;  %v14190_v41 = vcombine.low %v6590_v63, %v6598_v53  ;;  %v14205_v38 = vcombine.high %v6605_v27, %v6613_v28  ;;  %v6709_v57 = vld [vmem:[%s22233_s2 + $0xc90] sm:$0xff]  ;;  %v6702_v63 = vld [vmem:[%s22233_s2 + $0xc38] sm:$0xff] }
 0x480   :  { %9779 = vmatprep.subr.bf16.mxu1 %v14095_v39  ;;  %v14207_v39 = vcombine.high %v6606_v15, %v6614_v31  ;;  %v6710_v53 = vld [vmem:[%s22233_s2 + $0xc98] sm:$0xff] }
 0x482   :  { %9694 = vmatpush1.bf16.msra.mxu0 %v14092_v43  ;;  %v14204_v43 = vcombine.low %v6605_v27, %v6613_v28  ;;  %v6717_v27 = vld [vmem:[%s22233_s2 + $0xcf0] sm:$0xff] }
 0x483   :  { %9780 = vmatpush1.bf16.msra.mxu1 %v14094_v62  ;;  %9695 = vmatprep.subr.bf16.mxu0 %v14109_v2  ;;  %v14206_v62 = vcombine.low %v6606_v15, %v6614_v31  ;;  %v14221_v2 = vcombine.high %v6621_v36, %v6629_v40  ;;  %v6725_v28 = vld [vmem:[%s22233_s2 + $0xd50] sm:$0xff]  ;;  %v14300_v15 = vcombine.low %v6701_v25, %v6709_v57  ;;  %v6718_v31 = vld [vmem:[%s22233_s2 + $0xcf8] sm:$0xff] }
 0x484   :  { %9781 = vmatprep.subr.bf16.mxu1 %v14111_v3  ;;  %v14223_v3 = vcombine.high %v6622_v55, %v6630_v42 }
 0x486   :  { %9696 = vmatpush1.bf16.msra.mxu0 %v14108_v54  ;;  %v14220_v54 = vcombine.low %v6621_v36, %v6629_v40  ;;  %v6741_v36 = vld [vmem:[%s22233_s2 + $0xe10] sm:$0xff] }
 0x487   :  { %9782 = vmatpush1.bf16.msra.mxu1 %v14110_v5  ;;  %9697 = vmatprep.subr.bf16.mxu0 %v14125_v17  ;;  %v14222_v5 = vcombine.low %v6622_v55, %v6630_v42  ;;  %v14237_v17 = vcombine.high %v6637_v56, %v6645_v35  ;;  %v6734_v55 = vld [vmem:[%s22233_s2 + $0xdb8] sm:$0xff] }
 0x488   :  { %9783 = vmatprep.subr.bf16.mxu1 %v14127_v58  ;;  %v14239_v58 = vcombine.high %v6638_v48, %v6646_v50  ;;  %v6742_v42 = vld [vmem:[%s22233_s2 + $0xe18] sm:$0xff] }
 0x48a   :  { %9698 = vmatpush1.bf16.msra.mxu0 %v14124_v22  ;;  %v14236_v22 = vcombine.low %v6637_v56, %v6645_v35  ;;  %v6749_v56 = vld [vmem:[%s22233_s2 + $0xe70] sm:$0xff] }
 0x48b   :  { %9784 = vmatpush1.bf16.msra.mxu1 %v14126_v60  ;;  %9699 = vmatprep.subr.bf16.mxu0 %v14141_v8  ;;  %v14238_v60 = vcombine.low %v6638_v48, %v6646_v50  ;;  %v14253_v8 = vcombine.high %v6653_v59, %v6661_v6  ;;  %v6757_v35 = vld [vmem:[%s22233_s2 + $0xed0] sm:$0xff]  ;;  %v6750_v48 = vld [vmem:[%s22233_s2 + $0xe78] sm:$0xff] }
 0x48c   :  { %9785 = vmatprep.subr.bf16.mxu1 %v14143_v23  ;;  %v14255_v23 = vcombine.high %v6654_v13, %v6662_v20  ;;  %v6758_v50 = vld [vmem:[%s22233_s2 + $0xed8] sm:$0xff] }
 0x48e   :  { %9700 = vmatpush1.bf16.msra.mxu0 %v14140_v46  ;;  %v14252_v46 = vcombine.low %v6653_v59, %v6661_v6  ;;  %v6765_v59 = vld [vmem:[%s22233_s2 + $0xf30] sm:$0xff] }
 0x48f   :  { %9786 = vmatpush1.bf16.msra.mxu1 %v14142_v47  ;;  %9701 = vmatprep.subr.bf16.mxu0 %v14157_v9  ;;  %v14254_v47 = vcombine.low %v6654_v13, %v6662_v20  ;;  %v14269_v9 = vcombine.high %v6669_v7, %v6677_v34  ;;  %v6773_v6 = vld [vmem:[%s22233_s2 + $0xf90] sm:$0xff]  ;;  %v6766_v13 = vld [vmem:[%s22233_s2 + $0xf38] sm:$0xff] }
 0x490   :  { %9787 = vmatprep.subr.bf16.mxu1 %v14159_v51  ;;  %v14271_v51 = vcombine.high %v6670_v16, %v6678_v45  ;;  %v6774_v20 = vld [vmem:[%s22233_s2 + $0xf98] sm:$0xff] }
 0x492   :  { %9702 = vmatpush1.bf16.msra.mxu0 %v14156_v11  ;;  %v14268_v11 = vcombine.low %v6669_v7, %v6677_v34  ;;  %v6781_v7 = vld [vmem:[%s22233_s2 + $0xff0] sm:$0xff] }
 0x493   :  { %9788 = vmatpush1.bf16.msra.mxu1 %v14158_v12  ;;  %9703 = vmatprep.subr.bf16.mxu0 %v14173_v21  ;;  %v14270_v12 = vcombine.low %v6670_v16, %v6678_v45  ;;  %v14285_v21 = vcombine.high %v6685_v10, %v6693_v18  ;;  %v6789_v34 = vld [vmem:[%s22233_s2 + $0x1050] sm:$0xff]  ;;  %v6782_v16 = vld [vmem:[%s22233_s2 + $0xff8] sm:$0xff] }
 0x494   :  { %9789 = vmatprep.subr.bf16.mxu1 %v14175_v26  ;;  %v14287_v26 = vcombine.high %v6686_v49, %v6694_v19  ;;  %v6790_v45 = vld [vmem:[%s22233_s2 + $0x1058] sm:$0xff] }
 0x496   :  { %9704 = vmatpush1.bf16.msra.mxu0 %v14172_v0  ;;  %v14284_v0 = vcombine.low %v6685_v10, %v6693_v18  ;;  %v6797_v10 = vld [vmem:[%s22233_s2 + $0x10b0] sm:$0xff] }
 0x497   :  { %9790 = vmatpush1.bf16.msra.mxu1 %v14174_v33  ;;  %9705 = vmatprep.subr.bf16.mxu0 %v14189_v4  ;;  %v14286_v33 = vcombine.low %v6686_v49, %v6694_v19  ;;  %v14301_v4 = vcombine.high %v6701_v25, %v6709_v57  ;;  %v6805_v18 = vld [vmem:[%s22233_s2 + $0x1110] sm:$0xff]  ;;  %v6798_v49 = vld [vmem:[%s22233_s2 + $0x10b8] sm:$0xff] }
 0x498   :  { %9791 = vmatprep.subr.bf16.mxu1 %v14191_v1  ;;  %v14303_v1 = vcombine.high %v6702_v63, %v6710_v53  ;;  %v6806_v19 = vld [vmem:[%s22233_s2 + $0x1118] sm:$0xff]  ;;  %v6813_v25 = vld [vmem:[%s22233_s2 + $0x1170] sm:$0xff] }
 0x499   :  { %v6821_v57 = vld [vmem:[%s22233_s2 + $0x11d0] sm:$0xff] }
 0x49a   :  { %9706 = vmatpush1.bf16.msra.mxu0 %v14188_v37  ;;  %v6726_v37 = vld [vmem:[%s22233_s2 + $0xd58] sm:$0xff] }
 0x49b   :  { %9792 = vmatpush1.bf16.msra.mxu1 %v14190_v41  ;;  %9707 = vmatprep.subr.bf16.mxu0 %v14205_v38  ;;  %v14302_v41 = vcombine.low %v6702_v63, %v6710_v53  ;;  %v14317_v38 = vcombine.high %v6717_v27, %v6725_v28  ;;  %v14319_v40 = vcombine.high %v6718_v31, %v6726_v37  ;;  %v6814_v63 = vld [vmem:[%s22233_s2 + $0x1178] sm:$0xff] }
 0x49c   :  { %9793 = vmatprep.subr.bf16.mxu1 %v14207_v39  ;;  %v6733_v39 = vld [vmem:[%s22233_s2 + $0xdb0] sm:$0xff]  ;;  %v6822_v53 = vld [vmem:[%s22233_s2 + $0x11d8] sm:$0xff] }
 0x49e   :  { %9708 = vmatpush1.bf16.msra.mxu0 %v14204_v43  ;;  %v14316_v43 = vcombine.low %v6717_v27, %v6725_v28  ;;  %v6829_v27 = vld [vmem:[%s22233_s2 + $0x1230] sm:$0xff] }
 0x49f   :  { %9794 = vmatpush1.bf16.msra.mxu1 %v14206_v62  ;;  %9709 = vmatprep.subr.bf16.mxu0 %v14221_v2  ;;  %v14318_v62 = vcombine.low %v6718_v31, %v6726_v37  ;;  %v14333_v2 = vcombine.high %v6733_v39, %v6741_v36  ;;  %v6837_v28 = vld [vmem:[%s22233_s2 + $0x1290] sm:$0xff]  ;;  %v6838_v31 = vld [vmem:[%s22233_s2 + $0x1298] sm:$0xff]  ;;  %v14412_v37 = vcombine.low %v6813_v25, %v6821_v57 }
 0x4a0   :  { %9795 = vmatprep.subr.bf16.mxu1 %v14223_v3  ;;  %v14335_v3 = vcombine.high %v6734_v55, %v6742_v42 }
 0x4a2   :  { %9710 = vmatpush1.bf16.msra.mxu0 %v14220_v54  ;;  %v14332_v54 = vcombine.low %v6733_v39, %v6741_v36  ;;  %v6845_v36 = vld [vmem:[%s22233_s2 + $0x12f0] sm:$0xff] }
 0x4a3   :  { %9796 = vmatpush1.bf16.msra.mxu1 %v14222_v5  ;;  %9711 = vmatprep.subr.bf16.mxu0 %v14237_v17  ;;  %v14334_v5 = vcombine.low %v6734_v55, %v6742_v42  ;;  %v14349_v17 = vcombine.high %v6749_v56, %v6757_v35  ;;  %v6846_v55 = vld [vmem:[%s22233_s2 + $0x12f8] sm:$0xff] }
 0x4a4   :  { %9797 = vmatprep.subr.bf16.mxu1 %v14239_v58  ;;  %v14351_v58 = vcombine.high %v6750_v48, %v6758_v50  ;;  %v6854_v42 = vld [vmem:[%s22233_s2 + $0x1358] sm:$0xff] }
 0x4a6   :  { %9712 = vmatpush1.bf16.msra.mxu0 %v14236_v22  ;;  %v14348_v22 = vcombine.low %v6749_v56, %v6757_v35  ;;  %v6861_v56 = vld [vmem:[%s22233_s2 + $0x13b0] sm:$0xff] }
 0x4a7   :  { %9798 = vmatpush1.bf16.msra.mxu1 %v14238_v60  ;;  %9713 = vmatprep.subr.bf16.mxu0 %v14253_v8  ;;  %v14350_v60 = vcombine.low %v6750_v48, %v6758_v50  ;;  %v14365_v8 = vcombine.high %v6765_v59, %v6773_v6  ;;  %v6869_v35 = vld [vmem:[%s22233_s2 + $0x1410] sm:$0xff]  ;;  %v6862_v48 = vld [vmem:[%s22233_s2 + $0x13b8] sm:$0xff] }
 0x4a8   :  { %9799 = vmatprep.subr.bf16.mxu1 %v14255_v23  ;;  %v14367_v23 = vcombine.high %v6766_v13, %v6774_v20  ;;  %v6870_v50 = vld [vmem:[%s22233_s2 + $0x1418] sm:$0xff] }
 0x4aa   :  { %9714 = vmatpush1.bf16.msra.mxu0 %v14252_v46  ;;  %v14364_v46 = vcombine.low %v6765_v59, %v6773_v6  ;;  %v6877_v59 = vld [vmem:[%s22233_s2 + $0x1470] sm:$0xff] }
 0x4ab   :  { %9800 = vmatpush1.bf16.msra.mxu1 %v14254_v47  ;;  %9715 = vmatprep.subr.bf16.mxu0 %v14269_v9  ;;  %v14366_v47 = vcombine.low %v6766_v13, %v6774_v20  ;;  %v14381_v9 = vcombine.high %v6781_v7, %v6789_v34  ;;  %v6885_v6 = vld [vmem:[%s22233_s2 + $0x14d0] sm:$0xff]  ;;  %v6878_v13 = vld [vmem:[%s22233_s2 + $0x1478] sm:$0xff] }
 0x4ac   :  { %9801 = vmatprep.subr.bf16.mxu1 %v14271_v51  ;;  %v14383_v51 = vcombine.high %v6782_v16, %v6790_v45  ;;  %v6886_v20 = vld [vmem:[%s22233_s2 + $0x14d8] sm:$0xff] }
 0x4ae   :  { %9716 = vmatpush1.bf16.msra.mxu0 %v14268_v11  ;;  %v14380_v11 = vcombine.low %v6781_v7, %v6789_v34  ;;  %v6893_v7 = vld [vmem:[%s22233_s2 + $0x1530] sm:$0xff] }
 0x4af   :  { %9802 = vmatpush1.bf16.msra.mxu1 %v14270_v12  ;;  %9717 = vmatprep.subr.bf16.mxu0 %v14285_v21  ;;  %v14382_v12 = vcombine.low %v6782_v16, %v6790_v45  ;;  %v14397_v21 = vcombine.high %v6797_v10, %v6805_v18  ;;  %v6901_v34 = vld [vmem:[%s22233_s2 + $0x1590] sm:$0xff]  ;;  %v6894_v16 = vld [vmem:[%s22233_s2 + $0x1538] sm:$0xff] }
 0x4b0   :  { %9803 = vmatprep.subr.bf16.mxu1 %v14287_v26  ;;  %v14399_v26 = vcombine.high %v6798_v49, %v6806_v19  ;;  %v6902_v45 = vld [vmem:[%s22233_s2 + $0x1598] sm:$0xff] }
 0x4b2   :  { %9718 = vmatpush1.bf16.msra.mxu0 %v14284_v0  ;;  %v14396_v0 = vcombine.low %v6797_v10, %v6805_v18  ;;  %v6909_v10 = vld [vmem:[%s22233_s2 + $0x15f0] sm:$0xff] }
 0x4b3   :  { %9804 = vmatpush1.bf16.msra.mxu1 %v14286_v33  ;;  %9730 = vmatprep.subr.bf16.mxu0 %v14301_v4  ;;  %v14398_v33 = vcombine.low %v6798_v49, %v6806_v19  ;;  %v14413_v4 = vcombine.high %v6813_v25, %v6821_v57  ;;  %v6917_v18 = vld [vmem:[%s22233_s2 + $0x1650] sm:$0xff]  ;;  %v6910_v49 = vld [vmem:[%s22233_s2 + $0x15f8] sm:$0xff] }
 0x4b4   :  { %9816 = vmatprep.subr.bf16.mxu1 %v14303_v1  ;;  %v14415_v1 = vcombine.high %v6814_v63, %v6822_v53  ;;  %v6918_v19 = vld [vmem:[%s22233_s2 + $0x1658] sm:$0xff]  ;;  %v6925_v25 = vld [vmem:[%s22233_s2 + $0x16b0] sm:$0xff] }
 0x4b5   :  { %9720 = vmatmul.mubr.bf16.vlgmr.msra.gmra.mrb[44].mxu0 %v16472_v14  ;;  %v6933_v57 = vld [vmem:[%s22233_s2 + $0x1710] sm:$0xff] }
 0x4b6   :  { %9806 = vmatmul.mubr.bf16.vlgmr.msra.gmra.mrb[44].mxu1 %v16472_v14  ;;  %9731 = vmatpush1.bf16.msra.mxu0 %v14300_v15  ;;  %v6830_v15 = vld [vmem:[%s22233_s2 + $0x1238] sm:$0xff] }
 0x4b7   :  { %9762 = vmatprep.mubr.bf16.mxu0 %v16539_v29  ;;  %9817 = vmatpush1.bf16.msra.mxu1 %v14302_v41  ;;  %v14414_v41 = vcombine.low %v6814_v63, %v6822_v53  ;;  %v14431_v39 = vcombine.high %v6830_v15, %v6838_v31  ;;  %v6926_v63 = vld [vmem:[%s22233_s2 + $0x16b8] sm:$0xff] }
 0x4b8   :  { %9848 = vmatprep.mubr.bf16.mxu1 %v16539_v29  ;;  %9732 = vmatprep.subr.bf16.mxu0 %v14317_v38  ;;  %v14429_v38 = vcombine.high %v6829_v27, %v6837_v28  ;;  %v6934_v53 = vld [vmem:[%s22233_s2 + $0x1718] sm:$0xff] }
 0x4b9   :  { %9818 = vmatprep.subr.bf16.mxu1 %v14319_v40  ;;  %v6853_v40 = vld [vmem:[%s22233_s2 + $0x1350] sm:$0xff] }
 0x4ba   :  { %9733 = vmatpush1.bf16.msra.mxu0 %v14316_v43  ;;  %v14428_v43 = vcombine.low %v6829_v27, %v6837_v28  ;;  %v6941_v27 = vld [vmem:[%s22233_s2 + $0x1770] sm:$0xff] }
 0x4bb   :  { %9819 = vmatpush1.bf16.msra.mxu1 %v14318_v62  ;;  %9734 = vmatprep.subr.bf16.mxu0 %v14333_v2  ;;  %v14430_v62 = vcombine.low %v6830_v15, %v6838_v31  ;;  %v14445_v2 = vcombine.high %v6845_v36, %v6853_v40  ;;  %v6949_v28 = vld [vmem:[%s22233_s2 + $0x17d0] sm:$0xff]  ;;  %v6942_v15 = vld [vmem:[%s22233_s2 + $0x1778] sm:$0xff] }
 0x4bc   :  { %9820 = vmatprep.subr.bf16.mxu1 %v14335_v3  ;;  %v14447_v3 = vcombine.high %v6846_v55, %v6854_v42  ;;  %v6950_v31 = vld [vmem:[%s22233_s2 + $0x17d8] sm:$0xff] }
 0x4be   :  { %9735 = vmatpush1.bf16.msra.mxu0 %v14332_v54  ;;  %v14444_v54 = vcombine.low %v6845_v36, %v6853_v40  ;;  %v6447_v36 = vld [vmem:[%s22233_s2 + $0x40] sm:$0xff] }
 0x4bf   :  { %9821 = vmatpush1.bf16.msra.mxu1 %v14334_v5  ;;  %9736 = vmatprep.subr.bf16.mxu0 %v14349_v17  ;;  %v14446_v5 = vcombine.low %v6846_v55, %v6854_v42  ;;  %v14461_v17 = vcombine.high %v6861_v56, %v6869_v35  ;;  %v6455_v40 = vld [vmem:[%s22233_s2 + $0xa0] sm:$0xff]  ;;  %v6448_v55 = vld [vmem:[%s22233_s2 + $0x48] sm:$0xff] }
 0x4c0   :  { %9822 = vmatprep.subr.bf16.mxu1 %v14351_v58  ;;  %v14463_v58 = vcombine.high %v6862_v48, %v6870_v50  ;;  %v6456_v42 = vld [vmem:[%s22233_s2 + $0xa8] sm:$0xff] }
 0x4c2   :  { %9737 = vmatpush1.bf16.msra.mxu0 %v14348_v22  ;;  %v14460_v22 = vcombine.low %v6861_v56, %v6869_v35  ;;  %v6463_v56 = vld [vmem:[%s22233_s2 + $0x100] sm:$0xff] }
 0x4c3   :  { %9823 = vmatpush1.bf16.msra.mxu1 %v14350_v60  ;;  %9738 = vmatprep.subr.bf16.mxu0 %v14365_v8  ;;  %v14462_v60 = vcombine.low %v6862_v48, %v6870_v50  ;;  %v14477_v8 = vcombine.high %v6877_v59, %v6885_v6  ;;  %v6471_v35 = vld [vmem:[%s22233_s2 + $0x160] sm:$0xff]  ;;  %v19453_v48 = vcombine.low %v6447_v36, %v6455_v40  ;;  %v6464_v50 = vld [vmem:[%s22233_s2 + $0x108] sm:$0xff] }
 0x4c4   :  { %9824 = vmatprep.subr.bf16.mxu1 %v14367_v23  ;;  %v14479_v23 = vcombine.high %v6878_v13, %v6886_v20 }
 0x4c6   :  { %9739 = vmatpush1.bf16.msra.mxu0 %v14364_v46  ;;  %v14476_v46 = vcombine.low %v6877_v59, %v6885_v6  ;;  %v6487_v59 = vld [vmem:[%s22233_s2 + $0x220] sm:$0xff] }
 0x4c7   :  { %9825 = vmatpush1.bf16.msra.mxu1 %v14366_v47  ;;  %9740 = vmatprep.subr.bf16.mxu0 %v14381_v9  ;;  %v14478_v47 = vcombine.low %v6878_v13, %v6886_v20  ;;  %v14493_v9 = vcombine.high %v6893_v7, %v6901_v34  ;;  %v6480_v13 = vld [vmem:[%s22233_s2 + $0x1c8] sm:$0xff] }
 0x4c8   :  { %9826 = vmatprep.subr.bf16.mxu1 %v14383_v51  ;;  %v14495_v51 = vcombine.high %v6894_v16, %v6902_v45  ;;  %v6488_v20 = vld [vmem:[%s22233_s2 + $0x228] sm:$0xff] }
 0x4ca   :  { %9741 = vmatpush1.bf16.msra.mxu0 %v14380_v11  ;;  %v14492_v11 = vcombine.low %v6893_v7, %v6901_v34  ;;  %v6495_v7 = vld [vmem:[%s22233_s2 + $0x280] sm:$0xff] }
 0x4cb   :  { %9827 = vmatpush1.bf16.msra.mxu1 %v14382_v12  ;;  %9742 = vmatprep.subr.bf16.mxu0 %v14397_v21  ;;  %v14494_v12 = vcombine.low %v6894_v16, %v6902_v45  ;;  %v14509_v21 = vcombine.high %v6909_v10, %v6917_v18  ;;  %v6503_v34 = vld [vmem:[%s22233_s2 + $0x2e0] sm:$0xff]  ;;  %v6496_v16 = vld [vmem:[%s22233_s2 + $0x288] sm:$0xff] }
 0x4cc   :  { %9828 = vmatprep.subr.bf16.mxu1 %v14399_v26  ;;  %v14511_v26 = vcombine.high %v6910_v49, %v6918_v19  ;;  %v6504_v45 = vld [vmem:[%s22233_s2 + $0x2e8] sm:$0xff] }
 0x4ce   :  { %9743 = vmatpush1.bf16.msra.mxu0 %v14396_v0  ;;  %v14508_v0 = vcombine.low %v6909_v10, %v6917_v18  ;;  %v6511_v10 = vld [vmem:[%s22233_s2 + $0x340] sm:$0xff] }
 0x4cf   :  { %9829 = vmatpush1.bf16.msra.mxu1 %v14398_v33  ;;  %9744 = vmatprep.subr.bf16.mxu0 %v14413_v4  ;;  %v14510_v33 = vcombine.low %v6910_v49, %v6918_v19  ;;  %v14525_v4 = vcombine.high %v6925_v25, %v6933_v57  ;;  %v6519_v18 = vld [vmem:[%s22233_s2 + $0x3a0] sm:$0xff]  ;;  %v6512_v49 = vld [vmem:[%s22233_s2 + $0x348] sm:$0xff] }
 0x4d0   :  { %9830 = vmatprep.subr.bf16.mxu1 %v14415_v1  ;;  %v14527_v1 = vcombine.high %v6926_v63, %v6934_v53  ;;  %v6520_v19 = vld [vmem:[%s22233_s2 + $0x3a8] sm:$0xff] }
 0x4d2   :  { %9745 = vmatpush1.bf16.msra.mxu0 %v14412_v37  ;;  %v14524_v37 = vcombine.low %v6925_v25, %v6933_v57  ;;  %v6527_v25 = vld [vmem:[%s22233_s2 + $0x400] sm:$0xff] }
 0x4d3   :  { %9831 = vmatpush1.bf16.msra.mxu1 %v14414_v41  ;;  %9746 = vmatprep.subr.bf16.mxu0 %v14429_v38  ;;  %v14526_v41 = vcombine.low %v6926_v63, %v6934_v53  ;;  %v14541_v38 = vcombine.high %v6941_v27, %v6949_v28  ;;  %v6535_v57 = vld [vmem:[%s22233_s2 + $0x460] sm:$0xff]  ;;  %v6528_v63 = vld [vmem:[%s22233_s2 + $0x408] sm:$0xff] }
 0x4d4   :  { %9832 = vmatprep.subr.bf16.mxu1 %v14431_v39  ;;  %v14543_v39 = vcombine.high %v6942_v15, %v6950_v31  ;;  %v6536_v53 = vld [vmem:[%s22233_s2 + $0x468] sm:$0xff] }
 0x4d6   :  { %9747 = vmatpush1.bf16.msra.mxu0 %v14428_v43  ;;  %v14540_v43 = vcombine.low %v6941_v27, %v6949_v28  ;;  %v6543_v27 = vld [vmem:[%s22233_s2 + $0x4c0] sm:$0xff] }
 0x4d7   :  { %9833 = vmatpush1.bf16.msra.mxu1 %v14430_v62  ;;  %9748 = vmatprep.subr.bf16.mxu0 %v14445_v2  ;;  %v14542_v62 = vcombine.low %v6942_v15, %v6950_v31  ;;  %v19443_v2 = vcombine.high %v6447_v36, %v6455_v40  ;;  %v6551_v28 = vld [vmem:[%s22233_s2 + $0x520] sm:$0xff]  ;;  %v6544_v15 = vld [vmem:[%s22233_s2 + $0x4c8] sm:$0xff] }
 0x4d8   :  { %9834 = vmatprep.subr.bf16.mxu1 %v14447_v3  ;;  %v19445_v3 = vcombine.high %v6448_v55, %v6456_v42  ;;  %v6552_v31 = vld [vmem:[%s22233_s2 + $0x528] sm:$0xff]  ;;  %v6559_v36 = vld [vmem:[%s22233_s2 + $0x580] sm:$0xff] }
 0x4d9   :  { %v6567_v40 = vld [vmem:[%s22233_s2 + $0x5e0] sm:$0xff] }
 0x4da   :  { %9749 = vmatpush1.bf16.msra.mxu0 %v14444_v54  ;;  %v6472_v54 = vld [vmem:[%s22233_s2 + $0x168] sm:$0xff] }
 0x4db   :  { %9835 = vmatpush1.bf16.msra.mxu1 %v14446_v5  ;;  %9750 = vmatprep.subr.bf16.mxu0 %v14461_v17  ;;  %v19462_v5 = vcombine.low %v6448_v55, %v6456_v42  ;;  %v19465_v17 = vcombine.high %v6463_v56, %v6471_v35  ;;  %v19474_v6 = vcombine.high %v6464_v50, %v6472_v54  ;;  %v6560_v55 = vld [vmem:[%s22233_s2 + $0x588] sm:$0xff] }
 0x4dc   :  { %9836 = vmatprep.subr.bf16.mxu1 %v14463_v58  ;;  %v6479_v58 = vld [vmem:[%s22233_s2 + $0x1c0] sm:$0xff]  ;;  %v6568_v42 = vld [vmem:[%s22233_s2 + $0x5e8] sm:$0xff] }
 0x4de   :  { %9751 = vmatpush1.bf16.msra.mxu0 %v14460_v22  ;;  %v19484_v22 = vcombine.low %v6463_v56, %v6471_v35  ;;  %v19612_v56 = vcombine.high %v6559_v36, %v6567_v40  ;;  %v19615_v35 = vcombine.high %v6560_v55, %v6568_v42 }
 0x4df   :  { %9837 = vmatpush1.bf16.msra.mxu1 %v14462_v60  ;;  %9752 = vmatprep.subr.bf16.mxu0 %v14477_v8  ;;  %v19488_v60 = vcombine.low %v6464_v50, %v6472_v54  ;;  %v19490_v8 = vcombine.high %v6479_v58, %v6487_v59  ;;  %v6575_v50 = vld [vmem:[%s22233_s2 + $0x640] sm:$0xff] }
 0x4e0   :  { %9838 = vmatprep.subr.bf16.mxu1 %v14479_v23  ;;  %v19494_v23 = vcombine.high %v6480_v13, %v6488_v20  ;;  %v6583_v54 = vld [vmem:[%s22233_s2 + $0x6a0] sm:$0xff] }
 0x4e2   :  { %9753 = vmatpush1.bf16.msra.mxu0 %v14476_v46  ;;  %v19510_v46 = vcombine.low %v6479_v58, %v6487_v59  ;;  %v6576_v58 = vld [vmem:[%s22233_s2 + $0x648] sm:$0xff] }
 0x4e3   :  { %9839 = vmatpush1.bf16.msra.mxu1 %v14478_v47  ;;  %9754 = vmatprep.subr.bf16.mxu0 %v14493_v9  ;;  %v19514_v47 = vcombine.low %v6480_v13, %v6488_v20  ;;  %v19516_v9 = vcombine.high %v6495_v7, %v6503_v34  ;;  %v6584_v59 = vld [vmem:[%s22233_s2 + $0x6a8] sm:$0xff]  ;;  %v19630_v13 = vcombine.low %v6559_v36, %v6567_v40 }
 0x4e4   :  { %9840 = vmatprep.subr.bf16.mxu1 %v14495_v51  ;;  %v19519_v51 = vcombine.high %v6496_v16, %v6504_v45  ;;  %v19634_v20 = vcombine.low %v6560_v55, %v6568_v42  ;;  %v6623_v55 = vld [vmem:[%s22233_s2 + $0x880] sm:$0xff] }
 0x4e5   :  { %v6631_v42 = vld [vmem:[%s22233_s2 + $0x8e0] sm:$0xff] }
 0x4e6   :  { %9755 = vmatpush1.bf16.msra.mxu0 %v14492_v11  ;;  %v19534_v11 = vcombine.low %v6495_v7, %v6503_v34  ;;  %v19636_v7 = vcombine.high %v6575_v50, %v6583_v54  ;;  %v19639_v34 = vcombine.high %v6576_v58, %v6584_v59 }
 0x4e7   :  { %9841 = vmatpush1.bf16.msra.mxu1 %v14494_v12  ;;  %9756 = vmatprep.subr.bf16.mxu0 %v14509_v21  ;;  %v19538_v12 = vcombine.low %v6496_v16, %v6504_v45  ;;  %v19540_v21 = vcombine.high %v6511_v10, %v6519_v18  ;;  %v6591_v16 = vld [vmem:[%s22233_s2 + $0x700] sm:$0xff] }
 0x4e8   :  { %9842 = vmatprep.subr.bf16.mxu1 %v14511_v26  ;;  %v19543_v26 = vcombine.high %v6512_v49, %v6520_v19  ;;  %v6599_v45 = vld [vmem:[%s22233_s2 + $0x760] sm:$0xff] }
 0x4ea   :  { %9757 = vmatpush1.bf16.msra.mxu0 %v14508_v0  ;;  %v19558_v0 = vcombine.low %v6511_v10, %v6519_v18  ;;  %v6592_v10 = vld [vmem:[%s22233_s2 + $0x708] sm:$0xff] }
 0x4eb   :  { %9843 = vmatpush1.bf16.msra.mxu1 %v14510_v33  ;;  %9758 = vmatprep.subr.bf16.mxu0 %v14525_v4  ;;  %v19562_v33 = vcombine.low %v6512_v49, %v6520_v19  ;;  %v19564_v4 = vcombine.high %v6527_v25, %v6535_v57  ;;  %v6600_v18 = vld [vmem:[%s22233_s2 + $0x768] sm:$0xff]  ;;  %v19654_v49 = vcombine.low %v6575_v50, %v6583_v54 }
 0x4ec   :  { %9844 = vmatprep.subr.bf16.mxu1 %v14527_v1  ;;  %v19567_v1 = vcombine.high %v6528_v63, %v6536_v53  ;;  %v19658_v19 = vcombine.low %v6576_v58, %v6584_v59  ;;  %v6624_v50 = vld [vmem:[%s22233_s2 + $0x888] sm:$0xff] }
 0x4ed   :  { %v6632_v54 = vld [vmem:[%s22233_s2 + $0x8e8] sm:$0xff] }
 0x4ee   :  { %9759 = vmatpush1.bf16.msra.mxu0 %v14524_v37  ;;  %v19582_v37 = vcombine.low %v6527_v25, %v6535_v57  ;;  %v19660_v25 = vcombine.high %v6591_v16, %v6599_v45  ;;  %v19663_v57 = vcombine.high %v6592_v10, %v6600_v18 }
 0x4ef   :  { %9845 = vmatpush1.bf16.msra.mxu1 %v14526_v41  ;;  %9760 = vmatprep.subr.bf16.mxu0 %v14541_v38  ;;  %v19586_v41 = vcombine.low %v6528_v63, %v6536_v53  ;;  %v19588_v38 = vcombine.high %v6543_v27, %v6551_v28  ;;  %v6607_v63 = vld [vmem:[%s22233_s2 + $0x7c0] sm:$0xff] }
 0x4f0   :  { %9846 = vmatprep.subr.bf16.mxu1 %v14543_v39  ;;  %v19591_v39 = vcombine.high %v6544_v15, %v6552_v31  ;;  %v6615_v53 = vld [vmem:[%s22233_s2 + $0x820] sm:$0xff] }
 0x4f1   :  { %v19684_v36 = vcombine.high %v6607_v63, %v6615_v53  ;;  %v19702_v58 = vcombine.low %v6607_v63, %v6615_v53  ;;  %v6640_v63 = vld [vmem:[%s22233_s2 + $0x948] sm:$0xff] }
 0x4f2   :  { %9761 = vmatpush1.bf16.msra.mxu0 %v14540_v43  ;;  %v19606_v43 = vcombine.low %v6543_v27, %v6551_v28  ;;  %v6608_v27 = vld [vmem:[%s22233_s2 + $0x7c8] sm:$0xff] }
 0x4f3   :  { %9847 = vmatpush1.bf16.msra.mxu1 %v14542_v62  ;;  %9859 = vmatprep.subr.bf16.mxu0 %v19443_v2  ;;  %v19610_v62 = vcombine.low %v6544_v15, %v6552_v31  ;;  %v6616_v28 = vld [vmem:[%s22233_s2 + $0x828] sm:$0xff]  ;;  %v19678_v15 = vcombine.low %v6591_v16, %v6599_v45  ;;  %v19682_v31 = vcombine.low %v6592_v10, %v6600_v18  ;;  %v6639_v10 = vld [vmem:[%s22233_s2 + $0x940] sm:$0xff] }
 0x4f4   :  { %9945 = vmatprep.subr.bf16.mxu1 %v19445_v3  ;;  %v19687_v40 = vcombine.high %v6608_v27, %v6616_v28  ;;  %22446 = vst [vmem:[#allocation8_spill] sm:$0xff] %v19702_v58  ;;  %v19706_v59 = vcombine.low %v6608_v27, %v6616_v28  ;;  %v19708_v16 = vcombine.high %v6623_v55, %v6631_v42  ;;  %v6647_v18 = vld [vmem:[%s22233_s2 + $0x9a0] sm:$0xff]  ;;  %v6648_v53 = vld [vmem:[%s22233_s2 + $0x9a8] sm:$0xff] }
 0x4f5   :  { %9763 = vmatmul.mubr.bf16.vlgmr.msra.gmra.mrb[44].mxu0 %v16515_v44  ;;  %v19711_v45 = vcombine.high %v6624_v50, %v6632_v54  ;;  %v19726_v27 = vcombine.low %v6623_v55, %v6631_v42  ;;  %v19730_v28 = vcombine.low %v6624_v50, %v6632_v54  ;;  %v19732_v24 = vcombine.high %v6639_v10, %v6647_v18  ;;  %v6663_v55 = vld [vmem:[%s22233_s2 + $0xa60] sm:$0xff]  ;;  %v6656_v42 = vld [vmem:[%s22233_s2 + $0xa08] sm:$0xff] }
 0x4f6   :  { %9849 = vmatmul.mubr.bf16.vlgmr.msra.gmra.mrb[44].mxu1 %v16515_v44  ;;  %9860 = vmatpush1.bf16.msra.mxu0 %v19453_v48  ;;  %22447 = vst [vmem:[#allocation9_spill] sm:$0xff] %v19706_v59  ;;  %22448 = vst [vmem:[#allocation10_spill] sm:$0xff] %v19708_v16  ;;  %v19735_v30 = vcombine.high %v6640_v63, %v6648_v53  ;;  %v6664_v50 = vld [vmem:[%s22233_s2 + $0xa68] sm:$0xff]  ;;  %v19750_v54 = vcombine.low %v6639_v10, %v6647_v18  ;;  %v6679_v10 = vld [vmem:[%s22233_s2 + $0xb20] sm:$0xff] }
 0x4f7   :  { %9891 = vmatprep.mubr.bf16.mxu0 %v16476_v32  ;;  %9946 = vmatpush1.bf16.msra.mxu1 %v19462_v5  ;;  %22449 = vst [vmem:[#allocation11_spill] sm:$0xff] %v19711_v45  ;;  %22450 = vst [vmem:[#allocation12_spill] sm:$0xff] %v19726_v27  ;;  %v6672_v18 = vld [vmem:[%s22233_s2 + $0xac8] sm:$0xff] }
 0x4f8   :  { %9977 = vmatprep.mubr.bf16.mxu1 %v16476_v32  ;;  %9861 = vmatprep.subr.bf16.mxu0 %v19465_v17  ;;  %22451 = vst [vmem:[#allocation13_spill] sm:$0xff] %v19730_v28  ;;  %22452 = vst [vmem:[#allocation14_spill] sm:$0xff] %v19732_v24 }
 0x4f9   :  { %9947 = vmatprep.subr.bf16.mxu1 %v19474_v6  ;;  %22453 = vst [vmem:[#allocation15_spill] sm:$0xff] %v19735_v30  ;;  %22454 = vst [vmem:[#allocation16_spill] sm:$0xff] %v19750_v54 }
 0x4fa   :  { %9862 = vmatpush1.bf16.msra.mxu0 %v19484_v22 }
 0x4fb   :  { %9948 = vmatpush1.bf16.msra.mxu1 %v19488_v60  ;;  %9863 = vmatprep.subr.bf16.mxu0 %v19490_v8 }
 0x4fc   :  { %9949 = vmatprep.subr.bf16.mxu1 %v19494_v23 }
 0x4fe   :  { %9864 = vmatpush1.bf16.msra.mxu0 %v19510_v46 }
 0x4ff   :  { %9950 = vmatpush1.bf16.msra.mxu1 %v19514_v47  ;;  %9865 = vmatprep.subr.bf16.mxu0 %v19516_v9 }
 0x500   :  { %9951 = vmatprep.subr.bf16.mxu1 %v19519_v51 }
 0x502   :  { %9866 = vmatpush1.bf16.msra.mxu0 %v19534_v11 }
 0x503   :  { %9952 = vmatpush1.bf16.msra.mxu1 %v19538_v12  ;;  %9867 = vmatprep.subr.bf16.mxu0 %v19540_v21 }
 0x504   :  { %9953 = vmatprep.subr.bf16.mxu1 %v19543_v26 }
 0x506   :  { %9868 = vmatpush1.bf16.msra.mxu0 %v19558_v0 }
 0x507   :  { %9954 = vmatpush1.bf16.msra.mxu1 %v19562_v33  ;;  %9869 = vmatprep.subr.bf16.mxu0 %v19564_v4 }
 0x508   :  { %9955 = vmatprep.subr.bf16.mxu1 %v19567_v1 }
 0x50a   :  { %9870 = vmatpush1.bf16.msra.mxu0 %v19582_v37 }
 0x50b   :  { %9956 = vmatpush1.bf16.msra.mxu1 %v19586_v41  ;;  %9871 = vmatprep.subr.bf16.mxu0 %v19588_v38 }
 0x50c   :  { %9957 = vmatprep.subr.bf16.mxu1 %v19591_v39 }
 0x50e   :  { %9872 = vmatpush1.bf16.msra.mxu0 %v19606_v43 }
 0x50f   :  { %9958 = vmatpush1.bf16.msra.mxu1 %v19610_v62  ;;  %9873 = vmatprep.subr.bf16.mxu0 %v19612_v56 }
 0x510   :  { %9959 = vmatprep.subr.bf16.mxu1 %v19615_v35 }
 0x512   :  { %9874 = vmatpush1.bf16.msra.mxu0 %v19630_v13 }
 0x513   :  { %9960 = vmatpush1.bf16.msra.mxu1 %v19634_v20  ;;  %9875 = vmatprep.subr.bf16.mxu0 %v19636_v7 }
 0x514   :  { %9961 = vmatprep.subr.bf16.mxu1 %v19639_v34 }
 0x516   :  { %9876 = vmatpush1.bf16.msra.mxu0 %v19654_v49 }
 0x517   :  { %9962 = vmatpush1.bf16.msra.mxu1 %v19658_v19  ;;  %9877 = vmatprep.subr.bf16.mxu0 %v19660_v25 }
 0x518   :  { %9963 = vmatprep.subr.bf16.mxu1 %v19663_v57 }
 0x51a   :  { %9878 = vmatpush1.bf16.msra.mxu0 %v19678_v15 }
 0x51b   :  { %9964 = vmatpush1.bf16.msra.mxu1 %v19682_v31  ;;  %9879 = vmatprep.subr.bf16.mxu0 %v19684_v36 }
 0x51c   :  { %9965 = vmatprep.subr.bf16.mxu1 %v19687_v40 }
 0x51e   :  { %9880 = vmatpush1.bf16.msra.mxu0 %v19702_v58  ;;  %v6671_v58 = vld [vmem:[%s22233_s2 + $0xac0] sm:$0xff] }
 0x51f   :  { %9966 = vmatpush1.bf16.msra.mxu1 %v19706_v59  ;;  %9881 = vmatprep.subr.bf16.mxu0 %v19708_v16  ;;  %v19756_v16 = vcombine.high %v6655_v52, %v6663_v55  ;;  %v19759_v59 = vcombine.high %v6656_v42, %v6664_v50 }
 0x520   :  { %9967 = vmatprep.subr.bf16.mxu1 %v19711_v45  ;;  %v19754_v45 = vcombine.low %v6640_v63, %v6648_v53  ;;  %v6680_v63 = vld [vmem:[%s22233_s2 + $0xb28] sm:$0xff]  ;;  %v19774_v53 = vcombine.low %v6655_v52, %v6663_v55  ;;  %v6695_v52 = vld [vmem:[%s22233_s2 + $0xbe0] sm:$0xff] }
 0x521   :  { %22456 = vst [vmem:[#allocation18_spill] sm:$0xff] %v19756_v16  ;;  %22457 = vst [vmem:[#allocation19_spill] sm:$0xff] %v19759_v59  ;;  %v6688_v55 = vld [vmem:[%s22233_s2 + $0xb88] sm:$0xff] }
 0x522   :  { %9882 = vmatpush1.bf16.msra.mxu0 %v19726_v27  ;;  %22455 = vst [vmem:[#allocation17_spill] sm:$0xff] %v19754_v45  ;;  %22458 = vst [vmem:[#allocation20_spill] sm:$0xff] %v19774_v53  ;;  %v6687_v27 = vld [vmem:[%s22233_s2 + $0xb80] sm:$0xff] }
 0x523   :  { %9968 = vmatpush1.bf16.msra.mxu1 %v19730_v28  ;;  %9883 = vmatprep.subr.bf16.mxu0 %v19732_v24  ;;  %v19780_v24 = vcombine.high %v6671_v58, %v6679_v10  ;;  %v19783_v28 = vcombine.high %v6672_v18, %v6680_v63 }
 0x524   :  { %9969 = vmatprep.subr.bf16.mxu1 %v19735_v30  ;;  %v19778_v30 = vcombine.low %v6656_v42, %v6664_v50  ;;  %v6696_v42 = vld [vmem:[%s22233_s2 + $0xbe8] sm:$0xff]  ;;  %v19798_v50 = vcombine.low %v6671_v58, %v6679_v10  ;;  %v6711_v58 = vld [vmem:[%s22233_s2 + $0xca0] sm:$0xff] }
 0x525   :  { %22460 = vst [vmem:[#allocation22_spill] sm:$0xff] %v19780_v24  ;;  %22461 = vst [vmem:[#allocation23_spill] sm:$0xff] %v19783_v28  ;;  %v6704_v10 = vld [vmem:[%s22233_s2 + $0xc48] sm:$0xff] }
 0x526   :  { %9884 = vmatpush1.bf16.msra.mxu0 %v19750_v54  ;;  %22459 = vst [vmem:[#allocation21_spill] sm:$0xff] %v19778_v30  ;;  %22462 = vst [vmem:[#allocation24_spill] sm:$0xff] %v19798_v50  ;;  %v6703_v54 = vld [vmem:[%s22233_s2 + $0xc40] sm:$0xff] }
 0x527   :  { %9970 = vmatpush1.bf16.msra.mxu1 %v19754_v45  ;;  %9885 = vmatprep.subr.bf16.mxu0 %v19756_v16  ;;  %v19804_v16 = vcombine.high %v6687_v27, %v6695_v52  ;;  %v19807_v45 = vcombine.high %v6688_v55, %v6696_v42 }
 0x528   :  { %9971 = vmatprep.subr.bf16.mxu1 %v19759_v59  ;;  %v19802_v59 = vcombine.low %v6672_v18, %v6680_v63  ;;  %v6712_v18 = vld [vmem:[%s22233_s2 + $0xca8] sm:$0xff]  ;;  %v19822_v63 = vcombine.low %v6687_v27, %v6695_v52  ;;  %v6727_v27 = vld [vmem:[%s22233_s2 + $0xd60] sm:$0xff]  ;;  %v19840_v52 = vcombine.low %v6703_v54, %v6711_v58 }
 0x529   :  { %22464 = vst [vmem:[#allocation26_spill] sm:$0xff] %v19804_v16  ;;  %22465 = vst [vmem:[#allocation27_spill] sm:$0xff] %v19807_v45 }
 0x52a   :  { %9886 = vmatpush1.bf16.msra.mxu0 %v19774_v53  ;;  %22463 = vst [vmem:[#allocation25_spill] sm:$0xff] %v19802_v59  ;;  %22466 = vst [vmem:[#allocation28_spill] sm:$0xff] %v19822_v63  ;;  %v6719_v53 = vld [vmem:[%s22233_s2 + $0xd00] sm:$0xff] }
 0x52b   :  { %9972 = vmatpush1.bf16.msra.mxu1 %v19778_v30  ;;  %9887 = vmatprep.subr.bf16.mxu0 %v19780_v24  ;;  %v19828_v24 = vcombine.high %v6703_v54, %v6711_v58  ;;  %v19831_v30 = vcombine.high %v6704_v10, %v6712_v18  ;;  %22470 = vst [vmem:[#allocation32_spill] sm:$0xff] %v19840_v52  ;;  %v6735_v54 = vld [vmem:[%s22233_s2 + $0xdc0] sm:$0xff] }
 0x52c   :  { %9973 = vmatprep.subr.bf16.mxu1 %v19783_v28  ;;  %v19826_v28 = vcombine.low %v6688_v55, %v6696_v42  ;;  %v6720_v55 = vld [vmem:[%s22233_s2 + $0xd08] sm:$0xff]  ;;  %v6743_v58 = vld [vmem:[%s22233_s2 + $0xe20] sm:$0xff] }
 0x52d   :  { %22468 = vst [vmem:[#allocation30_spill] sm:$0xff] %v19828_v24  ;;  %22469 = vst [vmem:[#allocation31_spill] sm:$0xff] %v19831_v30  ;;  %v6728_v42 = vld [vmem:[%s22233_s2 + $0xd68] sm:$0xff] }
 0x52e   :  { %9888 = vmatpush1.bf16.msra.mxu0 %v19798_v50  ;;  %22467 = vst [vmem:[#allocation29_spill] sm:$0xff] %v19826_v28  ;;  %v6767_v50 = vld [vmem:[%s22233_s2 + $0xf40] sm:$0xff] }
 0x52f   :  { %9974 = vmatpush1.bf16.msra.mxu1 %v19802_v59  ;;  %9889 = vmatprep.subr.bf16.mxu0 %v19804_v16  ;;  %v19853_v16 = vcombine.high %v6719_v53, %v6727_v27 }
 0x530   :  { %9975 = vmatprep.subr.bf16.mxu1 %v19807_v45  ;;  %v19850_v45 = vcombine.low %v6704_v10, %v6712_v18  ;;  %v6736_v10 = vld [vmem:[%s22233_s2 + $0xdc8] sm:$0xff] }
 0x531   :  { %22472 = vst [vmem:[#allocation34_spill] sm:$0xff] %v19853_v16  ;;  %v6744_v18 = vld [vmem:[%s22233_s2 + $0xe28] sm:$0xff] }
 0x532   :  { %9890 = vmatpush1.bf16.msra.mxu0 %v19822_v63  ;;  %22471 = vst [vmem:[#allocation33_spill] sm:$0xff] %v19850_v45  ;;  %v19862_v63 = vcombine.high %v6720_v55, %v6728_v42  ;;  %v19882_v59 = vcombine.high %v6736_v10, %v6744_v18 }
 0x533   :  { %9976 = vmatpush1.bf16.msra.mxu1 %v19826_v28  ;;  %9902 = vmatprep.subr.bf16.mxu0 %v19828_v24  ;;  %v19876_v24 = vcombine.low %v6720_v55, %v6728_v42  ;;  %v19878_v28 = vcombine.high %v6735_v54, %v6743_v58  ;;  %v6760_v55 = vld [vmem:[%s22233_s2 + $0xee8] sm:$0xff]  ;;  %v19898_v42 = vcombine.low %v6735_v54, %v6743_v58  ;;  %v6775_v54 = vld [vmem:[%s22233_s2 + $0xfa0] sm:$0xff] }
 0x534   :  { %9988 = vmatprep.subr.bf16.mxu1 %v19831_v30  ;;  %22473 = vst [vmem:[#allocation35_spill] sm:$0xff] %v19862_v63  ;;  %v19872_v30 = vcombine.low %v6719_v53, %v6727_v27  ;;  %22477 = vst [vmem:[#allocation39_spill] sm:$0xff] %v19882_v59  ;;  %v6759_v53 = vld [vmem:[%s22233_s2 + $0xee0] sm:$0xff]  ;;  %v6752_v27 = vld [vmem:[%s22233_s2 + $0xe88] sm:$0xff] }
 0x535   :  { %9892 = vmatmul.mubr.bf16.vlgmr.msra.gmra.mrb[32].mxu0 %v16472_v14  ;;  %22475 = vst [vmem:[#allocation37_spill] sm:$0xff] %v19876_v24  ;;  %22476 = vst [vmem:[#allocation38_spill] sm:$0xff] %v19878_v28  ;;  %v6768_v58 = vld [vmem:[%s22233_s2 + $0xf48] sm:$0xff] }
 0x536   :  { %9978 = vmatmul.mubr.bf16.vlgmr.msra.gmra.mrb[32].mxu1 %v16472_v14  ;;  %9903 = vmatpush1.bf16.msra.mxu0 %v19840_v52  ;;  %22474 = vst [vmem:[#allocation36_spill] sm:$0xff] %v19872_v30  ;;  %v6751_v52 = vld [vmem:[%s22233_s2 + $0xe80] sm:$0xff]  ;;  %22478 = vst [vmem:[#allocation40_spill] sm:$0xff] %v19898_v42 }
 0x537   :  { %9934 = vmatprep.mubr.bf16.mxu0 %v16539_v29  ;;  %9989 = vmatpush1.bf16.msra.mxu1 %v19850_v45  ;;  %v19904_v45 = vcombine.high %v6751_v52, %v6759_v53 }
 0x538   :  { %10020 = vmatprep.mubr.bf16.mxu1 %v16539_v29  ;;  %9904 = vmatprep.subr.bf16.mxu0 %v19853_v16  ;;  %v19902_v16 = vcombine.low %v6736_v10, %v6744_v18  ;;  %v6776_v10 = vld [vmem:[%s22233_s2 + $0xfa8] sm:$0xff]  ;;  %v19922_v18 = vcombine.low %v6751_v52, %v6759_v53  ;;  %v6791_v52 = vld [vmem:[%s22233_s2 + $0x1060] sm:$0xff] }
 0x539   :  { %9990 = vmatprep.subr.bf16.mxu1 %v19862_v63  ;;  %22480 = vst [vmem:[#allocation42_spill] sm:$0xff] %v19904_v45  ;;  %v19907_v63 = vcombine.high %v6752_v27, %v6760_v55  ;;  %v6784_v53 = vld [vmem:[%s22233_s2 + $0x1008] sm:$0xff] }
 0x53a   :  { %9905 = vmatpush1.bf16.msra.mxu0 %v19872_v30  ;;  %22479 = vst [vmem:[#allocation41_spill] sm:$0xff] %v19902_v16  ;;  %22482 = vst [vmem:[#allocation44_spill] sm:$0xff] %v19922_v18  ;;  %v6783_v30 = vld [vmem:[%s22233_s2 + $0x1000] sm:$0xff] }
 0x53b   :  { %9991 = vmatpush1.bf16.msra.mxu1 %v19876_v24  ;;  %9906 = vmatprep.subr.bf16.mxu0 %v19878_v28  ;;  %22481 = vst [vmem:[#allocation43_spill] sm:$0xff] %v19907_v63  ;;  %v19928_v28 = vcombine.high %v6767_v50, %v6775_v54  ;;  %v19931_v24 = vcombine.high %v6768_v58, %v6776_v10 }
 0x53c   :  { %9992 = vmatprep.subr.bf16.mxu1 %v19882_v59  ;;  %v19926_v59 = vcombine.low %v6752_v27, %v6760_v55  ;;  %v6792_v27 = vld [vmem:[%s22233_s2 + $0x1068] sm:$0xff]  ;;  %v19946_v55 = vcombine.low %v6767_v50, %v6775_v54  ;;  %v6807_v50 = vld [vmem:[%s22233_s2 + $0x1120] sm:$0xff] }
 0x53d   :  { %22484 = vst [vmem:[#allocation46_spill] sm:$0xff] %v19928_v28  ;;  %22485 = vst [vmem:[#allocation47_spill] sm:$0xff] %v19931_v24  ;;  %v6800_v54 = vld [vmem:[%s22233_s2 + $0x10c8] sm:$0xff] }
 0x53e   :  { %9907 = vmatpush1.bf16.msra.mxu0 %v19898_v42  ;;  %22483 = vst [vmem:[#allocation45_spill] sm:$0xff] %v19926_v59  ;;  %22486 = vst [vmem:[#allocation48_spill] sm:$0xff] %v19946_v55  ;;  %v6799_v42 = vld [vmem:[%s22233_s2 + $0x10c0] sm:$0xff] }
 0x53f   :  { %9993 = vmatpush1.bf16.msra.mxu1 %v19902_v16  ;;  %9908 = vmatprep.subr.bf16.mxu0 %v19904_v45  ;;  %v19952_v45 = vcombine.high %v6783_v30, %v6791_v52  ;;  %v19955_v16 = vcombine.high %v6784_v53, %v6792_v27 }
 0x540   :  { %9994 = vmatprep.subr.bf16.mxu1 %v19907_v63  ;;  %v19950_v63 = vcombine.low %v6768_v58, %v6776_v10  ;;  %v6808_v58 = vld [vmem:[%s22233_s2 + $0x1128] sm:$0xff]  ;;  %v19970_v10 = vcombine.low %v6783_v30, %v6791_v52  ;;  %v6823_v30 = vld [vmem:[%s22233_s2 + $0x11e0] sm:$0xff] }
 0x541   :  { %22488 = vst [vmem:[#allocation50_spill] sm:$0xff] %v19952_v45  ;;  %22489 = vst [vmem:[#allocation51_spill] sm:$0xff] %v19955_v16  ;;  %v6816_v52 = vld [vmem:[%s22233_s2 + $0x1188] sm:$0xff] }
 0x542   :  { %9909 = vmatpush1.bf16.msra.mxu0 %v19922_v18  ;;  %22487 = vst [vmem:[#allocation49_spill] sm:$0xff] %v19950_v63  ;;  %22490 = vst [vmem:[#allocation52_spill] sm:$0xff] %v19970_v10  ;;  %v6815_v18 = vld [vmem:[%s22233_s2 + $0x1180] sm:$0xff] }
 0x543   :  { %9995 = vmatpush1.bf16.msra.mxu1 %v19926_v59  ;;  %9910 = vmatprep.subr.bf16.mxu0 %v19928_v28  ;;  %v19976_v28 = vcombine.high %v6799_v42, %v6807_v50  ;;  %v19979_v59 = vcombine.high %v6800_v54, %v6808_v58 }
 0x544   :  { %9996 = vmatprep.subr.bf16.mxu1 %v19931_v24  ;;  %v19974_v24 = vcombine.low %v6784_v53, %v6792_v27  ;;  %v6824_v53 = vld [vmem:[%s22233_s2 + $0x11e8] sm:$0xff]  ;;  %v19994_v27 = vcombine.low %v6799_v42, %v6807_v50  ;;  %v6839_v42 = vld [vmem:[%s22233_s2 + $0x12a0] sm:$0xff] }
 0x545   :  { %22492 = vst [vmem:[#allocation54_spill] sm:$0xff] %v19976_v28  ;;  %22493 = vst [vmem:[#allocation55_spill] sm:$0xff] %v19979_v59  ;;  %v6832_v50 = vld [vmem:[%s22233_s2 + $0x1248] sm:$0xff] }
 0x546   :  { %9911 = vmatpush1.bf16.msra.mxu0 %v19946_v55  ;;  %22491 = vst [vmem:[#allocation53_spill] sm:$0xff] %v19974_v24  ;;  %22494 = vst [vmem:[#allocation56_spill] sm:$0xff] %v19994_v27  ;;  %v6831_v55 = vld [vmem:[%s22233_s2 + $0x1240] sm:$0xff] }
 0x547   :  { %9997 = vmatpush1.bf16.msra.mxu1 %v19950_v63  ;;  %9912 = vmatprep.subr.bf16.mxu0 %v19952_v45  ;;  %v20000_v45 = vcombine.high %v6815_v18, %v6823_v30  ;;  %v20003_v63 = vcombine.high %v6816_v52, %v6824_v53 }
 0x548   :  { %9998 = vmatprep.subr.bf16.mxu1 %v19955_v16  ;;  %v19998_v16 = vcombine.low %v6800_v54, %v6808_v58  ;;  %v6840_v54 = vld [vmem:[%s22233_s2 + $0x12a8] sm:$0xff]  ;;  %v20018_v58 = vcombine.low %v6815_v18, %v6823_v30  ;;  %v6855_v18 = vld [vmem:[%s22233_s2 + $0x1360] sm:$0xff] }
 0x549   :  { %22496 = vst [vmem:[#allocation58_spill] sm:$0xff] %v20000_v45  ;;  %22497 = vst [vmem:[#allocation59_spill] sm:$0xff] %v20003_v63  ;;  %v6848_v30 = vld [vmem:[%s22233_s2 + $0x1308] sm:$0xff] }
 0x54a   :  { %9913 = vmatpush1.bf16.msra.mxu0 %v19970_v10  ;;  %22495 = vst [vmem:[#allocation57_spill] sm:$0xff] %v19998_v16  ;;  %22498 = vst [vmem:[#allocation60_spill] sm:$0xff] %v20018_v58  ;;  %v6847_v10 = vld [vmem:[%s22233_s2 + $0x1300] sm:$0xff] }
 0x54b   :  { %9999 = vmatpush1.bf16.msra.mxu1 %v19974_v24  ;;  %9914 = vmatprep.subr.bf16.mxu0 %v19976_v28  ;;  %v20024_v28 = vcombine.high %v6831_v55, %v6839_v42  ;;  %v20027_v24 = vcombine.high %v6832_v50, %v6840_v54 }
 0x54c   :  { %10000 = vmatprep.subr.bf16.mxu1 %v19979_v59  ;;  %v20022_v59 = vcombine.low %v6816_v52, %v6824_v53  ;;  %v6856_v52 = vld [vmem:[%s22233_s2 + $0x1368] sm:$0xff]  ;;  %v20042_v53 = vcombine.low %v6831_v55, %v6839_v42  ;;  %v6871_v55 = vld [vmem:[%s22233_s2 + $0x1420] sm:$0xff] }
 0x54d   :  { %22500 = vst [vmem:[#allocation62_spill] sm:$0xff] %v20024_v28  ;;  %22501 = vst [vmem:[#allocation63_spill] sm:$0xff] %v20027_v24  ;;  %v6864_v42 = vld [vmem:[%s22233_s2 + $0x13c8] sm:$0xff] }
 0x54e   :  { %9915 = vmatpush1.bf16.msra.mxu0 %v19994_v27  ;;  %22499 = vst [vmem:[#allocation61_spill] sm:$0xff] %v20022_v59  ;;  %22502 = vst [vmem:[#allocation64_spill] sm:$0xff] %v20042_v53  ;;  %v6863_v27 = vld [vmem:[%s22233_s2 + $0x13c0] sm:$0xff] }
 0x54f   :  { %10001 = vmatpush1.bf16.msra.mxu1 %v19998_v16  ;;  %9916 = vmatprep.subr.bf16.mxu0 %v20000_v45  ;;  %v20048_v45 = vcombine.high %v6847_v10, %v6855_v18  ;;  %v20051_v16 = vcombine.high %v6848_v30, %v6856_v52 }
 0x550   :  { %10002 = vmatprep.subr.bf16.mxu1 %v20003_v63  ;;  %v20046_v63 = vcombine.low %v6832_v50, %v6840_v54  ;;  %v6872_v50 = vld [vmem:[%s22233_s2 + $0x1428] sm:$0xff]  ;;  %v20066_v54 = vcombine.low %v6847_v10, %v6855_v18  ;;  %v6887_v10 = vld [vmem:[%s22233_s2 + $0x14e0] sm:$0xff] }
 0x551   :  { %22504 = vst [vmem:[#allocation66_spill] sm:$0xff] %v20048_v45  ;;  %22505 = vst [vmem:[#allocation67_spill] sm:$0xff] %v20051_v16  ;;  %v6880_v18 = vld [vmem:[%s22233_s2 + $0x1488] sm:$0xff] }
 0x552   :  { %9917 = vmatpush1.bf16.msra.mxu0 %v20018_v58  ;;  %22503 = vst [vmem:[#allocation65_spill] sm:$0xff] %v20046_v63  ;;  %22506 = vst [vmem:[#allocation68_spill] sm:$0xff] %v20066_v54  ;;  %v6879_v58 = vld [vmem:[%s22233_s2 + $0x1480] sm:$0xff] }
 0x553   :  { %10003 = vmatpush1.bf16.msra.mxu1 %v20022_v59  ;;  %9918 = vmatprep.subr.bf16.mxu0 %v20024_v28  ;;  %v20072_v28 = vcombine.high %v6863_v27, %v6871_v55  ;;  %v20075_v59 = vcombine.high %v6864_v42, %v6872_v50 }
 0x554   :  { %10004 = vmatprep.subr.bf16.mxu1 %v20027_v24  ;;  %v20070_v24 = vcombine.low %v6848_v30, %v6856_v52  ;;  %v6888_v30 = vld [vmem:[%s22233_s2 + $0x14e8] sm:$0xff]  ;;  %v20090_v52 = vcombine.low %v6863_v27, %v6871_v55  ;;  %v6903_v27 = vld [vmem:[%s22233_s2 + $0x15a0] sm:$0xff] }
 0x555   :  { %22508 = vst [vmem:[#allocation70_spill] sm:$0xff] %v20072_v28  ;;  %22509 = vst [vmem:[#allocation71_spill] sm:$0xff] %v20075_v59  ;;  %v6896_v55 = vld [vmem:[%s22233_s2 + $0x1548] sm:$0xff] }
 0x556   :  { %9919 = vmatpush1.bf16.msra.mxu0 %v20042_v53  ;;  %22507 = vst [vmem:[#allocation69_spill] sm:$0xff] %v20070_v24  ;;  %22510 = vst [vmem:[#allocation72_spill] sm:$0xff] %v20090_v52  ;;  %v6895_v53 = vld [vmem:[%s22233_s2 + $0x1540] sm:$0xff] }
 0x557   :  { %10005 = vmatpush1.bf16.msra.mxu1 %v20046_v63  ;;  %9920 = vmatprep.subr.bf16.mxu0 %v20048_v45  ;;  %v20096_v45 = vcombine.high %v6879_v58, %v6887_v10  ;;  %v20099_v63 = vcombine.high %v6880_v18, %v6888_v30 }
 0x558   :  { %10006 = vmatprep.subr.bf16.mxu1 %v20051_v16  ;;  %v20094_v16 = vcombine.low %v6864_v42, %v6872_v50  ;;  %v6904_v42 = vld [vmem:[%s22233_s2 + $0x15a8] sm:$0xff]  ;;  %v20114_v50 = vcombine.low %v6879_v58, %v6887_v10  ;;  %v6919_v58 = vld [vmem:[%s22233_s2 + $0x1660] sm:$0xff] }
 0x559   :  { %22512 = vst [vmem:[#allocation74_spill] sm:$0xff] %v20096_v45  ;;  %22513 = vst [vmem:[#allocation75_spill] sm:$0xff] %v20099_v63  ;;  %v6912_v10 = vld [vmem:[%s22233_s2 + $0x1608] sm:$0xff] }
 0x55a   :  { %9921 = vmatpush1.bf16.msra.mxu0 %v20066_v54  ;;  %22511 = vst [vmem:[#allocation73_spill] sm:$0xff] %v20094_v16  ;;  %22514 = vst [vmem:[#allocation76_spill] sm:$0xff] %v20114_v50  ;;  %v6911_v54 = vld [vmem:[%s22233_s2 + $0x1600] sm:$0xff] }
 0x55b   :  { %10007 = vmatpush1.bf16.msra.mxu1 %v20070_v24  ;;  %9922 = vmatprep.subr.bf16.mxu0 %v20072_v28  ;;  %v20120_v28 = vcombine.high %v6895_v53, %v6903_v27  ;;  %v20123_v24 = vcombine.high %v6896_v55, %v6904_v42 }
 0x55c   :  { %10008 = vmatprep.subr.bf16.mxu1 %v20075_v59  ;;  %v20118_v59 = vcombine.low %v6880_v18, %v6888_v30  ;;  %v6920_v18 = vld [vmem:[%s22233_s2 + $0x1668] sm:$0xff]  ;;  %v20138_v30 = vcombine.low %v6895_v53, %v6903_v27  ;;  %v6935_v53 = vld [vmem:[%s22233_s2 + $0x1720] sm:$0xff] }
 0x55d   :  { %22516 = vst [vmem:[#allocation78_spill] sm:$0xff] %v20120_v28  ;;  %22517 = vst [vmem:[#allocation79_spill] sm:$0xff] %v20123_v24  ;;  %v6928_v27 = vld [vmem:[%s22233_s2 + $0x16c8] sm:$0xff] }
 0x55e   :  { %9923 = vmatpush1.bf16.msra.mxu0 %v20090_v52  ;;  %22515 = vst [vmem:[#allocation77_spill] sm:$0xff] %v20118_v59  ;;  %22518 = vst [vmem:[#allocation80_spill] sm:$0xff] %v20138_v30  ;;  %v6927_v52 = vld [vmem:[%s22233_s2 + $0x16c0] sm:$0xff] }
 0x55f   :  { %10009 = vmatpush1.bf16.msra.mxu1 %v20094_v16  ;;  %9924 = vmatprep.subr.bf16.mxu0 %v20096_v45  ;;  %v20144_v45 = vcombine.high %v6911_v54, %v6919_v58  ;;  %v20147_v16 = vcombine.high %v6912_v10, %v6920_v18 }
 0x560   :  { %10010 = vmatprep.subr.bf16.mxu1 %v20099_v63  ;;  %v20142_v63 = vcombine.low %v6896_v55, %v6904_v42  ;;  %v6936_v55 = vld [vmem:[%s22233_s2 + $0x1728] sm:$0xff]  ;;  %v20162_v42 = vcombine.low %v6911_v54, %v6919_v58  ;;  %v6951_v54 = vld [vmem:[%s22233_s2 + $0x17e0] sm:$0xff] }
 0x561   :  { %22520 = vst [vmem:[#allocation82_spill] sm:$0xff] %v20144_v45  ;;  %22521 = vst [vmem:[#allocation83_spill] sm:$0xff] %v20147_v16  ;;  %v6944_v58 = vld [vmem:[%s22233_s2 + $0x1788] sm:$0xff] }
 0x562   :  { %9925 = vmatpush1.bf16.msra.mxu0 %v20114_v50  ;;  %22519 = vst [vmem:[#allocation81_spill] sm:$0xff] %v20142_v63  ;;  %22522 = vst [vmem:[#allocation84_spill] sm:$0xff] %v20162_v42  ;;  %v6943_v50 = vld [vmem:[%s22233_s2 + $0x1780] sm:$0xff] }
 0x563   :  { %10011 = vmatpush1.bf16.msra.mxu1 %v20118_v59  ;;  %9926 = vmatprep.subr.bf16.mxu0 %v20120_v28  ;;  %v20168_v28 = vcombine.high %v6927_v52, %v6935_v53  ;;  %v20171_v59 = vcombine.high %v6928_v27, %v6936_v55 }
 0x564   :  { %10012 = vmatprep.subr.bf16.mxu1 %v20123_v24  ;;  %v20166_v24 = vcombine.low %v6912_v10, %v6920_v18  ;;  %v6952_v10 = vld [vmem:[%s22233_s2 + $0x17e8] sm:$0xff]  ;;  %v20186_v18 = vcombine.low %v6927_v52, %v6935_v53  ;;  %v6457_v52 = vld [vmem:[%s22233_s2 + $0xb0] sm:$0xff]  ;;  %v6450_v53 = vld [vmem:[%s22233_s2 + $0x58] sm:$0xff] }
 0x565   :  { %22524 = vst [vmem:[#allocation86_spill] sm:$0xff] %v20168_v28  ;;  %22525 = vst [vmem:[#allocation87_spill] sm:$0xff] %v20171_v59 }
 0x566   :  { %9927 = vmatpush1.bf16.msra.mxu0 %v20138_v30  ;;  %22523 = vst [vmem:[#allocation85_spill] sm:$0xff] %v20166_v24  ;;  %v6449_v30 = vld [vmem:[%s22233_s2 + $0x50] sm:$0xff] }
 0x567   :  { %10013 = vmatpush1.bf16.msra.mxu1 %v20142_v63  ;;  %9928 = vmatprep.subr.bf16.mxu0 %v20144_v45  ;;  %v20192_v45 = vcombine.high %v6943_v50, %v6951_v54  ;;  %v20195_v63 = vcombine.high %v6944_v58, %v6952_v10 }
 0x568   :  { %10014 = vmatprep.subr.bf16.mxu1 %v20147_v16  ;;  %v20190_v16 = vcombine.low %v6928_v27, %v6936_v55  ;;  %v6458_v27 = vld [vmem:[%s22233_s2 + $0xb8] sm:$0xff]  ;;  %v20210_v55 = vcombine.low %v6943_v50, %v6951_v54  ;;  %v6473_v50 = vld [vmem:[%s22233_s2 + $0x170] sm:$0xff]  ;;  %v20228_v54 = vcombine.low %v6449_v30, %v6457_v52 }
 0x569   :  { %22527 = vst [vmem:[#allocation89_spill] sm:$0xff] %v20192_v45  ;;  %22528 = vst [vmem:[#allocation90_spill] sm:$0xff] %v20195_v63 }
 0x56a   :  { %9929 = vmatpush1.bf16.msra.mxu0 %v20162_v42  ;;  %22526 = vst [vmem:[#allocation88_spill] sm:$0xff] %v20190_v16  ;;  %22529 = vst [vmem:[#allocation91_spill] sm:$0xff] %v20210_v55  ;;  %v6465_v42 = vld [vmem:[%s22233_s2 + $0x110] sm:$0xff] }
 0x56b   :  { %10015 = vmatpush1.bf16.msra.mxu1 %v20166_v24  ;;  %9930 = vmatprep.subr.bf16.mxu0 %v20168_v28  ;;  %v20216_v28 = vcombine.high %v6449_v30, %v6457_v52  ;;  %v20219_v24 = vcombine.high %v6450_v53, %v6458_v27  ;;  %22533 = vst [vmem:[#allocation95_spill] sm:$0xff] %v20228_v54  ;;  %v6481_v30 = vld [vmem:[%s22233_s2 + $0x1d0] sm:$0xff] }
 0x56c   :  { %10016 = vmatprep.subr.bf16.mxu1 %v20171_v59  ;;  %v20214_v59 = vcombine.low %v6944_v58, %v6952_v10  ;;  %v6466_v58 = vld [vmem:[%s22233_s2 + $0x118] sm:$0xff]  ;;  %v6489_v52 = vld [vmem:[%s22233_s2 + $0x230] sm:$0xff] }
 0x56d   :  { %22531 = vst [vmem:[#allocation93_spill] sm:$0xff] %v20216_v28  ;;  %22532 = vst [vmem:[#allocation94_spill] sm:$0xff] %v20219_v24  ;;  %v6474_v10 = vld [vmem:[%s22233_s2 + $0x178] sm:$0xff] }
 0x56e   :  { %9931 = vmatpush1.bf16.msra.mxu0 %v20186_v18  ;;  %22530 = vst [vmem:[#allocation92_spill] sm:$0xff] %v20214_v59 }
 0x56f   :  { %10017 = vmatpush1.bf16.msra.mxu1 %v20190_v16  ;;  %9932 = vmatprep.subr.bf16.mxu0 %v20192_v45  ;;  %v20241_v45 = vcombine.high %v6465_v42, %v6473_v50 }
 0x570   :  { %10018 = vmatprep.subr.bf16.mxu1 %v20195_v63  ;;  %v20238_v63 = vcombine.low %v6450_v53, %v6458_v27  ;;  %v6482_v53 = vld [vmem:[%s22233_s2 + $0x1d8] sm:$0xff] }
 0x571   :  { %22535 = vst [vmem:[#allocation97_spill] sm:$0xff] %v20241_v45  ;;  %v6490_v27 = vld [vmem:[%s22233_s2 + $0x238] sm:$0xff] }
 0x572   :  { %9933 = vmatpush1.bf16.msra.mxu0 %v20210_v55  ;;  %22534 = vst [vmem:[#allocation96_spill] sm:$0xff] %v20238_v63  ;;  %v20250_v55 = vcombine.high %v6466_v58, %v6474_v10  ;;  %v20270_v16 = vcombine.high %v6482_v53, %v6490_v27 }
 0x573   :  { %10019 = vmatpush1.bf16.msra.mxu1 %v20214_v59  ;;  %10031 = vmatprep.subr.bf16.mxu0 %v20216_v28  ;;  %v20264_v28 = vcombine.low %v6466_v58, %v6474_v10  ;;  %v20266_v59 = vcombine.high %v6481_v30, %v6489_v52  ;;  %v20286_v58 = vcombine.low %v6481_v30, %v6489_v52  ;;  %v6521_v30 = vld [vmem:[%s22233_s2 + $0x3b0] sm:$0xff]  ;;  %v6514_v52 = vld [vmem:[%s22233_s2 + $0x358] sm:$0xff] }
 0x574   :  { %10117 = vmatprep.subr.bf16.mxu1 %v20219_v24  ;;  %22536 = vst [vmem:[#allocation98_spill] sm:$0xff] %v20250_v55  ;;  %v20260_v24 = vcombine.low %v6465_v42, %v6473_v50  ;;  %22540 = vst [vmem:[#allocation102_spill] sm:$0xff] %v20270_v16  ;;  %v6505_v42 = vld [vmem:[%s22233_s2 + $0x2f0] sm:$0xff]  ;;  %v6498_v50 = vld [vmem:[%s22233_s2 + $0x298] sm:$0xff]  ;;  %v20290_v10 = vcombine.low %v6482_v53, %v6490_v27 }
 0x575   :  { %9935 = vmatmul.mubr.bf16.vlgmr.msra.gmra.mrb[32].mxu0 %v16515_v44  ;;  %22538 = vst [vmem:[#allocation100_spill] sm:$0xff] %v20264_v28  ;;  %22539 = vst [vmem:[#allocation101_spill] sm:$0xff] %v20266_v59  ;;  %v6522_v53 = vld [vmem:[%s22233_s2 + $0x3b8] sm:$0xff] }
 0x576   :  { %10021 = vmatmul.mubr.bf16.vlgmr.msra.gmra.mrb[32].mxu1 %v16515_v44  ;;  %10032 = vmatpush1.bf16.msra.mxu0 %v20228_v54  ;;  %22537 = vst [vmem:[#allocation99_spill] sm:$0xff] %v20260_v24  ;;  %v6497_v54 = vld [vmem:[%s22233_s2 + $0x290] sm:$0xff]  ;;  %22541 = vst [vmem:[#allocation103_spill] sm:$0xff] %v20286_v58 }
 0x577   :  { %10063 = vmatprep.mubr.bf16.mxu0 %v16476_v32  ;;  %10118 = vmatpush1.bf16.msra.mxu1 %v20238_v63  ;;  %22542 = vst [vmem:[#allocation104_spill] sm:$0xff] %v20290_v10  ;;  %v6513_v63 = vld [vmem:[%s22233_s2 + $0x350] sm:$0xff]  ;;  %v20310_v27 = vcombine.low %v6497_v54, %v6505_v42 }
 0x578   :  { %10149 = vmatprep.mubr.bf16.mxu1 %v16476_v32  ;;  %10033 = vmatprep.subr.bf16.mxu0 %v20241_v45  ;;  %v6506_v32 = vld [vmem:[%s22233_s2 + $0x2f8] sm:$0xff]  ;;  %v20292_v45 = vcombine.high %v6497_v54, %v6505_v42  ;;  %v6537_v54 = vld [vmem:[%s22233_s2 + $0x470] sm:$0xff] }
 0x579   :  { %10119 = vmatprep.subr.bf16.mxu1 %v20250_v55  ;;  %v20295_v55 = vcombine.high %v6498_v50, %v6506_v32  ;;  %22545 = vst [vmem:[#allocation107_spill] sm:$0xff] %v20310_v27  ;;  %v6530_v42 = vld [vmem:[%s22233_s2 + $0x418] sm:$0xff] }
 0x57a   :  { %10034 = vmatpush1.bf16.msra.mxu0 %v20260_v24  ;;  %22543 = vst [vmem:[#allocation105_spill] sm:$0xff] %v20292_v45  ;;  %v6529_v24 = vld [vmem:[%s22233_s2 + $0x410] sm:$0xff] }
 0x57b   :  { %10120 = vmatpush1.bf16.msra.mxu1 %v20264_v28  ;;  %10035 = vmatprep.subr.bf16.mxu0 %v20266_v59  ;;  %22544 = vst [vmem:[#allocation106_spill] sm:$0xff] %v20295_v55  ;;  %v20316_v59 = vcombine.high %v6513_v63, %v6521_v30  ;;  %v20319_v28 = vcombine.high %v6514_v52, %v6522_v53 }
 0x57c   :  { %10121 = vmatprep.subr.bf16.mxu1 %v20270_v16  ;;  %v20314_v16 = vcombine.low %v6498_v50, %v6506_v32  ;;  %v6538_v50 = vld [vmem:[%s22233_s2 + $0x478] sm:$0xff]  ;;  %v20334_v32 = vcombine.low %v6513_v63, %v6521_v30  ;;  %v6553_v63 = vld [vmem:[%s22233_s2 + $0x530] sm:$0xff] }
 0x57d   :  { %22547 = vst [vmem:[#allocation109_spill] sm:$0xff] %v20316_v59  ;;  %22548 = vst [vmem:[#allocation110_spill] sm:$0xff] %v20319_v28  ;;  %v6546_v30 = vld [vmem:[%s22233_s2 + $0x4d8] sm:$0xff] }
 0x57e   :  { %10036 = vmatpush1.bf16.msra.mxu0 %v20286_v58  ;;  %22546 = vst [vmem:[#allocation108_spill] sm:$0xff] %v20314_v16  ;;  %22549 = vst [vmem:[#allocation111_spill] sm:$0xff] %v20334_v32  ;;  %v6545_v58 = vld [vmem:[%s22233_s2 + $0x4d0] sm:$0xff] }
 0x57f   :  { %10122 = vmatpush1.bf16.msra.mxu1 %v20290_v10  ;;  %10037 = vmatprep.subr.bf16.mxu0 %v20292_v45  ;;  %v20340_v45 = vcombine.high %v6529_v24, %v6537_v54  ;;  %v20343_v10 = vcombine.high %v6530_v42, %v6538_v50 }
 0x580   :  { %10123 = vmatprep.subr.bf16.mxu1 %v20295_v55  ;;  %v20338_v55 = vcombine.low %v6514_v52, %v6522_v53  ;;  %v6554_v52 = vld [vmem:[%s22233_s2 + $0x538] sm:$0xff]  ;;  %v20358_v53 = vcombine.low %v6529_v24, %v6537_v54  ;;  %v6569_v24 = vld [vmem:[%s22233_s2 + $0x5f0] sm:$0xff] }
 0x581   :  { %22551 = vst [vmem:[#allocation113_spill] sm:$0xff] %v20340_v45  ;;  %22552 = vst [vmem:[#allocation114_spill] sm:$0xff] %v20343_v10  ;;  %v6562_v54 = vld [vmem:[%s22233_s2 + $0x598] sm:$0xff] }
 0x582   :  { %10038 = vmatpush1.bf16.msra.mxu0 %v20310_v27  ;;  %22550 = vst [vmem:[#allocation112_spill] sm:$0xff] %v20338_v55  ;;  %22553 = vst [vmem:[#allocation115_spill] sm:$0xff] %v20358_v53  ;;  %v6561_v27 = vld [vmem:[%s22233_s2 + $0x590] sm:$0xff] }
 0x583   :  { %10124 = vmatpush1.bf16.msra.mxu1 %v20314_v16  ;;  %10039 = vmatprep.subr.bf16.mxu0 %v20316_v59  ;;  %v20364_v59 = vcombine.high %v6545_v58, %v6553_v63  ;;  %v20367_v16 = vcombine.high %v6546_v30, %v6554_v52 }
 0x584   :  { %10125 = vmatprep.subr.bf16.mxu1 %v20319_v28  ;;  %v20362_v28 = vcombine.low %v6530_v42, %v6538_v50  ;;  %v6570_v42 = vld [vmem:[%s22233_s2 + $0x5f8] sm:$0xff]  ;;  %v20382_v50 = vcombine.low %v6545_v58, %v6553_v63  ;;  %v6585_v58 = vld [vmem:[%s22233_s2 + $0x6b0] sm:$0xff] }
 0x585   :  { %22555 = vst [vmem:[#allocation117_spill] sm:$0xff] %v20364_v59  ;;  %22556 = vst [vmem:[#allocation118_spill] sm:$0xff] %v20367_v16  ;;  %v6578_v63 = vld [vmem:[%s22233_s2 + $0x658] sm:$0xff] }
 0x586   :  { %10040 = vmatpush1.bf16.msra.mxu0 %v20334_v32  ;;  %22554 = vst [vmem:[#allocation116_spill] sm:$0xff] %v20362_v28  ;;  %22557 = vst [vmem:[#allocation119_spill] sm:$0xff] %v20382_v50  ;;  %v6577_v32 = vld [vmem:[%s22233_s2 + $0x650] sm:$0xff] }
 0x587   :  { %10126 = vmatpush1.bf16.msra.mxu1 %v20338_v55  ;;  %10041 = vmatprep.subr.bf16.mxu0 %v20340_v45  ;;  %v20388_v45 = vcombine.high %v6561_v27, %v6569_v24  ;;  %v20391_v55 = vcombine.high %v6562_v54, %v6570_v42 }
 0x588   :  { %10127 = vmatprep.subr.bf16.mxu1 %v20343_v10  ;;  %v20386_v10 = vcombine.low %v6546_v30, %v6554_v52  ;;  %v6586_v30 = vld [vmem:[%s22233_s2 + $0x6b8] sm:$0xff]  ;;  %v20406_v52 = vcombine.low %v6561_v27, %v6569_v24  ;;  %v6601_v27 = vld [vmem:[%s22233_s2 + $0x770] sm:$0xff] }
 0x589   :  { %22559 = vst [vmem:[#allocation121_spill] sm:$0xff] %v20388_v45  ;;  %22560 = vst [vmem:[#allocation122_spill] sm:$0xff] %v20391_v55  ;;  %v6594_v24 = vld [vmem:[%s22233_s2 + $0x718] sm:$0xff] }
 0x58a   :  { %10042 = vmatpush1.bf16.msra.mxu0 %v20358_v53  ;;  %22558 = vst [vmem:[#allocation120_spill] sm:$0xff] %v20386_v10  ;;  %22561 = vst [vmem:[#allocation123_spill] sm:$0xff] %v20406_v52  ;;  %v6593_v53 = vld [vmem:[%s22233_s2 + $0x710] sm:$0xff] }
 0x58b   :  { %10128 = vmatpush1.bf16.msra.mxu1 %v20362_v28  ;;  %10043 = vmatprep.subr.bf16.mxu0 %v20364_v59  ;;  %v20412_v59 = vcombine.high %v6577_v32, %v6585_v58  ;;  %v20415_v28 = vcombine.high %v6578_v63, %v6586_v30 }
 0x58c   :  { %10129 = vmatprep.subr.bf16.mxu1 %v20367_v16  ;;  %v20410_v16 = vcombine.low %v6562_v54, %v6570_v42  ;;  %v6602_v54 = vld [vmem:[%s22233_s2 + $0x778] sm:$0xff]  ;;  %v20430_v42 = vcombine.low %v6577_v32, %v6585_v58  ;;  %v6617_v32 = vld [vmem:[%s22233_s2 + $0x830] sm:$0xff] }
 0x58d   :  { %22563 = vst [vmem:[#allocation125_spill] sm:$0xff] %v20412_v59  ;;  %22564 = vst [vmem:[#allocation126_spill] sm:$0xff] %v20415_v28  ;;  %v6610_v58 = vld [vmem:[%s22233_s2 + $0x7d8] sm:$0xff] }
 0x58e   :  { %10044 = vmatpush1.bf16.msra.mxu0 %v20382_v50  ;;  %22562 = vst [vmem:[#allocation124_spill] sm:$0xff] %v20410_v16  ;;  %22565 = vst [vmem:[#allocation127_spill] sm:$0xff] %v20430_v42  ;;  %v6609_v50 = vld [vmem:[%s22233_s2 + $0x7d0] sm:$0xff] }
 0x58f   :  { %10130 = vmatpush1.bf16.msra.mxu1 %v20386_v10  ;;  %10045 = vmatprep.subr.bf16.mxu0 %v20388_v45  ;;  %v20436_v45 = vcombine.high %v6593_v53, %v6601_v27  ;;  %v20439_v10 = vcombine.high %v6594_v24, %v6602_v54 }
 0x590   :  { %10131 = vmatprep.subr.bf16.mxu1 %v20391_v55  ;;  %v20434_v55 = vcombine.low %v6578_v63, %v6586_v30  ;;  %v6618_v63 = vld [vmem:[%s22233_s2 + $0x838] sm:$0xff]  ;;  %v20454_v30 = vcombine.low %v6593_v53, %v6601_v27  ;;  %v6633_v53 = vld [vmem:[%s22233_s2 + $0x8f0] sm:$0xff] }
 0x591   :  { %22567 = vst [vmem:[#allocation129_spill] sm:$0xff] %v20436_v45  ;;  %22568 = vst [vmem:[#allocation130_spill] sm:$0xff] %v20439_v10  ;;  %v6626_v27 = vld [vmem:[%s22233_s2 + $0x898] sm:$0xff] }
 0x592   :  { %10046 = vmatpush1.bf16.msra.mxu0 %v20406_v52  ;;  %22566 = vst [vmem:[#allocation128_spill] sm:$0xff] %v20434_v55  ;;  %22569 = vst [vmem:[#allocation131_spill] sm:$0xff] %v20454_v30  ;;  %v6625_v52 = vld [vmem:[%s22233_s2 + $0x890] sm:$0xff] }
 0x593   :  { %10132 = vmatpush1.bf16.msra.mxu1 %v20410_v16  ;;  %10047 = vmatprep.subr.bf16.mxu0 %v20412_v59  ;;  %v20460_v59 = vcombine.high %v6609_v50, %v6617_v32  ;;  %v20463_v16 = vcombine.high %v6610_v58, %v6618_v63 }
 0x594   :  { %10133 = vmatprep.subr.bf16.mxu1 %v20415_v28  ;;  %v20458_v28 = vcombine.low %v6594_v24, %v6602_v54  ;;  %v6634_v24 = vld [vmem:[%s22233_s2 + $0x8f8] sm:$0xff]  ;;  %v20478_v54 = vcombine.low %v6609_v50, %v6617_v32  ;;  %v6649_v50 = vld [vmem:[%s22233_s2 + $0x9b0] sm:$0xff] }
 0x595   :  { %22571 = vst [vmem:[#allocation133_spill] sm:$0xff] %v20460_v59  ;;  %22572 = vst [vmem:[#allocation134_spill] sm:$0xff] %v20463_v16  ;;  %v6642_v32 = vld [vmem:[%s22233_s2 + $0x958] sm:$0xff] }
 0x596   :  { %10048 = vmatpush1.bf16.msra.mxu0 %v20430_v42  ;;  %22570 = vst [vmem:[#allocation132_spill] sm:$0xff] %v20458_v28  ;;  %22573 = vst [vmem:[#allocation135_spill] sm:$0xff] %v20478_v54  ;;  %v6641_v42 = vld [vmem:[%s22233_s2 + $0x950] sm:$0xff] }
 0x597   :  { %10134 = vmatpush1.bf16.msra.mxu1 %v20434_v55  ;;  %10049 = vmatprep.subr.bf16.mxu0 %v20436_v45  ;;  %v20484_v45 = vcombine.high %v6625_v52, %v6633_v53  ;;  %v20487_v55 = vcombine.high %v6626_v27, %v6634_v24 }
 0x598   :  { %10135 = vmatprep.subr.bf16.mxu1 %v20439_v10  ;;  %v20482_v10 = vcombine.low %v6610_v58, %v6618_v63  ;;  %v6650_v58 = vld [vmem:[%s22233_s2 + $0x9b8] sm:$0xff]  ;;  %v20502_v63 = vcombine.low %v6625_v52, %v6633_v53  ;;  %v6665_v52 = vld [vmem:[%s22233_s2 + $0xa70] sm:$0xff] }
 0x599   :  { %22575 = vst [vmem:[#allocation137_spill] sm:$0xff] %v20484_v45  ;;  %22576 = vst [vmem:[#allocation138_spill] sm:$0xff] %v20487_v55  ;;  %v6658_v53 = vld [vmem:[%s22233_s2 + $0xa18] sm:$0xff] }
 0x59a   :  { %10050 = vmatpush1.bf16.msra.mxu0 %v20454_v30  ;;  %22574 = vst [vmem:[#allocation136_spill] sm:$0xff] %v20482_v10  ;;  %22577 = vst [vmem:[#allocation139_spill] sm:$0xff] %v20502_v63  ;;  %v6657_v30 = vld [vmem:[%s22233_s2 + $0xa10] sm:$0xff] }
 0x59b   :  { %10136 = vmatpush1.bf16.msra.mxu1 %v20458_v28  ;;  %10051 = vmatprep.subr.bf16.mxu0 %v20460_v59  ;;  %v20508_v59 = vcombine.high %v6641_v42, %v6649_v50  ;;  %v20511_v28 = vcombine.high %v6642_v32, %v6650_v58 }
 0x59c   :  { %10137 = vmatprep.subr.bf16.mxu1 %v20463_v16  ;;  %v20506_v16 = vcombine.low %v6626_v27, %v6634_v24  ;;  %v6666_v27 = vld [vmem:[%s22233_s2 + $0xa78] sm:$0xff]  ;;  %v20526_v24 = vcombine.low %v6641_v42, %v6649_v50  ;;  %v6681_v42 = vld [vmem:[%s22233_s2 + $0xb30] sm:$0xff] }
 0x59d   :  { %22579 = vst [vmem:[#allocation141_spill] sm:$0xff] %v20508_v59  ;;  %22580 = vst [vmem:[#allocation142_spill] sm:$0xff] %v20511_v28  ;;  %v6674_v50 = vld [vmem:[%s22233_s2 + $0xad8] sm:$0xff] }
 0x59e   :  { %10052 = vmatpush1.bf16.msra.mxu0 %v20478_v54  ;;  %22578 = vst [vmem:[#allocation140_spill] sm:$0xff] %v20506_v16  ;;  %22581 = vst [vmem:[#allocation143_spill] sm:$0xff] %v20526_v24  ;;  %v6673_v54 = vld [vmem:[%s22233_s2 + $0xad0] sm:$0xff] }
 0x59f   :  { %10138 = vmatpush1.bf16.msra.mxu1 %v20482_v10  ;;  %10053 = vmatprep.subr.bf16.mxu0 %v20484_v45  ;;  %v20532_v45 = vcombine.high %v6657_v30, %v6665_v52  ;;  %v20535_v10 = vcombine.high %v6658_v53, %v6666_v27 }
 0x5a0   :  { %10139 = vmatprep.subr.bf16.mxu1 %v20487_v55  ;;  %v20530_v55 = vcombine.low %v6642_v32, %v6650_v58  ;;  %v6682_v32 = vld [vmem:[%s22233_s2 + $0xb38] sm:$0xff]  ;;  %v20550_v58 = vcombine.low %v6657_v30, %v6665_v52  ;;  %v6697_v30 = vld [vmem:[%s22233_s2 + $0xbf0] sm:$0xff] }
 0x5a1   :  { %22583 = vst [vmem:[#allocation145_spill] sm:$0xff] %v20532_v45  ;;  %22584 = vst [vmem:[#allocation146_spill] sm:$0xff] %v20535_v10  ;;  %v6690_v52 = vld [vmem:[%s22233_s2 + $0xb98] sm:$0xff] }
 0x5a2   :  { %10054 = vmatpush1.bf16.msra.mxu0 %v20502_v63  ;;  %22582 = vst [vmem:[#allocation144_spill] sm:$0xff] %v20530_v55  ;;  %22585 = vst [vmem:[#allocation147_spill] sm:$0xff] %v20550_v58  ;;  %v6689_v63 = vld [vmem:[%s22233_s2 + $0xb90] sm:$0xff] }
 0x5a3   :  { %10140 = vmatpush1.bf16.msra.mxu1 %v20506_v16  ;;  %10055 = vmatprep.subr.bf16.mxu0 %v20508_v59  ;;  %v20556_v59 = vcombine.high %v6673_v54, %v6681_v42  ;;  %v20559_v16 = vcombine.high %v6674_v50, %v6682_v32 }
 0x5a4   :  { %10141 = vmatprep.subr.bf16.mxu1 %v20511_v28  ;;  %v20554_v28 = vcombine.low %v6658_v53, %v6666_v27  ;;  %v6698_v53 = vld [vmem:[%s22233_s2 + $0xbf8] sm:$0xff]  ;;  %v20574_v27 = vcombine.low %v6673_v54, %v6681_v42  ;;  %v6713_v54 = vld [vmem:[%s22233_s2 + $0xcb0] sm:$0xff] }
 0x5a5   :  { %22587 = vst [vmem:[#allocation149_spill] sm:$0xff] %v20556_v59  ;;  %22588 = vst [vmem:[#allocation150_spill] sm:$0xff] %v20559_v16  ;;  %v6706_v42 = vld [vmem:[%s22233_s2 + $0xc58] sm:$0xff] }
 0x5a6   :  { %10056 = vmatpush1.bf16.msra.mxu0 %v20526_v24  ;;  %22586 = vst [vmem:[#allocation148_spill] sm:$0xff] %v20554_v28  ;;  %v6705_v24 = vld [vmem:[%s22233_s2 + $0xc50] sm:$0xff] }
 0x5a7   :  { %10142 = vmatpush1.bf16.msra.mxu1 %v20530_v55  ;;  %10057 = vmatprep.subr.bf16.mxu0 %v20532_v45  ;;  %v20580_v45 = vcombine.high %v6689_v63, %v6697_v30  ;;  %v20583_v55 = vcombine.high %v6690_v52, %v6698_v53 }
 0x5a8   :  { %10143 = vmatprep.subr.bf16.mxu1 %v20535_v10  ;;  %v20578_v10 = vcombine.low %v6674_v50, %v6682_v32  ;;  %v6714_v50 = vld [vmem:[%s22233_s2 + $0xcb8] sm:$0xff]  ;;  %v20598_v32 = vcombine.low %v6689_v63, %v6697_v30  ;;  %v6729_v63 = vld [vmem:[%s22233_s2 + $0xd70] sm:$0xff]  ;;  %v20616_v30 = vcombine.low %v6705_v24, %v6713_v54 }
 0x5a9   :  { %22590 = vst [vmem:[#allocation152_spill] sm:$0xff] %v20580_v45  ;;  %22591 = vst [vmem:[#allocation153_spill] sm:$0xff] %v20583_v55 }
 0x5aa   :  { %10058 = vmatpush1.bf16.msra.mxu0 %v20550_v58  ;;  %22589 = vst [vmem:[#allocation151_spill] sm:$0xff] %v20578_v10  ;;  %22592 = vst [vmem:[#allocation154_spill] sm:$0xff] %v20598_v32  ;;  %v6721_v58 = vld [vmem:[%s22233_s2 + $0xd10] sm:$0xff] }
 0x5ab   :  { %10144 = vmatpush1.bf16.msra.mxu1 %v20554_v28  ;;  %10059 = vmatprep.subr.bf16.mxu0 %v20556_v59  ;;  %v20604_v59 = vcombine.high %v6705_v24, %v6713_v54  ;;  %v20607_v28 = vcombine.high %v6706_v42, %v6714_v50  ;;  %v6737_v24 = vld [vmem:[%s22233_s2 + $0xdd0] sm:$0xff] }
 0x5ac   :  { %10145 = vmatprep.subr.bf16.mxu1 %v20559_v16  ;;  %v20602_v16 = vcombine.low %v6690_v52, %v6698_v53  ;;  %v6722_v52 = vld [vmem:[%s22233_s2 + $0xd18] sm:$0xff]  ;;  %v6745_v54 = vld [vmem:[%s22233_s2 + $0xe30] sm:$0xff] }
 0x5ad   :  { %22594 = vst [vmem:[#allocation156_spill] sm:$0xff] %v20604_v59  ;;  %22595 = vst [vmem:[#allocation157_spill] sm:$0xff] %v20607_v28  ;;  %v6730_v53 = vld [vmem:[%s22233_s2 + $0xd78] sm:$0xff] }
 0x5ae   :  { %10060 = vmatpush1.bf16.msra.mxu0 %v20574_v27  ;;  %22593 = vst [vmem:[#allocation155_spill] sm:$0xff] %v20602_v16 }
 0x5af   :  { %10146 = vmatpush1.bf16.msra.mxu1 %v20578_v10  ;;  %10061 = vmatprep.subr.bf16.mxu0 %v20580_v45  ;;  %v20629_v45 = vcombine.high %v6721_v58, %v6729_v63 }
 0x5b0   :  { %10147 = vmatprep.subr.bf16.mxu1 %v20583_v55  ;;  %v20626_v55 = vcombine.low %v6706_v42, %v6714_v50  ;;  %v6738_v42 = vld [vmem:[%s22233_s2 + $0xdd8] sm:$0xff] }
 0x5b1   :  { %22597 = vst [vmem:[#allocation159_spill] sm:$0xff] %v20629_v45  ;;  %v6746_v50 = vld [vmem:[%s22233_s2 + $0xe38] sm:$0xff] }
 0x5b2   :  { %10062 = vmatpush1.bf16.msra.mxu0 %v20598_v32  ;;  %22596 = vst [vmem:[#allocation158_spill] sm:$0xff] %v20626_v55  ;;  %v20638_v32 = vcombine.high %v6722_v52, %v6730_v53  ;;  %v20658_v10 = vcombine.high %v6738_v42, %v6746_v50 }
 0x5b3   :  { %10148 = vmatpush1.bf16.msra.mxu1 %v20602_v16  ;;  %10074 = vmatprep.subr.bf16.mxu0 %v20604_v59  ;;  %v20652_v59 = vcombine.low %v6722_v52, %v6730_v53  ;;  %v20654_v16 = vcombine.high %v6737_v24, %v6745_v54  ;;  %v20674_v52 = vcombine.low %v6737_v24, %v6745_v54  ;;  %v6777_v24 = vld [vmem:[%s22233_s2 + $0xfb0] sm:$0xff]  ;;  %v6770_v54 = vld [vmem:[%s22233_s2 + $0xf58] sm:$0xff] }
 0x5b4   :  { %10160 = vmatprep.subr.bf16.mxu1 %v20607_v28  ;;  %22598 = vst [vmem:[#allocation160_spill] sm:$0xff] %v20638_v32  ;;  %v20648_v28 = vcombine.low %v6721_v58, %v6729_v63  ;;  %22602 = vst [vmem:[#allocation164_spill] sm:$0xff] %v20658_v10  ;;  %v6761_v58 = vld [vmem:[%s22233_s2 + $0xef0] sm:$0xff]  ;;  %v6754_v63 = vld [vmem:[%s22233_s2 + $0xe98] sm:$0xff]  ;;  %v20678_v53 = vcombine.low %v6738_v42, %v6746_v50 }
 0x5b5   :  { %10064 = vmatmul.mubr.bf16.vlgmr.msra.gmra.mrb[36].mxu0 %v16472_v14  ;;  %22600 = vst [vmem:[#allocation162_spill] sm:$0xff] %v20652_v59  ;;  %22601 = vst [vmem:[#allocation163_spill] sm:$0xff] %v20654_v16  ;;  %v6778_v42 = vld [vmem:[%s22233_s2 + $0xfb8] sm:$0xff] }
 0x5b6   :  { %10150 = vmatmul.mubr.bf16.vlgmr.msra.gmra.mrb[36].mxu1 %v16472_v14  ;;  %10075 = vmatpush1.bf16.msra.mxu0 %v20616_v30  ;;  %22599 = vst [vmem:[#allocation161_spill] sm:$0xff] %v20648_v28  ;;  %v6753_v14 = vld [vmem:[%s22233_s2 + $0xe90] sm:$0xff]  ;;  %22603 = vst [vmem:[#allocation165_spill] sm:$0xff] %v20674_v52 }
 0x5b7   :  { %10106 = vmatprep.mubr.bf16.mxu0 %v16539_v29  ;;  %10161 = vmatpush1.bf16.msra.mxu1 %v20626_v55  ;;  %22604 = vst [vmem:[#allocation166_spill] sm:$0xff] %v20678_v53  ;;  %v6769_v55 = vld [vmem:[%s22233_s2 + $0xf50] sm:$0xff]  ;;  %v20698_v50 = vcombine.low %v6753_v14, %v6761_v58 }
 0x5b8   :  { %10192 = vmatprep.mubr.bf16.mxu1 %v16539_v29  ;;  %10076 = vmatprep.subr.bf16.mxu0 %v20629_v45  ;;  %v6762_v29 = vld [vmem:[%s22233_s2 + $0xef8] sm:$0xff]  ;;  %v20680_v45 = vcombine.high %v6753_v14, %v6761_v58  ;;  %v6793_v14 = vld [vmem:[%s22233_s2 + $0x1070] sm:$0xff] }
 0x5b9   :  { %10162 = vmatprep.subr.bf16.mxu1 %v20638_v32  ;;  %v20683_v32 = vcombine.high %v6754_v63, %v6762_v29  ;;  %22607 = vst [vmem:[#allocation169_spill] sm:$0xff] %v20698_v50  ;;  %v6786_v58 = vld [vmem:[%s22233_s2 + $0x1018] sm:$0xff] }
 0x5ba   :  { %10077 = vmatpush1.bf16.msra.mxu0 %v20648_v28  ;;  %22605 = vst [vmem:[#allocation167_spill] sm:$0xff] %v20680_v45  ;;  %v6785_v28 = vld [vmem:[%s22233_s2 + $0x1010] sm:$0xff] }
 0x5bb   :  { %10163 = vmatpush1.bf16.msra.mxu1 %v20652_v59  ;;  %10078 = vmatprep.subr.bf16.mxu0 %v20654_v16  ;;  %22606 = vst [vmem:[#allocation168_spill] sm:$0xff] %v20683_v32  ;;  %v20704_v16 = vcombine.high %v6769_v55, %v6777_v24  ;;  %v20707_v59 = vcombine.high %v6770_v54, %v6778_v42 }
 0x5bc   :  { %10164 = vmatprep.subr.bf16.mxu1 %v20658_v10  ;;  %v20702_v10 = vcombine.low %v6754_v63, %v6762_v29  ;;  %v6794_v63 = vld [vmem:[%s22233_s2 + $0x1078] sm:$0xff]  ;;  %v20722_v29 = vcombine.low %v6769_v55, %v6777_v24  ;;  %v6809_v55 = vld [vmem:[%s22233_s2 + $0x1130] sm:$0xff] }
 0x5bd   :  { %22609 = vst [vmem:[#allocation171_spill] sm:$0xff] %v20704_v16  ;;  %22610 = vst [vmem:[#allocation172_spill] sm:$0xff] %v20707_v59  ;;  %v6802_v24 = vld [vmem:[%s22233_s2 + $0x10d8] sm:$0xff] }
 0x5be   :  { %10079 = vmatpush1.bf16.msra.mxu0 %v20674_v52  ;;  %22608 = vst [vmem:[#allocation170_spill] sm:$0xff] %v20702_v10  ;;  %22611 = vst [vmem:[#allocation173_spill] sm:$0xff] %v20722_v29  ;;  %v6801_v52 = vld [vmem:[%s22233_s2 + $0x10d0] sm:$0xff] }
 0x5bf   :  { %10165 = vmatpush1.bf16.msra.mxu1 %v20678_v53  ;;  %10080 = vmatprep.subr.bf16.mxu0 %v20680_v45  ;;  %v20728_v45 = vcombine.high %v6785_v28, %v6793_v14  ;;  %v20731_v53 = vcombine.high %v6786_v58, %v6794_v63 }
 0x5c0   :  { %10166 = vmatprep.subr.bf16.mxu1 %v20683_v32  ;;  %v20726_v32 = vcombine.low %v6770_v54, %v6778_v42  ;;  %v6810_v54 = vld [vmem:[%s22233_s2 + $0x1138] sm:$0xff]  ;;  %v20746_v42 = vcombine.low %v6785_v28, %v6793_v14  ;;  %v6825_v28 = vld [vmem:[%s22233_s2 + $0x11f0] sm:$0xff] }
 0x5c1   :  { %22613 = vst [vmem:[#allocation175_spill] sm:$0xff] %v20728_v45  ;;  %22614 = vst [vmem:[#allocation176_spill] sm:$0xff] %v20731_v53  ;;  %v6818_v14 = vld [vmem:[%s22233_s2 + $0x1198] sm:$0xff] }
 0x5c2   :  { %10081 = vmatpush1.bf16.msra.mxu0 %v20698_v50  ;;  %22612 = vst [vmem:[#allocation174_spill] sm:$0xff] %v20726_v32  ;;  %22615 = vst [vmem:[#allocation177_spill] sm:$0xff] %v20746_v42  ;;  %v6817_v50 = vld [vmem:[%s22233_s2 + $0x1190] sm:$0xff] }
 0x5c3   :  { %10167 = vmatpush1.bf16.msra.mxu1 %v20702_v10  ;;  %10082 = vmatprep.subr.bf16.mxu0 %v20704_v16  ;;  %v20752_v16 = vcombine.high %v6801_v52, %v6809_v55  ;;  %v20755_v10 = vcombine.high %v6802_v24, %v6810_v54 }
 0x5c4   :  { %10168 = vmatprep.subr.bf16.mxu1 %v20707_v59  ;;  %v20750_v59 = vcombine.low %v6786_v58, %v6794_v63  ;;  %v6826_v58 = vld [vmem:[%s22233_s2 + $0x11f8] sm:$0xff]  ;;  %v20770_v63 = vcombine.low %v6801_v52, %v6809_v55  ;;  %v6841_v52 = vld [vmem:[%s22233_s2 + $0x12b0] sm:$0xff] }
 0x5c5   :  { %22617 = vst [vmem:[#allocation179_spill] sm:$0xff] %v20752_v16  ;;  %22618 = vst [vmem:[#allocation180_spill] sm:$0xff] %v20755_v10  ;;  %v6834_v55 = vld [vmem:[%s22233_s2 + $0x1258] sm:$0xff] }
 0x5c6   :  { %10083 = vmatpush1.bf16.msra.mxu0 %v20722_v29  ;;  %22616 = vst [vmem:[#allocation178_spill] sm:$0xff] %v20750_v59  ;;  %22619 = vst [vmem:[#allocation181_spill] sm:$0xff] %v20770_v63  ;;  %v6833_v29 = vld [vmem:[%s22233_s2 + $0x1250] sm:$0xff] }
 0x5c7   :  { %10169 = vmatpush1.bf16.msra.mxu1 %v20726_v32  ;;  %10084 = vmatprep.subr.bf16.mxu0 %v20728_v45  ;;  %v20776_v45 = vcombine.high %v6817_v50, %v6825_v28  ;;  %v20779_v32 = vcombine.high %v6818_v14, %v6826_v58 }
 0x5c8   :  { %10170 = vmatprep.subr.bf16.mxu1 %v20731_v53  ;;  %v20774_v53 = vcombine.low %v6802_v24, %v6810_v54  ;;  %v6842_v24 = vld [vmem:[%s22233_s2 + $0x12b8] sm:$0xff]  ;;  %v20794_v54 = vcombine.low %v6817_v50, %v6825_v28  ;;  %v6857_v50 = vld [vmem:[%s22233_s2 + $0x1370] sm:$0xff] }
 0x5c9   :  { %22621 = vst [vmem:[#allocation183_spill] sm:$0xff] %v20776_v45  ;;  %22622 = vst [vmem:[#allocation184_spill] sm:$0xff] %v20779_v32  ;;  %v6850_v28 = vld [vmem:[%s22233_s2 + $0x1318] sm:$0xff] }
 0x5ca   :  { %10085 = vmatpush1.bf16.msra.mxu0 %v20746_v42  ;;  %22620 = vst [vmem:[#allocation182_spill] sm:$0xff] %v20774_v53  ;;  %22623 = vst [vmem:[#allocation185_spill] sm:$0xff] %v20794_v54  ;;  %v6849_v42 = vld [vmem:[%s22233_s2 + $0x1310] sm:$0xff] }
 0x5cb   :  { %10171 = vmatpush1.bf16.msra.mxu1 %v20750_v59  ;;  %10086 = vmatprep.subr.bf16.mxu0 %v20752_v16  ;;  %v20800_v16 = vcombine.high %v6833_v29, %v6841_v52  ;;  %v20803_v59 = vcombine.high %v6834_v55, %v6842_v24 }
 0x5cc   :  { %10172 = vmatprep.subr.bf16.mxu1 %v20755_v10  ;;  %v20798_v10 = vcombine.low %v6818_v14, %v6826_v58  ;;  %v6858_v14 = vld [vmem:[%s22233_s2 + $0x1378] sm:$0xff]  ;;  %v20818_v58 = vcombine.low %v6833_v29, %v6841_v52  ;;  %v6873_v29 = vld [vmem:[%s22233_s2 + $0x1430] sm:$0xff] }
 0x5cd   :  { %22625 = vst [vmem:[#allocation187_spill] sm:$0xff] %v20800_v16  ;;  %22626 = vst [vmem:[#allocation188_spill] sm:$0xff] %v20803_v59  ;;  %v6866_v52 = vld [vmem:[%s22233_s2 + $0x13d8] sm:$0xff] }
 0x5ce   :  { %10087 = vmatpush1.bf16.msra.mxu0 %v20770_v63  ;;  %22624 = vst [vmem:[#allocation186_spill] sm:$0xff] %v20798_v10  ;;  %22627 = vst [vmem:[#allocation189_spill] sm:$0xff] %v20818_v58  ;;  %v6865_v63 = vld [vmem:[%s22233_s2 + $0x13d0] sm:$0xff] }
 0x5cf   :  { %10173 = vmatpush1.bf16.msra.mxu1 %v20774_v53  ;;  %10088 = vmatprep.subr.bf16.mxu0 %v20776_v45  ;;  %v20824_v45 = vcombine.high %v6849_v42, %v6857_v50  ;;  %v20827_v53 = vcombine.high %v6850_v28, %v6858_v14 }
 0x5d0   :  { %10174 = vmatprep.subr.bf16.mxu1 %v20779_v32  ;;  %v20822_v32 = vcombine.low %v6834_v55, %v6842_v24  ;;  %v6874_v55 = vld [vmem:[%s22233_s2 + $0x1438] sm:$0xff]  ;;  %v20842_v24 = vcombine.low %v6849_v42, %v6857_v50  ;;  %v6889_v42 = vld [vmem:[%s22233_s2 + $0x14f0] sm:$0xff] }
 0x5d1   :  { %22629 = vst [vmem:[#allocation191_spill] sm:$0xff] %v20824_v45  ;;  %22630 = vst [vmem:[#allocation192_spill] sm:$0xff] %v20827_v53  ;;  %v6882_v50 = vld [vmem:[%s22233_s2 + $0x1498] sm:$0xff] }
 0x5d2   :  { %10089 = vmatpush1.bf16.msra.mxu0 %v20794_v54  ;;  %22628 = vst [vmem:[#allocation190_spill] sm:$0xff] %v20822_v32  ;;  %22631 = vst [vmem:[#allocation193_spill] sm:$0xff] %v20842_v24  ;;  %v6881_v54 = vld [vmem:[%s22233_s2 + $0x1490] sm:$0xff] }
 0x5d3   :  { %10175 = vmatpush1.bf16.msra.mxu1 %v20798_v10  ;;  %10090 = vmatprep.subr.bf16.mxu0 %v20800_v16  ;;  %v20848_v16 = vcombine.high %v6865_v63, %v6873_v29  ;;  %v20851_v10 = vcombine.high %v6866_v52, %v6874_v55 }
 0x5d4   :  { %10176 = vmatprep.subr.bf16.mxu1 %v20803_v59  ;;  %v20846_v59 = vcombine.low %v6850_v28, %v6858_v14  ;;  %v6890_v28 = vld [vmem:[%s22233_s2 + $0x14f8] sm:$0xff]  ;;  %v20866_v14 = vcombine.low %v6865_v63, %v6873_v29  ;;  %v6905_v63 = vld [vmem:[%s22233_s2 + $0x15b0] sm:$0xff] }
 0x5d5   :  { %22633 = vst [vmem:[#allocation195_spill] sm:$0xff] %v20848_v16  ;;  %22634 = vst [vmem:[#allocation196_spill] sm:$0xff] %v20851_v10  ;;  %v6898_v29 = vld [vmem:[%s22233_s2 + $0x1558] sm:$0xff] }
 0x5d6   :  { %10091 = vmatpush1.bf16.msra.mxu0 %v20818_v58  ;;  %22632 = vst [vmem:[#allocation194_spill] sm:$0xff] %v20846_v59  ;;  %22635 = vst [vmem:[#allocation197_spill] sm:$0xff] %v20866_v14  ;;  %v6897_v58 = vld [vmem:[%s22233_s2 + $0x1550] sm:$0xff] }
 0x5d7   :  { %10177 = vmatpush1.bf16.msra.mxu1 %v20822_v32  ;;  %10092 = vmatprep.subr.bf16.mxu0 %v20824_v45  ;;  %v20872_v45 = vcombine.high %v6881_v54, %v6889_v42  ;;  %v20875_v32 = vcombine.high %v6882_v50, %v6890_v28 }
 0x5d8   :  { %10178 = vmatprep.subr.bf16.mxu1 %v20827_v53  ;;  %v20870_v53 = vcombine.low %v6866_v52, %v6874_v55  ;;  %v6906_v52 = vld [vmem:[%s22233_s2 + $0x15b8] sm:$0xff]  ;;  %v20890_v55 = vcombine.low %v6881_v54, %v6889_v42  ;;  %v6921_v54 = vld [vmem:[%s22233_s2 + $0x1670] sm:$0xff] }
 0x5d9   :  { %22637 = vst [vmem:[#allocation199_spill] sm:$0xff] %v20872_v45  ;;  %22638 = vst [vmem:[#allocation200_spill] sm:$0xff] %v20875_v32  ;;  %v6914_v42 = vld [vmem:[%s22233_s2 + $0x1618] sm:$0xff] }
 0x5da   :  { %10093 = vmatpush1.bf16.msra.mxu0 %v20842_v24  ;;  %22636 = vst [vmem:[#allocation198_spill] sm:$0xff] %v20870_v53  ;;  %22639 = vst [vmem:[#allocation201_spill] sm:$0xff] %v20890_v55  ;;  %v6913_v24 = vld [vmem:[%s22233_s2 + $0x1610] sm:$0xff] }
 0x5db   :  { %10179 = vmatpush1.bf16.msra.mxu1 %v20846_v59  ;;  %10094 = vmatprep.subr.bf16.mxu0 %v20848_v16  ;;  %v20896_v16 = vcombine.high %v6897_v58, %v6905_v63  ;;  %v20899_v59 = vcombine.high %v6898_v29, %v6906_v52 }
 0x5dc   :  { %10180 = vmatprep.subr.bf16.mxu1 %v20851_v10  ;;  %v20894_v10 = vcombine.low %v6882_v50, %v6890_v28  ;;  %v6922_v50 = vld [vmem:[%s22233_s2 + $0x1678] sm:$0xff]  ;;  %v20914_v28 = vcombine.low %v6897_v58, %v6905_v63  ;;  %v6937_v58 = vld [vmem:[%s22233_s2 + $0x1730] sm:$0xff] }
 0x5dd   :  { %22641 = vst [vmem:[#allocation203_spill] sm:$0xff] %v20896_v16  ;;  %22642 = vst [vmem:[#allocation204_spill] sm:$0xff] %v20899_v59  ;;  %v6930_v63 = vld [vmem:[%s22233_s2 + $0x16d8] sm:$0xff] }
 0x5de   :  { %10095 = vmatpush1.bf16.msra.mxu0 %v20866_v14  ;;  %22640 = vst [vmem:[#allocation202_spill] sm:$0xff] %v20894_v10  ;;  %22643 = vst [vmem:[#allocation205_spill] sm:$0xff] %v20914_v28  ;;  %v6929_v14 = vld [vmem:[%s22233_s2 + $0x16d0] sm:$0xff] }
 0x5df   :  { %10181 = vmatpush1.bf16.msra.mxu1 %v20870_v53  ;;  %10096 = vmatprep.subr.bf16.mxu0 %v20872_v45  ;;  %v20920_v45 = vcombine.high %v6913_v24, %v6921_v54  ;;  %v20923_v53 = vcombine.high %v6914_v42, %v6922_v50 }
 0x5e0   :  { %10182 = vmatprep.subr.bf16.mxu1 %v20875_v32  ;;  %v20918_v32 = vcombine.low %v6898_v29, %v6906_v52  ;;  %v6938_v29 = vld [vmem:[%s22233_s2 + $0x1738] sm:$0xff]  ;;  %v20938_v52 = vcombine.low %v6913_v24, %v6921_v54  ;;  %v6953_v24 = vld [vmem:[%s22233_s2 + $0x17f0] sm:$0xff] }
 0x5e1   :  { %22645 = vst [vmem:[#allocation207_spill] sm:$0xff] %v20920_v45  ;;  %22646 = vst [vmem:[#allocation208_spill] sm:$0xff] %v20923_v53  ;;  %v6946_v54 = vld [vmem:[%s22233_s2 + $0x1798] sm:$0xff] }
 0x5e2   :  { %10097 = vmatpush1.bf16.msra.mxu0 %v20890_v55  ;;  %22644 = vst [vmem:[#allocation206_spill] sm:$0xff] %v20918_v32  ;;  %v6945_v55 = vld [vmem:[%s22233_s2 + $0x1790] sm:$0xff] }
 0x5e3   :  { %10183 = vmatpush1.bf16.msra.mxu1 %v20894_v10  ;;  %10098 = vmatprep.subr.bf16.mxu0 %v20896_v16  ;;  %v20944_v16 = vcombine.high %v6929_v14, %v6937_v58  ;;  %v20947_v10 = vcombine.high %v6930_v63, %v6938_v29 }
 0x5e4   :  { %10184 = vmatprep.subr.bf16.mxu1 %v20899_v59  ;;  %v20942_v59 = vcombine.low %v6914_v42, %v6922_v50  ;;  %v6954_v42 = vld [vmem:[%s22233_s2 + $0x17f8] sm:$0xff]  ;;  %v20962_v50 = vcombine.low %v6929_v14, %v6937_v58  ;;  %v22691_v58 = vld [vmem:[#allocation50_spill] sm:$0xff] }
 0x5e5   :  { %v20978_v14 = vcombine.low %v6946_v54, %v6954_v42 }
 0x5e6   :  { %10099 = vmatpush1.bf16.msra.mxu0 %v20914_v28  ;;  %v20974_v28 = vcombine.low %v6945_v55, %v6953_v24 }
 0x5e7   :  { %10185 = vmatpush1.bf16.msra.mxu1 %v20918_v32  ;;  %10100 = vmatprep.subr.bf16.mxu0 %v20920_v45  ;;  %v20968_v45 = vcombine.high %v6945_v55, %v6953_v24  ;;  %v20971_v32 = vcombine.high %v6946_v54, %v6954_v42  ;;  %v22690_v55 = vld [vmem:[#allocation49_spill] sm:$0xff] }
 0x5e8   :  { %10186 = vmatprep.subr.bf16.mxu1 %v20923_v53  ;;  %v20966_v53 = vcombine.low %v6930_v63, %v6938_v29  ;;  %v22692_v29 = vld [vmem:[#allocation51_spill] sm:$0xff] }
 0x5ea   :  { %10101 = vmatpush1.bf16.msra.mxu0 %v20938_v52 }
 0x5eb   :  { %10187 = vmatpush1.bf16.msra.mxu1 %v20942_v59  ;;  %10102 = vmatprep.subr.bf16.mxu0 %v20944_v16 }
 0x5ec   :  { %10188 = vmatprep.subr.bf16.mxu1 %v20947_v10 }
 0x5ee   :  { %10103 = vmatpush1.bf16.msra.mxu0 %v20962_v50 }
 0x5ef   :  { %10189 = vmatpush1.bf16.msra.mxu1 %v20966_v53  ;;  %10104 = vmatprep.subr.bf16.mxu0 %v20968_v45 }
 0x5f0   :  { %10190 = vmatprep.subr.bf16.mxu1 %v20971_v32 }
 0x5f2   :  { %10105 = vmatpush1.bf16.msra.mxu0 %v20974_v28 }
 0x5f3   :  { %10191 = vmatpush1.bf16.msra.mxu1 %v20978_v14  ;;  %10239 = vmatprep.subr.bf16.mxu0 %v19443_v2  ;;  %v22648_v2 = vld [vmem:[#allocation9_spill] sm:$0xff] }
 0x5f4   :  { %10325 = vmatprep.subr.bf16.mxu1 %v19445_v3  ;;  %v22649_v3 = vld [vmem:[#allocation10_spill] sm:$0xff] }
 0x5f5   :  { %10107 = vmatmul.mubr.bf16.vlgmr.msra.gmra.mrb[36].mxu0 %v16515_v44 }
 0x5f6   :  { %10193 = vmatmul.mubr.bf16.vlgmr.msra.gmra.mrb[36].mxu1 %v16515_v44  ;;  %10240 = vmatpush1.bf16.msra.mxu0 %v19453_v48  ;;  %v22647_v44 = vld [vmem:[#allocation8_spill] sm:$0xff]  ;;  %v22650_v48 = vld [vmem:[#allocation11_spill] sm:$0xff] }
 0x5f7   :  { %10271 = vmatprep.mubr.bf16.mxu0 %v16466_v61  ;;  %10326 = vmatpush1.bf16.msra.mxu1 %v19462_v5  ;;  %v22651_v5 = vld [vmem:[#allocation12_spill] sm:$0xff] }
 0x5f8   :  { %10357 = vmatprep.mubr.bf16.mxu1 %v16466_v61  ;;  %10241 = vmatprep.subr.bf16.mxu0 %v19465_v17  ;;  %v22652_v17 = vld [vmem:[#allocation13_spill] sm:$0xff] }
 0x5f9   :  { %10327 = vmatprep.subr.bf16.mxu1 %v19474_v6  ;;  %v22653_v6 = vld [vmem:[#allocation14_spill] sm:$0xff] }
 0x5fa   :  { %10242 = vmatpush1.bf16.msra.mxu0 %v19484_v22  ;;  %v22654_v22 = vld [vmem:[#allocation15_spill] sm:$0xff] }
 0x5fb   :  { %10328 = vmatpush1.bf16.msra.mxu1 %v19488_v60  ;;  %10243 = vmatprep.subr.bf16.mxu0 %v19490_v8  ;;  %v22655_v60 = vld [vmem:[#allocation16_spill] sm:$0xff]  ;;  %v22656_v8 = vld [vmem:[#allocation17_spill] sm:$0xff] }
 0x5fc   :  { %10329 = vmatprep.subr.bf16.mxu1 %v19494_v23  ;;  %v22657_v23 = vld [vmem:[#allocation18_spill] sm:$0xff] }
 0x5fe   :  { %10244 = vmatpush1.bf16.msra.mxu0 %v19510_v46  ;;  %v22658_v46 = vld [vmem:[#allocation19_spill] sm:$0xff] }
 0x5ff   :  { %10330 = vmatpush1.bf16.msra.mxu1 %v19514_v47  ;;  %10245 = vmatprep.subr.bf16.mxu0 %v19516_v9  ;;  %v22659_v47 = vld [vmem:[#allocation20_spill] sm:$0xff]  ;;  %v22660_v9 = vld [vmem:[#allocation21_spill] sm:$0xff] }
 0x600   :  { %10331 = vmatprep.subr.bf16.mxu1 %v19519_v51  ;;  %v22661_v51 = vld [vmem:[#allocation22_spill] sm:$0xff] }
 0x602   :  { %10246 = vmatpush1.bf16.msra.mxu0 %v19534_v11  ;;  %v22662_v11 = vld [vmem:[#allocation23_spill] sm:$0xff] }
 0x603   :  { %10332 = vmatpush1.bf16.msra.mxu1 %v19538_v12  ;;  %10247 = vmatprep.subr.bf16.mxu0 %v19540_v21  ;;  %v22663_v12 = vld [vmem:[#allocation24_spill] sm:$0xff]  ;;  %v22664_v21 = vld [vmem:[#allocation25_spill] sm:$0xff] }
 0x604   :  { %10333 = vmatprep.subr.bf16.mxu1 %v19543_v26  ;;  %v22665_v26 = vld [vmem:[#allocation26_spill] sm:$0xff] }
 0x606   :  { %10248 = vmatpush1.bf16.msra.mxu0 %v19558_v0  ;;  %v22666_v0 = vld [vmem:[#allocation27_spill] sm:$0xff] }
 0x607   :  { %10334 = vmatpush1.bf16.msra.mxu1 %v19562_v33  ;;  %10249 = vmatprep.subr.bf16.mxu0 %v19564_v4  ;;  %v22667_v33 = vld [vmem:[#allocation28_spill] sm:$0xff]  ;;  %v22668_v4 = vld [vmem:[#allocation29_spill] sm:$0xff] }
 0x608   :  { %10335 = vmatprep.subr.bf16.mxu1 %v19567_v1  ;;  %v22669_v1 = vld [vmem:[#allocation30_spill] sm:$0xff] }
 0x60a   :  { %10250 = vmatpush1.bf16.msra.mxu0 %v19582_v37  ;;  %v22670_v37 = vld [vmem:[#allocation31_spill] sm:$0xff] }
 0x60b   :  { %10336 = vmatpush1.bf16.msra.mxu1 %v19586_v41  ;;  %10251 = vmatprep.subr.bf16.mxu0 %v19588_v38  ;;  %v22671_v41 = vld [vmem:[#allocation5_spill] sm:$0xff]  ;;  %v22672_v38 = vld [vmem:[#allocation32_spill] sm:$0xff] }
 0x60c   :  { %10337 = vmatprep.subr.bf16.mxu1 %v19591_v39  ;;  %v22673_v39 = vld [vmem:[#allocation7_spill] sm:$0xff] }
 0x60e   :  { %10252 = vmatpush1.bf16.msra.mxu0 %v19606_v43  ;;  %v22674_v43 = vld [vmem:[#allocation33_spill] sm:$0xff] }
 0x60f   :  { %10338 = vmatpush1.bf16.msra.mxu1 %v19610_v62  ;;  %10253 = vmatprep.subr.bf16.mxu0 %v19612_v56  ;;  %v22675_v62 = vld [vmem:[#allocation34_spill] sm:$0xff]  ;;  %v22676_v56 = vld [vmem:[#allocation35_spill] sm:$0xff] }
 0x610   :  { %10339 = vmatprep.subr.bf16.mxu1 %v19615_v35  ;;  %v22677_v35 = vld [vmem:[#allocation36_spill] sm:$0xff] }
 0x612   :  { %10254 = vmatpush1.bf16.msra.mxu0 %v19630_v13  ;;  %v22678_v13 = vld [vmem:[#allocation37_spill] sm:$0xff] }
 0x613   :  { %10340 = vmatpush1.bf16.msra.mxu1 %v19634_v20  ;;  %10255 = vmatprep.subr.bf16.mxu0 %v19636_v7  ;;  %v22679_v20 = vld [vmem:[#allocation38_spill] sm:$0xff]  ;;  %v22680_v7 = vld [vmem:[#allocation39_spill] sm:$0xff] }
 0x614   :  { %10341 = vmatprep.subr.bf16.mxu1 %v19639_v34  ;;  %v22681_v34 = vld [vmem:[#allocation40_spill] sm:$0xff] }
 0x616   :  { %10256 = vmatpush1.bf16.msra.mxu0 %v19654_v49  ;;  %v22682_v49 = vld [vmem:[#allocation41_spill] sm:$0xff] }
 0x617   :  { %10342 = vmatpush1.bf16.msra.mxu1 %v19658_v19  ;;  %10257 = vmatprep.subr.bf16.mxu0 %v19660_v25  ;;  %v22683_v19 = vld [vmem:[#allocation42_spill] sm:$0xff]  ;;  %v22684_v25 = vld [vmem:[#allocation43_spill] sm:$0xff] }
 0x618   :  { %10343 = vmatprep.subr.bf16.mxu1 %v19663_v57  ;;  %v22685_v57 = vld [vmem:[#allocation44_spill] sm:$0xff] }
 0x61a   :  { %10258 = vmatpush1.bf16.msra.mxu0 %v19678_v15  ;;  %v22686_v15 = vld [vmem:[#allocation45_spill] sm:$0xff] }
 0x61b   :  { %10344 = vmatpush1.bf16.msra.mxu1 %v19682_v31  ;;  %10259 = vmatprep.subr.bf16.mxu0 %v19684_v36  ;;  %v22687_v31 = vld [vmem:[#allocation46_spill] sm:$0xff]  ;;  %v22688_v36 = vld [vmem:[#allocation47_spill] sm:$0xff] }
 0x61c   :  { %10345 = vmatprep.subr.bf16.mxu1 %v19687_v40  ;;  %v22689_v40 = vld [vmem:[#allocation48_spill] sm:$0xff] }
 0x61e   :  { %10260 = vmatpush1.bf16.msra.mxu0 %v22647_v44 }
 0x61f   :  { %10346 = vmatpush1.bf16.msra.mxu1 %v22648_v2  ;;  %10261 = vmatprep.subr.bf16.mxu0 %v22649_v3  ;;  %v22693_v2 = vld [vmem:[#allocation52_spill] sm:$0xff] }
 0x620   :  { %10347 = vmatprep.subr.bf16.mxu1 %v22650_v48  ;;  %v22694_v48 = vld [vmem:[#allocation53_spill] sm:$0xff] }
 0x622   :  { %10262 = vmatpush1.bf16.msra.mxu0 %v22651_v5 }
 0x623   :  { %10348 = vmatpush1.bf16.msra.mxu1 %v22652_v17  ;;  %10263 = vmatprep.subr.bf16.mxu0 %v22653_v6  ;;  %v22695_v17 = vld [vmem:[#allocation54_spill] sm:$0xff] }
 0x624   :  { %10349 = vmatprep.subr.bf16.mxu1 %v22654_v22  ;;  %v22696_v22 = vld [vmem:[#allocation55_spill] sm:$0xff] }
 0x626   :  { %10264 = vmatpush1.bf16.msra.mxu0 %v22655_v60  ;;  %v22697_v60 = vld [vmem:[#allocation56_spill] sm:$0xff] }
 0x627   :  { %10350 = vmatpush1.bf16.msra.mxu1 %v22656_v8  ;;  %10265 = vmatprep.subr.bf16.mxu0 %v22657_v23  ;;  %v22698_v8 = vld [vmem:[#allocation57_spill] sm:$0xff]  ;;  %v22699_v23 = vld [vmem:[#allocation58_spill] sm:$0xff] }
 0x628   :  { %10351 = vmatprep.subr.bf16.mxu1 %v22658_v46  ;;  %v22700_v46 = vld [vmem:[#allocation59_spill] sm:$0xff] }
 0x62a   :  { %10266 = vmatpush1.bf16.msra.mxu0 %v22659_v47  ;;  %v22701_v47 = vld [vmem:[#allocation60_spill] sm:$0xff] }
 0x62b   :  { %10352 = vmatpush1.bf16.msra.mxu1 %v22660_v9  ;;  %10267 = vmatprep.subr.bf16.mxu0 %v22661_v51  ;;  %v22702_v9 = vld [vmem:[#allocation61_spill] sm:$0xff]  ;;  %v22703_v51 = vld [vmem:[#allocation62_spill] sm:$0xff] }
 0x62c   :  { %10353 = vmatprep.subr.bf16.mxu1 %v22662_v11  ;;  %v22704_v11 = vld [vmem:[#allocation63_spill] sm:$0xff] }
 0x62e   :  { %10268 = vmatpush1.bf16.msra.mxu0 %v22663_v12  ;;  %v22705_v12 = vld [vmem:[#allocation64_spill] sm:$0xff] }
 0x62f   :  { %10354 = vmatpush1.bf16.msra.mxu1 %v22664_v21  ;;  %10269 = vmatprep.subr.bf16.mxu0 %v22665_v26  ;;  %v22706_v21 = vld [vmem:[#allocation65_spill] sm:$0xff]  ;;  %v22707_v26 = vld [vmem:[#allocation66_spill] sm:$0xff] }
 0x630   :  { %10355 = vmatprep.subr.bf16.mxu1 %v22666_v0  ;;  %v22708_v0 = vld [vmem:[#allocation67_spill] sm:$0xff] }
 0x632   :  { %10270 = vmatpush1.bf16.msra.mxu0 %v22667_v33  ;;  %v22709_v33 = vld [vmem:[#allocation68_spill] sm:$0xff] }
 0x633   :  { %10356 = vmatpush1.bf16.msra.mxu1 %v22668_v4  ;;  %10282 = vmatprep.subr.bf16.mxu0 %v22669_v1  ;;  %v22710_v4 = vld [vmem:[#allocation69_spill] sm:$0xff]  ;;  %v22711_v1 = vld [vmem:[#allocation70_spill] sm:$0xff] }
 0x634   :  { %10368 = vmatprep.subr.bf16.mxu1 %v22670_v37  ;;  %v22712_v37 = vld [vmem:[#allocation71_spill] sm:$0xff] }
 0x635   :  { %10272 = vmatmul.mubr.bf16.vlgmr.msra.gmra.mrb[40].mxu0 %v22671_v41 }
 0x636   :  { %10358 = vmatmul.mubr.bf16.vlgmr.msra.gmra.mrb[40].mxu1 %v22671_v41  ;;  %10283 = vmatpush1.bf16.msra.mxu0 %v22672_v38  ;;  %v22713_v38 = vld [vmem:[#allocation72_spill] sm:$0xff] }
 0x637   :  { %10314 = vmatprep.mubr.bf16.mxu0 %v22673_v39  ;;  %10369 = vmatpush1.bf16.msra.mxu1 %v22674_v43  ;;  %v22714_v43 = vld [vmem:[#allocation73_spill] sm:$0xff] }
 0x638   :  { %10400 = vmatprep.mubr.bf16.mxu1 %v22673_v39  ;;  %10284 = vmatprep.subr.bf16.mxu0 %v22675_v62  ;;  %v22715_v62 = vld [vmem:[#allocation74_spill] sm:$0xff] }
 0x639   :  { %10370 = vmatprep.subr.bf16.mxu1 %v22676_v56  ;;  %v22716_v56 = vld [vmem:[#allocation75_spill] sm:$0xff] }
 0x63a   :  { %10285 = vmatpush1.bf16.msra.mxu0 %v22677_v35  ;;  %v22717_v35 = vld [vmem:[#allocation76_spill] sm:$0xff] }
 0x63b   :  { %10371 = vmatpush1.bf16.msra.mxu1 %v22678_v13  ;;  %10286 = vmatprep.subr.bf16.mxu0 %v22679_v20  ;;  %v22718_v13 = vld [vmem:[#allocation77_spill] sm:$0xff]  ;;  %v22719_v20 = vld [vmem:[#allocation78_spill] sm:$0xff] }
 0x63c   :  { %10372 = vmatprep.subr.bf16.mxu1 %v22680_v7  ;;  %v22720_v7 = vld [vmem:[#allocation79_spill] sm:$0xff] }
 0x63e   :  { %10287 = vmatpush1.bf16.msra.mxu0 %v22681_v34  ;;  %v22721_v34 = vld [vmem:[#allocation80_spill] sm:$0xff] }
 0x63f   :  { %10373 = vmatpush1.bf16.msra.mxu1 %v22682_v49  ;;  %10288 = vmatprep.subr.bf16.mxu0 %v22683_v19  ;;  %v22722_v49 = vld [vmem:[#allocation81_spill] sm:$0xff]  ;;  %v22723_v19 = vld [vmem:[#allocation82_spill] sm:$0xff] }
 0x640   :  { %10374 = vmatprep.subr.bf16.mxu1 %v22684_v25  ;;  %v22724_v25 = vld [vmem:[#allocation83_spill] sm:$0xff] }
 0x642   :  { %10289 = vmatpush1.bf16.msra.mxu0 %v22685_v57  ;;  %v22725_v57 = vld [vmem:[#allocation84_spill] sm:$0xff] }
 0x643   :  { %10375 = vmatpush1.bf16.msra.mxu1 %v22686_v15  ;;  %10290 = vmatprep.subr.bf16.mxu0 %v22687_v31  ;;  %v22726_v15 = vld [vmem:[#allocation85_spill] sm:$0xff]  ;;  %v22727_v31 = vld [vmem:[#allocation86_spill] sm:$0xff] }
 0x644   :  { %10376 = vmatprep.subr.bf16.mxu1 %v22688_v36  ;;  %v22728_v36 = vld [vmem:[#allocation87_spill] sm:$0xff] }
 0x646   :  { %10291 = vmatpush1.bf16.msra.mxu0 %v22689_v40  ;;  %v22729_v40 = vld [vmem:[#allocation88_spill] sm:$0xff] }
 0x647   :  { %10377 = vmatpush1.bf16.msra.mxu1 %v22690_v55  ;;  %10292 = vmatprep.subr.bf16.mxu0 %v22691_v58  ;;  %v22730_v55 = vld [vmem:[#allocation89_spill] sm:$0xff]  ;;  %v22731_v58 = vld [vmem:[#allocation90_spill] sm:$0xff] }
 0x648   :  { %v21076_v63 = vpop.f32.mrb[32].mxu0  ;;  %10378 = vmatprep.subr.bf16.mxu1 %v22692_v29  ;;  %v22732_v29 = vld [vmem:[#allocation91_spill] sm:$0xff] }
 0x649   :  { %v21079_v24 = vpop.f32.mrb[32].mxu1  ;;  %v21081_v54 = vpop.f32.mrb[33].mxu0 }
 0x64a   :  { %v21083_v42 = vpop.f32.mrb[33].mxu1  ;;  %v21085_v44 = vpop.f32.mrb[34].mxu0  ;;  %10293 = vmatpush1.bf16.msra.mxu0 %v22693_v2  ;;  %v22733_v2 = vld [vmem:[#allocation92_spill] sm:$0xff] }
 0x64b   :  { %v21088_v3 = vpop.f32.mrb[34].mxu1  ;;  %10379 = vmatpush1.bf16.msra.mxu1 %v22694_v48  ;;  %v21091_v5 = vpop.f32.mrb[35].mxu0  ;;  %10294 = vmatprep.subr.bf16.mxu0 %v22695_v17  ;;  %v22734_v48 = vld [vmem:[#allocation93_spill] sm:$0xff]  ;;  %v22735_v17 = vld [vmem:[#allocation94_spill] sm:$0xff] }
 0x64c   :  { %v21094_v6 = vpop.f32.mrb[35].mxu1  ;;  %10380 = vmatprep.subr.bf16.mxu1 %v22696_v22  ;;  %v22736_v22 = vld [vmem:[#allocation6_spill] sm:$0xff] }
 0x64e   :  { %10295 = vmatpush1.bf16.msra.mxu0 %v22697_v60  ;;  %v22737_v60 = vld [vmem:[#allocation95_spill] sm:$0xff] }
 0x64f   :  { %10381 = vmatpush1.bf16.msra.mxu1 %v22698_v8  ;;  %10296 = vmatprep.subr.bf16.mxu0 %v22699_v23  ;;  %v22739_v8 = vld [vmem:[#allocation97_spill] sm:$0xff]  ;;  %v22740_v23 = vld [vmem:[#allocation98_spill] sm:$0xff] }
 0x650   :  { %10382 = vmatprep.subr.bf16.mxu1 %v22700_v46  ;;  %v22741_v46 = vld [vmem:[#allocation99_spill] sm:$0xff] }
 0x652   :  { %10297 = vmatpush1.bf16.msra.mxu0 %v22701_v47  ;;  %v22742_v47 = vld [vmem:[#allocation100_spill] sm:$0xff] }
 0x653   :  { %10383 = vmatpush1.bf16.msra.mxu1 %v22702_v9  ;;  %10298 = vmatprep.subr.bf16.mxu0 %v22703_v51  ;;  %v22743_v9 = vld [vmem:[#allocation101_spill] sm:$0xff]  ;;  %v22744_v51 = vld [vmem:[#allocation102_spill] sm:$0xff] }
 0x654   :  { %10384 = vmatprep.subr.bf16.mxu1 %v22704_v11  ;;  %v22745_v11 = vld [vmem:[#allocation103_spill] sm:$0xff] }
 0x656   :  { %10299 = vmatpush1.bf16.msra.mxu0 %v22705_v12  ;;  %v22746_v12 = vld [vmem:[#allocation104_spill] sm:$0xff] }
 0x657   :  { %10385 = vmatpush1.bf16.msra.mxu1 %v22706_v21  ;;  %10300 = vmatprep.subr.bf16.mxu0 %v22707_v26  ;;  %v22747_v21 = vld [vmem:[#allocation105_spill] sm:$0xff]  ;;  %v22748_v26 = vld [vmem:[#allocation106_spill] sm:$0xff] }
 0x658   :  { %10386 = vmatprep.subr.bf16.mxu1 %v22708_v0  ;;  %v22750_v0 = vld [vmem:[#allocation108_spill] sm:$0xff] }
 0x65a   :  { %10301 = vmatpush1.bf16.msra.mxu0 %v22709_v33  ;;  %v22751_v33 = vld [vmem:[#allocation109_spill] sm:$0xff] }
 0x65b   :  { %10387 = vmatpush1.bf16.msra.mxu1 %v22710_v4  ;;  %10302 = vmatprep.subr.bf16.mxu0 %v22711_v1  ;;  %v22752_v4 = vld [vmem:[#allocation110_spill] sm:$0xff]  ;;  %v22753_v1 = vld [vmem:[#allocation111_spill] sm:$0xff] }
 0x65c   :  { %10388 = vmatprep.subr.bf16.mxu1 %v22712_v37  ;;  %v22754_v37 = vld [vmem:[#allocation112_spill] sm:$0xff] }
 0x65e   :  { %10303 = vmatpush1.bf16.msra.mxu0 %v22713_v38  ;;  %v22755_v38 = vld [vmem:[#allocation113_spill] sm:$0xff] }
 0x65f   :  { %10389 = vmatpush1.bf16.msra.mxu1 %v22714_v43  ;;  %10304 = vmatprep.subr.bf16.mxu0 %v22715_v62  ;;  %v22756_v43 = vld [vmem:[#allocation114_spill] sm:$0xff]  ;;  %v22757_v62 = vld [vmem:[#allocation115_spill] sm:$0xff] }
 0x660   :  { %10390 = vmatprep.subr.bf16.mxu1 %v22716_v56  ;;  %v22758_v56 = vld [vmem:[#allocation116_spill] sm:$0xff] }
 0x662   :  { %10305 = vmatpush1.bf16.msra.mxu0 %v22717_v35  ;;  %v22759_v35 = vld [vmem:[#allocation117_spill] sm:$0xff] }
 0x663   :  { %10391 = vmatpush1.bf16.msra.mxu1 %v22718_v13  ;;  %10306 = vmatprep.subr.bf16.mxu0 %v22719_v20  ;;  %v22760_v13 = vld [vmem:[#allocation118_spill] sm:$0xff]  ;;  %v22761_v20 = vld [vmem:[#allocation119_spill] sm:$0xff] }
 0x664   :  { %10392 = vmatprep.subr.bf16.mxu1 %v22720_v7  ;;  %v22762_v7 = vld [vmem:[#allocation120_spill] sm:$0xff] }
 0x666   :  { %10307 = vmatpush1.bf16.msra.mxu0 %v22721_v34  ;;  %v22763_v34 = vld [vmem:[#allocation121_spill] sm:$0xff] }
 0x667   :  { %10393 = vmatpush1.bf16.msra.mxu1 %v22722_v49  ;;  %10308 = vmatprep.subr.bf16.mxu0 %v22723_v19  ;;  %v22764_v49 = vld [vmem:[#allocation122_spill] sm:$0xff]  ;;  %v22765_v19 = vld [vmem:[#allocation123_spill] sm:$0xff] }
 0x668   :  { %10394 = vmatprep.subr.bf16.mxu1 %v22724_v25  ;;  %v22766_v25 = vld [vmem:[#allocation124_spill] sm:$0xff] }
 0x66a   :  { %10309 = vmatpush1.bf16.msra.mxu0 %v22725_v57  ;;  %v22767_v57 = vld [vmem:[#allocation125_spill] sm:$0xff] }
 0x66b   :  { %10395 = vmatpush1.bf16.msra.mxu1 %v22726_v15  ;;  %10310 = vmatprep.subr.bf16.mxu0 %v22727_v31  ;;  %v22768_v15 = vld [vmem:[#allocation126_spill] sm:$0xff]  ;;  %v22769_v31 = vld [vmem:[#allocation127_spill] sm:$0xff] }
 0x66c   :  { %10396 = vmatprep.subr.bf16.mxu1 %v22728_v36  ;;  %v22770_v36 = vld [vmem:[#allocation128_spill] sm:$0xff] }
 0x66e   :  { %10311 = vmatpush1.bf16.msra.mxu0 %v20186_v18  ;;  %v22738_v18 = vld [vmem:[#allocation96_spill] sm:$0xff] }
 0x66f   :  { %10397 = vmatpush1.bf16.msra.mxu1 %v22729_v40  ;;  %10312 = vmatprep.subr.bf16.mxu0 %v22730_v55  ;;  %v22771_v40 = vld [vmem:[#allocation129_spill] sm:$0xff]  ;;  %v22772_v55 = vld [vmem:[#allocation130_spill] sm:$0xff] }
 0x670   :  { %10398 = vmatprep.subr.bf16.mxu1 %v22731_v58  ;;  %v22773_v58 = vld [vmem:[#allocation131_spill] sm:$0xff] }
 0x672   :  { %10313 = vmatpush1.bf16.msra.mxu0 %v22732_v29  ;;  %v22774_v29 = vld [vmem:[#allocation132_spill] sm:$0xff] }
 0x673   :  { %10399 = vmatpush1.bf16.msra.mxu1 %v22733_v2  ;;  %10411 = vmatprep.subr.bf16.mxu0 %v22734_v48  ;;  %v22775_v2 = vld [vmem:[#allocation133_spill] sm:$0xff]  ;;  %v22776_v48 = vld [vmem:[#allocation134_spill] sm:$0xff] }
 0x674   :  { %10497 = vmatprep.subr.bf16.mxu1 %v22735_v17  ;;  %v22777_v17 = vld [vmem:[#allocation135_spill] sm:$0xff] }
 0x675   :  { %10315 = vmatmul.mubr.bf16.vlgmr.msra.gmra.mrb[40].mxu0 %v22736_v22 }
 0x676   :  { %10401 = vmatmul.mubr.bf16.vlgmr.msra.gmra.mrb[40].mxu1 %v22736_v22  ;;  %10412 = vmatpush1.bf16.msra.mxu0 %v22737_v60  ;;  %v22778_v60 = vld [vmem:[#allocation136_spill] sm:$0xff] }
 0x677   :  { %10443 = vmatprep.mubr.bf16.mxu0 %v16466_v61  ;;  %10498 = vmatpush1.bf16.msra.mxu1 %v22738_v18  ;;  %v22779_v18 = vld [vmem:[#allocation137_spill] sm:$0xff] }
 0x678   :  { %10529 = vmatprep.mubr.bf16.mxu1 %v16466_v61  ;;  %10413 = vmatprep.subr.bf16.mxu0 %v22739_v8  ;;  %v22749_v61 = vld [vmem:[#allocation107_spill] sm:$0xff]  ;;  %v22780_v8 = vld [vmem:[#allocation138_spill] sm:$0xff] }
 0x679   :  { %10499 = vmatprep.subr.bf16.mxu1 %v22740_v23  ;;  %v22781_v23 = vld [vmem:[#allocation139_spill] sm:$0xff] }
 0x67a   :  { %10414 = vmatpush1.bf16.msra.mxu0 %v22741_v46  ;;  %v22782_v46 = vld [vmem:[#allocation140_spill] sm:$0xff] }
 0x67b   :  { %10500 = vmatpush1.bf16.msra.mxu1 %v22742_v47  ;;  %10415 = vmatprep.subr.bf16.mxu0 %v22743_v9  ;;  %v22783_v47 = vld [vmem:[#allocation141_spill] sm:$0xff]  ;;  %v22784_v9 = vld [vmem:[#allocation142_spill] sm:$0xff] }
 0x67c   :  { %10501 = vmatprep.subr.bf16.mxu1 %v22744_v51  ;;  %v22785_v51 = vld [vmem:[#allocation143_spill] sm:$0xff] }
 0x67e   :  { %10416 = vmatpush1.bf16.msra.mxu0 %v22745_v11  ;;  %v22786_v11 = vld [vmem:[#allocation144_spill] sm:$0xff] }
 0x67f   :  { %10502 = vmatpush1.bf16.msra.mxu1 %v22746_v12  ;;  %10417 = vmatprep.subr.bf16.mxu0 %v22747_v21  ;;  %v22787_v12 = vld [vmem:[#allocation145_spill] sm:$0xff]  ;;  %v22788_v21 = vld [vmem:[#allocation146_spill] sm:$0xff] }
 0x680   :  { %10503 = vmatprep.subr.bf16.mxu1 %v22748_v26  ;;  %v22789_v26 = vld [vmem:[#allocation147_spill] sm:$0xff] }
 0x682   :  { %10418 = vmatpush1.bf16.msra.mxu0 %v22749_v61  ;;  %v22790_v61 = vld [vmem:[#allocation148_spill] sm:$0xff] }
 0x683   :  { %10504 = vmatpush1.bf16.msra.mxu1 %v22750_v0  ;;  %10419 = vmatprep.subr.bf16.mxu0 %v22751_v33  ;;  %v22791_v0 = vld [vmem:[#allocation149_spill] sm:$0xff]  ;;  %v22792_v33 = vld [vmem:[#allocation150_spill] sm:$0xff] }
 0x684   :  { %10505 = vmatprep.subr.bf16.mxu1 %v22752_v4  ;;  %v22793_v4 = vld [vmem:[#allocation151_spill] sm:$0xff] }
 0x686   :  { %10420 = vmatpush1.bf16.msra.mxu0 %v22753_v1  ;;  %v22794_v1 = vld [vmem:[#allocation152_spill] sm:$0xff] }
 0x687   :  { %10506 = vmatpush1.bf16.msra.mxu1 %v22754_v37  ;;  %10421 = vmatprep.subr.bf16.mxu0 %v22755_v38  ;;  %v22795_v37 = vld [vmem:[#allocation153_spill] sm:$0xff]  ;;  %v22796_v38 = vld [vmem:[#allocation154_spill] sm:$0xff] }
 0x688   :  { %10507 = vmatprep.subr.bf16.mxu1 %v22756_v43  ;;  %v22797_v43 = vld [vmem:[#allocation155_spill] sm:$0xff] }
 0x68a   :  { %10422 = vmatpush1.bf16.msra.mxu0 %v22757_v62  ;;  %v22798_v62 = vld [vmem:[#allocation156_spill] sm:$0xff] }
 0x68b   :  { %10508 = vmatpush1.bf16.msra.mxu1 %v22758_v56  ;;  %10423 = vmatprep.subr.bf16.mxu0 %v22759_v35  ;;  %v22799_v56 = vld [vmem:[#allocation157_spill] sm:$0xff]  ;;  %v22801_v35 = vld [vmem:[#allocation159_spill] sm:$0xff] }
 0x68c   :  { %10509 = vmatprep.subr.bf16.mxu1 %v22760_v13  ;;  %v22802_v13 = vld [vmem:[#allocation160_spill] sm:$0xff] }
 0x68e   :  { %10424 = vmatpush1.bf16.msra.mxu0 %v22761_v20  ;;  %v22803_v20 = vld [vmem:[#allocation161_spill] sm:$0xff] }
 0x68f   :  { %10510 = vmatpush1.bf16.msra.mxu1 %v22762_v7  ;;  %10425 = vmatprep.subr.bf16.mxu0 %v22763_v34  ;;  %v22804_v7 = vld [vmem:[#allocation162_spill] sm:$0xff]  ;;  %v22805_v34 = vld [vmem:[#allocation163_spill] sm:$0xff] }
 0x690   :  { %10511 = vmatprep.subr.bf16.mxu1 %v22764_v49  ;;  %v22806_v49 = vld [vmem:[#allocation164_spill] sm:$0xff] }
 0x692   :  { %10426 = vmatpush1.bf16.msra.mxu0 %v22765_v19  ;;  %v22809_v19 = vld [vmem:[#allocation167_spill] sm:$0xff] }
 0x693   :  { %10512 = vmatpush1.bf16.msra.mxu1 %v22766_v25  ;;  %10427 = vmatprep.subr.bf16.mxu0 %v22767_v57  ;;  %v22810_v25 = vld [vmem:[#allocation168_spill] sm:$0xff]  ;;  %v22812_v57 = vld [vmem:[#allocation170_spill] sm:$0xff] }
 0x694   :  { %10513 = vmatprep.subr.bf16.mxu1 %v22768_v15  ;;  %v22813_v15 = vld [vmem:[#allocation171_spill] sm:$0xff] }
 0x696   :  { %10428 = vmatpush1.bf16.msra.mxu0 %v22769_v31  ;;  %v22814_v31 = vld [vmem:[#allocation172_spill] sm:$0xff] }
 0x697   :  { %10514 = vmatpush1.bf16.msra.mxu1 %v22770_v36  ;;  %10429 = vmatprep.subr.bf16.mxu0 %v22771_v40  ;;  %v22815_v36 = vld [vmem:[#allocation173_spill] sm:$0xff]  ;;  %v22816_v40 = vld [vmem:[#allocation174_spill] sm:$0xff] }
 0x698   :  { %10515 = vmatprep.subr.bf16.mxu1 %v22772_v55  ;;  %v22817_v55 = vld [vmem:[#allocation175_spill] sm:$0xff] }
 0x69a   :  { %10430 = vmatpush1.bf16.msra.mxu0 %v22773_v58 }
 0x69b   :  { %10516 = vmatpush1.bf16.msra.mxu1 %v22774_v29  ;;  %10431 = vmatprep.subr.bf16.mxu0 %v22775_v2  ;;  %v22818_v29 = vld [vmem:[#allocation176_spill] sm:$0xff] }
 0x69c   :  { %10517 = vmatprep.subr.bf16.mxu1 %v22776_v48 }
 0x69e   :  { %10432 = vmatpush1.bf16.msra.mxu0 %v22777_v17 }
 0x69f   :  { %10518 = vmatpush1.bf16.msra.mxu1 %v22778_v60  ;;  %10433 = vmatprep.subr.bf16.mxu0 %v22779_v18 }
 0x6a0   :  { %10519 = vmatprep.subr.bf16.mxu1 %v22780_v8 }
 0x6a2   :  { %10434 = vmatpush1.bf16.msra.mxu0 %v22781_v23 }
 0x6a3   :  { %10520 = vmatpush1.bf16.msra.mxu1 %v22782_v46  ;;  %10435 = vmatprep.subr.bf16.mxu0 %v22783_v47  ;;  %v22819_v46 = vld [vmem:[#allocation177_spill] sm:$0xff] }
 0x6a4   :  { %10521 = vmatprep.subr.bf16.mxu1 %v22784_v9 }
 0x6a6   :  { %10436 = vmatpush1.bf16.msra.mxu0 %v22785_v51 }
 0x6a7   :  { %10522 = vmatpush1.bf16.msra.mxu1 %v22786_v11  ;;  %10437 = vmatprep.subr.bf16.mxu0 %v22787_v12  ;;  %v22820_v11 = vld [vmem:[#allocation178_spill] sm:$0xff] }
 0x6a8   :  { %10523 = vmatprep.subr.bf16.mxu1 %v22788_v21  ;;  %v22821_v21 = vld [vmem:[#allocation179_spill] sm:$0xff] }
 0x6aa   :  { %10438 = vmatpush1.bf16.msra.mxu0 %v22789_v26 }
 0x6ab   :  { %10524 = vmatpush1.bf16.msra.mxu1 %v22790_v61  ;;  %10439 = vmatprep.subr.bf16.mxu0 %v22791_v0 }
 0x6ac   :  { %10525 = vmatprep.subr.bf16.mxu1 %v22792_v33  ;;  %v22822_v33 = vld [vmem:[#allocation180_spill] sm:$0xff] }
 0x6ae   :  { %10440 = vmatpush1.bf16.msra.mxu0 %v20574_v27  ;;  %v22800_v27 = vld [vmem:[#allocation158_spill] sm:$0xff] }
 0x6af   :  { %10526 = vmatpush1.bf16.msra.mxu1 %v22793_v4  ;;  %10441 = vmatprep.subr.bf16.mxu0 %v22794_v1  ;;  %v22823_v1 = vld [vmem:[#allocation181_spill] sm:$0xff] }
 0x6b0   :  { %10527 = vmatprep.subr.bf16.mxu1 %v22795_v37  ;;  %v22824_v37 = vld [vmem:[#allocation182_spill] sm:$0xff] }
 0x6b2   :  { %10442 = vmatpush1.bf16.msra.mxu0 %v22796_v38  ;;  %v22825_v38 = vld [vmem:[#allocation183_spill] sm:$0xff] }
 0x6b3   :  { %10528 = vmatpush1.bf16.msra.mxu1 %v22797_v43  ;;  %10454 = vmatprep.subr.bf16.mxu0 %v22798_v62  ;;  %v22826_v43 = vld [vmem:[#allocation184_spill] sm:$0xff]  ;;  %v22827_v62 = vld [vmem:[#allocation185_spill] sm:$0xff] }
 0x6b4   :  { %10540 = vmatprep.subr.bf16.mxu1 %v22799_v56  ;;  %v22828_v56 = vld [vmem:[#allocation186_spill] sm:$0xff] }
 0x6b5   :  { %10444 = vmatmul.mubr.bf16.vlgmr.msra.gmra.mrb[44].mxu0 %v22671_v41 }
 0x6b6   :  { %10530 = vmatmul.mubr.bf16.vlgmr.msra.gmra.mrb[44].mxu1 %v22671_v41  ;;  %10455 = vmatpush1.bf16.msra.mxu0 %v20616_v30  ;;  %v22807_v41 = vld [vmem:[#allocation165_spill] sm:$0xff]  ;;  %v22808_v30 = vld [vmem:[#allocation166_spill] sm:$0xff] }
 0x6b7   :  { %10486 = vmatprep.mubr.bf16.mxu0 %v22673_v39  ;;  %10541 = vmatpush1.bf16.msra.mxu1 %v22800_v27  ;;  %v22829_v27 = vld [vmem:[#allocation187_spill] sm:$0xff] }
 0x6b8   :  { %10572 = vmatprep.mubr.bf16.mxu1 %v22673_v39  ;;  %10456 = vmatprep.subr.bf16.mxu0 %v22801_v35  ;;  %v22811_v39 = vld [vmem:[#allocation169_spill] sm:$0xff]  ;;  %v22830_v35 = vld [vmem:[#allocation188_spill] sm:$0xff] }
 0x6b9   :  { %10542 = vmatprep.subr.bf16.mxu1 %v22802_v13  ;;  %v22831_v13 = vld [vmem:[#allocation189_spill] sm:$0xff] }
 0x6ba   :  { %10457 = vmatpush1.bf16.msra.mxu0 %v22803_v20  ;;  %v22832_v20 = vld [vmem:[#allocation190_spill] sm:$0xff] }
 0x6bb   :  { %10543 = vmatpush1.bf16.msra.mxu1 %v22804_v7  ;;  %10458 = vmatprep.subr.bf16.mxu0 %v22805_v34  ;;  %v22833_v7 = vld [vmem:[#allocation191_spill] sm:$0xff]  ;;  %v22834_v34 = vld [vmem:[#allocation192_spill] sm:$0xff] }
 0x6bc   :  { %10544 = vmatprep.subr.bf16.mxu1 %v22806_v49  ;;  %v22835_v49 = vld [vmem:[#allocation193_spill] sm:$0xff] }
 0x6be   :  { %10459 = vmatpush1.bf16.msra.mxu0 %v22807_v41  ;;  %v22836_v41 = vld [vmem:[#allocation194_spill] sm:$0xff] }
 0x6bf   :  { %10545 = vmatpush1.bf16.msra.mxu1 %v22808_v30  ;;  %10460 = vmatprep.subr.bf16.mxu0 %v22809_v19  ;;  %v22837_v30 = vld [vmem:[#allocation195_spill] sm:$0xff]  ;;  %v22838_v19 = vld [vmem:[#allocation196_spill] sm:$0xff] }
 0x6c0   :  { %10546 = vmatprep.subr.bf16.mxu1 %v22810_v25  ;;  %v22839_v25 = vld [vmem:[#allocation197_spill] sm:$0xff] }
 0x6c2   :  { %10461 = vmatpush1.bf16.msra.mxu0 %v22811_v39  ;;  %v22840_v39 = vld [vmem:[#allocation198_spill] sm:$0xff] }
 0x6c3   :  { %10547 = vmatpush1.bf16.msra.mxu1 %v22812_v57  ;;  %10462 = vmatprep.subr.bf16.mxu0 %v22813_v15  ;;  %v22841_v57 = vld [vmem:[#allocation199_spill] sm:$0xff]  ;;  %v22842_v15 = vld [vmem:[#allocation200_spill] sm:$0xff] }
 0x6c4   :  { %10548 = vmatprep.subr.bf16.mxu1 %v22814_v31  ;;  %v22843_v31 = vld [vmem:[#allocation201_spill] sm:$0xff] }
 0x6c6   :  { %10463 = vmatpush1.bf16.msra.mxu0 %v22815_v36  ;;  %v22844_v36 = vld [vmem:[#allocation202_spill] sm:$0xff] }
 0x6c7   :  { %10549 = vmatpush1.bf16.msra.mxu1 %v22816_v40  ;;  %10464 = vmatprep.subr.bf16.mxu0 %v22817_v55  ;;  %v22845_v40 = vld [vmem:[#allocation203_spill] sm:$0xff]  ;;  %v22846_v55 = vld [vmem:[#allocation204_spill] sm:$0xff] }
 0x6c8   :  { %v21228_v58 = vpop.f32.mrb[36].mxu0  ;;  %10550 = vmatprep.subr.bf16.mxu1 %v22818_v29  ;;  %v22847_v29 = vld [vmem:[#allocation205_spill] sm:$0xff] }
 0x6c9   :  { %v10599_v2 = vmax.f32 %v21076_v63, %v21228_v58  ;;  %v21233_v48 = vpop.f32.mrb[36].mxu1  ;;  %v21235_v17 = vpop.f32.mrb[37].mxu0 }
 0x6ca   :  { %v10601_v60 = vmax.f32 %v21079_v24, %v21233_v48  ;;  %v10600_v18 = vmax.f32 %v21081_v54, %v21235_v17  ;;  %v21241_v8 = vpop.f32.mrb[37].mxu1  ;;  %v21243_v23 = vpop.f32.mrb[38].mxu0  ;;  %10465 = vmatpush1.bf16.msra.mxu0 %v22819_v46  ;;  %v22848_v46 = vld [vmem:[#allocation206_spill] sm:$0xff] }
 0x6cb   :  { %v10602_v47 = vmax.f32 %v21083_v42, %v21241_v8  ;;  %v10603_v9 = vmax.f32 %v21085_v44, %v21243_v23  ;;  %v21250_v51 = vpop.f32.mrb[38].mxu1  ;;  %10551 = vmatpush1.bf16.msra.mxu1 %v22820_v11  ;;  %v21253_v12 = vpop.f32.mrb[39].mxu0  ;;  %10466 = vmatprep.subr.bf16.mxu0 %v22821_v21  ;;  %v22849_v11 = vld [vmem:[#allocation207_spill] sm:$0xff]  ;;  %v22850_v21 = vld [vmem:[#allocation208_spill] sm:$0xff] }
 0x6cc   :  { %v10605_v26 = vmax.f32 %v21088_v3, %v21250_v51  ;;  %v10604_v61 = vmax.f32 %v21091_v5, %v21253_v12  ;;  %v21260_v0 = vpop.f32.mrb[39].mxu1  ;;  %10552 = vmatprep.subr.bf16.mxu1 %v22822_v33  ;;  %v15635_v33 = vld [vmem:[%s22235_s4 + $0x140] sm:$0xff]  }
 0x6cd   :  { %v10606_v4 = vmax.f32 %v21094_v6, %v21260_v0 }
 0x6ce   :  { %10467 = vmatpush1.bf16.msra.mxu0 %v22823_v1  ;;  %v15647_v1 = vld [vmem:[%s22235_s4 + $0x158] sm:$0xff]  }
 0x6cf   :  { %10553 = vmatpush1.bf16.msra.mxu1 %v22824_v37  ;;  %10468 = vmatprep.subr.bf16.mxu0 %v22825_v38  ;;  %v15648_v37 = vld [vmem:[%s22235_s4 + $0x1d8] sm:$0xff]  }
 0x6d0   :  { %10554 = vmatprep.subr.bf16.mxu1 %v22826_v43  ;;  %v15649_v43 = vld [vmem:[%s22235_s4 + $0x118] sm:$0xff]  }
 0x6d2   :  { %10469 = vmatpush1.bf16.msra.mxu0 %v22827_v62  ;;  %v15650_v62 = vld [vmem:[%s22235_s4 + $0x198] sm:$0xff]  }
 0x6d3   :  { %10555 = vmatpush1.bf16.msra.mxu1 %v22828_v56  ;;  %10470 = vmatprep.subr.bf16.mxu0 %v22829_v27 }
 0x6d4   :  { %10556 = vmatprep.subr.bf16.mxu1 %v22830_v35 }
 0x6d6   :  { %10471 = vmatpush1.bf16.msra.mxu0 %v22831_v13 }
 0x6d7   :  { %10557 = vmatpush1.bf16.msra.mxu1 %v22832_v20  ;;  %10472 = vmatprep.subr.bf16.mxu0 %v22833_v7 }
 0x6d8   :  { %10558 = vmatprep.subr.bf16.mxu1 %v22834_v34 }
 0x6da   :  { %10473 = vmatpush1.bf16.msra.mxu0 %v22835_v49  ;;  %v15651_v49 = vld [vmem:[%s22235_s4 + $0x160] sm:$0xff]  }
 0x6db   :  { %10559 = vmatpush1.bf16.msra.mxu1 %v22836_v41  ;;  %10474 = vmatprep.subr.bf16.mxu0 %v22837_v30  ;;  %v15652_v41 = vld [vmem:[%s22235_s4 + $0x1e0] sm:$0xff]  }
 0x6dc   :  { %10560 = vmatprep.subr.bf16.mxu1 %v22838_v19  ;;  %v15653_v30 = vld [vmem:[%s22235_s4 + $0x120] sm:$0xff]  }
 0x6dd   :  { %v15654_v19 = vld [vmem:[%s22235_s4 + $0x1a0] sm:$0xff]  }
 0x6de   :  { %10475 = vmatpush1.bf16.msra.mxu0 %v22839_v25  ;;  %v15655_v25 = vld [vmem:[%s22235_s4 + $0x168] sm:$0xff]  }
 0x6df   :  { %10561 = vmatpush1.bf16.msra.mxu1 %v22840_v39  ;;  %10476 = vmatprep.subr.bf16.mxu0 %v22841_v57  ;;  %v15656_v39 = vld [vmem:[%s22235_s4 + $0x1e8] sm:$0xff]  }
 0x6e0   :  { %10562 = vmatprep.subr.bf16.mxu1 %v22842_v15  ;;  %v15657_v57 = vld [vmem:[%s22235_s4 + $0x128] sm:$0xff]  }
 0x6e1   :  { %v15658_v15 = vld [vmem:[%s22235_s4 + $0x1a8] sm:$0xff]  }
 0x6e2   :  { %10477 = vmatpush1.bf16.msra.mxu0 %v22843_v31  ;;  %v15659_v31 = vld [vmem:[%s22235_s4 + $0x170] sm:$0xff]  }
 0x6e3   :  { %10563 = vmatpush1.bf16.msra.mxu1 %v22844_v36  ;;  %10478 = vmatprep.subr.bf16.mxu0 %v22845_v40  ;;  %v15660_v36 = vld [vmem:[%s22235_s4 + $0x1f0] sm:$0xff]  }
 0x6e4   :  { %10564 = vmatprep.subr.bf16.mxu1 %v22846_v55  ;;  %v15661_v40 = vld [vmem:[%s22235_s4 + $0x130] sm:$0xff]  }
 0x6e5   :  { %v15662_v55 = vld [vmem:[%s22235_s4 + $0x1b0] sm:$0xff]  }
 0x6e6   :  { %10479 = vmatpush1.bf16.msra.mxu0 %v22847_v29  ;;  %v15663_v29 = vld [vmem:[%s22235_s4 + $0x178] sm:$0xff]  }
 0x6e7   :  { %10565 = vmatpush1.bf16.msra.mxu1 %v22848_v46  ;;  %10480 = vmatprep.subr.bf16.mxu0 %v22849_v11  ;;  %v15664_v46 = vld [vmem:[%s22235_s4 + $0x1f8] sm:$0xff]  }
 0x6e8   :  { %10566 = vmatprep.subr.bf16.mxu1 %v22850_v21  ;;  %v15665_v11 = vld [vmem:[%s22235_s4 + $0x138] sm:$0xff]  }
 0x6e9   :  { %v15666_v21 = vld [vmem:[%s22235_s4 + $0x1b8] sm:$0xff]  }
 0x6ea   :  { %10481 = vmatpush1.bf16.msra.mxu0 %v20938_v52  ;;  %v15643_v52 = vld [vmem:[%s22235_s4 + $0x150] sm:$0xff]  }
 0x6eb   :  { %10567 = vmatpush1.bf16.msra.mxu1 %v20942_v59  ;;  %10482 = vmatprep.subr.bf16.mxu0 %v20944_v16  ;;  %v15636_v59 = vld [vmem:[%s22235_s4 + $0x1c0] sm:$0xff]  }
 0x6ec   :  { %10568 = vmatprep.subr.bf16.mxu1 %v20947_v10  ;;  %v15637_v16 = vld [vmem:[%s22235_s4 + $0x100] sm:$0xff]   ;;  %v15639_v10 = vld [vmem:[%s22235_s4 + $0x148] sm:$0xff]  }
 0x6ee   :  { %10483 = vmatpush1.bf16.msra.mxu0 %v20962_v50  ;;  %v15644_v50 = vld [vmem:[%s22235_s4 + $0x1d0] sm:$0xff]  }
 0x6ef   :  { %10569 = vmatpush1.bf16.msra.mxu1 %v20966_v53  ;;  %10484 = vmatprep.subr.bf16.mxu0 %v20968_v45  ;;  %v15638_v45 = vld [vmem:[%s22235_s4 + $0x180] sm:$0xff]   ;;  %v15641_v53 = vld [vmem:[%s22235_s4 + $0x108] sm:$0xff]  }
 0x6f0   :  { %10570 = vmatprep.subr.bf16.mxu1 %v20971_v32  ;;  %v15640_v32 = vld [vmem:[%s22235_s4 + $0x1c8] sm:$0xff]  }
 0x6f2   :  { %10485 = vmatpush1.bf16.msra.mxu0 %v20974_v28  ;;  %v15642_v28 = vld [vmem:[%s22235_s4 + $0x188] sm:$0xff]  }
 0x6f3   :  { %10571 = vmatpush1.bf16.msra.mxu1 %v20978_v14  ;;  %15161 = vmatprep.subr.bf16.mxu0 %v15635_v33  ;;  %v15645_v14 = vld [vmem:[%s22235_s4 + $0x110] sm:$0xff]   ;;  %v15667_v33 = vld [vmem:[%s22235_s4 + $0x40] sm:$0xff]  }
 0x6f4   :  { %15183 = vmatprep.subr.bf16.mxu1 %v15636_v59  ;;  %v15668_v59 = vld [vmem:[%s22235_s4 + $0xc0] sm:$0xff]  }
 0x6f5   :  { %10487 = vmatmul.mubr.bf16.vlgmr.msra.gmra.mrb[44].mxu0 %v22736_v22 }
 0x6f6   :  { %10573 = vmatmul.mubr.bf16.vlgmr.msra.gmra.mrb[44].mxu1 %v22736_v22  ;;  %15162 = vmatpush3.bf16.msra.mxu0 %v15637_v16  ;;  %v15646_v22 = vld [vmem:[%s22235_s4 + $0x190] sm:$0xff]   ;;  %v10625_v16 = vlaneseq }
 0x6f7   :  { %15184 = vmatpush3.bf16.msra.mxu1 %v15638_v45  ;;  %15163 = vmatprep.subr.bf16.mxu0 %v15639_v10 }
 0x6f8   :  { %15185 = vmatprep.subr.bf16.mxu1 %v15640_v32  ;;  %v10626_v45 = vshrl.u32 %v10625_v16, 7  ;;  %v10623_v32 = vld [vmem:[%s22234_s3] sm:$0xf] }
 0x6fa   :  { %15164 = vmatpush3.bf16.msra.mxu0 %v15641_v53  ;;  %v10627_v10 = vsub.s32 0, %v10626_v45  ;;  %v10635_v53 = vsub.s32 2, %v10626_v45 }
 0x6fb   :  { %15186 = vmatpush3.bf16.msra.mxu1 %v15642_v28  ;;  %15165 = vmatprep.subr.bf16.mxu0 %v15643_v52  ;;  %v10631_v28 = vsub.s32 1, %v10626_v45  ;;  %v10639_v52 = vsub.s32 3, %v10626_v45 }
 0x6fc   :  { %15187 = vmatprep.subr.bf16.mxu1 %v15644_v50 }
 0x6fe   :  { %15166 = vmatpush3.bf16.msra.mxu0 %v15645_v14 }
 0x6ff   :  { %15188 = vmatpush3.bf16.msra.mxu1 %v15646_v22  ;;  %15167 = vmatprep.subr.bf16.mxu0 %v15647_v1  ;;  %v10628_v22 = vrot.slane %v10623_v32, %v10627_v10 }
 0x700   :  { %15189 = vmatprep.subr.bf16.mxu1 %v15648_v37 }
 0x702   :  { %15168 = vmatpush3.bf16.msra.mxu0 %v15649_v43 }
 0x703   :  { %15190 = vmatpush3.bf16.msra.mxu1 %v15650_v62  ;;  %15169 = vmatprep.subr.bf16.mxu0 %v15651_v49  ;;  %v10636_v62 = vrot.slane %v10623_v32, %v10635_v53 }
 0x704   :  { %15191 = vmatprep.subr.bf16.mxu1 %v15652_v41  ;;  %v10632_v41 = vrot.slane %v10623_v32, %v10631_v28 }
 0x706   :  { %15170 = vmatpush3.bf16.msra.mxu0 %v15653_v30 }
 0x707   :  { %15192 = vmatpush3.bf16.msra.mxu1 %v15654_v19  ;;  %15171 = vmatprep.subr.bf16.mxu0 %v15655_v25 }
 0x708   :  { %15193 = vmatprep.subr.bf16.mxu1 %v15656_v39 }
 0x70a   :  { %15172 = vmatpush3.bf16.msra.mxu0 %v15657_v57  ;;  %v10640_v57 = vrot.slane %v10623_v32, %v10639_v52 }
 0x70b   :  { %15194 = vmatpush3.bf16.msra.mxu1 %v15658_v15  ;;  %15173 = vmatprep.subr.bf16.mxu0 %v15659_v31 }
 0x70c   :  { %15195 = vmatprep.subr.bf16.mxu1 %v15660_v36 }
 0x70e   :  { %15174 = vmatpush3.bf16.msra.mxu0 %v15661_v40 }
 0x70f   :  { %15196 = vmatpush3.bf16.msra.mxu1 %v15662_v55  ;;  %15175 = vmatprep.subr.bf16.mxu0 %v15663_v29 }
 0x710   :  { %15197 = vmatprep.subr.bf16.mxu1 %v15664_v46 }
 0x712   :  { %15176 = vmatpush3.bf16.msra.mxu0 %v15665_v11 }
 0x713   :  { %15198 = vmatpush3.bf16.msra.mxu1 %v15666_v21  ;;  %15205 = vmatprep.subr.bf16.mxu0 %v15667_v33 }
 0x714   :  { %15227 = vmatprep.subr.bf16.mxu1 %v15668_v59 }
 0x748   :  { %v21347_v38 = vpop.f32.mrb[40].mxu0 }
 0x749   :  { %v21355_v56 = vpop.f32.mrb[40].mxu1  ;;  %v21357_v27 = vpop.f32.mrb[41].mxu0 }
 0x74a   :  { %v21359_v35 = vpop.f32.mrb[41].mxu1  ;;  %v21361_v13 = vpop.f32.mrb[42].mxu0 }
 0x74b   :  { %v21363_v20 = vpop.f32.mrb[42].mxu1  ;;  %v21365_v7 = vpop.f32.mrb[43].mxu0 }
 0x74c   :  { %v21367_v34 = vpop.f32.mrb[43].mxu1 }
 0x7c8   :  { %v10488_v50 = vpop.f32.mrb[44].mxu0 }
 0x7c9   :  { %v10607_v14 = vmax.f32 %v21347_v38, %v10488_v50  ;;  %v10574_v1 = vpop.f32.mrb[44].mxu1  ;;  %v10490_v37 = vpop.f32.mrb[45].mxu0 }
 0x7ca   :  { %v10609_v43 = vmax.f32 %v21355_v56, %v10574_v1  ;;  %v10608_v49 = vmax.f32 %v21357_v27, %v10490_v37  ;;  %v10576_v30 = vpop.f32.mrb[45].mxu1  ;;  %v10492_v19 = vpop.f32.mrb[46].mxu0 }
 0x7cb   :  { %v10615_v25 = vmax.f32 %v10599_v2, %v10607_v14  ;;  %v10610_v39 = vmax.f32 %v21359_v35, %v10576_v30  ;;  %v10611_v38 = vmax.f32 %v21361_v13, %v10492_v19  ;;  %v10578_v15 = vpop.f32.mrb[46].mxu1  ;;  %v10494_v31 = vpop.f32.mrb[47].mxu0 }
 0x7cc   :  { %v10617_v56 = vmax.f32 %v10601_v60, %v10609_v43  ;;  %v10616_v27 = vmax.f32 %v10600_v18, %v10608_v49  ;;  %v10613_v36 = vmax.f32 %v21363_v20, %v10578_v15  ;;  %v10612_v63 = vmax.f32 %v21365_v7, %v10494_v31  ;;  %v10580_v58 = vpop.f32.mrb[47].mxu1 }
 0x7cd   :  { %v10645_v2 = vadd.f32 %v10628_v22, %v10615_v25  ;;  %v10618_v35 = vmax.f32 %v10602_v47, %v10610_v39  ;;  %v10619_v24 = vmax.f32 %v10603_v9, %v10611_v38  ;;  %v10614_v48 = vmax.f32 %v21367_v34, %v10580_v58  ;;  %v15670_v25 = vld [vmem:[%s22235_s4 + $0x80] sm:$0xff]  }
 0x7ce   :  { %v10647_v60 = vadd.f32 %v10636_v62, %v10617_v56  ;;  %v10646_v54 = vadd.f32 %v10632_v41, %v10616_v27  ;;  %v10621_v17 = vmax.f32 %v10605_v26, %v10613_v36  ;;  %v10620_v18 = vmax.f32 %v10604_v61, %v10612_v63  ;;  %v15671_v27 = vld [vmem:[%s22235_s4 + $0x48] sm:$0xff]  }
 0x7cf   :  { %v10653_v13 = vmax.f32 %v10645_v2, 0.0  ;;  %v10648_v20 = vadd.f32 %v10640_v57, %v10618_v35  ;;  %v10649_v42 = vadd.f32 %v10628_v22, %v10619_v24  ;;  %v10622_v44 = vmax.f32 %v10606_v4, %v10614_v48  ;;  %v15672_v63 = vld [vmem:[%s22235_s4 + $0xc8] sm:$0xff]  }
 0x7d0   :  { %v10655_v8 = vmax.f32 %v10647_v60, 0.0  ;;  %v10654_v23 = vmax.f32 %v10646_v54, 0.0  ;;  %v10651_v47 = vadd.f32 %v10636_v62, %v10621_v17  ;;  %v10650_v9 = vadd.f32 %v10632_v41, %v10620_v18  ;;  %v15669_v41 = vld [vmem:[%s22235_s4] sm:$0xff]   ;;  %v15673_v24 = vld [vmem:[%s22235_s4 + $0x8] sm:$0xff]  }
 0x7d1   :  { %v10661_v7 = vpack.c.bf16 %v10653_v13, %v10653_v13  ;;  %v10656_v34 = vmax.f32 %v10648_v20, 0.0  ;;  %v10657_v40 = vmax.f32 %v10649_v42, 0.0  ;;  %v10652_v3 = vadd.f32 %v10640_v57, %v10622_v44  ;;  %v15674_v18 = vld [vmem:[%s22235_s4 + $0x88] sm:$0xff]   ;;  %v15675_v13 = vld [vmem:[%s22235_s4 + $0x50] sm:$0xff]  }
 0x7d2   :  { %v10663_v51 = vpack.c.bf16 %v10655_v8, %v10655_v8  ;;  %v10662_v26 = vpack.c.bf16 %v10654_v23, %v10654_v23  ;;  %v10659_v55 = vmax.f32 %v10651_v47, 0.0  ;;  %v10658_v5 = vmax.f32 %v10650_v9, 0.0  ;;  %v15676_v8 = vld [vmem:[%s22235_s4 + $0xd0] sm:$0xff]  }
 0x7d3   :  { %v21458_v12 = vunpack.c.l.b16 %v10661_v7  ;;  %v10664_v61 = vpack.c.bf16 %v10656_v34, %v10656_v34  ;;  %v10665_v29 = vpack.c.bf16 %v10657_v40, %v10657_v40  ;;  %v10660_v46 = vmax.f32 %v10652_v3, 0.0  ;;  %v15677_v40 = vld [vmem:[%s22235_s4 + $0x10] sm:$0xff]  }
 0x7d4   :  { %v21460_v11 = vunpack.c.l.b16 %v10663_v51  ;;  %v21462_v6 = vunpack.c.l.b16 %v10662_v26  ;;  %v10667_v0 = vpack.c.bf16 %v10659_v55, %v10659_v55  ;;  %v10666_v4 = vpack.c.bf16 %v10658_v5, %v10658_v5  ;;  %v15678_v55 = vld [vmem:[%s22235_s4 + $0x90] sm:$0xff]   ;;  %v15679_v5 = vld [vmem:[%s22235_s4 + $0x58] sm:$0xff]  }
 0x7d5   :  { %v21464_v21 = vunpack.c.l.b16 %v10664_v61  ;;  %v21466_v33 = vunpack.c.l.b16 %v10665_v29  ;;  %v10668_v59 = vpack.c.bf16 %v10660_v46, %v10660_v46  ;;  %v10814_v16 = vrot.slane %v21458_v12, 1 }
 0x7d6   :  { %v21469_v45 = vunpack.c.l.b16 %v10667_v0  ;;  %v21471_v10 = vunpack.c.l.b16 %v10666_v4  ;;  %v10817_v32 = vrot.slane %v21462_v6, 1  ;;  %v10819_v53 = vrot.slane %v21460_v11, 1  ;;  %v15680_v4 = vld [vmem:[%s22235_s4 + $0xd8] sm:$0xff]  }
 0x7d7   :  { %v21475_v28 = vunpack.c.l.b16 %v10668_v59  ;;  %v10821_v52 = vrot.slane %v21464_v21, 1  ;;  %v10816_v50 = vsel %vm10815_vm1, %v21466_v33, %v10814_v16  ;;  %v11103_v14 = vrot.slane %v21466_v33, 7 }
 0x7d8   :  { %v10818_v22 = vsel %vm10815_vm1, %v21471_v10, %v10817_v32  ;;  %v10820_v1 = vsel %vm10815_vm1, %v21469_v45, %v10819_v53  ;;  %v11105_v37 = vrot.slane %v21471_v10, 7  ;;  %v10823_v49 = vpack.c.b16 %v10816_v50, %v10816_v50 }
 0x7d9   :  { %v10824_v43 = vpack.c.b16 %v10818_v22, %v10818_v22  ;;  %v10822_v62 = vsel %vm10815_vm1, %v21475_v28, %v10821_v52  ;;  %v11109_v30 = vrot.slane %v21475_v28, 7  ;;  %v21499_v57 = vsel %vm10815_vm1, %v11103_v14, %v21458_v12  ;;  %v15681_v22 = vld [vmem:[%s22235_s4 + $0x18] sm:$0xff]  }
 0x7da   :  { %v10826_v19 = vpack.c.b16 %v10822_v62, %v10822_v62  ;;  %v11106_v39 = vsel %vm10815_vm1, %v11105_v37, %v21462_v6  ;;  %v11107_v38 = vrot.slane %v21469_v45, 7  ;;  %v10825_v15 = vpack.c.b16 %v10820_v1, %v10820_v1  ;;  %v15682_v37 = vld [vmem:[%s22235_s4 + $0x98] sm:$0xff]  }
 0x7db   :  { %11055 = vmatprep.mubr.bf16.mxu0 %v10824_v43  ;;  %v11112_v31 = vpack.c.b16 %v11106_v39, %v11106_v39  ;;  %v11110_v56 = vsel %vm10815_vm1, %v11109_v30, %v21464_v21  ;;  %v11459_v2 = vrot.slane %v21462_v6, 2  ;;  %v11460_v35 = vrot.slane %v21471_v10, 1  ;;  %v15683_v43 = vld [vmem:[%s22235_s4 + $0x60] sm:$0xff]  }
 0x7dc   :  { %11095 = vmatprep.mubr.bf16.mxu1 %v10826_v19  ;;  %11056 = vmatmul.mubr.bf16.vlgmr.msra.gmra.mrb[48].mxu0 %v10823_v49  ;;  %v11114_v36 = vpack.c.b16 %v11110_v56, %v11110_v56  ;;  %v21512_v58 = vsel %vm10815_vm1, %v11107_v38, %v21460_v11  ;;  %v11465_v48 = vrot.slane %v21464_v21, 2  ;;  %v11466_v60 = vrot.slane %v21475_v28, 1  ;;  %v15684_v30 = vld [vmem:[%s22235_s4 + $0xe0] sm:$0xff]  }
 0x7dd   :  { %11096 = vmatmul.mubr.bf16.vlgmr.msra.gmra.mrb[48].mxu1 %v10825_v15  ;;  %15206 = vmatpush3.bf16.msra.mxu0 %v15669_v41  ;;  %v11456_v54 = vrot.slane %v21458_v12, 2  ;;  %v11457_v17 = vrot.slane %v21466_v33, 1  ;;  %v21530_v20 = vsel %vm10815_vm1, %v11460_v35, %v11459_v2  ;;  %v11462_v42 = vrot.slane %v21460_v11, 2 }
 0x7de   :  { %15228 = vmatpush3.bf16.msra.mxu1 %v15670_v25  ;;  %11343 = vmatprep.mubr.bf16.mxu0 %v11112_v31  ;;  %v11463_v44 = vrot.slane %v21469_v45, 1  ;;  %v21538_v23 = vsel %vm10815_vm1, %v11466_v60, %v11465_v48  ;;  %v11817_v9 = vrot.slane %v21462_v6, 3  ;;  %v11818_v7 = vrot.slane %v21471_v10, 2  ;;  %v15687_v48 = vld [vmem:[%s22235_s4 + $0x68] sm:$0xff]  }
 0x7df   :  { %11383 = vmatprep.mubr.bf16.mxu1 %v11114_v36  ;;  %15207 = vmatprep.subr.bf16.mxu0 %v15671_v27  ;;  %v21541_v47 = vsel %vm10815_vm1, %v11457_v17, %v11456_v54  ;;  %v11823_v51 = vrot.slane %v21464_v21, 3  ;;  %v11824_v26 = vrot.slane %v21475_v28, 2  ;;  %v11814_v61 = vrot.slane %v21458_v12, 3  ;;  %v15685_v27 = vld [vmem:[%s22235_s4 + $0x20] sm:$0xff]   ;;  %v15688_v54 = vld [vmem:[%s22235_s4 + $0xe8] sm:$0xff]  }
 0x7e0   :  { %15229 = vmatprep.subr.bf16.mxu1 %v15672_v63  ;;  %v21546_v34 = vsel %vm10815_vm1, %v11463_v44, %v11462_v42  ;;  %v21552_v3 = vsel %vm10815_vm1, %v11818_v7, %v11817_v9  ;;  %v11815_v29 = vrot.slane %v21466_v33, 2  ;;  %v11820_v46 = vrot.slane %v21460_v11, 3  ;;  %v15689_v7 = vld [vmem:[%s22235_s4 + $0x28] sm:$0xff]  }
 0x7e1   :  { %15208 = vmatpush3.bf16.msra.mxu0 %v15673_v24  ;;  %v11821_v0 = vrot.slane %v21469_v45, 2  ;;  %v21570_v59 = vsel %vm10815_vm1, %v11824_v26, %v11823_v51  ;;  %v12175_v16 = vrot.slane %v21462_v6, 4  ;;  %v12176_v32 = vrot.slane %v21471_v10, 3  ;;  %v15686_v24 = vld [vmem:[%s22235_s4 + $0xa0] sm:$0xff]  }
 0x7e2   :  { %15230 = vmatpush3.bf16.msra.mxu1 %v15674_v18  ;;  %15209 = vmatprep.subr.bf16.mxu0 %v15675_v13  ;;  %v21575_v53 = vsel %vm10815_vm1, %v11815_v29, %v11814_v61  ;;  %v12181_v50 = vrot.slane %v21464_v21, 4  ;;  %v12182_v14 = vrot.slane %v21475_v28, 3  ;;  %v12172_v49 = vrot.slane %v21458_v12, 4  ;;  %v15693_v29 = vld [vmem:[%s22235_s4 + $0x30] sm:$0xff]  }
 0x7e3   :  { %15231 = vmatprep.subr.bf16.mxu1 %v15676_v8  ;;  %v21578_v52 = vsel %vm10815_vm1, %v11821_v0, %v11820_v46  ;;  %v21586_v1 = vsel %vm10815_vm1, %v12176_v32, %v12175_v16  ;;  %v12173_v41 = vrot.slane %v21466_v33, 3  ;;  %v12178_v19 = vrot.slane %v21460_v11, 4  ;;  %v15696_v46 = vld [vmem:[%s22235_s4 + $0xf8] sm:$0xff]   ;;  %v15699_v16 = vld [vmem:[%s22235_s4 + $0x240] sm:$0xff]  }
 0x7e4   :  { %v21595_v62 = vsel %vm10815_vm1, %v12182_v14, %v12181_v50  ;;  %v12179_v25 = vrot.slane %v21469_v45, 3  ;;  %v12533_v39 = vrot.slane %v21462_v6, 5  ;;  %v12534_v38 = vrot.slane %v21471_v10, 4  ;;  %v15697_v0 = vld [vmem:[%s22235_s4 + $0x38] sm:$0xff]   ;;  %v15700_v32 = vld [vmem:[%s22235_s4 + $0x2c0] sm:$0xff]  }
 0x7e5   :  { %15210 = vmatpush3.bf16.msra.mxu0 %v15677_v40  ;;  %v21607_v15 = vsel %vm10815_vm1, %v12173_v41, %v12172_v49  ;;  %v12539_v31 = vrot.slane %v21464_v21, 5  ;;  %v12540_v56 = vrot.slane %v21475_v28, 4  ;;  %v12530_v2 = vrot.slane %v21458_v12, 5  ;;  %v15701_v50 = vld [vmem:[%s22235_s4 + $0x200] sm:$0xff]  }
 0x7e6   :  { %15232 = vmatpush3.bf16.msra.mxu1 %v15678_v55  ;;  %15211 = vmatprep.subr.bf16.mxu0 %v15679_v5  ;;  %v21615_v36 = vsel %vm10815_vm1, %v12179_v25, %v12178_v19  ;;  %v21618_v63 = vsel %vm10815_vm1, %v12534_v38, %v12533_v39  ;;  %v12531_v35 = vrot.slane %v21466_v33, 4  ;;  %v12536_v18 = vrot.slane %v21460_v11, 5  ;;  %v15692_v55 = vld [vmem:[%s22235_s4 + $0xf0] sm:$0xff]   ;;  %v15711_v39 = vld [vmem:[%s22235_s4 + $0x258] sm:$0xff]  }
 0x7e7   :  { %15233 = vmatprep.subr.bf16.mxu1 %v15680_v4  ;;  %v21629_v60 = vsel %vm10815_vm1, %v12540_v56, %v12539_v31  ;;  %v12537_v13 = vrot.slane %v21469_v45, 4  ;;  %v12891_v42 = vrot.slane %v21462_v6, 6  ;;  %v12892_v44 = vrot.slane %v21471_v10, 5  ;;  %v15690_v6 = vld [vmem:[%s22235_s4 + $0xa8] sm:$0xff]   ;;  %v15698_v4 = vld [vmem:[%s22235_s4 + $0xb8] sm:$0xff]   ;;  %v15709_v19 = vld [vmem:[%s22235_s4 + $0x210] sm:$0xff]  }
 0x7e8   :  { %v21635_v17 = vsel %vm10815_vm1, %v12531_v35, %v12530_v2  ;;  %v12897_v8 = vrot.slane %v21464_v21, 6  ;;  %v12898_v9 = vrot.slane %v21475_v28, 5  ;;  %v12888_v51 = vrot.slane %v21458_v12, 6  ;;  %v15691_v21 = vld [vmem:[%s22235_s4 + $0x70] sm:$0xff]   ;;  %v15712_v38 = vld [vmem:[%s22235_s4 + $0x2d8] sm:$0xff]   ;;  %v15716_v2 = vld [vmem:[%s22235_s4 + $0x2e0] sm:$0xff]  }
 0x7e9   :  { %15212 = vmatpush3.bf16.msra.mxu0 %v15681_v22  ;;  %v21647_v40 = vsel %vm10815_vm1, %v12537_v13, %v12536_v18  ;;  %v12889_v26 = vrot.slane %v21466_v33, 5  ;;  %v21658_v10 = vsel %vm10815_vm1, %v12892_v44, %v12891_v42  ;;  %v12894_v12 = vrot.slane %v21460_v11, 6  ;;  %v15694_v11 = vld [vmem:[%s22235_s4 + $0xb0] sm:$0xff]   ;;  %v15702_v22 = vld [vmem:[%s22235_s4 + $0x280] sm:$0xff]   ;;  %v15713_v31 = vld [vmem:[%s22235_s4 + $0x218] sm:$0xff]  }
 0x7ea   :  { %15234 = vmatpush3.bf16.msra.mxu1 %v15682_v37  ;;  %15213 = vmatprep.subr.bf16.mxu0 %v15683_v43  ;;  %v21661_v28 = vsel %vm10815_vm1, %v12898_v9, %v12897_v8  ;;  %v12895_v33 = vrot.slane %v21469_v45, 5  ;;  %v15695_v45 = vld [vmem:[%s22235_s4 + $0x78] sm:$0xff]   ;;  %v11111_v14 = vpack.c.b16 %v21499_v57, %v21499_v57  ;;  %v11113_v37 = vpack.c.b16 %v21512_v58, %v21512_v58  ;;  %v15703_v43 = vld [vmem:[%s22235_s4 + $0x248] sm:$0xff]   ;;  %v15710_v25 = vld [vmem:[%s22235_s4 + $0x290] sm:$0xff]  }
 0x7eb   :  { %15235 = vmatprep.subr.bf16.mxu1 %v15684_v30  ;;  %v21669_v5 = vsel %vm10815_vm1, %v12889_v26, %v12888_v51  ;;  %v11469_v49 = vpack.c.b16 %v21530_v20, %v21530_v20  ;;  %v15704_v57 = vld [vmem:[%s22235_s4 + $0x2c8] sm:$0xff]   ;;  %v11471_v41 = vpack.c.b16 %v21538_v23, %v21538_v23  ;;  %v15707_v20 = vld [vmem:[%s22235_s4 + $0x250] sm:$0xff]   ;;  %v15714_v56 = vld [vmem:[%s22235_s4 + $0x298] sm:$0xff]  }
 0x7ec   :  { %v21672_v61 = vsel %vm10815_vm1, %v12895_v33, %v12894_v12  ;;  %v15705_v58 = vld [vmem:[%s22235_s4 + $0x208] sm:$0xff]   ;;  %v15708_v23 = vld [vmem:[%s22235_s4 + $0x2d0] sm:$0xff]   ;;  %v15717_v35 = vld [vmem:[%s22235_s4 + $0x220] sm:$0xff]  }
 0x7ed   :  { %15214 = vmatpush3.bf16.msra.mxu0 %v15685_v27  ;;  %v15706_v30 = vld [vmem:[%s22235_s4 + $0x288] sm:$0xff]   ;;  %v15715_v27 = vld [vmem:[%s22235_s4 + $0x260] sm:$0xff]   ;;  %v15723_v42 = vld [vmem:[%s22235_s4 + $0x270] sm:$0xff]  }
 0x7ee   :  { %15236 = vmatpush3.bf16.msra.mxu1 %v15686_v24  ;;  %15215 = vmatprep.subr.bf16.mxu0 %v15687_v48  ;;  %v15718_v24 = vld [vmem:[%s22235_s4 + $0x2a0] sm:$0xff]   ;;  %v15719_v48 = vld [vmem:[%s22235_s4 + $0x268] sm:$0xff]   ;;  %v15724_v44 = vld [vmem:[%s22235_s4 + $0x2f0] sm:$0xff]  }
 0x7ef   :  { %15237 = vmatprep.subr.bf16.mxu1 %v15688_v54  ;;  %v15720_v54 = vld [vmem:[%s22235_s4 + $0x2e8] sm:$0xff]   ;;  %v15725_v8 = vld [vmem:[%s22235_s4 + $0x230] sm:$0xff]   ;;  %v15728_v51 = vld [vmem:[%s22235_s4 + $0x2f8] sm:$0xff]  }
 0x7f0   :  { %v15721_v18 = vld [vmem:[%s22235_s4 + $0x228] sm:$0xff]   ;;  %v15726_v9 = vld [vmem:[%s22235_s4 + $0x2b0] sm:$0xff]   ;;  %v15729_v26 = vld [vmem:[%s22235_s4 + $0x238] sm:$0xff]  }
 0x7f1   :  { %15216 = vmatpush3.bf16.msra.mxu0 %v15689_v7  ;;  %v15722_v13 = vld [vmem:[%s22235_s4 + $0x2a8] sm:$0xff]   ;;  %v15727_v7 = vld [vmem:[%s22235_s4 + $0x278] sm:$0xff]   ;;  %v15732_v12 = vld [vmem:[%s22235_s4 + $0x3c0] sm:$0xff]  }
 0x7f2   :  { %15238 = vmatpush3.bf16.msra.mxu1 %v15690_v6  ;;  %15217 = vmatprep.subr.bf16.mxu0 %v15691_v21  ;;  %v15730_v6 = vld [vmem:[%s22235_s4 + $0x2b8] sm:$0xff]   ;;  %v15731_v21 = vld [vmem:[%s22235_s4 + $0x340] sm:$0xff]  }
 0x7f3   :  { %15239 = vmatprep.subr.bf16.mxu1 %v15692_v55  ;;  %v15733_v33 = vld [vmem:[%s22235_s4 + $0x300] sm:$0xff]   ;;  %v11468_v55 = vpack.c.b16 %v21541_v47, %v21541_v47  ;;  %v15736_v47 = vld [vmem:[%s22235_s4 + $0x3c8] sm:$0xff]  }
 0x7f5   :  { %15218 = vmatpush3.bf16.msra.mxu0 %v15693_v29  ;;  %v15734_v29 = vld [vmem:[%s22235_s4 + $0x380] sm:$0xff]  }
 0x7f6   :  { %15240 = vmatpush3.bf16.msra.mxu1 %v15694_v11  ;;  %15219 = vmatprep.subr.bf16.mxu0 %v15695_v45  ;;  %v11470_v11 = vpack.c.b16 %v21546_v34, %v21546_v34  ;;  %v15735_v45 = vld [vmem:[%s22235_s4 + $0x348] sm:$0xff]  }
 0x7f7   :  { %15241 = vmatprep.subr.bf16.mxu1 %v15696_v46  ;;  %v11827_v46 = vpack.c.b16 %v21552_v3, %v21552_v3  ;;  %v15737_v34 = vld [vmem:[%s22235_s4 + $0x308] sm:$0xff]   ;;  %v15739_v3 = vld [vmem:[%s22235_s4 + $0x350] sm:$0xff]  }
 0x7f9   :  { %15220 = vmatpush3.bf16.msra.mxu0 %v15697_v0  ;;  %v11829_v0 = vpack.c.b16 %v21570_v59, %v21570_v59  ;;  %v15740_v59 = vld [vmem:[%s22235_s4 + $0x3d0] sm:$0xff]  }
 0x7fa   :  { %15242 = vmatpush3.bf16.msra.mxu1 %v15698_v4  ;;  %15249 = vmatprep.subr.bf16.mxu0 %v15699_v16  ;;  %v15738_v4 = vld [vmem:[%s22235_s4 + $0x388] sm:$0xff]   ;;  %v15741_v16 = vld [vmem:[%s22235_s4 + $0x310] sm:$0xff]  }
 0x7fb   :  { %15271 = vmatprep.subr.bf16.mxu1 %v15700_v32  ;;  %v15742_v32 = vld [vmem:[%s22235_s4 + $0x390] sm:$0xff]  }
 0x7fc   :  { %11344 = vmatmul.mubr.bf16.vlgmr.msra.gmra.mrb[52].mxu0 %v11111_v14  ;;  %v15744_v14 = vld [vmem:[%s22235_s4 + $0x3d8] sm:$0xff]  }
 0x7fd   :  { %11384 = vmatmul.mubr.bf16.vlgmr.msra.gmra.mrb[52].mxu1 %v11113_v37  ;;  %15250 = vmatpush3.bf16.msra.mxu0 %v15701_v50  ;;  %v15743_v50 = vld [vmem:[%s22235_s4 + $0x358] sm:$0xff]  }
 0x7fe   :  { %11700 = vmatprep.mubr.bf16.mxu0 %v11469_v49  ;;  %15272 = vmatpush3.bf16.msra.mxu1 %v15702_v22  ;;  %v15745_v22 = vld [vmem:[%s22235_s4 + $0x318] sm:$0xff]   ;;  %v15748_v49 = vld [vmem:[%s22235_s4 + $0x3e0] sm:$0xff]  }
 0x7ff   :  { %11740 = vmatprep.mubr.bf16.mxu1 %v11471_v41  ;;  %15251 = vmatprep.subr.bf16.mxu0 %v15703_v43  ;;  %v15746_v37 = vld [vmem:[%s22235_s4 + $0x398] sm:$0xff]   ;;  %v15747_v43 = vld [vmem:[%s22235_s4 + $0x360] sm:$0xff]  }
 0x800   :  { %15273 = vmatprep.subr.bf16.mxu1 %v15704_v57  ;;  %v15749_v57 = vld [vmem:[%s22235_s4 + $0x320] sm:$0xff]  }
 0x801   :  { %15252 = vmatpush3.bf16.msra.mxu0 %v15705_v58  ;;  %v15750_v41 = vld [vmem:[%s22235_s4 + $0x3a0] sm:$0xff]   ;;  %v15751_v58 = vld [vmem:[%s22235_s4 + $0x368] sm:$0xff]  }
 0x802   :  { %15274 = vmatpush3.bf16.msra.mxu1 %v15706_v30  ;;  %15253 = vmatprep.subr.bf16.mxu0 %v15707_v20  ;;  %v15752_v30 = vld [vmem:[%s22235_s4 + $0x3e8] sm:$0xff]  }
 0x803   :  { %15275 = vmatprep.subr.bf16.mxu1 %v15708_v23  ;;  %v15753_v20 = vld [vmem:[%s22235_s4 + $0x328] sm:$0xff]  }
 0x804   :  { %v15754_v23 = vld [vmem:[%s22235_s4 + $0x3a8] sm:$0xff]  }
 0x805   :  { %15254 = vmatpush3.bf16.msra.mxu0 %v15709_v19  ;;  %v15755_v19 = vld [vmem:[%s22235_s4 + $0x370] sm:$0xff]  }
 0x806   :  { %15276 = vmatpush3.bf16.msra.mxu1 %v15710_v25  ;;  %15255 = vmatprep.subr.bf16.mxu0 %v15711_v39  ;;  %v15756_v25 = vld [vmem:[%s22235_s4 + $0x3f0] sm:$0xff]  }
 0x807   :  { %15277 = vmatprep.subr.bf16.mxu1 %v15712_v38  ;;  %v15757_v39 = vld [vmem:[%s22235_s4 + $0x330] sm:$0xff]  }
 0x808   :  { %v15758_v38 = vld [vmem:[%s22235_s4 + $0x3b0] sm:$0xff]  }
 0x809   :  { %15256 = vmatpush3.bf16.msra.mxu0 %v15713_v31  ;;  %v15759_v31 = vld [vmem:[%s22235_s4 + $0x378] sm:$0xff]  }
 0x80a   :  { %15278 = vmatpush3.bf16.msra.mxu1 %v15714_v56  ;;  %15257 = vmatprep.subr.bf16.mxu0 %v15715_v27  ;;  %v15760_v56 = vld [vmem:[%s22235_s4 + $0x3f8] sm:$0xff]  }
 0x80b   :  { %15279 = vmatprep.subr.bf16.mxu1 %v15716_v2  ;;  %v15761_v27 = vld [vmem:[%s22235_s4 + $0x338] sm:$0xff]  }
 0x80c   :  { %v15762_v2 = vld [vmem:[%s22235_s4 + $0x3b8] sm:$0xff]  }
 0x80d   :  { %15258 = vmatpush3.bf16.msra.mxu0 %v15717_v35  ;;  %v15763_v35 = vld [vmem:[%s22235_s4 + $0x440] sm:$0xff]  }
 0x80e   :  { %15280 = vmatpush3.bf16.msra.mxu1 %v15718_v24  ;;  %15259 = vmatprep.subr.bf16.mxu0 %v15719_v48  ;;  %v15764_v24 = vld [vmem:[%s22235_s4 + $0x4c0] sm:$0xff]  }
 0x80f   :  { %15281 = vmatprep.subr.bf16.mxu1 %v15720_v54  ;;  %v15765_v48 = vld [vmem:[%s22235_s4 + $0x400] sm:$0xff]   ;;  %v11826_v54 = vpack.c.b16 %v21575_v53, %v21575_v53  ;;  %v15768_v53 = vld [vmem:[%s22235_s4 + $0x4c8] sm:$0xff]  }
 0x811   :  { %15260 = vmatpush3.bf16.msra.mxu0 %v15721_v18  ;;  %v15766_v18 = vld [vmem:[%s22235_s4 + $0x480] sm:$0xff]  }
 0x812   :  { %15282 = vmatpush3.bf16.msra.mxu1 %v15722_v13  ;;  %15261 = vmatprep.subr.bf16.mxu0 %v15723_v42  ;;  %v11828_v13 = vpack.c.b16 %v21578_v52, %v21578_v52  ;;  %v15767_v42 = vld [vmem:[%s22235_s4 + $0x448] sm:$0xff]  }
 0x813   :  { %15283 = vmatprep.subr.bf16.mxu1 %v15724_v44  ;;  %v12185_v44 = vpack.c.b16 %v21586_v1, %v21586_v1  ;;  %v15769_v52 = vld [vmem:[%s22235_s4 + $0x408] sm:$0xff]   ;;  %v15771_v1 = vld [vmem:[%s22235_s4 + $0x450] sm:$0xff]  }
 0x815   :  { %15262 = vmatpush3.bf16.msra.mxu0 %v15725_v8  ;;  %v12187_v8 = vpack.c.b16 %v21595_v62, %v21595_v62  ;;  %v15772_v62 = vld [vmem:[%s22235_s4 + $0x4d0] sm:$0xff]  }
 0x816   :  { %15284 = vmatpush3.bf16.msra.mxu1 %v15726_v9  ;;  %15263 = vmatprep.subr.bf16.mxu0 %v15727_v7  ;;  %v15770_v9 = vld [vmem:[%s22235_s4 + $0x488] sm:$0xff]   ;;  %v15773_v7 = vld [vmem:[%s22235_s4 + $0x410] sm:$0xff]  }
 0x817   :  { %15285 = vmatprep.subr.bf16.mxu1 %v15728_v51  ;;  %v15774_v51 = vld [vmem:[%s22235_s4 + $0x490] sm:$0xff]  }
 0x819   :  { %15264 = vmatpush3.bf16.msra.mxu0 %v15729_v26  ;;  %v15775_v26 = vld [vmem:[%s22235_s4 + $0x458] sm:$0xff]  }
 0x81a   :  { %15286 = vmatpush3.bf16.msra.mxu1 %v15730_v6  ;;  %15293 = vmatprep.subr.bf16.mxu0 %v15731_v21  ;;  %v15776_v6 = vld [vmem:[%s22235_s4 + $0x4d8] sm:$0xff]  }
 0x81b   :  { %15315 = vmatprep.subr.bf16.mxu1 %v15732_v12  ;;  %v15777_v21 = vld [vmem:[%s22235_s4 + $0x418] sm:$0xff]  }
 0x81c   :  { %11701 = vmatmul.mubr.bf16.vlgmr.msra.gmra.mrb[56].mxu0 %v11468_v55  ;;  %v15778_v12 = vld [vmem:[%s22235_s4 + $0x498] sm:$0xff]   ;;  %v15780_v55 = vld [vmem:[%s22235_s4 + $0x4e0] sm:$0xff]  }
 0x81d   :  { %11741 = vmatmul.mubr.bf16.vlgmr.msra.gmra.mrb[56].mxu1 %v11470_v11  ;;  %15294 = vmatpush3.bf16.msra.mxu0 %v15733_v33  ;;  %v15779_v33 = vld [vmem:[%s22235_s4 + $0x460] sm:$0xff]  }
 0x81e   :  { %12058 = vmatprep.mubr.bf16.mxu0 %v11827_v46  ;;  %15316 = vmatpush3.bf16.msra.mxu1 %v15734_v29  ;;  %v15781_v29 = vld [vmem:[%s22235_s4 + $0x420] sm:$0xff]   ;;  %v15784_v46 = vld [vmem:[%s22235_s4 + $0x4e8] sm:$0xff]  }
 0x81f   :  { %12098 = vmatprep.mubr.bf16.mxu1 %v11829_v0  ;;  %15295 = vmatprep.subr.bf16.mxu0 %v15735_v45  ;;  %v15782_v11 = vld [vmem:[%s22235_s4 + $0x4a0] sm:$0xff]   ;;  %v15783_v45 = vld [vmem:[%s22235_s4 + $0x468] sm:$0xff]  }
 0x820   :  { %15317 = vmatprep.subr.bf16.mxu1 %v15736_v47  ;;  %v15785_v47 = vld [vmem:[%s22235_s4 + $0x428] sm:$0xff]  }
 0x821   :  { %15296 = vmatpush3.bf16.msra.mxu0 %v15737_v34  ;;  %v15786_v0 = vld [vmem:[%s22235_s4 + $0x4a8] sm:$0xff]   ;;  %v15787_v34 = vld [vmem:[%s22235_s4 + $0x470] sm:$0xff]  }
 0x822   :  { %15318 = vmatpush3.bf16.msra.mxu1 %v15738_v4  ;;  %15297 = vmatprep.subr.bf16.mxu0 %v15739_v3  ;;  %v15788_v4 = vld [vmem:[%s22235_s4 + $0x4f0] sm:$0xff]  }
 0x823   :  { %15319 = vmatprep.subr.bf16.mxu1 %v15740_v59  ;;  %v15789_v3 = vld [vmem:[%s22235_s4 + $0x430] sm:$0xff]  }
 0x824   :  { %v15790_v59 = vld [vmem:[%s22235_s4 + $0x4b0] sm:$0xff]  }
 0x825   :  { %15298 = vmatpush3.bf16.msra.mxu0 %v15741_v16  ;;  %v15791_v16 = vld [vmem:[%s22235_s4 + $0x478] sm:$0xff]  }
 0x826   :  { %15320 = vmatpush3.bf16.msra.mxu1 %v15742_v32  ;;  %15299 = vmatprep.subr.bf16.mxu0 %v15743_v50  ;;  %v15792_v32 = vld [vmem:[%s22235_s4 + $0x4f8] sm:$0xff]  }
 0x827   :  { %15321 = vmatprep.subr.bf16.mxu1 %v15744_v14  ;;  %v15793_v50 = vld [vmem:[%s22235_s4 + $0x438] sm:$0xff]  }
 0x828   :  { %v15794_v14 = vld [vmem:[%s22235_s4 + $0x4b8] sm:$0xff]  }
 0x829   :  { %15300 = vmatpush3.bf16.msra.mxu0 %v15745_v22  ;;  %v15795_v22 = vld [vmem:[%s22235_s4 + $0x540] sm:$0xff]  }
 0x82a   :  { %15322 = vmatpush3.bf16.msra.mxu1 %v15746_v37  ;;  %15301 = vmatprep.subr.bf16.mxu0 %v15747_v43  ;;  %v15796_v37 = vld [vmem:[%s22235_s4 + $0x5c0] sm:$0xff]  }
 0x82b   :  { %15323 = vmatprep.subr.bf16.mxu1 %v15748_v49  ;;  %v15797_v43 = vld [vmem:[%s22235_s4 + $0x500] sm:$0xff]   ;;  %v12184_v49 = vpack.c.b16 %v21607_v15, %v21607_v15  ;;  %v15800_v15 = vld [vmem:[%s22235_s4 + $0x5c8] sm:$0xff]  }
 0x82d   :  { %15302 = vmatpush3.bf16.msra.mxu0 %v15749_v57  ;;  %v15798_v57 = vld [vmem:[%s22235_s4 + $0x580] sm:$0xff]  }
 0x82e   :  { %15324 = vmatpush3.bf16.msra.mxu1 %v15750_v41  ;;  %15303 = vmatprep.subr.bf16.mxu0 %v15751_v58  ;;  %v12186_v41 = vpack.c.b16 %v21615_v36, %v21615_v36  ;;  %v15799_v58 = vld [vmem:[%s22235_s4 + $0x548] sm:$0xff]  }
 0x82f   :  { %15325 = vmatprep.subr.bf16.mxu1 %v15752_v30  ;;  %v12543_v30 = vpack.c.b16 %v21618_v63, %v21618_v63  ;;  %v15801_v36 = vld [vmem:[%s22235_s4 + $0x508] sm:$0xff]   ;;  %v15803_v63 = vld [vmem:[%s22235_s4 + $0x550] sm:$0xff]  }
 0x831   :  { %15304 = vmatpush3.bf16.msra.mxu0 %v15753_v20  ;;  %v12545_v20 = vpack.c.b16 %v21629_v60, %v21629_v60  ;;  %v15804_v60 = vld [vmem:[%s22235_s4 + $0x5d0] sm:$0xff]  }
 0x832   :  { %15326 = vmatpush3.bf16.msra.mxu1 %v15754_v23  ;;  %15305 = vmatprep.subr.bf16.mxu0 %v15755_v19  ;;  %v15802_v23 = vld [vmem:[%s22235_s4 + $0x588] sm:$0xff]   ;;  %v15805_v19 = vld [vmem:[%s22235_s4 + $0x510] sm:$0xff]  }
 0x833   :  { %15327 = vmatprep.subr.bf16.mxu1 %v15756_v25  ;;  %v15806_v25 = vld [vmem:[%s22235_s4 + $0x590] sm:$0xff]  }
 0x835   :  { %15306 = vmatpush3.bf16.msra.mxu0 %v15757_v39  ;;  %v15807_v39 = vld [vmem:[%s22235_s4 + $0x558] sm:$0xff]  }
 0x836   :  { %15328 = vmatpush3.bf16.msra.mxu1 %v15758_v38  ;;  %15307 = vmatprep.subr.bf16.mxu0 %v15759_v31  ;;  %v15808_v38 = vld [vmem:[%s22235_s4 + $0x5d8] sm:$0xff]  }
 0x837   :  { %15329 = vmatprep.subr.bf16.mxu1 %v15760_v56  ;;  %v15809_v31 = vld [vmem:[%s22235_s4 + $0x518] sm:$0xff]  }
 0x838   :  { %v15810_v56 = vld [vmem:[%s22235_s4 + $0x598] sm:$0xff]  }
 0x839   :  { %15308 = vmatpush3.bf16.msra.mxu0 %v15761_v27  ;;  %v15811_v27 = vld [vmem:[%s22235_s4 + $0x560] sm:$0xff]  }
 0x83a   :  { %15330 = vmatpush3.bf16.msra.mxu1 %v15762_v2  ;;  %15337 = vmatprep.subr.bf16.mxu0 %v15763_v35  ;;  %v15812_v2 = vld [vmem:[%s22235_s4 + $0x5e0] sm:$0xff]  }
 0x83b   :  { %15359 = vmatprep.subr.bf16.mxu1 %v15764_v24  ;;  %v15813_v35 = vld [vmem:[%s22235_s4 + $0x520] sm:$0xff]  }
 0x83c   :  { %12059 = vmatmul.mubr.bf16.vlgmr.msra.gmra.mrb[60].mxu0 %v11826_v54  ;;  %v15814_v24 = vld [vmem:[%s22235_s4 + $0x5a0] sm:$0xff]   ;;  %v15816_v54 = vld [vmem:[%s22235_s4 + $0x5e8] sm:$0xff]  }
 0x83d   :  { %12099 = vmatmul.mubr.bf16.vlgmr.msra.gmra.mrb[60].mxu1 %v11828_v13  ;;  %15338 = vmatpush3.bf16.msra.mxu0 %v15765_v48  ;;  %v15815_v48 = vld [vmem:[%s22235_s4 + $0x568] sm:$0xff]  }
 0x83e   :  { %12416 = vmatprep.mubr.bf16.mxu0 %v12185_v44  ;;  %15360 = vmatpush3.bf16.msra.mxu1 %v15766_v18  ;;  %v15817_v18 = vld [vmem:[%s22235_s4 + $0x528] sm:$0xff]   ;;  %v15820_v44 = vld [vmem:[%s22235_s4 + $0x5f0] sm:$0xff]  }
 0x83f   :  { %12456 = vmatprep.mubr.bf16.mxu1 %v12187_v8  ;;  %15339 = vmatprep.subr.bf16.mxu0 %v15767_v42  ;;  %v15818_v13 = vld [vmem:[%s22235_s4 + $0x5a8] sm:$0xff]   ;;  %v15819_v42 = vld [vmem:[%s22235_s4 + $0x570] sm:$0xff]  }
 0x840   :  { %15361 = vmatprep.subr.bf16.mxu1 %v15768_v53  ;;  %v15821_v53 = vld [vmem:[%s22235_s4 + $0x530] sm:$0xff]  }
 0x841   :  { %15340 = vmatpush3.bf16.msra.mxu0 %v15769_v52  ;;  %v15822_v8 = vld [vmem:[%s22235_s4 + $0x5b0] sm:$0xff]   ;;  %v15823_v52 = vld [vmem:[%s22235_s4 + $0x578] sm:$0xff]  }
 0x842   :  { %15362 = vmatpush3.bf16.msra.mxu1 %v15770_v9  ;;  %15341 = vmatprep.subr.bf16.mxu0 %v15771_v1  ;;  %v15824_v9 = vld [vmem:[%s22235_s4 + $0x5f8] sm:$0xff]  }
 0x843   :  { %15363 = vmatprep.subr.bf16.mxu1 %v15772_v62  ;;  %v15825_v1 = vld [vmem:[%s22235_s4 + $0x538] sm:$0xff]  }
 0x844   :  { %v15826_v62 = vld [vmem:[%s22235_s4 + $0x5b8] sm:$0xff]  }
 0x845   :  { %15342 = vmatpush3.bf16.msra.mxu0 %v15773_v7  ;;  %v15827_v7 = vld [vmem:[%s22235_s4 + $0x640] sm:$0xff]  }
 0x846   :  { %15364 = vmatpush3.bf16.msra.mxu1 %v15774_v51  ;;  %15343 = vmatprep.subr.bf16.mxu0 %v15775_v26  ;;  %v15828_v51 = vld [vmem:[%s22235_s4 + $0x6c0] sm:$0xff]  }
 0x847   :  { %15365 = vmatprep.subr.bf16.mxu1 %v15776_v6  ;;  %v15829_v26 = vld [vmem:[%s22235_s4 + $0x600] sm:$0xff]   ;;  %v12542_v6 = vpack.c.b16 %v21635_v17, %v21635_v17  ;;  %v15832_v17 = vld [vmem:[%s22235_s4 + $0x6c8] sm:$0xff]  }
 0x849   :  { %15344 = vmatpush3.bf16.msra.mxu0 %v15777_v21  ;;  %v15830_v21 = vld [vmem:[%s22235_s4 + $0x680] sm:$0xff]  }
 0x84a   :  { %15366 = vmatpush3.bf16.msra.mxu1 %v15778_v12  ;;  %15345 = vmatprep.subr.bf16.mxu0 %v15779_v33  ;;  %v12544_v12 = vpack.c.b16 %v21647_v40, %v21647_v40  ;;  %v15831_v33 = vld [vmem:[%s22235_s4 + $0x648] sm:$0xff]  }
 0x84b   :  { %15367 = vmatprep.subr.bf16.mxu1 %v15780_v55  ;;  %v12901_v55 = vpack.c.b16 %v21658_v10, %v21658_v10  ;;  %v15833_v40 = vld [vmem:[%s22235_s4 + $0x608] sm:$0xff]   ;;  %v15835_v10 = vld [vmem:[%s22235_s4 + $0x650] sm:$0xff]  }
 0x84d   :  { %15346 = vmatpush3.bf16.msra.mxu0 %v15781_v29  ;;  %v12903_v29 = vpack.c.b16 %v21661_v28, %v21661_v28  ;;  %v15836_v28 = vld [vmem:[%s22235_s4 + $0x6d0] sm:$0xff]  }
 0x84e   :  { %15368 = vmatpush3.bf16.msra.mxu1 %v15782_v11  ;;  %15347 = vmatprep.subr.bf16.mxu0 %v15783_v45  ;;  %v15834_v11 = vld [vmem:[%s22235_s4 + $0x688] sm:$0xff]   ;;  %v15837_v45 = vld [vmem:[%s22235_s4 + $0x610] sm:$0xff]  }
 0x84f   :  { %15369 = vmatprep.subr.bf16.mxu1 %v15784_v46  ;;  %v15838_v46 = vld [vmem:[%s22235_s4 + $0x690] sm:$0xff]  }
 0x851   :  { %15348 = vmatpush3.bf16.msra.mxu0 %v15785_v47  ;;  %v15839_v47 = vld [vmem:[%s22235_s4 + $0x658] sm:$0xff]  }
 0x852   :  { %15370 = vmatpush3.bf16.msra.mxu1 %v15786_v0  ;;  %15349 = vmatprep.subr.bf16.mxu0 %v15787_v34  ;;  %v15840_v0 = vld [vmem:[%s22235_s4 + $0x6d8] sm:$0xff]  }
 0x853   :  { %15371 = vmatprep.subr.bf16.mxu1 %v15788_v4  ;;  %v15841_v34 = vld [vmem:[%s22235_s4 + $0x618] sm:$0xff]  }
 0x854   :  { %v15842_v4 = vld [vmem:[%s22235_s4 + $0x698] sm:$0xff]  }
 0x855   :  { %15350 = vmatpush3.bf16.msra.mxu0 %v15789_v3  ;;  %v15843_v3 = vld [vmem:[%s22235_s4 + $0x660] sm:$0xff]  }
 0x856   :  { %15372 = vmatpush3.bf16.msra.mxu1 %v15790_v59  ;;  %15351 = vmatprep.subr.bf16.mxu0 %v15791_v16  ;;  %v15844_v59 = vld [vmem:[%s22235_s4 + $0x6e0] sm:$0xff]  }
 0x857   :  { %15373 = vmatprep.subr.bf16.mxu1 %v15792_v32  ;;  %v15845_v16 = vld [vmem:[%s22235_s4 + $0x620] sm:$0xff]  }
 0x858   :  { %v15846_v32 = vld [vmem:[%s22235_s4 + $0x6a0] sm:$0xff]  }
 0x859   :  { %15352 = vmatpush3.bf16.msra.mxu0 %v15793_v50  ;;  %v15847_v50 = vld [vmem:[%s22235_s4 + $0x668] sm:$0xff]  }
 0x85a   :  { %15374 = vmatpush3.bf16.msra.mxu1 %v15794_v14  ;;  %15381 = vmatprep.subr.bf16.mxu0 %v15795_v22  ;;  %v15848_v14 = vld [vmem:[%s22235_s4 + $0x6e8] sm:$0xff]  }
 0x85b   :  { %15403 = vmatprep.subr.bf16.mxu1 %v15796_v37  ;;  %v15849_v22 = vld [vmem:[%s22235_s4 + $0x628] sm:$0xff]  }
 0x85c   :  { %12417 = vmatmul.mubr.bf16.vlgmr.msra.gmra.mrb[64].mxu0 %v12184_v49  ;;  %v15850_v37 = vld [vmem:[%s22235_s4 + $0x6a8] sm:$0xff]   ;;  %v15852_v49 = vld [vmem:[%s22235_s4 + $0x6f0] sm:$0xff]  }
 0x85d   :  { %12457 = vmatmul.mubr.bf16.vlgmr.msra.gmra.mrb[64].mxu1 %v12186_v41  ;;  %15382 = vmatpush3.bf16.msra.mxu0 %v15797_v43  ;;  %v15851_v43 = vld [vmem:[%s22235_s4 + $0x670] sm:$0xff]  }
 0x85e   :  { %12774 = vmatprep.mubr.bf16.mxu0 %v12543_v30  ;;  %15404 = vmatpush3.bf16.msra.mxu1 %v15798_v57  ;;  %v15853_v57 = vld [vmem:[%s22235_s4 + $0x630] sm:$0xff]   ;;  %v15856_v30 = vld [vmem:[%s22235_s4 + $0x6f8] sm:$0xff]  }
 0x85f   :  { %12814 = vmatprep.mubr.bf16.mxu1 %v12545_v20  ;;  %15383 = vmatprep.subr.bf16.mxu0 %v15799_v58  ;;  %v15854_v41 = vld [vmem:[%s22235_s4 + $0x6b0] sm:$0xff]   ;;  %v15855_v58 = vld [vmem:[%s22235_s4 + $0x678] sm:$0xff]  }
 0x860   :  { %15405 = vmatprep.subr.bf16.mxu1 %v15800_v15  ;;  %v15857_v15 = vld [vmem:[%s22235_s4 + $0x638] sm:$0xff]  }
 0x861   :  { %15384 = vmatpush3.bf16.msra.mxu0 %v15801_v36  ;;  %v15858_v20 = vld [vmem:[%s22235_s4 + $0x6b8] sm:$0xff]   ;;  %v12900_v36 = vpack.c.b16 %v21669_v5, %v21669_v5 }
 0x862   :  { %15406 = vmatpush3.bf16.msra.mxu1 %v15802_v23  ;;  %15385 = vmatprep.subr.bf16.mxu0 %v15803_v63  ;;  %v12902_v23 = vpack.c.b16 %v21672_v61, %v21672_v61 }
 0x863   :  { %15407 = vmatprep.subr.bf16.mxu1 %v15804_v60 }
 0x865   :  { %15386 = vmatpush3.bf16.msra.mxu0 %v15805_v19 }
 0x866   :  { %15408 = vmatpush3.bf16.msra.mxu1 %v15806_v25  ;;  %15387 = vmatprep.subr.bf16.mxu0 %v15807_v39 }
 0x867   :  { %15409 = vmatprep.subr.bf16.mxu1 %v15808_v38 }
 0x869   :  { %15388 = vmatpush3.bf16.msra.mxu0 %v15809_v31 }
 0x86a   :  { %15410 = vmatpush3.bf16.msra.mxu1 %v15810_v56  ;;  %15389 = vmatprep.subr.bf16.mxu0 %v15811_v27 }
 0x86b   :  { %15411 = vmatprep.subr.bf16.mxu1 %v15812_v2 }
 0x86d   :  { %15390 = vmatpush3.bf16.msra.mxu0 %v15813_v35 }
 0x86e   :  { %15412 = vmatpush3.bf16.msra.mxu1 %v15814_v24  ;;  %15391 = vmatprep.subr.bf16.mxu0 %v15815_v48 }
 0x86f   :  { %15413 = vmatprep.subr.bf16.mxu1 %v15816_v54 }
 0x871   :  { %15392 = vmatpush3.bf16.msra.mxu0 %v15817_v18 }
 0x872   :  { %15414 = vmatpush3.bf16.msra.mxu1 %v15818_v13  ;;  %15393 = vmatprep.subr.bf16.mxu0 %v15819_v42 }
 0x873   :  { %15415 = vmatprep.subr.bf16.mxu1 %v15820_v44 }
 0x875   :  { %15394 = vmatpush3.bf16.msra.mxu0 %v15821_v53 }
 0x876   :  { %15416 = vmatpush3.bf16.msra.mxu1 %v15822_v8  ;;  %15395 = vmatprep.subr.bf16.mxu0 %v15823_v52 }
 0x877   :  { %15417 = vmatprep.subr.bf16.mxu1 %v15824_v9 }
 0x879   :  { %15396 = vmatpush3.bf16.msra.mxu0 %v15825_v1 }
 0x87a   :  { %15418 = vmatpush3.bf16.msra.mxu1 %v15826_v62  ;;  %15425 = vmatprep.subr.bf16.mxu0 %v15827_v7 }
 0x87b   :  { %15447 = vmatprep.subr.bf16.mxu1 %v15828_v51 }
 0x87c   :  { %12775 = vmatmul.mubr.bf16.vlgmr.msra.gmra.mrb[68].mxu0 %v12542_v6 }
 0x87d   :  { %12815 = vmatmul.mubr.bf16.vlgmr.msra.gmra.mrb[68].mxu1 %v12544_v12  ;;  %15426 = vmatpush3.bf16.msra.mxu0 %v15829_v26 }
 0x87e   :  { %13132 = vmatprep.mubr.bf16.mxu0 %v12901_v55  ;;  %15448 = vmatpush3.bf16.msra.mxu1 %v15830_v21 }
 0x87f   :  { %13172 = vmatprep.mubr.bf16.mxu1 %v12903_v29  ;;  %15427 = vmatprep.subr.bf16.mxu0 %v15831_v33 }
 0x880   :  { %15449 = vmatprep.subr.bf16.mxu1 %v15832_v17 }
 0x881   :  { %15428 = vmatpush3.bf16.msra.mxu0 %v15833_v40 }
 0x882   :  { %15450 = vmatpush3.bf16.msra.mxu1 %v15834_v11  ;;  %15429 = vmatprep.subr.bf16.mxu0 %v15835_v10 }
 0x883   :  { %15451 = vmatprep.subr.bf16.mxu1 %v15836_v28 }
 0x885   :  { %15430 = vmatpush3.bf16.msra.mxu0 %v15837_v45 }
 0x886   :  { %15452 = vmatpush3.bf16.msra.mxu1 %v15838_v46  ;;  %15431 = vmatprep.subr.bf16.mxu0 %v15839_v47 }
 0x887   :  { %15453 = vmatprep.subr.bf16.mxu1 %v15840_v0 }
 0x889   :  { %15432 = vmatpush3.bf16.msra.mxu0 %v15841_v34 }
 0x88a   :  { %15454 = vmatpush3.bf16.msra.mxu1 %v15842_v4  ;;  %15433 = vmatprep.subr.bf16.mxu0 %v15843_v3 }
 0x88b   :  { %15455 = vmatprep.subr.bf16.mxu1 %v15844_v59 }
 0x88d   :  { %15434 = vmatpush3.bf16.msra.mxu0 %v15845_v16 }
 0x88e   :  { %15456 = vmatpush3.bf16.msra.mxu1 %v15846_v32  ;;  %15435 = vmatprep.subr.bf16.mxu0 %v15847_v50 }
 0x88f   :  { %15457 = vmatprep.subr.bf16.mxu1 %v15848_v14 }
 0x891   :  { %15436 = vmatpush3.bf16.msra.mxu0 %v15849_v22 }
 0x892   :  { %15458 = vmatpush3.bf16.msra.mxu1 %v15850_v37  ;;  %15437 = vmatprep.subr.bf16.mxu0 %v15851_v43 }
 0x893   :  { %15459 = vmatprep.subr.bf16.mxu1 %v15852_v49 }
 0x895   :  { %15438 = vmatpush3.bf16.msra.mxu0 %v15853_v57 }
 0x896   :  { %15460 = vmatpush3.bf16.msra.mxu1 %v15854_v41  ;;  %15439 = vmatprep.subr.bf16.mxu0 %v15855_v58 }
 0x897   :  { %15461 = vmatprep.subr.bf16.mxu1 %v15856_v30 }
 0x899   :  { %15440 = vmatpush3.bf16.msra.mxu0 %v15857_v15 }
 0x89a   :  { %15462 = vmatpush3.bf16.msra.mxu1 %v15858_v20 }
 0x89c   :  { %13133 = vmatmul.mubr.bf16.vlgmr.msra.gmra.mrb[72].mxu0 %v12900_v36 }
 0x89d   :  { %13173 = vmatmul.mubr.bf16.vlgmr.msra.gmra.mrb[72].mxu1 %v12902_v23 }
 0x8af   :  { %v15177_v63 = vpop.f32.mrb[48].mxu0 }
 0x8b0   :  { %v15199_v60 = vpop.f32.mrb[48].mxu1  ;;  %v15178_v19 = vpop.f32.mrb[49].mxu0 }
 0x8b1   :  { %v15179_v25 = vadd.f32 %v15178_v19, %v15177_v63  ;;  %v15200_v39 = vpop.f32.mrb[49].mxu1  ;;  %v15180_v38 = vpop.f32.mrb[50].mxu0 }
 0x8b2   :  { %v15201_v31 = vadd.f32 %v15200_v39, %v15199_v60  ;;  %v15202_v56 = vpop.f32.mrb[50].mxu1  ;;  %v15181_v27 = vpop.f32.mrb[51].mxu0 }
 0x8b3   :  { %v15203_v2 = vpop.f32.mrb[51].mxu1 }
 0x8b4   :  { %v11098_v35 = vadd.f32 %v15201_v31, %v15179_v25 }
 0x8cf   :  { %v15221_v24 = vpop.f32.mrb[52].mxu0 }
 0x8d0   :  { %v15243_v48 = vpop.f32.mrb[52].mxu1  ;;  %v15222_v54 = vpop.f32.mrb[53].mxu0 }
 0x8d1   :  { %v15223_v5 = vadd.f32 %v15222_v54, %v15221_v24  ;;  %v15244_v18 = vpop.f32.mrb[53].mxu1  ;;  %v15224_v13 = vpop.f32.mrb[54].mxu0 }
 0x8d2   :  { %v15245_v61 = vadd.f32 %v15244_v18, %v15243_v48  ;;  %v15246_v42 = vpop.f32.mrb[54].mxu1  ;;  %v15225_v44 = vpop.f32.mrb[55].mxu0 }
 0x8d3   :  { %v11346_v53 = vadd.f32 %v15223_v5, %v11098_v35  ;;  %v15247_v8 = vpop.f32.mrb[55].mxu1  ;;  %v15160_v42 = vld [vmem:[%s22236_s5] ss:$0 sm:$0xff] }
 0x8d5   :  { %v11386_v52 = vadd.f32 %v15245_v61, %v11346_v53 }
 0x8ef   :  { %v15265_v9 = vpop.f32.mrb[56].mxu0 }
 0x8f0   :  { %v15287_v1 = vpop.f32.mrb[56].mxu1  ;;  %v15266_v62 = vpop.f32.mrb[57].mxu0 }
 0x8f1   :  { %v15267_v7 = vadd.f32 %v15266_v62, %v15265_v9  ;;  %v15288_v51 = vpop.f32.mrb[57].mxu1  ;;  %v15268_v26 = vpop.f32.mrb[58].mxu0 }
 0x8f2   :  { %v15289_v6 = vadd.f32 %v15288_v51, %v15287_v1  ;;  %v15290_v21 = vpop.f32.mrb[58].mxu1  ;;  %v15269_v12 = vpop.f32.mrb[59].mxu0 }
 0x8f3   :  { %v15291_v33 = vpop.f32.mrb[59].mxu1 }
 0x8f4   :  { %v11743_v55 = vadd.f32 %v15289_v6, %v15267_v7 }
 0x8f6   :  { %v11748_v17 = vadd.f32 %v11743_v55, %v11386_v52 }
 0x90f   :  { %v15309_v29 = vpop.f32.mrb[60].mxu0 }
 0x910   :  { %v15331_v40 = vpop.f32.mrb[60].mxu1  ;;  %v15310_v11 = vpop.f32.mrb[61].mxu0 }
 0x911   :  { %v15311_v10 = vadd.f32 %v15310_v11, %v15309_v29  ;;  %v15332_v28 = vpop.f32.mrb[61].mxu1  ;;  %v15312_v45 = vpop.f32.mrb[62].mxu0 }
 0x912   :  { %v15333_v46 = vadd.f32 %v15332_v28, %v15331_v40  ;;  %v15334_v47 = vpop.f32.mrb[62].mxu1  ;;  %v15313_v0 = vpop.f32.mrb[63].mxu0 }
 0x913   :  { %v15335_v34 = vpop.f32.mrb[63].mxu1 }
 0x914   :  { %v12101_v4 = vadd.f32 %v15333_v46, %v15311_v10 }
 0x916   :  { %v12106_v3 = vadd.f32 %v12101_v4, %v11748_v17 }
 0x92f   :  { %v15353_v59 = vpop.f32.mrb[64].mxu0 }
 0x930   :  { %v15375_v16 = vpop.f32.mrb[64].mxu1  ;;  %v15354_v32 = vpop.f32.mrb[65].mxu0 }
 0x931   :  { %v15355_v50 = vadd.f32 %v15354_v32, %v15353_v59  ;;  %v15376_v14 = vpop.f32.mrb[65].mxu1  ;;  %v15356_v22 = vpop.f32.mrb[66].mxu0 }
 0x932   :  { %v15377_v37 = vadd.f32 %v15376_v14, %v15375_v16  ;;  %v15378_v43 = vpop.f32.mrb[66].mxu1  ;;  %v15357_v49 = vpop.f32.mrb[67].mxu0 }
 0x933   :  { %v15379_v57 = vpop.f32.mrb[67].mxu1 }
 0x934   :  { %v12459_v41 = vadd.f32 %v15377_v37, %v15355_v50 }
 0x936   :  { %v12464_v58 = vadd.f32 %v12459_v41, %v12106_v3 }
 0x94f   :  { %v15397_v30 = vpop.f32.mrb[68].mxu0 }
 0x950   :  { %v15419_v15 = vpop.f32.mrb[68].mxu1  ;;  %v15398_v20 = vpop.f32.mrb[69].mxu0 }
 0x951   :  { %v15399_v36 = vadd.f32 %v15398_v20, %v15397_v30  ;;  %v15420_v23 = vpop.f32.mrb[69].mxu1  ;;  %v15400_v63 = vpop.f32.mrb[70].mxu0 }
 0x952   :  { %v15421_v60 = vadd.f32 %v15420_v23, %v15419_v15  ;;  %v15422_v19 = vpop.f32.mrb[70].mxu1  ;;  %v15401_v25 = vpop.f32.mrb[71].mxu0 }
 0x953   :  { %v15423_v39 = vpop.f32.mrb[71].mxu1 }
 0x954   :  { %v12817_v38 = vadd.f32 %v15421_v60, %v15399_v36 }
 0x956   :  { %v12822_v31 = vadd.f32 %v12817_v38, %v12464_v58 }
 0x96f   :  { %v15441_v56 = vpop.f32.mrb[72].mxu0 }
 0x970   :  { %v15463_v27 = vpop.f32.mrb[72].mxu1  ;;  %v15442_v2 = vpop.f32.mrb[73].mxu0 }
 0x971   :  { %v15443_v35 = vadd.f32 %v15442_v2, %v15441_v56  ;;  %v15464_v24 = vpop.f32.mrb[73].mxu1  ;;  %v15444_v48 = vpop.f32.mrb[74].mxu0 }
 0x972   :  { %v15465_v54 = vadd.f32 %v15464_v24, %v15463_v27  ;;  %v15466_v5 = vpop.f32.mrb[74].mxu1  ;;  %v15445_v18 = vpop.f32.mrb[75].mxu0 }
 0x973   :  { %v15467_v13 = vpop.f32.mrb[75].mxu1 }
 0x974   :  { %v13175_v61 = vadd.f32 %v15465_v54, %v15443_v35 }
 0x976   :  { %v13180_v44 = vadd.f32 %v13175_v61, %v12822_v31 }
 0x978   :  { %v13188_v53 = vadd.f32 %v15160_v42, %v13180_v44 }
 0x97a   :  { %13189 = vst [vmem:[#allocation2] sm:$0x3] %v13188_v53 }
 0x97b   :  { %15870 = shalt.err (!%p15867_p4)
}
 0x97c   :  { %s15871_s24 = scalar_lea.hbm %s22237_s6, 32 }
 0x97d   :  { %p15872_p5 = scmp.ne.s32.totalorder %s22237_s6, %s15871_s24  ;;  %p15875_p6 = scmp.lt.u32.totalorder %s15871_s24, %s22237_s6 }
 0x97f   :  { %p15877_p7 = pnand %p15875_p6, %p15872_p5 }
 0x981   :  { %15880 = shalt.err (!%p15877_p7)
}
 0x982   :  { %13199 = dma.vmem_to_hbm [thread:$0]  %s13197_s20, 32, %s22237_s6, [#allocation3]  }
 0x983   :  { %15881 = dma.done.wait [#allocation3], 32  }
 0x984   :  { %15882 = vsyncadd [#allocation3], 4294967264 }
 0x985   :  { %13203 = vsyncpa [#allocation3], 1 }

</bundles_post_ra>
